<compile_context>
chip_gen: v6e
topology: v6e:2x2x1
jax: 0.10.0
libtpu: 0.0.40
codegen_flags: <defaults>
</compile_context>

<pallas_src>
import math

import jax
import jax.numpy as jnp
from jax.experimental import pallas as pl
from jax.experimental.pallas import tpu as pltpu

# ---- model hyperparameters (small, consistent with the module) ----
C = 3                      # ViT backbones take 3-channel images
IMG = 16                   # image_size
PATCH = 4                  # patch size
N = (IMG // PATCH) ** 2    # 16 tokens per image
PD = C * PATCH * PATCH     # 48 = flattened patch dim
PDP = 128                  # patch dim padded to a full lane tile
D = 32                     # emb_dim (what infer_feat_dim returns)
H_MLP = 64                 # transformer MLP hidden
LN_EPS = 1e-5              # torch.nn.LayerNorm default

# ---- batching: BG images per grid step -> 128 flattened tokens per step ----
BG = 8                     # images per group (grid step)
BN_G = BG * N              # 128 tokens per group
B = 16                     # example batch (any multiple of BG works)

# ---- single merged parameter slab: [SLAB_ROWS, 128], row bands 8-aligned ----
R_WP = 0                   # [PDP, D]   patch embed (rows PD..PDP are zero)
R_WQ = 128                 # [D, D]
R_WK = 160                 # [D, D]
R_WV = 192                 # [D, D]
R_WO = 224                 # [D, D]
R_W1 = 256                 # [D, H_MLP]
R_W2 = 288                 # [H_MLP, D]
R_WOUT = 352               # [D, 128]   cols 0:D = I_D, col D = linear head
R_POS = 384                # [BN_G, D]  pos + patch-embed bias, tiled over BG
R_MASK = 512               # [BN_G, BN_G] additive block-diagonal mask
R_POOL = 640               # [BG, BN_G] mean-pool matrix (1/N on block diag)
R_LN1G = 648
R_LN1B = 656
R_LN2G = 664
R_LN2B = 672
R_B1 = 680                 # [1, H_MLP]
R_B2 = 688                 # [1, D]
R_BOUT = 696               # [1, 128]   col D = head bias
SLAB_ROWS = 704
SLAB_COLS = 128


def _gelu(x):
    # tanh-approx GELU (EUP-friendly; see TODO re torch's erf default)
    return 0.5 * x * (1.0 + jnp.tanh(0.7978845608028654 * (x + 0.044715 * x * x * x)))


def _layernorm(x, g, b, eps=LN_EPS):
    mu = jnp.mean(x, axis=-1, keepdims=True)
    var = jnp.mean((x - mu) * (x - mu), axis=-1, keepdims=True)
    return (x - mu) * jax.lax.rsqrt(var + eps) * g + b


def vit_head_kernel(x_ref, s_ref, out_ref):
    f32 = jnp.float32
    hi = jax.lax.Precision.HIGHEST

    def mm(a, b):
        return jnp.dot(a, b, precision=hi, preferred_element_type=f32)

    x = x_ref[...]                                    # [BN_G, PDP] padded patches

    # -- static slab slices (sublane offsets multiples of 8, lane offset 0) --
    wp = s_ref[R_WP:R_WP + PDP, 0:D]
    wq = s_ref[R_WQ:R_WQ + D, 0:D]
    wk = s_ref[R_WK:R_WK + D, 0:D]
    wv = s_ref[R_WV:R_WV + D, 0:D]
    wo = s_ref[R_WO:R_WO + D, 0:D]
    w1 = s_ref[R_W1:R_W1 + D, 0:H_MLP]
    w2 = s_ref[R_W2:R_W2 + H_MLP, 0:D]
    wout = s_ref[R_WOUT:R_WOUT + D, 0:SLAB_COLS]

    posb = s_ref[R_POS:R_POS + BN_G, 0:D]
    mask = s_ref[R_MASK:R_MASK + BN_G, 0:BN_G]
    pool = s_ref[R_POOL:R_POOL + BG, 0:BN_G]
    ln1g = s_ref[R_LN1G:R_LN1G + 1, 0:D]
    ln1b = s_ref[R_LN1B:R_LN1B + 1, 0:D]
    ln2g = s_ref[R_LN2G:R_LN2G + 1, 0:D]
    ln2b = s_ref[R_LN2B:R_LN2B + 1, 0:D]
    b1 = s_ref[R_B1:R_B1 + 1, 0:H_MLP]
    b2 = s_ref[R_B2:R_B2 + 1, 0:D]
    bout = s_ref[R_BOUT:R_BOUT + 1, 0:SLAB_COLS]

    # --- patch embedding + positional embedding (bias folded into posb) ---
    tokens = mm(x, wp) + posb                                          # [BN_G, D]

    # --- transformer encoder block (pre-LN, single head) ---
    h = _layernorm(tokens, ln1g, ln1b)
    q = mm(h, wq)
    k = mm(h, wk)
    v = mm(h, wv)

    # scores over the flattened group; precomputed block-diagonal additive mask
    scores = jax.lax.dot_general(
        q, k, (((1,), (1,)), ((), ())),
        precision=hi, preferred_element_type=f32
    ) * (1.0 / math.sqrt(D)) + mask                                    # [BN_G, BN_G]

    m = jnp.max(scores, axis=-1, keepdims=True)
    e = jnp.exp(scores - m)
    p = e / jnp.sum(e, axis=-1, keepdims=True)                         # exact softmax
    ctx = mm(p, v)                                                     # [BN_G, D]
    tokens = tokens + mm(ctx, wo)

    h2 = _layernorm(tokens, ln2g, ln2b)
    mlp = _gelu(mm(h2, w1) + b1)                                       # [BN_G, H]
    tokens = tokens + mm(mlp, w2) + b2

    # --- mean-pool per image via precomputed pooling matmul (MXU, no XLU) ---
    feats = mm(pool, tokens)                                           # [BG, D]

    # --- combined lane-dense output: [ feats | logit | 0-pad ] -------------
    # (identity half of wout is exact under precision=HIGHEST)
    out = mm(feats, wout) + bout                                       # [BG, 128]
    out_ref[...] = out.astype(out_ref.dtype)


def _patchify(images):
    # images: [B, C, H, W] (NCHW) -> [B*N, PDP] (zero-padded to 128 lanes)
    b, c, h, w = images.shape
    x = images.reshape(b, c, h // PATCH, PATCH, w // PATCH, PATCH)
    x = x.transpose(0, 2, 4, 1, 3, 5)                # [B, h/P, w/P, C, P, P]
    x = x.reshape(b * (h // PATCH) * (w // PATCH), c * PATCH * PATCH)
    return jnp.pad(x, ((0, 0), (0, PDP - PD)))


def init_params(key):
    ks = jax.random.split(key, 10)
    s = 0.02
    return dict(
        wp=s * jax.random.normal(ks[0], (PD, D), jnp.float32),
        bp=jnp.zeros((1, D), jnp.float32),
        pos=s * jax.random.normal(ks[1], (N, D), jnp.float32),
        wq=s * jax.random.normal(ks[2], (D, D), jnp.float32),
        wk=s * jax.random.normal(ks[3], (D, D), jnp.float32),
        wv=s * jax.random.normal(ks[4], (D, D), jnp.float32),
        wo=s * jax.random.normal(ks[5], (D, D), jnp.float32),
        ln1g=jnp.ones((1, D), jnp.float32),
        ln1b=jnp.zeros((1, D), jnp.float32),
        ln2g=jnp.ones((1, D), jnp.float32),
        ln2b=jnp.zeros((1, D), jnp.float32),
        w1=s * jax.random.normal(ks[6], (D, H_MLP), jnp.float32),
        b1=jnp.zeros((1, H_MLP), jnp.float32),
        w2=s * jax.random.normal(ks[7], (H_MLP, D), jnp.float32),
        b2=jnp.zeros((1, D), jnp.float32),
        wh=s * jax.random.normal(ks[8], (D, 1), jnp.float32),
        bh=jnp.zeros((1, 1), jnp.float32),
    )


def pack_params(p):
    """Pack all parameters (+ mask/pool constants) into one [704,128] slab."""
    slab = jnp.zeros((SLAB_ROWS, SLAB_COLS), jnp.float32)
    slab = slab.at[R_WP:R_WP + PD, 0:D].set(p["wp"])      # rows PD..PDP stay 0
    slab = slab.at[R_WQ:R_WQ + D, 0:D].set(p["wq"])
    slab = slab.at[R_WK:R_WK + D, 0:D].set(p["wk"])
    slab = slab.at[R_WV:R_WV + D, 0:D].set(p["wv"])
    slab = slab.at[R_WO:R_WO + D, 0:D].set(p["wo"])
    slab = slab.at[R_W1:R_W1 + D, 0:H_MLP].set(p["w1"])
    slab = slab.at[R_W2:R_W2 + H_MLP, 0:D].set(p["w2"])

    # combined head: cols 0:D pass feats through, col D is the linear head
    wout = jnp.zeros((D, SLAB_COLS), jnp.float32)
    wout = wout.at[:, 0:D].set(jnp.eye(D, dtype=jnp.float32))
    wout = wout.at[:, D:D + 1].set(p["wh"])
    slab = slab.at[R_WOUT:R_WOUT + D, :].set(wout)

    # pos + patch-embed bias, tiled over the group (decoupled from total B)
    posb = jnp.tile(p["pos"] + p["bp"], (BG, 1))          # [BN_G, D]
    slab = slab.at[R_POS:R_POS + BN_G, 0:D].set(posb)

    # block-diagonal additive mask and mean-pool matrix (precomputed once)
    tok_img = jnp.arange(BN_G, dtype=jnp.int32) // N
    mask = jnp.where(tok_img[:, None] == tok_img[None, :], 0.0, -1e30)
    slab = slab.at[R_MASK:R_MASK + BN_G, 0:BN_G].set(mask.astype(jnp.float32))
    img = jnp.arange(BG, dtype=jnp.int32)
    pool = jnp.where(img[:, None] == tok_img[None, :], 1.0 / N, 0.0)
    slab = slab.at[R_POOL:R_POOL + BG, 0:BN_G].set(pool.astype(jnp.float32))

    slab = slab.at[R_LN1G, 0:D].set(p["ln1g"][0])
    slab = slab.at[R_LN1B, 0:D].set(p["ln1b"][0])
    slab = slab.at[R_LN2G, 0:D].set(p["ln2g"][0])
    slab = slab.at[R_LN2B, 0:D].set(p["ln2b"][0])
    slab = slab.at[R_B1, 0:H_MLP].set(p["b1"][0])
    slab = slab.at[R_B2, 0:D].set(p["b2"][0])
    slab = slab.at[R_BOUT, D].set(p["bh"][0, 0])
    return slab


def _cost_estimate(num_groups):
    flops_group = 2 * (
        BN_G * PDP * D            # patch embed
        + 3 * BN_G * D * D        # q, k, v
        + 2 * BN_G * BN_G * D     # scores + ctx
        + BN_G * D * D            # wo
        + 2 * BN_G * D * H_MLP    # mlp up + down
        + BG * BN_G * D           # pool
        + BG * D * SLAB_COLS      # combined head
    )
    transc_group = BN_G * BN_G + BN_G * H_MLP   # exp + tanh
    bytes_group = (BN_G * PDP + BG * SLAB_COLS) * 4
    return pl.CostEstimate(
        flops=flops_group * num_groups,
        transcendentals=transc_group * num_groups,
        bytes_accessed=bytes_group * num_groups + SLAB_ROWS * SLAB_COLS * 4,
    )


@jax.jit
def model_train_forward(images, slab):
    """ModelTrain.forward: returns (logits [B,1], image_feats [B,D])."""
    b = images.shape[0]
    assert b % BG == 0, "batch must be a multiple of the group size BG"
    num_groups = b // BG
    x2d = _patchify(images.astype(jnp.float32))           # [B*N, PDP]

    out = pl.pallas_call(
        vit_head_kernel,
        out_shape=jax.ShapeDtypeStruct((b, SLAB_COLS), jnp.float32),
        grid=(num_groups,),
        in_specs=[
            pl.BlockSpec((BN_G, PDP), lambda i: (i, 0)),            # tokens of group i
            pl.BlockSpec((SLAB_ROWS, SLAB_COLS), lambda i: (0, 0)),  # params, resident
        ],
        out_specs=pl.BlockSpec((BG, SLAB_COLS), lambda i: (i, 0)),
        compiler_params=pltpu.CompilerParams(
            dimension_semantics=("parallel",)),
        cost_estimate=_cost_estimate(num_groups),
    )(x2d, slab)

    feats = out[:, 0:D]
    logits = out[:, D:D + 1]
    return logits, feats


if __name__ == "__main__":
    key = jax.random.PRNGKey(0)
    k_img, k_par = jax.random.split(key)
    images = jax.random.normal(k_img, (B, C, IMG, IMG), jnp.float32)
    params = init_params(k_par)
    slab = pack_params(params)

    logits, feats = model_train_forward(images, slab)
    jax.block_until_ready((logits, feats))

    assert logits.shape == (B, 1) and feats.shape == (B, D)
    assert bool(jnp.all(jnp.isfinite(logits))) and bool(jnp.all(jnp.isfinite(feats)))
    print("KERNEL_OK")
</pallas_src>

<mosaic_0001>
module attributes {stable_mosaic.version = 11 : i64} {
  func.func @vit_head_kernel(%arg0: i32, %arg1: memref<128x128xf32, #tpu.memory_space<vmem>>, %arg2: memref<704x128xf32, #tpu.memory_space<vmem>>, %arg3: memref<8x128xf32, #tpu.memory_space<vmem>>) attributes {dimension_semantics = [#tpu.dimension_semantics<parallel>], iteration_bounds = array<i64: 2>, scalar_prefetch = 0 : i64, scratch_operands = 0 : i64, tpu.core_type = #tpu.core_type<tc>, window_params = [{transform_indices = @transform_0, window_bounds = array<i64: 128, 128>}, {pipeline_mode = #tpu.pipeline_mode<synchronous>, transform_indices = @transform_1, window_bounds = array<i64: 704, 128>}, {transform_indices = @transform_2, window_bounds = array<i64: 8, 128>}]} {
    %c0 = arith.constant 0 : index
    %c0_0 = arith.constant 0 : index
    %0 = vector.load %arg1[%c0, %c0_0] : memref<128x128xf32, #tpu.memory_space<vmem>>, vector<128x128xf32>
    %c0_1 = arith.constant 0 : index
    %c0_2 = arith.constant 0 : index
    %1 = vector.load %arg2[%c0_1, %c0_2] : memref<704x128xf32, #tpu.memory_space<vmem>>, vector<128x32xf32>
    %c128 = arith.constant 128 : index
    %c0_3 = arith.constant 0 : index
    %2 = vector.load %arg2[%c128, %c0_3] : memref<704x128xf32, #tpu.memory_space<vmem>>, vector<32x32xf32>
    %c160 = arith.constant 160 : index
    %c0_4 = arith.constant 0 : index
    %3 = vector.load %arg2[%c160, %c0_4] : memref<704x128xf32, #tpu.memory_space<vmem>>, vector<32x32xf32>
    %c192 = arith.constant 192 : index
    %c0_5 = arith.constant 0 : index
    %4 = vector.load %arg2[%c192, %c0_5] : memref<704x128xf32, #tpu.memory_space<vmem>>, vector<32x32xf32>
    %c224 = arith.constant 224 : index
    %c0_6 = arith.constant 0 : index
    %5 = vector.load %arg2[%c224, %c0_6] : memref<704x128xf32, #tpu.memory_space<vmem>>, vector<32x32xf32>
    %c256 = arith.constant 256 : index
    %c0_7 = arith.constant 0 : index
    %6 = vector.load %arg2[%c256, %c0_7] : memref<704x128xf32, #tpu.memory_space<vmem>>, vector<32x64xf32>
    %c288 = arith.constant 288 : index
    %c0_8 = arith.constant 0 : index
    %7 = vector.load %arg2[%c288, %c0_8] : memref<704x128xf32, #tpu.memory_space<vmem>>, vector<64x32xf32>
    %c352 = arith.constant 352 : index
    %c0_9 = arith.constant 0 : index
    %8 = vector.load %arg2[%c352, %c0_9] : memref<704x128xf32, #tpu.memory_space<vmem>>, vector<32x128xf32>
    %c384 = arith.constant 384 : index
    %c0_10 = arith.constant 0 : index
    %9 = vector.load %arg2[%c384, %c0_10] : memref<704x128xf32, #tpu.memory_space<vmem>>, vector<128x32xf32>
    %c512 = arith.constant 512 : index
    %c0_11 = arith.constant 0 : index
    %10 = vector.load %arg2[%c512, %c0_11] : memref<704x128xf32, #tpu.memory_space<vmem>>, vector<128x128xf32>
    %c640 = arith.constant 640 : index
    %c0_12 = arith.constant 0 : index
    %11 = vector.load %arg2[%c640, %c0_12] : memref<704x128xf32, #tpu.memory_space<vmem>>, vector<8x128xf32>
    %c648 = arith.constant 648 : index
    %c0_13 = arith.constant 0 : index
    %12 = vector.load %arg2[%c648, %c0_13] : memref<704x128xf32, #tpu.memory_space<vmem>>, vector<1x32xf32>
    %c656 = arith.constant 656 : index
    %c0_14 = arith.constant 0 : index
    %13 = vector.load %arg2[%c656, %c0_14] : memref<704x128xf32, #tpu.memory_space<vmem>>, vector<1x32xf32>
    %c664 = arith.constant 664 : index
    %c0_15 = arith.constant 0 : index
    %14 = vector.load %arg2[%c664, %c0_15] : memref<704x128xf32, #tpu.memory_space<vmem>>, vector<1x32xf32>
    %c672 = arith.constant 672 : index
    %c0_16 = arith.constant 0 : index
    %15 = vector.load %arg2[%c672, %c0_16] : memref<704x128xf32, #tpu.memory_space<vmem>>, vector<1x32xf32>
    %c680 = arith.constant 680 : index
    %c0_17 = arith.constant 0 : index
    %16 = vector.load %arg2[%c680, %c0_17] : memref<704x128xf32, #tpu.memory_space<vmem>>, vector<1x64xf32>
    %c688 = arith.constant 688 : index
    %c0_18 = arith.constant 0 : index
    %17 = vector.load %arg2[%c688, %c0_18] : memref<704x128xf32, #tpu.memory_space<vmem>>, vector<1x32xf32>
    %c696 = arith.constant 696 : index
    %c0_19 = arith.constant 0 : index
    %18 = vector.load %arg2[%c696, %c0_19] : memref<704x128xf32, #tpu.memory_space<vmem>>, vector<1x128xf32>
    %cst = arith.constant dense<0.000000e+00> : vector<128x32xf32>
    %19 = tpu.matmul %0, %1, %cst {dimension_numbers = #tpu.dot_dimension_numbers<[1], [0], [0], [1], [0, 0, 1, 1], [], []>, precision = #tpu.contract_precision<fp32>} : vector<128x128xf32>, vector<128x32xf32>, vector<128x32xf32> -> vector<128x32xf32>
    %20 = arith.addf %19, %9 : vector<128x32xf32>
    %cst_20 = arith.constant dense<0.000000e+00> : vector<128xf32>
    %21 = vector.multi_reduction <add>, %20, %cst_20 [1] : vector<128x32xf32> to vector<128xf32>
    %22 = vector.shape_cast %21 : vector<128xf32> to vector<128x1xf32>
    %cst_21 = arith.constant 3.200000e+01 : f32
    %23 = vector.broadcast %cst_21 : f32 to vector<128x1xf32>
    %24 = arith.divf %22, %23 : vector<128x1xf32>
    %25 = vector.broadcast %24 : vector<128x1xf32> to vector<128x32xf32>
    %26 = arith.subf %20, %25 : vector<128x32xf32>
    %27 = vector.broadcast %24 : vector<128x1xf32> to vector<128x32xf32>
    %28 = arith.subf %20, %27 : vector<128x32xf32>
    %29 = arith.mulf %26, %28 : vector<128x32xf32>
    %cst_22 = arith.constant dense<0.000000e+00> : vector<128xf32>
    %30 = vector.multi_reduction <add>, %29, %cst_22 [1] : vector<128x32xf32> to vector<128xf32>
    %31 = vector.shape_cast %30 : vector<128xf32> to vector<128x1xf32>
    %cst_23 = arith.constant 3.200000e+01 : f32
    %32 = vector.broadcast %cst_23 : f32 to vector<128x1xf32>
    %33 = arith.divf %31, %32 : vector<128x1xf32>
    %34 = vector.broadcast %24 : vector<128x1xf32> to vector<128x32xf32>
    %35 = arith.subf %20, %34 : vector<128x32xf32>
    %cst_24 = arith.constant 9.99999974E-6 : f32
    %36 = vector.broadcast %cst_24 : f32 to vector<128x1xf32>
    %37 = arith.addf %33, %36 : vector<128x1xf32>
    %38 = math.rsqrt %37 : vector<128x1xf32>
    %39 = vector.broadcast %38 : vector<128x1xf32> to vector<128x32xf32>
    %40 = arith.mulf %35, %39 : vector<128x32xf32>
    %41 = vector.broadcast %12 : vector<1x32xf32> to vector<128x32xf32>
    %42 = arith.mulf %40, %41 : vector<128x32xf32>
    %43 = vector.broadcast %13 : vector<1x32xf32> to vector<128x32xf32>
    %44 = arith.addf %42, %43 : vector<128x32xf32>
    %cst_25 = arith.constant dense<0.000000e+00> : vector<128x32xf32>
    %45 = tpu.matmul %44, %2, %cst_25 {dimension_numbers = #tpu.dot_dimension_numbers<[1], [0], [0], [1], [0, 0, 1, 1], [], []>, precision = #tpu.contract_precision<fp32>} : vector<128x32xf32>, vector<32x32xf32>, vector<128x32xf32> -> vector<128x32xf32>
    %cst_26 = arith.constant dense<0.000000e+00> : vector<128x32xf32>
    %46 = tpu.matmul %44, %3, %cst_26 {dimension_numbers = #tpu.dot_dimension_numbers<[1], [0], [0], [1], [0, 0, 1, 1], [], []>, precision = #tpu.contract_precision<fp32>} : vector<128x32xf32>, vector<32x32xf32>, vector<128x32xf32> -> vector<128x32xf32>
    %cst_27 = arith.constant dense<0.000000e+00> : vector<128x32xf32>
    %47 = tpu.matmul %44, %4, %cst_27 {dimension_numbers = #tpu.dot_dimension_numbers<[1], [0], [0], [1], [0, 0, 1, 1], [], []>, precision = #tpu.contract_precision<fp32>} : vector<128x32xf32>, vector<32x32xf32>, vector<128x32xf32> -> vector<128x32xf32>
    %cst_28 = arith.constant dense<0.000000e+00> : vector<128x128xf32>
    %48 = tpu.matmul %45, %46, %cst_28 {dimension_numbers = #tpu.dot_dimension_numbers<[1], [1], [0], [0], [0, 0, 1, 0], [], []>, precision = #tpu.contract_precision<fp32>} : vector<128x32xf32>, vector<128x32xf32>, vector<128x128xf32> -> vector<128x128xf32>
    %cst_29 = arith.constant 0.176776692 : f32
    %49 = vector.broadcast %cst_29 : f32 to vector<128x128xf32>
    %50 = arith.mulf %48, %49 : vector<128x128xf32>
    %51 = arith.addf %50, %10 : vector<128x128xf32>
    %cst_30 = arith.constant dense<0xFF800000> : vector<128xf32>
    %52 = vector.multi_reduction <maximumf>, %51, %cst_30 [1] : vector<128x128xf32> to vector<128xf32>
    %53 = vector.shape_cast %52 : vector<128xf32> to vector<128x1xf32>
    %54 = vector.broadcast %53 : vector<128x1xf32> to vector<128x128xf32>
    %55 = arith.subf %51, %54 : vector<128x128xf32>
    %56 = math.exp %55 : vector<128x128xf32>
    %cst_31 = arith.constant dense<0.000000e+00> : vector<128xf32>
    %57 = vector.multi_reduction <add>, %56, %cst_31 [1] : vector<128x128xf32> to vector<128xf32>
    %58 = vector.shape_cast %57 : vector<128xf32> to vector<128x1xf32>
    %59 = vector.broadcast %58 : vector<128x1xf32> to vector<128x128xf32>
    %60 = arith.divf %56, %59 : vector<128x128xf32>
    %cst_32 = arith.constant dense<0.000000e+00> : vector<128x32xf32>
    %61 = tpu.matmul %60, %47, %cst_32 {dimension_numbers = #tpu.dot_dimension_numbers<[1], [0], [0], [1], [0, 0, 1, 1], [], []>, precision = #tpu.contract_precision<fp32>} : vector<128x128xf32>, vector<128x32xf32>, vector<128x32xf32> -> vector<128x32xf32>
    %cst_33 = arith.constant dense<0.000000e+00> : vector<128x32xf32>
    %62 = tpu.matmul %61, %5, %cst_33 {dimension_numbers = #tpu.dot_dimension_numbers<[1], [0], [0], [1], [0, 0, 1, 1], [], []>, precision = #tpu.contract_precision<fp32>} : vector<128x32xf32>, vector<32x32xf32>, vector<128x32xf32> -> vector<128x32xf32>
    %63 = arith.addf %20, %62 : vector<128x32xf32>
    %cst_34 = arith.constant dense<0.000000e+00> : vector<128xf32>
    %64 = vector.multi_reduction <add>, %63, %cst_34 [1] : vector<128x32xf32> to vector<128xf32>
    %65 = vector.shape_cast %64 : vector<128xf32> to vector<128x1xf32>
    %cst_35 = arith.constant 3.200000e+01 : f32
    %66 = vector.broadcast %cst_35 : f32 to vector<128x1xf32>
    %67 = arith.divf %65, %66 : vector<128x1xf32>
    %68 = vector.broadcast %67 : vector<128x1xf32> to vector<128x32xf32>
    %69 = arith.subf %63, %68 : vector<128x32xf32>
    %70 = vector.broadcast %67 : vector<128x1xf32> to vector<128x32xf32>
    %71 = arith.subf %63, %70 : vector<128x32xf32>
    %72 = arith.mulf %69, %71 : vector<128x32xf32>
    %cst_36 = arith.constant dense<0.000000e+00> : vector<128xf32>
    %73 = vector.multi_reduction <add>, %72, %cst_36 [1] : vector<128x32xf32> to vector<128xf32>
    %74 = vector.shape_cast %73 : vector<128xf32> to vector<128x1xf32>
    %cst_37 = arith.constant 3.200000e+01 : f32
    %75 = vector.broadcast %cst_37 : f32 to vector<128x1xf32>
    %76 = arith.divf %74, %75 : vector<128x1xf32>
    %77 = vector.broadcast %67 : vector<128x1xf32> to vector<128x32xf32>
    %78 = arith.subf %63, %77 : vector<128x32xf32>
    %cst_38 = arith.constant 9.99999974E-6 : f32
    %79 = vector.broadcast %cst_38 : f32 to vector<128x1xf32>
    %80 = arith.addf %76, %79 : vector<128x1xf32>
    %81 = math.rsqrt %80 : vector<128x1xf32>
    %82 = vector.broadcast %81 : vector<128x1xf32> to vector<128x32xf32>
    %83 = arith.mulf %78, %82 : vector<128x32xf32>
    %84 = vector.broadcast %14 : vector<1x32xf32> to vector<128x32xf32>
    %85 = arith.mulf %83, %84 : vector<128x32xf32>
    %86 = vector.broadcast %15 : vector<1x32xf32> to vector<128x32xf32>
    %87 = arith.addf %85, %86 : vector<128x32xf32>
    %cst_39 = arith.constant dense<0.000000e+00> : vector<128x64xf32>
    %88 = tpu.matmul %87, %6, %cst_39 {dimension_numbers = #tpu.dot_dimension_numbers<[1], [0], [0], [1], [0, 0, 1, 1], [], []>, precision = #tpu.contract_precision<fp32>} : vector<128x32xf32>, vector<32x64xf32>, vector<128x64xf32> -> vector<128x64xf32>
    %89 = vector.broadcast %16 : vector<1x64xf32> to vector<128x64xf32>
    %90 = arith.addf %88, %89 : vector<128x64xf32>
    %cst_40 = arith.constant 5.000000e-01 : f32
    %91 = vector.broadcast %cst_40 : f32 to vector<128x64xf32>
    %92 = arith.mulf %91, %90 : vector<128x64xf32>
    %cst_41 = arith.constant 4.471500e-02 : f32
    %93 = vector.broadcast %cst_41 : f32 to vector<128x64xf32>
    %94 = arith.mulf %93, %90 : vector<128x64xf32>
    %95 = arith.mulf %94, %90 : vector<128x64xf32>
    %96 = arith.mulf %95, %90 : vector<128x64xf32>
    %97 = arith.addf %90, %96 : vector<128x64xf32>
    %cst_42 = arith.constant 0.797884583 : f32
    %98 = vector.broadcast %cst_42 : f32 to vector<128x64xf32>
    %99 = arith.mulf %98, %97 : vector<128x64xf32>
    %100 = math.tanh %99 : vector<128x64xf32>
    %cst_43 = arith.constant 1.000000e+00 : f32
    %101 = vector.broadcast %cst_43 : f32 to vector<128x64xf32>
    %102 = arith.addf %101, %100 : vector<128x64xf32>
    %103 = arith.mulf %92, %102 : vector<128x64xf32>
    %cst_44 = arith.constant dense<0.000000e+00> : vector<128x32xf32>
    %104 = tpu.matmul %103, %7, %cst_44 {dimension_numbers = #tpu.dot_dimension_numbers<[1], [0], [0], [1], [0, 0, 1, 1], [], []>, precision = #tpu.contract_precision<fp32>} : vector<128x64xf32>, vector<64x32xf32>, vector<128x32xf32> -> vector<128x32xf32>
    %105 = arith.addf %63, %104 : vector<128x32xf32>
    %106 = vector.broadcast %17 : vector<1x32xf32> to vector<128x32xf32>
    %107 = arith.addf %105, %106 : vector<128x32xf32>
    %cst_45 = arith.constant dense<0.000000e+00> : vector<8x32xf32>
    %108 = tpu.matmul %11, %107, %cst_45 {dimension_numbers = #tpu.dot_dimension_numbers<[1], [0], [0], [1], [0, 0, 1, 1], [], []>, precision = #tpu.contract_precision<fp32>} : vector<8x128xf32>, vector<128x32xf32>, vector<8x32xf32> -> vector<8x32xf32>
    %cst_46 = arith.constant dense<0.000000e+00> : vector<8x128xf32>
    %109 = tpu.matmul %108, %8, %cst_46 {dimension_numbers = #tpu.dot_dimension_numbers<[1], [0], [0], [1], [0, 0, 1, 1], [], []>, precision = #tpu.contract_precision<fp32>} : vector<8x32xf32>, vector<32x128xf32>, vector<8x128xf32> -> vector<8x128xf32>
    %110 = vector.broadcast %18 : vector<1x128xf32> to vector<8x128xf32>
    %111 = arith.addf %109, %110 : vector<8x128xf32>
    %c0_47 = arith.constant 0 : index
    %c0_48 = arith.constant 0 : index
    %112 = vector.load %arg3[%c0_47, %c0_48] : memref<8x128xf32, #tpu.memory_space<vmem>>, vector<8x128xf32>
    tpu.vector_store %arg3[%c0_47, %c0_48], %111 {strides = array<i32>} : memref<8x128xf32, #tpu.memory_space<vmem>>, vector<8x128xf32>,
    return
  }
  func.func @transform_0(%arg0: i32) -> (i32, i32) {
    %c0_i32 = arith.constant 0 : i32
    %c0_i32_0 = arith.constant 0 : i32
    return %arg0, %c0_i32 : i32, i32
  }
  func.func @transform_1(%arg0: i32) -> (i32, i32) {
    %c0_i32 = arith.constant 0 : i32
    %c0_i32_0 = arith.constant 0 : i32
    %c0_i32_1 = arith.constant 0 : i32
    return %c0_i32, %c0_i32_0 : i32, i32
  }
  func.func @transform_2(%arg0: i32) -> (i32, i32) {
    %c0_i32 = arith.constant 0 : i32
    %c0_i32_0 = arith.constant 0 : i32
    return %arg0, %c0_i32 : i32, i32
  }
}

</mosaic_0001>

<bundles_post_ra>
// kernel: model_train_forward.1
= control target key start
LH: loop header
LB: loop body
LE: loop exit
PB: predicated region body
PF: predicated region fallthrough
CT: control target
= control target key end

     0   :  { %s17436_s9 = smov 0   ;;  %s23890_s0 = inlined_call_operand.vmem [shape: f32[256,128], index: 0, kind: input, shape index: {}]   ;;  %s23891_s1 = inlined_call_operand.vmem [shape: f32[704,128], index: 1, kind: input, shape index: {}]   ;;  %s23892_s2 = inlined_call_operand.vmem [shape: f32[16,128], index: 2, kind: output, shape index: {}]  }
   0x1 LB: > { %s17442_s10 = sadd.s32 4294967295, %s17417_s9   ;;  %p13292_p0 = scmp.ge.s32.totalorder %s17417_s9, 1  ;;  %s17417_s9 = sphi %s17436_s9, %s12_s9  }
   0x2   : > { %p113_p1 = scmp.lt.s32.totalorder %s17417_s9, 3 }
   0x4   : > { %p114_p2 = pnand %p13292_p0, %p113_p1 }
   0x6   : > { %117 = sbr.rel (%p114_p2) target bundleno = 3829 (0xef5), region = 28 }
   0xb   : > { %v175_v0 = vld [vmem:[%s23891_s1 + $0x78] sm:$0xff]  ;;  %v174_v1 = vld [vmem:[%s23891_s1 + $0x70] sm:$0xff]  ;;  %v173_v2 = vld [vmem:[%s23891_s1 + $0x68] sm:$0xff]  ;;  %s13293_s17 = sshll.u32 %s17442_s10, 4  ;;  %vm1534_vm0 = vcmask 261120   ;;  %vm10834_vm1 = vcmask 523264  }
   0xc   : > { %v17456_v3 = vand.u32 4294901760, %v175_v0  ;;  %v17458_v4 = vand.u32 4294901760, %v174_v1  ;;  %v17460_v5 = vand.u32 4294901760, %v173_v2  ;;  %v172_v6 = vld [vmem:[%s23891_s1 + $0x60] sm:$0xff]  ;;  %v171_v7 = vld [vmem:[%s23891_s1 + $0x58] sm:$0xff]  ;;  %v170_v8 = vld [vmem:[%s23891_s1 + $0x50] sm:$0xff] }
   0xd   : > { %v17471_v9 = vand.u32 4294901760, %v172_v6  ;;  %v17473_v10 = vand.u32 4294901760, %v171_v7  ;;  %v17475_v11 = vand.u32 4294901760, %v170_v8  ;;  %v169_v12 = vld [vmem:[%s23891_s1 + $0x48] sm:$0xff]  ;;  %v168_v13 = vld [vmem:[%s23891_s1 + $0x40] sm:$0xff]  ;;  %v167_v18 = vld [vmem:[%s23891_s1 + $0x38] sm:$0xff] }
   0xe   : > { %14757 = vmatprep.subr.mxu0 %v17456_v3  ;;  %v17485_v14 = vsub.f32 %v175_v0, %v17456_v3  ;;  %v17488_v15 = vsub.f32 %v174_v1, %v17458_v4  ;;  %v17490_v16 = vand.u32 4294901760, %v169_v12  ;;  %v17493_v17 = vsub.f32 %v173_v2, %v17460_v5  ;;  %p135_p3 = scmp.lt.s32.totalorder %s13293_s17, 31  ;;  %v166_v25 = vld [vmem:[%s23891_s1 + $0x30] sm:$0xff]  ;;  %v165_v35 = vld [vmem:[%s23891_s1 + $0x28] sm:$0xff]  ;;  %v164_v40 = vld [vmem:[%s23891_s1 + $0x20] sm:$0xff]  ;;  %p140_p4 = scmp.lt.s32.totalorder %s17442_s10, 1 }
   0xf   : > { %14758 = vmatpush3.msra.mxu0 %v17456_v3  ;;  %v17500_v19 = vsub.f32 %v172_v6, %v17471_v9  ;;  %v17503_v20 = vsub.f32 %v171_v7, %v17473_v10  ;;  %v17515_v24 = vand.u32 4294901760, %v168_v13  ;;  %v17524_v27 = vand.u32 4294901760, %v167_v18  ;;  %v163_v53 = vld [vmem:[%s23891_s1 + $0x18] sm:$0xff]  ;;  %v162_v59 = vld [vmem:[%s23891_s1 + $0x10] sm:$0xff]  ;;  %v161_v6 = vld [vmem:[%s23891_s1 + $0x8] sm:$0xff] }
  0x10   : > { %14759 = vmatprep.subr.mxu0 %v17458_v4  ;;  %v17507_v21 = vand.u32 4294901760, %v17485_v14  ;;  %v17510_v22 = vand.u32 4294901760, %v17488_v15  ;;  %v17513_v23 = vand.u32 4294901760, %v17493_v17  ;;  %s25072_s17 = smov (!%p135_p3, %s13293_s17), 31  ;;  %v17530_v29 = vsub.f32 %v170_v8, %v17475_v11  ;;  %s25074_s10 = smov (!%p140_p4, %s17442_s10), 1 }
  0x11   : > { %14760 = vmatpush3.msra.mxu0 %v17458_v4  ;;  %v17522_v26 = vand.u32 4294901760, %v17500_v19  ;;  %v17527_v28 = vand.u32 4294901760, %v17503_v20  ;;  %v17540_v33 = vsub.f32 %v169_v12, %v17490_v16  ;;  %s13294_s4 = sshll.u32 %s25072_s17, 3  ;;  %v17543_v34 = vand.u32 4294901760, %v166_v25  ;;  %s13295_s8 = sshll.u32 %s25074_s10, 3 }
  0x12   : > { %24280 = vst [vmem:[#allocation2_spill] sm:$0xff] %v17510_v22  ;;  %24281 = vst [vmem:[#allocation3_spill] sm:$0xff] %v17513_v23  ;;  %14761 = vmatprep.subr.mxu0 %v17460_v5  ;;  %v493_v30 = vsub.f32 %v17485_v14, %v17507_v21  ;;  %v500_v31 = vsub.f32 %v17488_v15, %v17510_v22  ;;  %v507_v32 = vsub.f32 %v17493_v17, %v17513_v23  ;;  %s17551_s11 = scalar_lea.vmem %s23890_s0, %s13294_s4  ;;  %vm17420_vm2 = vmmov 0   ;;  %s143_s13 = scalar_lea.vmem %s23892_s2, %s13295_s8 }
  0x13   : > { %24282 = vst [vmem:[#allocation4_spill] sm:$0xff] %v17522_v26  ;;  %24283 = vst [vmem:[#allocation5_spill] sm:$0xff] %v17527_v28  ;;  %14762 = vmatpush3.msra.mxu0 %v17460_v5  ;;  %v514_v38 = vsub.f32 %v17500_v19, %v17522_v26  ;;  %v17557_v39 = vand.u32 4294901760, %v17530_v29  ;;  %v17564_v41 = vand.u32 4294901760, %v17540_v33  ;;  %v17567_v42 = vsub.f32 %v168_v13, %v17515_v24  ;;  %v144_v47 = vld [vmem:[%s17551_s11] sm:$0xff]  ;;  %v145_v49 = vld [vmem:[%s17551_s11 + $0x8] sm:$0xff] }
  0x14   : > { %14763 = vmatprep.subr.mxu0 %v17471_v9  ;;  %v494_v36 = vand.u32 4294901760, %v493_v30  ;;  %v501_v37 = vand.u32 4294901760, %v500_v31  ;;  %v508_v43 = vand.u32 4294901760, %v507_v32  ;;  %v521_v44 = vsub.f32 %v17503_v20, %v17527_v28  ;;  %v146_v63 = vld [vmem:[%s17551_s11 + $0x10] sm:$0xff]  ;;  %v160_v31 = vld [vmem:[%s23891_s1] sm:$0xff]  ;;  %v153_v22 = vld [vmem:[%s17551_s11 + $0x48] sm:$0xff] }
  0x15   : > { %24284 = vst [vmem:[#allocation6_spill] sm:$0xff] %v17557_v39  ;;  %14764 = vmatpush3.msra.mxu0 %v17471_v9  ;;  %24285 = vst [vmem:[#allocation7_spill] sm:$0xff] %v17564_v41  ;;  %v17572_v45 = vand.u32 4294901760, %v165_v35  ;;  %v17575_v46 = vsub.f32 %v167_v18, %v17524_v27  ;;  %v17579_v48 = vand.u32 4294901760, %v164_v40  ;;  %v515_v50 = vand.u32 4294901760, %v514_v38  ;;  %v147_v18 = vld [vmem:[%s17551_s11 + $0x18] sm:$0xff] }
  0x16   : > { %14765 = vmatprep.subr.mxu0 %v17473_v10  ;;  %14813 = vmatprep.subr.mxu1 %v494_v36  ;;  %v528_v51 = vsub.f32 %v17530_v29, %v17557_v39  ;;  %v17586_v52 = vand.u32 4294901760, %v17567_v42  ;;  %v17592_v54 = vsub.f32 %v166_v25, %v17543_v34  ;;  %v535_v55 = vsub.f32 %v17540_v33, %v17564_v41 }
  0x17   : > { %14766 = vmatpush3.msra.mxu0 %v17473_v10  ;;  %14814 = vmatpush3.msra.mxu1 %v494_v36  ;;  %v17597_v56 = vand.u32 4294901760, %v144_v47  ;;  %v522_v57 = vand.u32 4294901760, %v521_v44  ;;  %v17601_v58 = vand.u32 4294901760, %v17575_v46  ;;  %v17607_v60 = vsub.f32 %v165_v35, %v17572_v45 }
  0x18   : > { %14767 = vmatprep.subr.mxu0 %v17475_v11  ;;  %14815 = vmatprep.subr.mxu1 %v501_v37  ;;  %24286 = vst [vmem:[#allocation8_spill] sm:$0xff] %v17586_v52  ;;  %v17609_v61 = vand.u32 4294901760, %v145_v49  ;;  %v17612_v62 = vand.u32 4294901760, %v163_v53  ;;  %v529_v0 = vand.u32 4294901760, %v528_v51  ;;  %v542_v1 = vsub.f32 %v17567_v42, %v17586_v52 }
  0x19   : > { %14768 = vmatpush3.msra.mxu0 %v17475_v11  ;;  %14816 = vmatpush3.msra.mxu1 %v501_v37  ;;  %24287 = vst [vmem:[#allocation9_spill] sm:$0xff] %v17601_v58  ;;  %v17619_v2 = vand.u32 4294901760, %v17592_v54  ;;  %v17625_v7 = vsub.f32 %v164_v40, %v17579_v48  ;;  %v536_v8 = vand.u32 4294901760, %v535_v55  ;;  %v17628_v12 = vand.u32 4294901760, %v162_v59 }
  0x1a   : > { %14769 = vmatprep.subr.mxu0 %v17490_v16  ;;  %14817 = vmatprep.subr.mxu1 %v508_v43  ;;  %v17631_v13 = vsub.f32 %v144_v47, %v17597_v56  ;;  %v549_v25 = vsub.f32 %v17575_v46, %v17601_v58  ;;  %v17638_v30 = vand.u32 4294901760, %v17607_v60  ;;  %v17644_v32 = vsub.f32 %v145_v49, %v17609_v61  ;;  %v148_v47 = vld [vmem:[%s17551_s11 + $0x20] sm:$0xff] }
  0x1b   : > { %14770 = vmatpush3.msra.mxu0 %v17490_v16  ;;  %14818 = vmatpush3.msra.mxu1 %v508_v43  ;;  %24288 = vst [vmem:[#allocation10_spill] sm:$0xff] %v17619_v2  ;;  %v17646_v35 = vand.u32 4294901760, %v146_v63  ;;  %v17649_v36 = vand.u32 4294901760, %v161_v6  ;;  %v17652_v37 = vsub.f32 %v163_v53, %v17612_v62  ;;  %v543_v38 = vand.u32 4294901760, %v542_v1 }
  0x1c   : > { %14771 = vmatprep.subr.mxu0 %v17515_v24  ;;  %14819 = vmatprep.subr.mxu1 %v515_v50  ;;  %24289 = vst [vmem:[#allocation11_spill] sm:$0xff] %v17638_v30  ;;  %v556_v40 = vsub.f32 %v17592_v54, %v17619_v2  ;;  %v17658_v43 = vand.u32 4294901760, %v17625_v7  ;;  %v17660_v44 = vand.u32 4294901760, %v147_v18  ;;  %v17664_v49 = vand.u32 4294901760, %v160_v31 }
  0x1d   : > { %14772 = vmatpush3.msra.mxu0 %v17515_v24  ;;  %14820 = vmatpush3.msra.mxu1 %v515_v50  ;;  %24290 = vst [vmem:[#allocation12_spill] sm:$0xff] %v17649_v36  ;;  %v17668_v51 = vsub.f32 %v162_v59, %v17628_v12  ;;  %v550_v53 = vand.u32 4294901760, %v549_v25  ;;  %v563_v55 = vsub.f32 %v17607_v60, %v17638_v30  ;;  %v17680_v50 = vand.u32 4294901760, %v17652_v37 }
  0x1e   : > { %14773 = vmatprep.subr.mxu0 %v17524_v27  ;;  %14821 = vmatprep.subr.mxu1 %v522_v57  ;;  %24291 = vst [vmem:[#allocation13_spill] sm:$0xff] %v17658_v43  ;;  %v17675_v1 = vsub.f32 %v146_v63, %v17646_v35  ;;  %v17683_v59 = vsub.f32 %v161_v6, %v17649_v36  ;;  %v17685_v2 = vand.u32 4294901760, %v148_v47  ;;  %v557_v25 = vand.u32 4294901760, %v556_v40 }
  0x1f   : > { %14774 = vmatpush3.msra.mxu0 %v17524_v27  ;;  %14822 = vmatpush3.msra.mxu1 %v522_v57  ;;  %24293 = vst [vmem:[#allocation15_spill] sm:$0xff] %v17680_v50  ;;  %v570_v63 = vsub.f32 %v17625_v7, %v17658_v43  ;;  %v17691_v57 = vsub.f32 %v147_v18, %v17660_v44  ;;  %v17698_v30 = vand.u32 4294901760, %v17668_v51  ;;  %v564_v40 = vand.u32 4294901760, %v563_v55 }
  0x20   : > { %14775 = vmatprep.subr.mxu0 %v17543_v34  ;;  %14823 = vmatprep.subr.mxu1 %v529_v0  ;;  %24292 = vst [vmem:[#allocation14_spill] sm:$0xff] %v17675_v1  ;;  %v24296_v18 = vand.u32 4294901760, %v17644_v32  ;;  %v17708_v52 = vsub.f32 %v160_v31, %v17664_v49  ;;  %v577_v41 = vsub.f32 %v17652_v37, %v17680_v50  ;;  %v17715_v39 = vand.u32 4294901760, %v17683_v59 }
  0x21   : > { %14776 = vmatpush3.msra.mxu0 %v17543_v34  ;;  %14824 = vmatpush3.msra.mxu1 %v529_v0  ;;  %v149_v0 = vld [vmem:[%s17551_s11 + $0x28] sm:$0xff]  ;;  %24295 = vst [vmem:[#allocation16_spill] sm:$0xff] %v17698_v30  ;;  %v17718_v55 = vsub.f32 %v148_v47, %v17685_v2  ;;  %v584_v50 = vsub.f32 %v17668_v51, %v17698_v30  ;;  %v24298_v31 = vand.u32 4294901760, %v17675_v1 }
  0x22   : > { %14777 = vmatprep.subr.mxu0 %v17572_v45  ;;  %14825 = vmatprep.subr.mxu1 %v536_v8  ;;  %v17700_v58 = vand.u32 4294901760, %v149_v0  ;;  %v342_v43 = vsub.f32 %v17644_v32, %v24296_v18  ;;  %24297 = vst [vmem:[#allocation17_spill] sm:$0xff] %v17715_v39  ;;  %v571_v18 = vand.u32 4294901760, %v570_v63 }
  0x23   : > { %14778 = vmatpush3.msra.mxu0 %v17572_v45  ;;  %14826 = vmatpush3.msra.mxu1 %v536_v8  ;;  %v24294_v8 = vand.u32 4294901760, %v17631_v13  ;;  %v352_v26 = vsub.f32 %v17675_v1, %v24298_v31  ;;  %v152_v1 = vld [vmem:[%s17551_s11 + $0x40] sm:$0xff] }
  0x24   : > { %14779 = vmatprep.subr.mxu0 %v17579_v48  ;;  %14827 = vmatprep.subr.mxu1 %v543_v38  ;;  %v17727_v28 = vsub.f32 %v149_v0, %v17700_v58  ;;  %v343_v63 = vand.u32 4294901760, %v342_v43  ;;  %v591_v0 = vsub.f32 %v17683_v59, %v17715_v39  ;;  %v24300_v43 = vand.u32 4294901760, %v17691_v57 }
  0x25   : > { %14780 = vmatpush3.msra.mxu0 %v17579_v48  ;;  %14828 = vmatpush3.msra.mxu1 %v543_v38  ;;  %v332_v6 = vsub.f32 %v17631_v13, %v24294_v8  ;;  %v150_v8 = vld [vmem:[%s17551_s11 + $0x30] sm:$0xff]  ;;  %v151_v38 = vld [vmem:[%s17551_s11 + $0x38] sm:$0xff]  ;;  %v353_v30 = vand.u32 4294901760, %v352_v26 }
  0x26   : > { %14781 = vmatprep.subr.mxu0 %v17612_v62  ;;  %14829 = vmatprep.subr.mxu1 %v550_v53  ;;  %v17729_v47 = vand.u32 4294901760, %v150_v8  ;;  %v17742_v23 = vand.u32 4294901760, %v151_v38  ;;  %v362_v31 = vsub.f32 %v17691_v57, %v24300_v43  ;;  %v592_v43 = vand.u32 4294901760, %v591_v0 }
  0x27   : > { %14782 = vmatpush3.msra.mxu0 %v17612_v62  ;;  %14830 = vmatpush3.msra.mxu1 %v550_v53  ;;  %v333_v53 = vand.u32 4294901760, %v332_v6  ;;  %v578_v6 = vand.u32 4294901760, %v577_v41  ;;  %v585_v41 = vand.u32 4294901760, %v584_v50 }
  0x28   : > { %14783 = vmatprep.subr.mxu0 %v17628_v12  ;;  %14831 = vmatprep.subr.mxu1 %v557_v25  ;;  %v17752_v39 = vsub.f32 %v150_v8, %v17729_v47  ;;  %v17764_v8 = vand.u32 4294901760, %v152_v1  ;;  %v363_v26 = vand.u32 4294901760, %v362_v31 }
  0x29   : > { %14784 = vmatpush3.msra.mxu0 %v17628_v12  ;;  %14832 = vmatpush3.msra.mxu1 %v557_v25  ;;  %v17736_v25 = vand.u32 4294901760, %v17708_v52 }
  0x2a   : > { %14785 = vmatprep.subr.mxu0 %v17649_v36  ;;  %14833 = vmatprep.subr.mxu1 %v564_v40  ;;  %v23930_v0 = vand.u32 4294901760, %v17752_v39  ;;  %v17778_v31 = vsub.f32 %v152_v1, %v17764_v8 }
  0x2b   : > { %24299 = vst [vmem:[#allocation18_spill] sm:$0xff] %v17736_v25  ;;  %14786 = vmatpush3.msra.mxu0 %v17649_v36  ;;  %14834 = vmatpush3.msra.mxu1 %v564_v40  ;;  %v598_v36 = vsub.f32 %v17708_v52, %v17736_v25  ;;  %v17762_v40 = vsub.f32 %v151_v38, %v17742_v23  ;;  %v154_v25 = vld [vmem:[%s17551_s11 + $0x50] sm:$0xff] }
  0x2c   : > { %14787 = vmatprep.subr.mxu0 %v17664_v49  ;;  %14835 = vmatprep.subr.mxu1 %v571_v18  ;;  %v23927_v1 = vand.u32 4294901760, %v17778_v31 }
  0x2d   : > { %14788 = vmatpush3.msra.mxu0 %v17664_v49  ;;  %14789 = vmatprep.mubr.f32.mxu0 %v333_v53  ;;  %v24301_v53 = vand.u32 4294901760, %v17718_v55  ;;  %v599_v38 = vand.u32 4294901760, %v598_v36 }
  0x2e   : > { %14836 = vmatpush3.msra.mxu1 %v571_v18  ;;  %14790 = vmatmul.mubr.f32.vlgmr.msra.gmra.mxu0 %v343_v63  ;;  %v24302_v18 = vand.u32 4294901760, %v17727_v28 }
  0x2f   : > { %14837 = vmatprep.subr.mxu1 %v578_v6  ;;  %14869 = vmatprep.subr.mxu0 %v17485_v14  ;;  %v372_v50 = vsub.f32 %v17718_v55, %v24301_v53  ;;  %v17772_v53 = vand.u32 4294901760, %v153_v22 }
  0x30   : > { %14838 = vmatpush3.msra.mxu1 %v578_v6  ;;  %14870 = vmatpush3.msra.mxu0 %v17485_v14  ;;  %v382_v63 = vsub.f32 %v17727_v28, %v24302_v18  ;;  %v23928_v6 = vand.u32 4294901760, %v17762_v40  ;;  %v155_v18 = vld [vmem:[%s17551_s11 + $0x58] sm:$0xff] }
  0x31   : > { %14839 = vmatprep.subr.mxu1 %v585_v41  ;;  %14871 = vmatprep.subr.mxu0 %v17488_v15  ;;  %v373_v14 = vand.u32 4294901760, %v372_v50  ;;  %v17787_v36 = vsub.f32 %v153_v22, %v17772_v53  ;;  %v156_v22 = vld [vmem:[%s17551_s11 + $0x60] sm:$0xff] }
  0x32   : > { %14792 = vmatprep.mubr.f32.mxu0 %v353_v30  ;;  %14840 = vmatpush3.msra.mxu1 %v585_v41  ;;  %v383_v30 = vand.u32 4294901760, %v382_v63  ;;  %v17789_v41 = vand.u32 4294901760, %v154_v25 }
  0x33   : > { %14872 = vmatpush3.msra.mxu0 %v17488_v15  ;;  %14841 = vmatprep.subr.mxu1 %v592_v43  ;;  %v392_v15 = vsub.f32 %v17752_v39, %v23930_v0 }
  0x34   : > { %14793 = vmatmul.mubr.f32.gmra.mxu0 %v363_v26  ;;  %14873 = vmatprep.subr.mxu0 %v17493_v17  ;;  %v23929_v26 = vand.u32 4294901760, %v17787_v36  ;;  %v17804_v63 = vsub.f32 %v154_v25, %v17789_v41  ;;  %v17817_v25 = vand.u32 4294901760, %v156_v22 }
  0x35   : > { %14842 = vmatpush3.msra.mxu1 %v592_v43  ;;  %14874 = vmatpush3.msra.mxu0 %v17493_v17  ;;  %v402_v17 = vsub.f32 %v17762_v40, %v23928_v6  ;;  %v17796_v43 = vand.u32 4294901760, %v155_v18  ;;  %v393_v50 = vand.u32 4294901760, %v392_v15 }
  0x36   : > { %14843 = vmatprep.subr.mxu1 %v599_v38  ;;  %14875 = vmatprep.subr.mxu0 %v17500_v19  ;;  %v23931_v15 = vand.u32 4294901760, %v17804_v63  ;;  %v17834_v6 = vsub.f32 %v156_v22, %v17817_v25 }
  0x37   : > { %14795 = vmatprep.mubr.f32.mxu0 %v373_v14  ;;  %14844 = vmatpush3.msra.mxu1 %v599_v38  ;;  %v157_v38 = vld [vmem:[%s17551_s11 + $0x68] sm:$0xff]  ;;  %v412_v14 = vsub.f32 %v17778_v31, %v23927_v1 }
  0x38   : > { %14845 = vmatprep.mubr.f32.mxu1 %v17597_v56  ;;  %14876 = vmatpush3.msra.mxu0 %v17500_v19  ;;  %v403_v19 = vand.u32 4294901760, %v402_v17  ;;  %v17826_v17 = vand.u32 4294901760, %v157_v38  ;;  %v451_v22 = vand.u32 4294901760, %v17834_v6 }
  0x39   : > { %14796 = vmatmul.mubr.f32.gmra.mxu0 %v383_v30  ;;  %14846 = vmatmul.mubr.f32.vlgmr.msra.gmra.mxu1 %v17609_v61  ;;  %v17815_v30 = vsub.f32 %v155_v18, %v17796_v43  ;;  %v158_v18 = vld [vmem:[%s17551_s11 + $0x70] sm:$0xff]  ;;  %v413_v1 = vand.u32 4294901760, %v412_v14 }
  0x3a   : > { %14877 = vmatprep.subr.mxu0 %v17503_v20  ;;  %14925 = vmatprep.subr.mxu1 %v17456_v3  ;;  %v17845_v14 = vsub.f32 %v157_v38, %v17826_v17  ;;  %v17847_v0 = vand.u32 4294901760, %v158_v18 }
  0x3b   : > { %14878 = vmatpush3.msra.mxu0 %v17503_v20  ;;  %14926 = vmatpush3.msra.mxu1 %v17456_v3  ;;  %v422_v20 = vsub.f32 %v17787_v36, %v23929_v26  ;;  %v159_v26 = vld [vmem:[%s17551_s11 + $0x78] sm:$0xff] }
  0x3c   : > { %14879 = vmatprep.subr.mxu0 %v17530_v29  ;;  %14927 = vmatprep.subr.mxu1 %v17458_v4 }
  0x3d   : > { %14798 = vmatprep.mubr.f32.mxu0 %v393_v50  ;;  %14848 = vmatprep.mubr.f32.mxu1 %v17646_v35  ;;  %v441_v50 = vand.u32 4294901760, %v17815_v30 }
  0x3e   : > { %14880 = vmatpush3.msra.mxu0 %v17530_v29  ;;  %14928 = vmatpush3.msra.mxu1 %v17458_v4  ;;  %v423_v29 = vand.u32 4294901760, %v422_v20  ;;  %v17856_v20 = vand.u32 4294901760, %v159_v26 }
  0x3f   : > { %14799 = vmatmul.mubr.f32.gmra.mxu0 %v403_v19  ;;  %14849 = vmatmul.mubr.f32.gmra.mxu1 %v17660_v44  ;;  %v432_v19 = vsub.f32 %v17804_v63, %v23931_v15  ;;  %v17863_v15 = vsub.f32 %v158_v18, %v17847_v0 }
  0x40   : > { %14881 = vmatprep.subr.mxu0 %v17540_v33  ;;  %14929 = vmatprep.subr.mxu1 %v17460_v5 }
  0x41   : > { %14882 = vmatpush3.msra.mxu0 %v17540_v33  ;;  %14930 = vmatpush3.msra.mxu1 %v17460_v5  ;;  %v442_v33 = vsub.f32 %v17815_v30, %v441_v50  ;;  %v433_v38 = vand.u32 4294901760, %v432_v19  ;;  %v17873_v19 = vsub.f32 %v159_v26, %v17856_v20  ;;  %v471_v18 = vand.u32 4294901760, %v17863_v15 }
  0x42   : > { %14883 = vmatprep.subr.mxu0 %v17567_v42  ;;  %14931 = vmatprep.subr.mxu1 %v17471_v9 }
  0x43   : > { %14801 = vmatprep.mubr.f32.mxu0 %v413_v1  ;;  %14851 = vmatprep.mubr.f32.mxu1 %v17685_v2  ;;  %v461_v1 = vand.u32 4294901760, %v17845_v14 }
  0x44   : > { %14884 = vmatpush3.msra.mxu0 %v17567_v42  ;;  %14932 = vmatpush3.msra.mxu1 %v17471_v9  ;;  %v443_v42 = vand.u32 4294901760, %v442_v33  ;;  %v481_v33 = vand.u32 4294901760, %v17873_v19 }
  0x45   : > { %14802 = vmatmul.mubr.f32.gmra.mxu0 %v423_v29  ;;  %14852 = vmatmul.mubr.f32.gmra.mxu1 %v17700_v58  ;;  %v452_v29 = vsub.f32 %v17834_v6, %v451_v22 }
  0x46   : > { %14885 = vmatprep.subr.mxu0 %v17575_v46  ;;  %14933 = vmatprep.subr.mxu1 %v17473_v10 }
  0x47   : > { %14886 = vmatpush3.msra.mxu0 %v17575_v46  ;;  %14934 = vmatpush3.msra.mxu1 %v17473_v10  ;;  %v462_v46 = vsub.f32 %v17845_v14, %v461_v1  ;;  %v453_v26 = vand.u32 4294901760, %v452_v29 }
  0x48   : > { %14887 = vmatprep.subr.mxu0 %v17592_v54  ;;  %14935 = vmatprep.subr.mxu1 %v17475_v11 }
  0x49   : > { %14804 = vmatprep.mubr.f32.mxu0 %v433_v38  ;;  %14854 = vmatprep.mubr.f32.mxu1 %v17729_v47  ;;  %v463_v38 = vand.u32 4294901760, %v462_v46  ;;  %v24309_v46 = vand.u32 4294901760, %v17644_v32 }
  0x4a   : > { %14888 = vmatpush3.msra.mxu0 %v17592_v54  ;;  %14936 = vmatpush3.msra.mxu1 %v17475_v11  ;;  %v472_v54 = vsub.f32 %v17863_v15, %v471_v18 }
  0x4b   : > { %14805 = vmatmul.mubr.f32.gmra.mxu0 %v443_v42  ;;  %14855 = vmatmul.mubr.f32.gmra.mxu1 %v17742_v23  ;;  %v482_v42 = vsub.f32 %v17873_v19, %v481_v33 }
  0x4c   : > { %14889 = vmatprep.subr.mxu0 %v17607_v60  ;;  %14937 = vmatprep.subr.mxu1 %v17490_v16 }
  0x4d   : > { %14890 = vmatpush3.msra.mxu0 %v17607_v60  ;;  %14938 = vmatpush3.msra.mxu1 %v17490_v16  ;;  %v473_v60 = vand.u32 4294901760, %v472_v54  ;;  %v483_v29 = vand.u32 4294901760, %v482_v42  ;;  %v24314_v54 = vld [vmem:[#allocation7_spill] sm:$0xff]  ;;  %v24318_v42 = vld [vmem:[#allocation9_spill] sm:$0xff] }
  0x4e   : > { %14891 = vmatprep.subr.mxu0 %v17625_v7  ;;  %14939 = vmatprep.subr.mxu1 %v17515_v24 }
  0x4f   : > { %14807 = vmatprep.mubr.f32.mxu0 %v453_v26  ;;  %14857 = vmatprep.mubr.f32.mxu1 %v17764_v8  ;;  %v24310_v26 = vld [vmem:[#allocation5_spill] sm:$0xff] }
  0x50   : > { %14892 = vmatpush3.msra.mxu0 %v17625_v7  ;;  %14940 = vmatpush3.msra.mxu1 %v17515_v24  ;;  %v24303_v7 = vld [vmem:[#allocation2_spill] sm:$0xff] }
  0x51   : > { %14808 = vmatmul.mubr.f32.gmra.mxu0 %v463_v38  ;;  %14858 = vmatmul.mubr.f32.gmra.mxu1 %v17772_v53  ;;  %v24311_v38 = vld [vmem:[#allocation6_spill] sm:$0xff] }
  0x52   : > { %14893 = vmatprep.subr.mxu0 %v17652_v37  ;;  %14941 = vmatprep.subr.mxu1 %v17524_v27 }
  0x53   : > { %14894 = vmatpush3.msra.mxu0 %v17652_v37  ;;  %14942 = vmatpush3.msra.mxu1 %v17524_v27  ;;  %v24305_v37 = vld [vmem:[#allocation12_spill] sm:$0xff] }
  0x54   : > { %14895 = vmatprep.subr.mxu0 %v17668_v51  ;;  %14943 = vmatprep.subr.mxu1 %v17543_v34 }
  0x55   : > { %14810 = vmatprep.mubr.f32.mxu0 %v473_v60  ;;  %14860 = vmatprep.mubr.f32.mxu1 %v17789_v41 }
  0x56   : > { %14896 = vmatpush3.msra.mxu0 %v17668_v51  ;;  %14944 = vmatpush3.msra.mxu1 %v17543_v34  ;;  %v24306_v51 = vld [vmem:[#allocation3_spill] sm:$0xff] }
  0x57   : > { %14811 = vmatmul.mubr.f32.gmra.mxu0 %v483_v29  ;;  %14861 = vmatmul.mubr.f32.gmra.mxu1 %v17796_v43 }
  0x58   : > { %14897 = vmatprep.subr.mxu0 %v17683_v59  ;;  %14945 = vmatprep.subr.mxu1 %v17572_v45 }
  0x59   : > { %14898 = vmatpush3.msra.mxu0 %v17683_v59  ;;  %14946 = vmatpush3.msra.mxu1 %v17572_v45  ;;  %v24308_v59 = vand.u32 4294901760, %v17631_v13 }
  0x5a   : > { %14899 = vmatprep.subr.mxu0 %v17708_v52  ;;  %14947 = vmatprep.subr.mxu1 %v17579_v48 }
  0x5b   : > { %14863 = vmatprep.mubr.f32.mxu1 %v17817_v25  ;;  %14900 = vmatpush3.msra.mxu0 %v17708_v52  ;;  %v24304_v52 = vld [vmem:[#allocation14_spill] sm:$0xff] }
  0x5c   : > { %14901 = vmatprep.mubr.f32.mxu0 %v17631_v13  ;;  %14948 = vmatpush3.msra.mxu1 %v17579_v48  ;;  %v24312_v13 = vand.u32 4294901760, %v24304_v52 }
  0x5d   : > { %14864 = vmatmul.mubr.f32.gmra.mxu1 %v17826_v17  ;;  %14902 = vmatmul.mubr.f32.vlgmr.msra.gmra.mxu0 %v17644_v32  ;;  %v24313_v32 = vand.u32 4294901760, %v17691_v57 }
  0x5e   : > { %14949 = vmatprep.subr.mxu1 %v17612_v62  ;;  %14981 = vmatprep.subr.mxu0 %v17507_v21 }
  0x5f   : > { %14950 = vmatpush3.msra.mxu1 %v17612_v62  ;;  %14982 = vmatpush3.msra.mxu0 %v17507_v21  ;;  %v24307_v21 = vld [vmem:[#allocation4_spill] sm:$0xff] }
  0x60   : > { %14951 = vmatprep.subr.mxu1 %v17628_v12  ;;  %14983 = vmatprep.subr.mxu0 %v24303_v7 }
  0x61   : > { %14866 = vmatprep.mubr.f32.mxu1 %v17847_v0  ;;  %14904 = vmatprep.mubr.f32.mxu0 %v24304_v52 }
  0x62   : > { %14952 = vmatpush3.msra.mxu1 %v17628_v12  ;;  %14984 = vmatpush3.msra.mxu0 %v24303_v7 }
  0x63   : > { %14867 = vmatmul.mubr.f32.gmra.mxu1 %v17856_v20  ;;  %14905 = vmatmul.mubr.f32.gmra.mxu0 %v17691_v57  ;;  %v24317_v57 = vand.u32 4294901760, %v17727_v28 }
  0x64   : > { %14953 = vmatprep.subr.mxu1 %v24305_v37  ;;  %14985 = vmatprep.subr.mxu0 %v24306_v51 }
  0x65   : > { %14954 = vmatpush3.msra.mxu1 %v24305_v37  ;;  %14986 = vmatpush3.msra.mxu0 %v24306_v51 }
  0x66   : > { %14955 = vmatprep.subr.mxu1 %v17664_v49  ;;  %14987 = vmatprep.subr.mxu0 %v24307_v21 }
  0x67   : > { %14907 = vmatprep.mubr.f32.mxu0 %v17718_v55  ;;  %14956 = vmatpush3.msra.mxu1 %v17664_v49 }
  0x68   : > { %14957 = vmatprep.mubr.f32.mxu1 %v24308_v59  ;;  %14988 = vmatpush3.msra.mxu0 %v24307_v21 }
  0x69   : > { %14908 = vmatmul.mubr.f32.gmra.mxu0 %v17727_v28  ;;  %14958 = vmatmul.mubr.f32.vlgmr.msra.gmra.mxu1 %v24309_v46  ;;  %v24321_v28 = vand.u32 4294901760, %v17762_v40 }
  0x6a   : > { %14989 = vmatprep.subr.mxu0 %v24310_v26  ;;  %15037 = vmatprep.subr.mxu1 %v17456_v3 }
  0x6b   : > { %14990 = vmatpush3.msra.mxu0 %v24310_v26  ;;  %15038 = vmatpush3.msra.mxu1 %v17456_v3  ;;  %v24315_v3 = vld [vmem:[#allocation8_spill] sm:$0xff] }
  0x6c   : > { %14991 = vmatprep.subr.mxu0 %v24311_v38  ;;  %15039 = vmatprep.subr.mxu1 %v17458_v4 }
  0x6d   : > { %14910 = vmatprep.mubr.f32.mxu0 %v17752_v39  ;;  %14960 = vmatprep.mubr.f32.mxu1 %v24312_v13 }
  0x6e   : > { %14992 = vmatpush3.msra.mxu0 %v24311_v38  ;;  %15040 = vmatpush3.msra.mxu1 %v17458_v4  ;;  %v24316_v4 = vand.u32 4294901760, %v17718_v55  ;;  %v24322_v55 = vld [vmem:[#allocation11_spill] sm:$0xff] }
  0x6f   : > { %14911 = vmatmul.mubr.f32.gmra.mxu0 %v17762_v40  ;;  %14961 = vmatmul.mubr.f32.gmra.mxu1 %v24313_v32  ;;  %v24326_v40 = vld [vmem:[#allocation15_spill] sm:$0xff] }
  0x70   : > { %14993 = vmatprep.subr.mxu0 %v24314_v54  ;;  %15041 = vmatprep.subr.mxu1 %v17460_v5 }
  0x71   : > { %14994 = vmatpush3.msra.mxu0 %v24314_v54  ;;  %15042 = vmatpush3.msra.mxu1 %v17460_v5  ;;  %v24319_v5 = vld [vmem:[#allocation10_spill] sm:$0xff] }
  0x72   : > { %14995 = vmatprep.subr.mxu0 %v24315_v3  ;;  %15043 = vmatprep.subr.mxu1 %v17471_v9 }
  0x73   : > { %14913 = vmatprep.mubr.f32.mxu0 %v17778_v31  ;;  %14963 = vmatprep.mubr.f32.mxu1 %v24316_v4 }
  0x74   : > { %14996 = vmatpush3.msra.mxu0 %v24315_v3  ;;  %15044 = vmatpush3.msra.mxu1 %v17471_v9  ;;  %v24320_v9 = vand.u32 4294901760, %v17752_v39  ;;  %v24325_v39 = vand.u32 4294901760, %v17787_v36 }
  0x75   : > { %14914 = vmatmul.mubr.f32.gmra.mxu0 %v17787_v36  ;;  %14964 = vmatmul.mubr.f32.gmra.mxu1 %v24317_v57 }
  0x76   : > { %14997 = vmatprep.subr.mxu0 %v24318_v42  ;;  %15045 = vmatprep.subr.mxu1 %v17473_v10 }
  0x77   : > { %14998 = vmatpush3.msra.mxu0 %v24318_v42  ;;  %15046 = vmatpush3.msra.mxu1 %v17473_v10  ;;  %v24323_v10 = vld [vmem:[#allocation13_spill] sm:$0xff] }
  0x78   : > { %14999 = vmatprep.subr.mxu0 %v24319_v5  ;;  %15047 = vmatprep.subr.mxu1 %v17475_v11 }
  0x79   : > { %14916 = vmatprep.mubr.f32.mxu0 %v17804_v63  ;;  %14966 = vmatprep.mubr.f32.mxu1 %v24320_v9 }
  0x7a   : > { %15000 = vmatpush3.msra.mxu0 %v24319_v5  ;;  %15048 = vmatpush3.msra.mxu1 %v17475_v11  ;;  %v24324_v11 = vand.u32 4294901760, %v17778_v31  ;;  %v24329_v31 = vld [vmem:[#allocation17_spill] sm:$0xff] }
  0x7b   : > { %14917 = vmatmul.mubr.f32.gmra.mxu0 %v17815_v30  ;;  %14967 = vmatmul.mubr.f32.gmra.mxu1 %v24321_v28 }
  0x7c   : > { %15001 = vmatprep.subr.mxu0 %v24322_v55  ;;  %15049 = vmatprep.subr.mxu1 %v17490_v16 }
  0x7d   : > { %15002 = vmatpush3.msra.mxu0 %v24322_v55  ;;  %15050 = vmatpush3.msra.mxu1 %v17490_v16  ;;  %v24327_v16 = vld [vmem:[#allocation16_spill] sm:$0xff] }
  0x7e   : > { %15003 = vmatprep.subr.mxu0 %v24323_v10  ;;  %15051 = vmatprep.subr.mxu1 %v17515_v24 }
  0x7f   : > { %14919 = vmatprep.mubr.f32.mxu0 %v17834_v6  ;;  %14969 = vmatprep.mubr.f32.mxu1 %v24324_v11 }
  0x80   : > { %15004 = vmatpush3.msra.mxu0 %v24323_v10  ;;  %15052 = vmatpush3.msra.mxu1 %v17515_v24  ;;  %v24328_v24 = vand.u32 4294901760, %v17804_v63 }
  0x81   : > { %14920 = vmatmul.mubr.f32.gmra.mxu0 %v17845_v14  ;;  %14970 = vmatmul.mubr.f32.gmra.mxu1 %v24325_v39 }
  0x82   : > { %15005 = vmatprep.subr.mxu0 %v24326_v40  ;;  %15053 = vmatprep.subr.mxu1 %v17524_v27 }
  0x83   : > { %15006 = vmatpush3.msra.mxu0 %v24326_v40  ;;  %15054 = vmatpush3.msra.mxu1 %v17524_v27  ;;  %v24330_v27 = vld [vmem:[#allocation18_spill] sm:$0xff] }
  0x84   : > { %15007 = vmatprep.subr.mxu0 %v24327_v16  ;;  %15055 = vmatprep.subr.mxu1 %v17543_v34 }
  0x85   : > { %14922 = vmatprep.mubr.f32.mxu0 %v17863_v15  ;;  %14972 = vmatprep.mubr.f32.mxu1 %v24328_v24  ;;  %v208_v24 = vld [vmem:[%s23891_s1 + $0x180] sm:$0xff] }
  0x86   : > { %15008 = vmatpush3.msra.mxu0 %v24327_v16  ;;  %15056 = vmatpush3.msra.mxu1 %v17543_v34  ;;  %v209_v16 = vld [vmem:[%s23891_s1 + $0x188] sm:$0xff] }
  0x87   : > { %14923 = vmatmul.mubr.f32.gmra.mxu0 %v17873_v19  ;;  %14973 = vmatmul.mubr.f32.gmra.mxu1 %v441_v50 }
  0x88   : > { %15009 = vmatprep.subr.mxu0 %v24329_v31  ;;  %15057 = vmatprep.subr.mxu1 %v17572_v45 }
  0x89   : > { %15010 = vmatpush3.msra.mxu0 %v24329_v31  ;;  %15058 = vmatpush3.msra.mxu1 %v17572_v45 }
  0x8a   : > { %15011 = vmatprep.subr.mxu0 %v24330_v27  ;;  %15059 = vmatprep.subr.mxu1 %v17579_v48 }
  0x8b   : > { %14975 = vmatprep.mubr.f32.mxu1 %v451_v22  ;;  %15012 = vmatpush3.msra.mxu0 %v24330_v27 }
  0x8c   : > { %15013 = vmatprep.mubr.f32.mxu0 %v17597_v56  ;;  %15060 = vmatpush3.msra.mxu1 %v17579_v48 }
  0x8d   : > { %14976 = vmatmul.mubr.f32.gmra.mxu1 %v461_v1  ;;  %15014 = vmatmul.mubr.f32.vlgmr.msra.gmra.mxu0 %v17609_v61 }
  0x8e   : > { %15061 = vmatprep.subr.mxu1 %v17612_v62  ;;  %14978 = vmatprep.mubr.f32.mxu1 %v471_v18 }
  0x8f   : > { %15062 = vmatpush3.msra.mxu1 %v17612_v62  ;;  %15016 = vmatprep.mubr.f32.mxu0 %v17646_v35 }
  0x90   : > { %15063 = vmatprep.subr.mxu1 %v17628_v12 }
  0x91   : > { %15064 = vmatpush3.msra.mxu1 %v17628_v12  ;;  %15017 = vmatmul.mubr.f32.gmra.mxu0 %v17660_v44 }
  0x92   : > { %14979 = vmatmul.mubr.f32.gmra.mxu1 %v481_v33  ;;  %15065 = vmatprep.subr.mxu1 %v24305_v37 }
  0x93   : > { %15066 = vmatpush3.msra.mxu1 %v24305_v37  ;;  %15019 = vmatprep.mubr.f32.mxu0 %v17685_v2 }
  0x94   : > { %15067 = vmatprep.subr.mxu1 %v17664_v49  ;;  %15069 = vmatprep.mubr.f32.mxu1 %v17597_v56 }
  0x95   : > { %15068 = vmatpush3.msra.mxu1 %v17664_v49  ;;  %15020 = vmatmul.mubr.f32.gmra.mxu0 %v17700_v58 }
  0x96   : > { %15070 = vmatmul.mubr.f32.vlgmr.msra.gmra.mxu1 %v17609_v61  ;;  %15022 = vmatprep.mubr.f32.mxu0 %v17729_v47 }
  0x97   : > { %15072 = vmatprep.mubr.f32.mxu1 %v17646_v35 }
  0x99   : > { %15023 = vmatmul.mubr.f32.gmra.mxu0 %v17742_v23 }
  0x9a   : > { %15073 = vmatmul.mubr.f32.gmra.mxu1 %v17660_v44  ;;  %15025 = vmatprep.mubr.f32.mxu0 %v17764_v8 }
  0x9b   : > { %15075 = vmatprep.mubr.f32.mxu1 %v17685_v2 }
  0x9d   : > { %15026 = vmatmul.mubr.f32.gmra.mxu0 %v17772_v53 }
  0x9e   : > { %15076 = vmatmul.mubr.f32.gmra.mxu1 %v17700_v58  ;;  %15028 = vmatprep.mubr.f32.mxu0 %v17789_v41 }
  0x9f   : > { %15078 = vmatprep.mubr.f32.mxu1 %v17729_v47 }
  0xa1   : > { %15029 = vmatmul.mubr.f32.gmra.mxu0 %v17796_v43 }
  0xa2   : > { %15079 = vmatmul.mubr.f32.gmra.mxu1 %v17742_v23  ;;  %15031 = vmatprep.mubr.f32.mxu0 %v17817_v25 }
  0xa3   : > { %15081 = vmatprep.mubr.f32.mxu1 %v17764_v8 }
  0xa5   : > { %15032 = vmatmul.mubr.f32.gmra.mxu0 %v17826_v17 }
  0xa6   : > { %15082 = vmatmul.mubr.f32.gmra.mxu1 %v17772_v53  ;;  %15034 = vmatprep.mubr.f32.mxu0 %v17847_v0 }
  0xa7   : > { %15084 = vmatprep.mubr.f32.mxu1 %v17789_v41 }
  0xa9   : > { %15035 = vmatmul.mubr.f32.gmra.mxu0 %v17856_v20 }
  0xaa   : > { %15085 = vmatmul.mubr.f32.gmra.mxu1 %v17796_v43 }
  0xab   : > { %15087 = vmatprep.mubr.f32.mxu1 %v17817_v25 }
  0xae   : > { %15088 = vmatmul.mubr.f32.gmra.mxu1 %v17826_v17 }
  0xaf   : > { %15090 = vmatprep.mubr.f32.mxu1 %v17847_v0 }
  0xb2   : > { %15091 = vmatmul.mubr.f32.gmra.mxu1 %v17856_v20 }
  0xee   : > { %v18076_v23 = vpop.f32.mrf.mxu0 }
  0xf0   : > { %v18078_v34 = vpop.f32.mrf.mxu0 }
  0xf4   : > { %v18080_v45 = vpop.f32.mrf.mxu0 }
  0xf6   : > { %v18082_v48 = vpop.f32.mrf.mxu0 }
  0xf9   : > { %v18084_v56 = vpop.f32.mrf.mxu0  ;;  %v18086_v58 = vpop.f32.mrf.mxu1 }
  0xfb   : > { %v18088_v61 = vpop.f32.mrf.mxu0  ;;  %v18090_v62 = vpop.f32.mrf.mxu1 }
  0xff   : > { %v18092_v2 = vpop.f32.mrf.mxu0  ;;  %v18094_v12 = vpop.f32.mrf.mxu1 }
 0x101   : > { %v18096_v35 = vpop.f32.mrf.mxu0  ;;  %v18098_v44 = vpop.f32.mrf.mxu1 }
 0x105   : > { %v18100_v49 = vpop.f32.mrf.mxu0  ;;  %v18102_v47 = vpop.f32.mrf.mxu1 }
 0x107   : > { %v18104_v8 = vpop.f32.mrf.mxu0  ;;  %v18106_v0 = vpop.f32.mrf.mxu1 }
 0x10b   : > { %v18108_v53 = vpop.f32.mrf.mxu0  ;;  %v18110_v6 = vpop.f32.mrf.mxu1 }
 0x10d   : > { %v18112_v36 = vpop.f32.mrf.mxu0  ;;  %v18114_v41 = vpop.f32.mrf.mxu1 }
 0x111   : > { %v18116_v43 = vpop.f32.mrf.mxu0  ;;  %v18118_v63 = vpop.f32.mrf.mxu1 }
 0x113   : > { %v18120_v30 = vpop.f32.mrf.mxu0  ;;  %v18122_v25 = vpop.f32.mrf.mxu1 }
 0x117   : > { %v18124_v15 = vpop.f32.mrf.mxu0  ;;  %v18126_v17 = vpop.f32.mrf.mxu1 }
 0x118   : > { %24331 = vst [vmem:[#allocation2_spill] sm:$0xff] %v18124_v15 }
 0x119   : > { %v18128_v50 = vpop.f32.mrf.mxu0  ;;  %v18130_v14 = vpop.f32.mrf.mxu1 }
 0x11a   : > { %24332 = vst [vmem:[#allocation14_spill] sm:$0xff] %v18128_v50 }
 0x11d   : > { %v18132_v22 = vpop.f32.mrf.mxu1  ;;  %v14903_v20 = vpop.f32.mrf.mxu0 }
 0x11e   : > { %24333 = vst [vmem:[#allocation12_spill] sm:$0xff] %v18132_v22 }
 0x11f   : > { %v18134_v1 = vpop.f32.mrf.mxu1  ;;  %v830_v19 = vpop.f32.mrf.mxu0 }
 0x123   : > { %v18136_v18 = vpop.f32.mrf.mxu1  ;;  %v18138_v33 = vpop.f32.mrf.mxu0 }
 0x124   : > { %24334 = vst [vmem:[#allocation3_spill] sm:$0xff] %v18136_v18  ;;  %v346_v18 = vadd.f32 %v18076_v23, %v209_v16  ;;  %v213_v16 = vld [vmem:[%s23891_s1 + $0x1a8] sm:$0xff] }
 0x125   : > { %v18140_v60 = vpop.f32.mrf.mxu1  ;;  %v844_v29 = vpop.f32.mrf.mxu0 }
 0x126   : > { %24335 = vst [vmem:[#allocation4_spill] sm:$0xff] %v18140_v60  ;;  %v211_v60 = vld [vmem:[%s23891_s1 + $0x198] sm:$0xff] }
 0x127   : > { %v366_v23 = vadd.f32 %v18080_v45, %v211_v60 }
 0x129   : > { %v18142_v7 = vpop.f32.mrf.mxu0  ;;  %v14959_v52 = vpop.f32.mrf.mxu1 }
 0x12b   : > { %v18144_v37 = vpop.f32.mrf.mxu0  ;;  %v1024_v51 = vpop.f32.mrf.mxu1 }
 0x12f   : > { %v18146_v21 = vpop.f32.mrf.mxu0  ;;  %v18148_v59 = vpop.f32.mrf.mxu1 }
 0x131   : > { %v18150_v46 = vpop.f32.mrf.mxu0  ;;  %v1040_v26 = vpop.f32.mrf.mxu1 }
 0x135   : > { %v18152_v38 = vpop.f32.mrf.mxu0  ;;  %v18154_v13 = vpop.f32.mrf.mxu1 }
 0x137   : > { %v18156_v32 = vpop.f32.mrf.mxu0  ;;  %v18158_v54 = vpop.f32.mrf.mxu1 }
 0x13b   : > { %v18160_v3 = vpop.f32.mrf.mxu0  ;;  %v18162_v4 = vpop.f32.mrf.mxu1 }
 0x13d   : > { %v18164_v57 = vpop.f32.mrf.mxu0  ;;  %v18166_v42 = vpop.f32.mrf.mxu1 }
 0x141   : > { %v18168_v5 = vpop.f32.mrf.mxu0  ;;  %v18170_v9 = vpop.f32.mrf.mxu1 }
 0x142   : > { %24336 = vst [vmem:[#allocation5_spill] sm:$0xff] %v18168_v5 }
 0x143   : > { %v18172_v28 = vpop.f32.mrf.mxu0  ;;  %v18174_v55 = vpop.f32.mrf.mxu1 }
 0x144   : > { %24337 = vst [vmem:[#allocation6_spill] sm:$0xff] %v18172_v28 }
 0x147   : > { %v18176_v10 = vpop.f32.mrf.mxu0  ;;  %v18178_v11 = vpop.f32.mrf.mxu1 }
 0x148   : > { %24338 = vst [vmem:[#allocation7_spill] sm:$0xff] %v18176_v10  ;;  %24339 = vst [vmem:[#allocation8_spill] sm:$0xff] %v18178_v11  ;;  %v336_v10 = vadd.f32 %v18078_v34, %v208_v24  ;;  %v210_v11 = vld [vmem:[%s23891_s1 + $0x190] sm:$0xff]  ;;  %v643_v24 = vadd.f32 %v18086_v58, %v346_v18  ;;  %v215_v58 = vld [vmem:[%s23891_s1 + $0x1b8] sm:$0xff]  ;;  %v655_v18 = vadd.f32 %v18094_v12, %v366_v23 }
 0x149   : > { %v18180_v39 = vpop.f32.mrf.mxu0  ;;  %v18182_v40 = vpop.f32.mrf.mxu1  ;;  %v356_v34 = vadd.f32 %v18082_v48, %v210_v11  ;;  %v386_v48 = vadd.f32 %v18084_v56, %v213_v16  ;;  %v406_v12 = vadd.f32 %v18092_v2, %v215_v58 }
 0x14a   : > { %24340 = vst [vmem:[#allocation9_spill] sm:$0xff] %v18180_v39  ;;  %24341 = vst [vmem:[#allocation10_spill] sm:$0xff] %v18182_v40  ;;  %v637_v28 = vadd.f32 %v18090_v62, %v336_v10 }
 0x14b   : > { %v649_v10 = vadd.f32 %v18098_v44, %v356_v34 }
 0x14c   : > { %v831_v50 = vadd.f32 %v830_v19, %v637_v28  ;;  %v214_v19 = vld [vmem:[%s23891_s1 + $0x1b0] sm:$0xff] }
 0x14d   : > { %v18190_v31 = vpop.f32.mrf.mxu1  ;;  %v15015_v27 = vpop.f32.mrf.mxu0  ;;  %v845_v28 = vadd.f32 %v844_v29, %v649_v10  ;;  %v396_v23 = vadd.f32 %v18096_v35, %v214_v19  ;;  %v217_v29 = vld [vmem:[%s23891_s1 + $0x1c8] sm:$0xff] }
 0x14e   : > { %24342 = vst [vmem:[#allocation11_spill] sm:$0xff] %v18190_v31  ;;  %v1025_v45 = vadd.f32 %v1024_v51, %v831_v50 }
 0x14f   : > { %v18194_v5 = vpop.f32.mrf.mxu1  ;;  %v1263_v39 = vpop.f32.mrf.mxu0  ;;  %v673_v10 = vadd.f32 %v18114_v41, %v396_v23  ;;  %v679_v41 = vadd.f32 %v18110_v6, %v406_v12 }
 0x150   : > { %24343 = vst [vmem:[#allocation13_spill] sm:$0xff] %v18194_v5  ;;  %v212_v5 = vld [vmem:[%s23891_s1 + $0x1a0] sm:$0xff] }
 0x151   : > { %v15018_v22 = vpop.f32.mrf.mxu0  ;;  %v376_v11 = vadd.f32 %v18088_v61, %v212_v5  ;;  %v852_v61 = vadd.f32 %v18138_v33, %v655_v18  ;;  %v1041_v5 = vadd.f32 %v1040_v26, %v845_v28  ;;  %v216_v33 = vld [vmem:[%s23891_s1 + $0x1c0] sm:$0xff] }
 0x152   : > { %v18203_v31 = vpop.f32.mrf.mxu1 }
 0x153   : > { %24344 = vst [vmem:[#allocation15_spill] sm:$0xff] %v18203_v31  ;;  %v1275_v40 = vpop.f32.mrf.mxu0  ;;  %v838_v31 = vadd.f32 %v14903_v20, %v643_v24  ;;  %v1264_v20 = vadd.f32 %v1263_v39, %v1025_v45  ;;  %v661_v51 = vadd.f32 %v18106_v0, %v376_v11  ;;  %v667_v0 = vadd.f32 %v18102_v47, %v386_v48 }
 0x154   : > { %v18214_v62 = vpop.f32.mrf.mxu1  ;;  %v1049_v26 = vadd.f32 %v18148_v59, %v852_v61 }
 0x155   : > { %v15021_v60 = vpop.f32.mrf.mxu0  ;;  %v1033_v44 = vadd.f32 %v14959_v52, %v838_v31  ;;  %v859_v52 = vadd.f32 %v18144_v37, %v661_v51  ;;  %v1276_v31 = vadd.f32 %v1275_v40, %v1041_v5  ;;  %v866_v47 = vadd.f32 %v18142_v7, %v667_v0  ;;  %v219_v40 = vld [vmem:[%s23891_s1 + $0x1d8] sm:$0xff] }
 0x156   : > { %v15071_v15 = vpop.f32.mrf.mxu1  ;;  %v426_v37 = vadd.f32 %v18100_v49, %v217_v29  ;;  %v1282_v11 = vadd.f32 %v15018_v22, %v1049_v26  ;;  %v873_v7 = vadd.f32 %v18150_v46, %v673_v10  ;;  %v218_v22 = vld [vmem:[%s23891_s1 + $0x1d0] sm:$0xff]  ;;  %v880_v46 = vadd.f32 %v18146_v21, %v679_v41 }
 0x157   : > { %v1287_v50 = vpop.f32.mrf.mxu0  ;;  %v1270_v34 = vadd.f32 %v15015_v27, %v1033_v44  ;;  %v1057_v48 = vadd.f32 %v18158_v54, %v859_v52  ;;  %v1065_v18 = vadd.f32 %v18154_v13, %v866_v47  ;;  %v436_v5 = vadd.f32 %v18112_v36, %v218_v22  ;;  %v24357_v22 = vld [vmem:[#allocation12_spill] sm:$0xff] }
 0x158   : > { %v1440_v56 = vpop.f32.mrf.mxu1  ;;  %v1081_v12 = vadd.f32 %v18162_v4, %v880_v46 }
 0x159   : > { %v18228_v16 = vadd.f32 %v1440_v56, %v1264_v20  ;;  %v18230_v24 = vpop.f32.mrf.mxu0  ;;  %v18243_v27 = vadd.f32 %v15071_v15, %v1270_v34  ;;  %v416_v15 = vadd.f32 %v18104_v8, %v216_v33  ;;  %v1288_v54 = vadd.f32 %v1287_v50, %v1057_v48  ;;  %v221_v34 = vld [vmem:[%s23891_s1 + $0x1e8] sm:$0xff]  ;;  %v24353_v48 = vld [vmem:[#allocation2_spill] sm:$0xff] }
 0x15a   : > { %v15074_v39 = vpop.f32.mrf.mxu1  ;;  %v446_v20 = vadd.f32 %v18108_v53, %v219_v40  ;;  %v1073_v50 = vadd.f32 %v18166_v42, %v873_v7  ;;  %v1294_v51 = vadd.f32 %v15021_v60, %v1065_v18  ;;  %v220_v53 = vld [vmem:[%s23891_s1 + $0x1e0] sm:$0xff]  ;;  %v466_v52 = vadd.f32 %v18116_v43, %v221_v34 }
 0x15b   : > { %24345 = vst [vmem:[#allocation16_spill] sm:$0xff] %v18228_v16  ;;  %24346 = vst [vmem:[#allocation17_spill] sm:$0xff] %v18243_v27  ;;  %v1299_v2 = vpop.f32.mrf.mxu0  ;;  %v1535_v35 = vsel %vm1534_vm0, %v18228_v16, 0.0  ;;  %v18265_v19 = vadd.f32 %v15074_v39, %v1282_v11  ;;  %v1538_v44 = vsel %vm1534_vm0, %v18243_v27, 0.0  ;;  %v685_v6 = vadd.f32 %v18122_v25, %v416_v15  ;;  %v24354_v15 = vld [vmem:[#allocation10_spill] sm:$0xff] }
 0x15c   : > { %v1452_v45 = vpop.f32.mrf.mxu1  ;;  %1536 = vadd.xlane.f32.xlu0 %v1535_v35  ;;  %v691_v25 = vadd.f32 %v18118_v63, %v426_v37  ;;  %v1300_v42 = vadd.f32 %v1299_v2, %v1073_v50  ;;  %v697_v63 = vadd.f32 %v18130_v14, %v436_v5  ;;  %v1306_v33 = vadd.f32 %v18230_v24, %v1081_v12  ;;  %v223_v14 = vld [vmem:[%s23891_s1 + $0x1f8] sm:$0xff]  ;;  %v24356_v18 = vld [vmem:[#allocation14_spill] sm:$0xff] }
 0x15d   : > { %v18251_v58 = vadd.f32 %v1452_v45, %v1276_v31  ;;  %v18253_v59 = vpop.f32.mrf.mxu0  ;;  %24348 = vst [vmem:[#allocation19_spill] sm:$0xff] %v18265_v19  ;;  %v887_v21 = vadd.f32 %v18156_v32, %v685_v6  ;;  %v1544_v36 = vsel %vm1534_vm0, %v18265_v19, 0.0  ;;  %v456_v2 = vadd.f32 %v18120_v30, %v220_v53 }
 0x15e   : > { %v15077_v49 = vpop.f32.mrf.mxu1  ;;  %v894_v32 = vadd.f32 %v18152_v38, %v691_v25  ;;  %v703_v38 = vadd.f32 %v18126_v17, %v446_v20  ;;  %v901_v35 = vadd.f32 %v18164_v57, %v697_v63  ;;  %v486_v11 = vadd.f32 %v24353_v48, %v223_v14  ;;  %v24361_v20 = vld [vmem:[#allocation4_spill] sm:$0xff]  ;;  %v24367_v63 = vld [vmem:[#allocation11_spill] sm:$0xff] }
 0x15f   : > { %24347 = vst [vmem:[#allocation18_spill] sm:$0xff] %v18251_v58  ;;  %v1311_v28 = vpop.f32.mrf.mxu0  ;;  %v1541_v8 = vsel %vm1534_vm0, %v18251_v58, 0.0  ;;  %v18287_v60 = vadd.f32 %v15077_v49, %v1294_v51  ;;  %v1089_v39 = vadd.f32 %v18174_v55, %v887_v21  ;;  %v222_v55 = vld [vmem:[%s23891_s1 + $0x1f0] sm:$0xff]  ;;  %v709_v17 = vadd.f32 %v18134_v1, %v456_v2  ;;  %v24362_v51 = vld [vmem:[#allocation5_spill] sm:$0xff]  ;;  %v24369_v14 = vld [vmem:[#allocation7_spill] sm:$0xff] }
 0x160   : > { %v1464_v13 = vpop.f32.mrf.mxu1  ;;  %1542 = vadd.xlane.f32.xlu1 %v1541_v8  ;;  %1539 = vadd.xlane.f32.xlu0 %v1538_v44  ;;  %v1097_v10 = vadd.f32 %v18170_v9, %v894_v32  ;;  %v908_v57 = vadd.f32 %v18160_v3, %v703_v38  ;;  %v1105_v40 = vadd.f32 %v24354_v15, %v901_v35  ;;  %v24359_v8 = vld [vmem:[#allocation8_spill] sm:$0xff]  ;;  %v24363_v21 = vld [vmem:[#allocation13_spill] sm:$0xff] }
 0x161   : > { %v18275_v56 = vadd.f32 %v1464_v13, %v1288_v54  ;;  %v15030_v61 = vpop.f32.mrf.mxu0  ;;  %24350 = vst [vmem:[#allocation21_spill] sm:$0xff] %v18287_v60  ;;  %v1312_v24 = vadd.f32 %v1311_v28, %v1089_v39  ;;  %v1550_v30 = vsel %vm1534_vm0, %v18287_v60, 0.0  ;;  %v476_v49 = vadd.f32 %v24356_v18, %v222_v55  ;;  %v24358_v28 = vld [vmem:[#allocation6_spill] sm:$0xff] }
 0x162   : > { %v15080_v23 = vpop.f32.mrf.mxu1  ;;  %v1318_v41 = vadd.f32 %v18253_v59, %v1097_v10  ;;  %v715_v54 = vadd.f32 %v24357_v22, %v466_v52  ;;  %v915_v1 = vadd.f32 %v24358_v28, %v709_v17  ;;  %v1113_v3 = vadd.f32 %v24359_v8, %v908_v57 }
 0x163   : > { %24349 = vst [vmem:[#allocation20_spill] sm:$0xff] %v18275_v56  ;;  %v1323_v29 = vpop.f32.mrf.mxu0  ;;  %v1547_v0 = vsel %vm1534_vm0, %v18275_v56, 0.0  ;;  %v18310_v47 = vadd.f32 %v15080_v23, %v1306_v33  ;;  %v721_v50 = vadd.f32 %v24361_v20, %v476_v49 }
 0x164   : > { %v1476_v4 = vpop.f32.mrf.mxu1  ;;  %1545 = vadd.xlane.f32.xlu1 %v1544_v36  ;;  %1548 = vadd.xlane.f32.xlu0 %v1547_v0  ;;  %v1324_v6 = vadd.f32 %v1323_v29, %v1105_v40  ;;  %v922_v5 = vadd.f32 %v24362_v51, %v715_v54  ;;  %v1121_v12 = vadd.f32 %v24363_v21, %v915_v1  ;;  %v24366_v36 = vld [vmem:[#allocation9_spill] sm:$0xff] }
 0x165   : > { %v18298_v26 = vadd.f32 %v1476_v4, %v1300_v42  ;;  %v15033_v31 = vpop.f32.mrf.mxu0  ;;  %24352 = vst [vmem:[#allocation23_spill] sm:$0xff] %v18310_v47  ;;  %v1556_v13 = vsel %vm1534_vm0, %v18310_v47, 0.0  ;;  %v1330_v23 = vadd.f32 %v15030_v61, %v1113_v3  ;;  %v24365_v42 = vld [vmem:[#allocation3_spill] sm:$0xff]  ;;  %v929_v0 = vadd.f32 %v24366_v36, %v721_v50 }
 0x166   : > { %v15083_v43 = vpop.f32.mrf.mxu1  ;;  %v727_v29 = vadd.f32 %v24365_v42, %v486_v11  ;;  %v1129_v32 = vadd.f32 %v24367_v63, %v922_v5 }
 0x167   : > { %24351 = vst [vmem:[#allocation22_spill] sm:$0xff] %v18298_v26  ;;  %v1553_v45 = vsel %vm1534_vm0, %v18298_v26, 0.0  ;;  %v1335_v37 = vpop.f32.mrf.mxu0  ;;  %v18327_v46 = vadd.f32 %v15083_v43, %v1318_v41  ;;  %v1137_v10 = vadd.f32 %v18214_v62, %v929_v0 }
 0x168   : > { %v1488_v9 = vpop.f32.mrf.mxu1  ;;  %1551 = vadd.xlane.f32.xlu1 %v1550_v30  ;;  %1554 = vadd.xlane.f32.xlu0 %v1553_v45  ;;  %v1336_v52 = vadd.f32 %v1335_v37, %v1121_v12  ;;  %v936_v61 = vadd.f32 %v24369_v14, %v727_v29  ;;  %v1342_v43 = vadd.f32 %v15033_v31, %v1129_v32 }
 0x169   : > { %v18321_v7 = vadd.f32 %v1488_v9, %v1312_v24  ;;  %24360 = vst [vmem:[#allocation10_spill] sm:$0xff] %v18327_v46  ;;  %v15036_v34 = vpop.f32.mrf.mxu0  ;;  %v1562_v33 = vsel %vm1534_vm0, %v18327_v46, 0.0  ;;  %v24371_v24 = vld [vmem:[#allocation15_spill] sm:$0xff] }
 0x16a   : > { %v15086_v44 = vpop.f32.mrf.mxu1  ;;  %v1145_v30 = vadd.f32 %v24371_v24, %v936_v61 }
 0x16b   : > { %24355 = vst [vmem:[#allocation2_spill] sm:$0xff] %v18321_v7  ;;  %v1559_v59 = vsel %vm1534_vm0, %v18321_v7, 0.0  ;;  %v18341_v39 = vadd.f32 %v15086_v44, %v1330_v23  ;;  %v1347_v38 = vpop.f32.mrf.mxu0 }
 0x16c   : > { %v1500_v25 = vpop.f32.mrf.mxu1  ;;  %1557 = vadd.xlane.f32.xlu1 %v1556_v13  ;;  %1560 = vadd.xlane.f32.xlu0 %v1559_v59  ;;  %v1348_v17 = vadd.f32 %v1347_v38, %v1137_v10  ;;  %v1354_v11 = vadd.f32 %v15036_v34, %v1145_v30 }
 0x16d   : > { %v18336_v53 = vadd.f32 %v1500_v25, %v1324_v6  ;;  %24368 = vst [vmem:[#allocation12_spill] sm:$0xff] %v18341_v39  ;;  %v1568_v37 = vsel %vm1534_vm0, %v18341_v39, 0.0 }
 0x16e   : > { %v15089_v4 = vpop.f32.mrf.mxu1 }
 0x16f   : > { %24364 = vst [vmem:[#allocation14_spill] sm:$0xff] %v18336_v53  ;;  %v1565_v2 = vsel %vm1534_vm0, %v18336_v53, 0.0  ;;  %v18352_v57 = vadd.f32 %v15089_v4, %v1342_v43 }
 0x170   : > { %v1512_v35 = vpop.f32.mrf.mxu1  ;;  %1563 = vadd.xlane.f32.xlu1 %v1562_v33  ;;  %1566 = vadd.xlane.f32.xlu0 %v1565_v2 }
 0x171   : > { %v18349_v55 = vadd.f32 %v1512_v35, %v1336_v52  ;;  %24372 = vst [vmem:[#allocation8_spill] sm:$0xff] %v18352_v57  ;;  %v1574_v15 = vsel %vm1534_vm0, %v18352_v57, 0.0 }
 0x172   : > { %v15092_v45 = vpop.f32.mrf.mxu1 }
 0x173   : > { %24370 = vst [vmem:[#allocation6_spill] sm:$0xff] %v18349_v55  ;;  %v1571_v9 = vsel %vm1534_vm0, %v18349_v55, 0.0  ;;  %v18360_v31 = vadd.f32 %v15092_v45, %v1354_v11 }
 0x174   : > { %v1524_v48 = vpop.f32.mrf.mxu1  ;;  %1569 = vadd.xlane.f32.xlu1 %v1568_v37  ;;  %1572 = vadd.xlane.f32.xlu0 %v1571_v9 }
 0x175   : > { %v18358_v62 = vadd.f32 %v1524_v48, %v1348_v17  ;;  %24374 = vst [vmem:[#allocation5_spill] sm:$0xff] %v18360_v31  ;;  %v1580_v41 = vsel %vm1534_vm0, %v18360_v31, 0.0 }
 0x177   : > { %24373 = vst [vmem:[#allocation4_spill] sm:$0xff] %v18358_v62  ;;  %v1577_v40 = vsel %vm1534_vm0, %v18358_v62, 0.0 }
 0x178   : > { %1575 = vadd.xlane.f32.xlu1 %v1574_v15  ;;  %1578 = vadd.xlane.f32.xlu0 %v1577_v40 }
 0x17c   : > { %1581 = vadd.xlane.f32.xlu1 %v1580_v41 }
 0x1e5   : > { %v1537_v18 = vpop.xlane.xlu0 %1536 }
 0x1e6   : > { %v1584_v49 = vmul.f32 0.03125, %v1537_v18 }
 0x1e8   : > { %v18369_v22 = vsub.f32 %v18228_v16, %v1584_v49 }
 0x1e9   : > { %v1543_v54 = vpop.xlane.xlu1 %1542  ;;  %v1540_v28 = vpop.xlane.xlu0 %1539 }
 0x1ea   : > { %v1586_v1 = vmul.f32 0.03125, %v1543_v54  ;;  %v1585_v8 = vmul.f32 0.03125, %v1540_v28  ;;  %v1616_v3 = vmul.f32 %v18369_v22, %v18369_v22 }
 0x1ec   : > { %v18374_v44 = vsub.f32 %v18251_v58, %v1586_v1  ;;  %v18377_v6 = vsub.f32 %v18243_v27, %v1585_v8  ;;  %v1632_v13 = vsel %vm1534_vm0, %v1616_v3, 0.0 }
 0x1ed   : > { %v1546_v59 = vpop.xlane.xlu1 %1545  ;;  %1633 = vadd.xlane.f32.xlu0 %v1632_v13  ;;  %v1549_v20 = vpop.xlane.xlu0 %1548 }
 0x1ee   : > { %v1587_v50 = vmul.f32 0.03125, %v1546_v59  ;;  %v1588_v51 = vmul.f32 0.03125, %v1549_v20  ;;  %v1618_v5 = vmul.f32 %v18374_v44, %v18374_v44  ;;  %v1617_v34 = vmul.f32 %v18377_v6, %v18377_v6 }
 0x1f0   : > { %v18385_v25 = vsub.f32 %v18265_v19, %v1587_v50  ;;  %v18388_v21 = vsub.f32 %v18275_v56, %v1588_v51  ;;  %v1638_v12 = vsel %vm1534_vm0, %v1618_v5, 0.0  ;;  %v1635_v23 = vsel %vm1534_vm0, %v1617_v34, 0.0 }
 0x1f1   : > { %v1552_v42 = vpop.xlane.xlu1 %1551  ;;  %1639 = vadd.xlane.f32.xlu0 %v1638_v12  ;;  %1636 = vadd.xlane.f32.xlu1 %v1635_v23  ;;  %v1555_v29 = vpop.xlane.xlu0 %1554 }
 0x1f2   : > { %v1589_v36 = vmul.f32 0.03125, %v1552_v42  ;;  %v1590_v0 = vmul.f32 0.03125, %v1555_v29  ;;  %v1619_v63 = vmul.f32 %v18385_v25, %v18385_v25  ;;  %v1620_v32 = vmul.f32 %v18388_v21, %v18388_v21 }
 0x1f4   : > { %v18397_v4 = vsub.f32 %v18287_v60, %v1589_v36  ;;  %v18400_v52 = vsub.f32 %v18298_v26, %v1590_v0  ;;  %v1641_v33 = vsel %vm1534_vm0, %v1619_v63, 0.0  ;;  %v1644_v2 = vsel %vm1534_vm0, %v1620_v32, 0.0 }
 0x1f5   : > { %v1558_v14 = vpop.xlane.xlu1 %1557  ;;  %1642 = vadd.xlane.f32.xlu1 %v1641_v33  ;;  %1645 = vadd.xlane.f32.xlu0 %v1644_v2  ;;  %v1561_v61 = vpop.xlane.xlu0 %1560  ;;  %v179_v2 = vld [vmem:[%s23891_s1 + $0x98] sm:$0xff] }
 0x1f6   : > { %v1591_v38 = vmul.f32 0.03125, %v1558_v14  ;;  %v1592_v35 = vmul.f32 0.03125, %v1561_v61  ;;  %v1621_v10 = vmul.f32 %v18397_v4, %v18397_v4  ;;  %v1622_v43 = vmul.f32 %v18400_v52, %v18400_v52 }
 0x1f7   : > { %v18455_v61 = vand.u32 4294901760, %v179_v2 }
 0x1f8   : > { %v18409_v24 = vsub.f32 %v18310_v47, %v1591_v38  ;;  %v18412_v30 = vsub.f32 %v18321_v7, %v1592_v35  ;;  %v1647_v45 = vsel %vm1534_vm0, %v1621_v10, 0.0  ;;  %v1650_v17 = vsel %vm1534_vm0, %v1622_v43, 0.0  ;;  %v178_v43 = vld [vmem:[%s23891_s1 + $0x90] sm:$0xff] }
 0x1f9   : > { %v1564_v37 = vpop.xlane.xlu1 %1563  ;;  %1648 = vadd.xlane.f32.xlu1 %v1647_v45  ;;  %1651 = vadd.xlane.f32.xlu0 %v1650_v17  ;;  %v1567_v9 = vpop.xlane.xlu0 %1566  ;;  %v18466_v45 = vsub.f32 %v179_v2, %v18455_v61  ;;  %v18468_v17 = vand.u32 4294901760, %v178_v43 }
 0x1fa   : > { %v1593_v48 = vmul.f32 0.03125, %v1564_v37  ;;  %v1594_v11 = vmul.f32 0.03125, %v1567_v9  ;;  %v1623_v15 = vmul.f32 %v18409_v24, %v18409_v24  ;;  %v1624_v40 = vmul.f32 %v18412_v30, %v18412_v30  ;;  %15093 = vmatprep.subr.mxu0 %v18455_v61 }
 0x1fb   : > { %15094 = vmatpush3.msra.mxu0 %v18455_v61 }
 0x1fc   : > { %v18421_v41 = vsub.f32 %v18327_v46, %v1593_v48  ;;  %v18424_v18 = vsub.f32 %v18336_v53, %v1594_v11  ;;  %v1653_v49 = vsel %vm1534_vm0, %v1623_v15, 0.0  ;;  %v1656_v54 = vsel %vm1534_vm0, %v1624_v40, 0.0  ;;  %v177_v11 = vld [vmem:[%s23891_s1 + $0x88] sm:$0xff]  ;;  %15095 = vmatprep.subr.mxu0 %v18468_v17 }
 0x1fd   : > { %v1570_v28 = vpop.xlane.xlu1 %1569  ;;  %1654 = vadd.xlane.f32.xlu1 %v1653_v49  ;;  %1657 = vadd.xlane.f32.xlu0 %v1656_v54  ;;  %v1573_v1 = vpop.xlane.xlu0 %1572  ;;  %v18480_v15 = vand.u32 4294901760, %v18466_v45  ;;  %v18483_v40 = vsub.f32 %v178_v43, %v18468_v17  ;;  %v18485_v49 = vand.u32 4294901760, %v177_v11 }
 0x1fe   : > { %v1595_v8 = vmul.f32 0.03125, %v1570_v28  ;;  %v1596_v3 = vmul.f32 0.03125, %v1573_v1  ;;  %v1625_v13 = vmul.f32 %v18421_v41, %v18421_v41  ;;  %v1626_v59 = vmul.f32 %v18424_v18, %v18424_v18  ;;  %15096 = vmatpush3.msra.mxu0 %v18468_v17 }
 0x1ff   : > { %v2089_v28 = vsub.f32 %v18466_v45, %v18480_v15  ;;  %v18494_v1 = vand.u32 4294901760, %v18483_v40  ;;  %15097 = vmatprep.subr.mxu0 %v18485_v49 }
 0x200   : > { %v18433_v20 = vsub.f32 %v18341_v39, %v1595_v8  ;;  %v18436_v50 = vsub.f32 %v18349_v55, %v1596_v3  ;;  %v1659_v51 = vsel %vm1534_vm0, %v1625_v13, 0.0  ;;  %v1662_v5 = vsel %vm1534_vm0, %v1626_v59, 0.0  ;;  %v176_v13 = vld [vmem:[%s23891_s1 + $0x80] sm:$0xff]  ;;  %15098 = vmatpush3.msra.mxu0 %v18485_v49 }
 0x201   : > { %v1576_v34 = vpop.xlane.xlu1 %1575  ;;  %1660 = vadd.xlane.f32.xlu1 %v1659_v51  ;;  %1663 = vadd.xlane.f32.xlu0 %v1662_v5  ;;  %v1579_v12 = vpop.xlane.xlu0 %1578  ;;  %v18497_v8 = vsub.f32 %v177_v11, %v18485_v49  ;;  %v2090_v59 = vand.u32 4294901760, %v2089_v28  ;;  %v2096_v51 = vsub.f32 %v18483_v40, %v18494_v1 }
 0x202   : > { %v1597_v23 = vmul.f32 0.03125, %v1576_v34  ;;  %v1598_v42 = vmul.f32 0.03125, %v1579_v12  ;;  %v1627_v29 = vmul.f32 %v18433_v20, %v18433_v20  ;;  %v1628_v36 = vmul.f32 %v18436_v50, %v18436_v50 }
 0x203   : > { %v18508_v5 = vand.u32 4294901760, %v18497_v8  ;;  %v18510_v34 = vand.u32 4294901760, %v176_v13  ;;  %15125 = vmatprep.subr.mxu1 %v2090_v59  ;;  %v2097_v12 = vand.u32 4294901760, %v2096_v51 }
 0x204   : > { %v18445_v0 = vsub.f32 %v18352_v57, %v1597_v23  ;;  %v18448_v63 = vsub.f32 %v18358_v62, %v1598_v42  ;;  %v1665_v32 = vsel %vm1534_vm0, %v1627_v29, 0.0  ;;  %v1668_v33 = vsel %vm1534_vm0, %v1628_v36, 0.0  ;;  %15126 = vmatpush3.msra.mxu1 %v2090_v59 }
 0x205   : > { %v1582_v14 = vpop.xlane.xlu1 %1581  ;;  %1666 = vadd.xlane.f32.xlu1 %v1665_v32  ;;  %1669 = vadd.xlane.f32.xlu0 %v1668_v33  ;;  %v2103_v23 = vsub.f32 %v18497_v8, %v18508_v5  ;;  %v18515_v42 = vsub.f32 %v176_v13, %v18510_v34 }
 0x206   : > { %v1599_v38 = vmul.f32 0.03125, %v1582_v14  ;;  %v1629_v35 = vmul.f32 %v18445_v0, %v18445_v0  ;;  %v1630_v10 = vmul.f32 %v18448_v63, %v18448_v63  ;;  %15099 = vmatprep.subr.mxu0 %v18510_v34  ;;  %15127 = vmatprep.subr.mxu1 %v2097_v12 }
 0x207   : > { %15100 = vmatpush3.msra.mxu0 %v18510_v34  ;;  %v2104_v29 = vand.u32 4294901760, %v2103_v23  ;;  %v18520_v36 = vand.u32 4294901760, %v18515_v42  ;;  %15128 = vmatpush3.msra.mxu1 %v2097_v12 }
 0x208   : > { %v18471_v37 = vsub.f32 %v18360_v31, %v1599_v38  ;;  %v1671_v9 = vsel %vm1534_vm0, %v1629_v35, 0.0  ;;  %v1674_v48 = vsel %vm1534_vm0, %v1630_v10, 0.0  ;;  %15157 = vmatprep.subr.mxu0 %v18466_v45 }
 0x209   : > { %1672 = vadd.xlane.f32.xlu1 %v1671_v9  ;;  %1675 = vadd.xlane.f32.xlu0 %v1674_v48  ;;  %v2110_v32 = vsub.f32 %v18515_v42, %v18520_v36 }
 0x20a   : > { %v1631_v54 = vmul.f32 %v18471_v37, %v18471_v37  ;;  %15129 = vmatprep.subr.mxu1 %v2104_v29 }
 0x20b   : > { %15130 = vmatpush3.msra.mxu1 %v2104_v29  ;;  %v2111_v33 = vand.u32 4294901760, %v2110_v32 }
 0x20c   : > { %v1677_v3 = vsel %vm1534_vm0, %v1631_v54, 0.0 }
 0x20d   : > { %1678 = vadd.xlane.f32.xlu1 %v1677_v3  ;;  %15131 = vmatprep.subr.mxu1 %v2111_v33 }
 0x20e   : > { %15132 = vmatpush3.msra.mxu1 %v2111_v33 }
 0x20f   : > { %15189 = vmatprep.subr.mxu1 %v18455_v61 }
 0x276   : > { %v1634_v2 = vpop.xlane.xlu0 %1633 }
 0x277   : > { %v1680_v14 = vmul.f32 0.03125, %v1634_v2 }
 0x279   : > { %v1696_v38 = vadd.f32 1e-05, %v1680_v14 }
 0x27a   : > { %v1637_v35 = vpop.xlane.xlu1 %1636  ;;  %v1640_v10 = vpop.xlane.xlu0 %1639 }
 0x27b   : > { %17251 = vrsqrt.f32 %v1696_v38  ;;  %v1681_v43 = vmul.f32 0.03125, %v1637_v35  ;;  %v1682_v9 = vmul.f32 0.03125, %v1640_v10 }
 0x27d   : > { %v1697_v48 = vadd.f32 1e-05, %v1681_v43  ;;  %v1698_v11 = vadd.f32 1e-05, %v1682_v9  ;;  %v18529_v9 = vld [vmem:[%s23891_s1 + $0x288] ss:$0 sm:$0xff] }
 0x27e   : > { %v1643_v54 = vpop.xlane.xlu1 %1642  ;;  %v1646_v28 = vpop.xlane.xlu0 %1645 }
 0x27f   : > { %17253 = vrsqrt.f32 %v1697_v48  ;;  %v1683_v3 = vmul.f32 0.03125, %v1643_v54  ;;  %v1684_v13 = vmul.f32 0.03125, %v1646_v28  ;;  %v18535_v28 = vld [vmem:[%s23891_s1 + $0x290] ss:$0 sm:$0xff] }
 0x280   : > { %17255 = vrsqrt.f32 %v1698_v11 }
 0x281   : > { %v1699_v59 = vadd.f32 1e-05, %v1683_v3  ;;  %v1700_v51 = vadd.f32 1e-05, %v1684_v13 }
 0x282   : > { %v1649_v12 = vpop.xlane.xlu1 %1648  ;;  %v1652_v23 = vpop.xlane.xlu0 %1651 }
 0x283   : > { %17257 = vrsqrt.f32 %v1699_v59  ;;  %v1685_v29 = vmul.f32 0.03125, %v1649_v12  ;;  %v1686_v32 = vmul.f32 0.03125, %v1652_v23 }
 0x284   : > { %17259 = vrsqrt.f32 %v1700_v51 }
 0x285   : > { %v1701_v33 = vadd.f32 1e-05, %v1685_v29  ;;  %v1702_v2 = vadd.f32 1e-05, %v1686_v32 }
 0x286   : > { %v1655_v14 = vpop.xlane.xlu1 %1654  ;;  %v1658_v38 = vpop.xlane.xlu0 %1657 }
 0x287   : > { %17261 = vrsqrt.f32 %v1701_v33  ;;  %v1687_v35 = vmul.f32 0.03125, %v1655_v14  ;;  %v1688_v10 = vmul.f32 0.03125, %v1658_v38 }
 0x288   : > { %v17252_v43 = vpop.eup %17251  ;;  %17263 = vrsqrt.f32 %v1702_v2 }
 0x289   : > { %v1728_v48 = vmul.f32 %v17252_v43, %v18369_v22  ;;  %v1703_v11 = vadd.f32 1e-05, %v1687_v35  ;;  %v1704_v54 = vadd.f32 1e-05, %v1688_v10 }
 0x28a   : > { %v1661_v3 = vpop.xlane.xlu1 %1660  ;;  %v1664_v13 = vpop.xlane.xlu0 %1663 }
 0x28b   : > { %v1748_v59 = vmul.f32 %v18529_v9, %v1728_v48  ;;  %17265 = vrsqrt.f32 %v1703_v11  ;;  %v1689_v51 = vmul.f32 0.03125, %v1661_v3  ;;  %v1690_v12 = vmul.f32 0.03125, %v1664_v13 }
 0x28c   : > { %v17254_v23 = vpop.eup %17253  ;;  %17267 = vrsqrt.f32 %v1704_v54 }
 0x28d   : > { %v17256_v29 = vpop.eup %17255  ;;  %v1768_v32 = vadd.f32 %v18535_v28, %v1748_v59  ;;  %v1729_v22 = vmul.f32 %v17254_v23, %v18377_v6  ;;  %v1705_v33 = vadd.f32 1e-05, %v1689_v51  ;;  %v1706_v2 = vadd.f32 1e-05, %v1690_v12 }
 0x28e   : > { %v1730_v14 = vmul.f32 %v17256_v29, %v18374_v44  ;;  %v1667_v38 = vpop.xlane.xlu1 %1666  ;;  %v1670_v35 = vpop.xlane.xlu0 %1669 }
 0x28f   : > { %v1785_v10 = vsel %vm1534_vm0, %v1768_v32, 0  ;;  %v1749_v43 = vmul.f32 %v18529_v9, %v1729_v22  ;;  %17269 = vrsqrt.f32 %v1705_v33  ;;  %v1691_v48 = vmul.f32 0.03125, %v1667_v38 }
 0x290   : > { %v17258_v11 = vpop.eup %17257  ;;  %v18543_v3 = vand.u32 4294901760, %v1785_v10  ;;  %v1750_v54 = vmul.f32 %v18529_v9, %v1730_v14  ;;  %17271 = vrsqrt.f32 %v1706_v2  ;;  %v1692_v13 = vmul.f32 0.03125, %v1670_v35 }
 0x291   : > { %v17260_v6 = vpop.eup %17259  ;;  %v1769_v59 = vadd.f32 %v18535_v28, %v1749_v43  ;;  %v1731_v44 = vmul.f32 %v17258_v11, %v18385_v25  ;;  %v1707_v51 = vadd.f32 1e-05, %v1691_v48 }
 0x292   : > { %v1770_v12 = vadd.f32 %v18535_v28, %v1750_v54  ;;  %v1732_v23 = vmul.f32 %v17260_v6, %v18388_v21  ;;  %v1708_v29 = vadd.f32 1e-05, %v1692_v13  ;;  %v1673_v32 = vpop.xlane.xlu1 %1672  ;;  %15133 = vmatprep.mubr.f32.mxu1 %v18543_v3  ;;  %v18552_v22 = vsub.f32 %v1785_v10, %v18543_v3  ;;  %v1676_v38 = vpop.xlane.xlu0 %1675 }
 0x293   : > { %v1788_v33 = vsel %vm1534_vm0, %v1769_v59, 0  ;;  %v1751_v2 = vmul.f32 %v18529_v9, %v1731_v44  ;;  %17273 = vrsqrt.f32 %v1707_v51  ;;  %v1693_v14 = vmul.f32 0.03125, %v1673_v32 }
 0x294   : > { %24375 = vst [vmem:[#allocation13_spill] sm:$0xff] %v18552_v22  ;;  %v17262_v25 = vpop.eup %17261  ;;  %v18556_v35 = vand.u32 4294901760, %v1788_v33  ;;  %v1791_v43 = vsel %vm1534_vm0, %v1770_v12, 0  ;;  %v1752_v21 = vmul.f32 %v18529_v9, %v1732_v23  ;;  %17275 = vrsqrt.f32 %v1708_v29 }
 0x295   : > { %v17264_v48 = vpop.eup %17263  ;;  %v18560_v11 = vand.u32 4294901760, %v1791_v43  ;;  %v1771_v10 = vadd.f32 %v18535_v28, %v1751_v2  ;;  %v1733_v54 = vmul.f32 %v17262_v25, %v18397_v4  ;;  %v1709_v13 = vadd.f32 1e-05, %v1693_v14 }
 0x296   : > { %v18565_v6 = vsub.f32 %v1788_v33, %v18556_v35  ;;  %v1772_v59 = vadd.f32 %v18535_v28, %v1752_v21  ;;  %v1734_v44 = vmul.f32 %v17264_v48, %v18400_v52  ;;  %v1694_v51 = vmul.f32 0.03125, %v1676_v38  ;;  %v1679_v12 = vpop.xlane.xlu1 %1678  ;;  %15134 = vmatmul.mubr.f32.vlgmr.msra.gmra.mxu1 %v18556_v35 }
 0x297   : > { %v1794_v23 = vsel %vm1534_vm0, %v1771_v10, 0  ;;  %v1753_v29 = vmul.f32 %v18529_v9, %v1733_v54  ;;  %17277 = vrsqrt.f32 %v1709_v13  ;;  %v1695_v32 = vmul.f32 0.03125, %v1679_v12  ;;  %15136 = vmatprep.mubr.f32.mxu1 %v18560_v11  ;;  %15190 = vmatpush3.msra.mxu1 %v18455_v61 }
 0x298   : > { %24376 = vst [vmem:[#allocation3_spill] sm:$0xff] %v18565_v6  ;;  %v17266_v4 = vpop.eup %17265  ;;  %v18574_v33 = vand.u32 4294901760, %v1794_v23  ;;  %v18577_v2 = vsel %vm1534_vm0, %v1772_v59, 0  ;;  %v1754_v52 = vmul.f32 %v18529_v9, %v1734_v44  ;;  %v1710_v14 = vadd.f32 1e-05, %v1694_v51  ;;  %15191 = vmatprep.subr.mxu1 %v18468_v17 }
 0x299   : > { %v17268_v38 = vpop.eup %17267  ;;  %v18582_v25 = vand.u32 4294901760, %v18577_v2  ;;  %v1773_v21 = vadd.f32 %v18535_v28, %v1753_v29  ;;  %v1735_v48 = vmul.f32 %v17266_v4, %v18409_v24  ;;  %v1711_v10 = vadd.f32 1e-05, %v1695_v32  ;;  %15192 = vmatpush3.msra.mxu1 %v18468_v17 }
 0x29a   : > { %v1774_v54 = vadd.f32 %v18535_v28, %v1754_v52  ;;  %v1736_v13 = vmul.f32 %v17268_v38, %v18412_v30  ;;  %17279 = vrsqrt.f32 %v1710_v14  ;;  %v18590_v59 = vand.u32 4294901760, %v18552_v22  ;;  %15137 = vmatmul.mubr.f32.gmra.mxu1 %v18574_v33  ;;  %15193 = vmatprep.subr.mxu1 %v18485_v49 }
 0x29b   : > { %24377 = vst [vmem:[#allocation9_spill] sm:$0xff] %v18582_v25  ;;  %v18595_v44 = vsel %vm1534_vm0, %v1773_v21, 0  ;;  %v1755_v24 = vmul.f32 %v18529_v9, %v1735_v48  ;;  %17281 = vrsqrt.f32 %v1711_v10  ;;  %15139 = vmatprep.mubr.f32.mxu1 %v18582_v25  ;;  %v18600_v51 = vand.u32 4294901760, %v18565_v6  ;;  %15194 = vmatpush3.msra.mxu1 %v18485_v49 }
 0x29c   : > { %24378 = vst [vmem:[#allocation11_spill] sm:$0xff] %v18590_v59  ;;  %v17270_v30 = vpop.eup %17269  ;;  %v18604_v12 = vand.u32 4294901760, %v18595_v44  ;;  %v1803_v29 = vsel %vm1534_vm0, %v1774_v54, 0  ;;  %v1756_v32 = vmul.f32 %v18529_v9, %v1736_v13  ;;  %v1904_v4 = vsub.f32 %v18552_v22, %v18590_v59  ;;  %15195 = vmatprep.subr.mxu1 %v18510_v34 }
 0x29d   : > { %v17272_v52 = vpop.eup %17271  ;;  %v18611_v14 = vand.u32 4294901760, %v1803_v29  ;;  %v1775_v38 = vadd.f32 %v18535_v28, %v1755_v24  ;;  %v1737_v21 = vmul.f32 %v17270_v30, %v18421_v41  ;;  %v1914_v48 = vsub.f32 %v18565_v6, %v18600_v51  ;;  %15196 = vmatpush3.msra.mxu1 %v18510_v34 }
 0x29e   : > { %24379 = vst [vmem:[#allocation7_spill] sm:$0xff] %v18604_v12  ;;  %v1776_v10 = vadd.f32 %v18535_v28, %v1756_v32  ;;  %v1738_v54 = vmul.f32 %v17272_v52, %v18424_v18  ;;  %v18620_v13 = vand.u32 4294901760, %v1904_v4  ;;  %15140 = vmatmul.mubr.f32.gmra.mxu1 %v18604_v12  ;;  %v18624_v62 = vsub.f32 %v1791_v43, %v18560_v11 }
 0x29f   : > { %24380 = vst [vmem:[#allocation15_spill] sm:$0xff] %v18611_v14  ;;  %15253 = vmatprep.subr.mxu1 %v18455_v61  ;;  %v1806_v41 = vsel %vm1534_vm0, %v1775_v38, 0  ;;  %v1757_v24 = vmul.f32 %v18529_v9, %v1737_v21  ;;  %v18629_v30 = vand.u32 4294901760, %v1914_v48  ;;  %15142 = vmatprep.mubr.f32.mxu1 %v18611_v14  ;;  %v18633_v32 = vsub.f32 %v1794_v23, %v18574_v33 }
 0x2a0   : > { %24381 = vst [vmem:[#allocation24_spill] sm:$0xff] %v18620_v13  ;;  %v17274_v18 = vpop.eup %17273  ;;  %v18635_v4 = vand.u32 4294901760, %v1806_v41  ;;  %v1809_v52 = vsel %vm1534_vm0, %v1776_v10, 0  ;;  %v1758_v43 = vmul.f32 %v18529_v9, %v1738_v54  ;;  %15101 = vmatprep.mubr.f32.mxu0 %v18620_v13  ;;  %v18641_v38 = vand.u32 4294901760, %v18624_v62 }
 0x2a1   : > { %24382 = vst [vmem:[#allocation25_spill] sm:$0xff] %v18629_v30  ;;  %24383 = vst [vmem:[#allocation26_spill] sm:$0xff] %v18633_v32  ;;  %v17276_v21 = vpop.eup %17275  ;;  %v18643_v48 = vand.u32 4294901760, %v1809_v52  ;;  %v1777_v31 = vadd.f32 %v18535_v28, %v1757_v24  ;;  %v1739_v23 = vmul.f32 %v17274_v18, %v18433_v20  ;;  %15102 = vmatmul.mubr.f32.vlgmr.msra.gmra.mxu0 %v18629_v30  ;;  %v18649_v55 = vand.u32 4294901760, %v18633_v32 }
 0x2a2   : > { %24384 = vst [vmem:[#allocation27_spill] sm:$0xff] %v18635_v4  ;;  %24385 = vst [vmem:[#allocation28_spill] sm:$0xff] %v18641_v38  ;;  %v1778_v10 = vadd.f32 %v18535_v28, %v1758_v43  ;;  %v1740_v54 = vmul.f32 %v17276_v21, %v18436_v50  ;;  %v1924_v57 = vsub.f32 %v18624_v62, %v18641_v38  ;;  %15158 = vmatpush3.msra.mxu0 %v18466_v45 }
 0x2a3   : > { %24386 = vst [vmem:[#allocation29_spill] sm:$0xff] %v18643_v48  ;;  %15143 = vmatmul.mubr.f32.gmra.mxu1 %v18635_v4  ;;  %v1812_v24 = vsel %vm1534_vm0, %v1777_v31, 0  ;;  %v1759_v20 = vmul.f32 %v18529_v9, %v1739_v23  ;;  %v1934_v18 = vsub.f32 %v18633_v32, %v18649_v55  ;;  %v18663_v53 = vsub.f32 %v18577_v2, %v18582_v25 }
 0x2a4   : > { %15145 = vmatprep.mubr.f32.mxu1 %v18643_v48  ;;  %15159 = vmatprep.subr.mxu0 %v18483_v40  ;;  %v17278_v50 = vpop.eup %17277  ;;  %v18667_v43 = vand.u32 4294901760, %v1812_v24  ;;  %v1815_v45 = vsel %vm1534_vm0, %v1778_v10, 0  ;;  %v1760_v31 = vmul.f32 %v18529_v9, %v1740_v54  ;;  %v18671_v21 = vand.u32 4294901760, %v1924_v57 }
 0x2a5   : > { %24387 = vst [vmem:[#allocation30_spill] sm:$0xff] %v18663_v53  ;;  %15160 = vmatpush3.msra.mxu0 %v18483_v40  ;;  %v18674_v23 = vand.u32 4294901760, %v1815_v45  ;;  %v1779_v2 = vadd.f32 %v18535_v28, %v1759_v20  ;;  %v1741_v39 = vmul.f32 %v17278_v50, %v18445_v0  ;;  %v18678_v7 = vand.u32 4294901760, %v1934_v18 }
 0x2a6   : > { %24388 = vst [vmem:[#allocation31_spill] sm:$0xff] %v18671_v21  ;;  %15161 = vmatprep.subr.mxu0 %v18497_v8  ;;  %v1780_v46 = vadd.f32 %v18535_v28, %v1760_v31  ;;  %15104 = vmatprep.mubr.f32.mxu0 %v18671_v21  ;;  %v18684_v10 = vand.u32 4294901760, %v18663_v53  ;;  %v18688_v57 = vsub.f32 %v18595_v44, %v18604_v12 }
 0x2a7   : > { %24389 = vst [vmem:[#allocation32_spill] sm:$0xff] %v18678_v7  ;;  %15146 = vmatmul.mubr.f32.gmra.mxu1 %v18667_v43  ;;  %v18692_v40 = vsub.f32 %v1803_v29, %v18611_v14  ;;  %v17280_v0 = vpop.eup %17279  ;;  %v1818_v54 = vsel %vm1534_vm0, %v1779_v2, 0  ;;  %v1761_v20 = vmul.f32 %v18529_v9, %v1741_v39  ;;  %15105 = vmatmul.mubr.f32.gmra.mxu0 %v18678_v7 }
 0x2a8   : > { %15148 = vmatprep.mubr.f32.mxu1 %v18674_v23  ;;  %v18699_v18 = vsub.f32 %v1806_v41, %v18635_v4  ;;  %v18702_v44 = vsub.f32 %v1809_v52, %v18643_v48  ;;  %v17282_v50 = vpop.eup %17281  ;;  %v18704_v31 = vand.u32 4294901760, %v1818_v54  ;;  %v1821_v29 = vsel %vm1534_vm0, %v1780_v46, 0  ;;  %15162 = vmatpush3.msra.mxu0 %v18497_v8 }
 0x2a9   : > { %24390 = vst [vmem:[#allocation33_spill] sm:$0xff] %v18692_v40  ;;  %v1742_v26 = vmul.f32 %v17280_v0, %v18448_v63  ;;  %v1944_v39 = vsub.f32 %v18663_v53, %v18684_v10  ;;  %v18711_v2 = vand.u32 4294901760, %v1821_v29  ;;  %v1781_v41 = vadd.f32 %v18535_v28, %v1761_v20  ;;  %15163 = vmatprep.subr.mxu0 %v18515_v42 }
 0x2aa   : > { %24391 = vst [vmem:[#allocation34_spill] sm:$0xff] %v18699_v18  ;;  %24392 = vst [vmem:[#allocation35_spill] sm:$0xff] %v18704_v31  ;;  %v1743_v47 = vmul.f32 %v17282_v50, %v18471_v37  ;;  %v18716_v52 = vand.u32 4294901760, %v18688_v57  ;;  %v18723_v63 = vand.u32 4294901760, %v18692_v40  ;;  %v18726_v8 = vand.u32 4294901760, %v18699_v18  ;;  %15164 = vmatpush3.msra.mxu0 %v18515_v42 }
 0x2ab   : > { %24393 = vst [vmem:[#allocation36_spill] sm:$0xff] %v18711_v2  ;;  %v1762_v46 = vmul.f32 %v18529_v9, %v1742_v26  ;;  %v18720_v56 = vand.u32 4294901760, %v1944_v39  ;;  %15149 = vmatmul.mubr.f32.gmra.mxu1 %v18704_v31  ;;  %v1824_v37 = vsel %vm1534_vm0, %v1781_v41, 0  ;;  %v18735_v26 = vand.u32 4294901760, %v18702_v44  ;;  %15221 = vmatprep.subr.mxu0 %v18480_v15 }
 0x2ac   : > { %v1763_v0 = vmul.f32 %v18529_v9, %v1743_v47  ;;  %v1954_v20 = vsub.f32 %v18688_v57, %v18716_v52  ;;  %15151 = vmatprep.mubr.f32.mxu1 %v18711_v2  ;;  %v18739_v50 = vand.u32 4294901760, %v1824_v37  ;;  %v1964_v42 = vsub.f32 %v18692_v40, %v18723_v63 }
 0x2ad   : > { %24394 = vst [vmem:[#allocation37_spill] sm:$0xff] %v18720_v56  ;;  %v1782_v39 = vadd.f32 %v18535_v28, %v1762_v46  ;;  %15107 = vmatprep.mubr.f32.mxu0 %v18720_v56  ;;  %v1974_v47 = vsub.f32 %v18699_v18, %v18726_v8  ;;  %v1984_v60 = vsub.f32 %v18702_v44, %v18735_v26 }
 0x2ae   : > { %24395 = vst [vmem:[#allocation38_spill] sm:$0xff] %v18739_v50  ;;  %v1783_v9 = vadd.f32 %v18535_v28, %v1763_v0  ;;  %v18748_v41 = vand.u32 4294901760, %v1954_v20  ;;  %v18753_v58 = vsub.f32 %v1812_v24, %v18667_v43  ;;  %v18756_v19 = vand.u32 4294901760, %v1964_v42  ;;  %v183_v28 = vld [vmem:[%s23891_s1 + $0xb8] sm:$0xff] }
 0x2af   : > { %v1827_v46 = vsel %vm1534_vm0, %v1782_v39, 0  ;;  %v18758_v16 = vand.u32 4294901760, %v1974_v47  ;;  %15152 = vmatmul.mubr.f32.gmra.mxu1 %v18739_v50  ;;  %v18762_v27 = vsub.f32 %v1815_v45, %v18674_v23  ;;  %v18771_v20 = vand.u32 4294901760, %v1984_v60 }
 0x2b0   : > { %24396 = vst [vmem:[#allocation39_spill] sm:$0xff] %v18748_v41  ;;  %24397 = vst [vmem:[#allocation40_spill] sm:$0xff] %v18753_v58  ;;  %v18767_v0 = vand.u32 4294901760, %v1827_v46  ;;  %v1830_v24 = vsel %vm1534_vm0, %v1783_v9, 0  ;;  %15108 = vmatmul.mubr.f32.gmra.mxu0 %v18748_v41  ;;  %v18774_v39 = vand.u32 4294901760, %v18753_v58  ;;  %v18783_v47 = vsub.f32 %v1818_v54, %v18704_v31 }
 0x2b1   : > { %24398 = vst [vmem:[#allocation41_spill] sm:$0xff] %v18756_v19  ;;  %24399 = vst [vmem:[#allocation42_spill] sm:$0xff] %v18758_v16  ;;  %v18776_v42 = vand.u32 4294901760, %v1830_v24  ;;  %15110 = vmatprep.mubr.f32.mxu0 %v18756_v19  ;;  %v18780_v45 = vand.u32 4294901760, %v18762_v27  ;;  %v18786_v56 = vsub.f32 %v1821_v29, %v18711_v2  ;;  %v18792_v9 = vsub.f32 %v1824_v37, %v18739_v50 }
 0x2b2   : > { %24400 = vst [vmem:[#allocation43_spill] sm:$0xff] %v18771_v20  ;;  %v1994_v60 = vsub.f32 %v18753_v58, %v18774_v39  ;;  %15154 = vmatprep.mubr.f32.mxu1 %v18767_v0  ;;  %v18795_v41 = vsub.f32 %v1827_v46, %v18767_v0  ;;  %v18797_v19 = vand.u32 4294901760, %v183_v28  ;;  %v18802_v7 = vand.u32 4294901760, %v18783_v47 }
 0x2b3   : > { %24401 = vst [vmem:[#allocation44_spill] sm:$0xff] %v18776_v42  ;;  %24402 = vst [vmem:[#allocation45_spill] sm:$0xff] %v18786_v56  ;;  %v2004_v54 = vsub.f32 %v18762_v27, %v18780_v45  ;;  %15155 = vmatmul.mubr.f32.gmra.mxu1 %v18776_v42  ;;  %v18806_v29 = vand.u32 4294901760, %v18786_v56  ;;  %v18813_v46 = vand.u32 4294901760, %v18792_v9  ;;  %v18816_v21 = vsub.f32 %v1830_v24, %v18776_v42 }
 0x2b4   : > { %24403 = vst [vmem:[#allocation46_spill] sm:$0xff] %v18792_v9  ;;  %24404 = vst [vmem:[#allocation47_spill] sm:$0xff] %v18795_v41  ;;  %15111 = vmatmul.mubr.f32.gmra.mxu0 %v18758_v16  ;;  %v18809_v37 = vand.u32 4294901760, %v1994_v60  ;;  %15197 = vmatprep.mubr.f32.mxu1 %v18590_v59  ;;  %v2014_v13 = vsub.f32 %v18783_v47, %v18802_v7  ;;  %v18826_v60 = vand.u32 4294901760, %v18795_v41 }
 0x2b5   : > { %24405 = vst [vmem:[#allocation48_spill] sm:$0xff] %v18802_v7  ;;  %24406 = vst [vmem:[#allocation49_spill] sm:$0xff] %v18806_v29  ;;  %15113 = vmatprep.mubr.f32.mxu0 %v18771_v20  ;;  %v18819_v30 = vand.u32 4294901760, %v2004_v54  ;;  %v2024_v16 = vsub.f32 %v18786_v56, %v18806_v29  ;;  %v18829_v59 = vsub.f32 %v183_v28, %v18797_v19  ;;  %v18839_v20 = vand.u32 4294901760, %v18816_v21 }
 0x2b6   : > { %24407 = vst [vmem:[#allocation50_spill] sm:$0xff] %v18813_v46  ;;  %24408 = vst [vmem:[#allocation51_spill] sm:$0xff] %v18816_v21  ;;  %v18833_v24 = vand.u32 4294901760, %v2014_v13  ;;  %v2034_v54 = vsub.f32 %v18792_v9, %v18813_v46  ;;  %v2044_v28 = vsub.f32 %v18795_v41, %v18826_v60 }
 0x2b7   : > { %24409 = vst [vmem:[#allocation52_spill] sm:$0xff] %v18819_v30  ;;  %24410 = vst [vmem:[#allocation53_spill] sm:$0xff] %v18826_v60  ;;  %15198 = vmatmul.mubr.f32.vlgmr.msra.gmra.mxu1 %v18600_v51  ;;  %v18842_v42 = vand.u32 4294901760, %v2024_v16  ;;  %v18849_v13 = vand.u32 4294901760, %v18829_v59  ;;  %v2054_v16 = vsub.f32 %v18816_v21, %v18839_v20 }
 0x2b8   : > { %15114 = vmatmul.mubr.f32.gmra.mxu0 %v18809_v37  ;;  %15200 = vmatprep.mubr.f32.mxu1 %v18641_v38  ;;  %v18853_v38 = vand.u32 4294901760, %v2034_v54 }
 0x2b9   : > { %15116 = vmatprep.mubr.f32.mxu0 %v18819_v30  ;;  %15254 = vmatpush3.msra.mxu1 %v18455_v61  ;;  %v18859_v30 = vand.u32 4294901760, %v2044_v28  ;;  %v3219_v61 = vsub.f32 %v18829_v59, %v18849_v13  ;;  %v18867_v54 = vand.u32 4294901760, %v2054_v16  ;;  %v182_v28 = vld [vmem:[%s23891_s1 + $0xb0] sm:$0xff] }
 0x2ba   : > { %15255 = vmatprep.subr.mxu1 %v18468_v17  ;;  %v18881_v16 = vand.u32 4294901760, %v182_v28 }
 0x2bb   : > { %15201 = vmatmul.mubr.f32.gmra.mxu1 %v18649_v55  ;;  %24411 = vst [vmem:[#allocation54_spill] sm:$0xff] %v18859_v30 }
 0x2bc   : > { %15117 = vmatmul.mubr.f32.gmra.mxu0 %v18833_v24  ;;  %15203 = vmatprep.mubr.f32.mxu1 %v18684_v10 }
 0x2bd   : > { %15119 = vmatprep.mubr.f32.mxu0 %v18842_v42  ;;  %15256 = vmatpush3.msra.mxu1 %v18468_v17  ;;  %v3220_v17 = vand.u32 4294901760, %v3219_v61 }
 0x2be   : > { %15257 = vmatprep.subr.mxu1 %v18485_v49 }
 0x2bf   : > { %15204 = vmatmul.mubr.f32.gmra.mxu1 %v18716_v52 }
 0x2c0   : > { %15120 = vmatmul.mubr.f32.gmra.mxu0 %v18853_v38  ;;  %15206 = vmatprep.mubr.f32.mxu1 %v18723_v63 }
 0x2c1   : > { %15122 = vmatprep.mubr.f32.mxu0 %v18859_v30  ;;  %15258 = vmatpush3.msra.mxu1 %v18485_v49  ;;  %v181_v49 = vld [vmem:[%s23891_s1 + $0xa8] sm:$0xff] }
 0x2c2   : > { %15259 = vmatprep.subr.mxu1 %v18510_v34  ;;  %v18895_v61 = vand.u32 4294901760, %v181_v49 }
 0x2c3   : > { %15207 = vmatmul.mubr.f32.gmra.mxu1 %v18726_v8 }
 0x2c4   : > { %15123 = vmatmul.mubr.f32.gmra.mxu0 %v18867_v54  ;;  %15209 = vmatprep.mubr.f32.mxu1 %v18735_v26 }
 0x2c5   : > { %15165 = vmatprep.mubr.f32.mxu0 %v18552_v22  ;;  %15260 = vmatpush3.msra.mxu1 %v18510_v34  ;;  %v18893_v34 = vsub.f32 %v182_v28, %v18881_v16 }
 0x2c6   : > { %15317 = vmatprep.subr.mxu1 %v3220_v17 }
 0x2c7   : > { %15210 = vmatmul.mubr.f32.gmra.mxu1 %v18774_v39 }
 0x2c8   : > { %15166 = vmatmul.mubr.f32.vlgmr.msra.gmra.mxu0 %v18565_v6  ;;  %15212 = vmatprep.mubr.f32.mxu1 %v18780_v45  ;;  %v180_v6 = vld [vmem:[%s23891_s1 + $0xa0] sm:$0xff] }
 0x2c9   : > { %15168 = vmatprep.mubr.f32.mxu0 %v18624_v62  ;;  %15222 = vmatpush3.msra.mxu0 %v18480_v15  ;;  %v18908_v15 = vand.u32 4294901760, %v18893_v34  ;;  %v18913_v28 = vand.u32 4294901760, %v180_v6 }
 0x2ca   : > { %15223 = vmatprep.subr.mxu0 %v18494_v1 }
 0x2cb   : > { %15224 = vmatpush3.msra.mxu0 %v18494_v1  ;;  %15213 = vmatmul.mubr.f32.gmra.mxu1 %v18802_v7  ;;  %v18911_v1 = vsub.f32 %v181_v49, %v18895_v61 }
 0x2cc   : > { %15169 = vmatmul.mubr.f32.gmra.mxu0 %v18633_v32  ;;  %15215 = vmatprep.mubr.f32.mxu1 %v18806_v29 }
 0x2cd   : > { %15171 = vmatprep.mubr.f32.mxu0 %v18663_v53  ;;  %15225 = vmatprep.subr.mxu0 %v18508_v5  ;;  %v18925_v49 = vand.u32 4294901760, %v18911_v1 }
 0x2ce   : > { %15226 = vmatpush3.msra.mxu0 %v18508_v5  ;;  %v3226_v5 = vsub.f32 %v18893_v34, %v18908_v15 }
 0x2cf   : > { %15216 = vmatmul.mubr.f32.gmra.mxu1 %v18813_v46  ;;  %15227 = vmatprep.subr.mxu0 %v18520_v36  ;;  %v18928_v46 = vsub.f32 %v180_v6, %v18913_v28 }
 0x2d0   : > { %15172 = vmatmul.mubr.f32.gmra.mxu0 %v18688_v57  ;;  %15218 = vmatprep.mubr.f32.mxu1 %v18826_v60 }
 0x2d1   : > { %15174 = vmatprep.mubr.f32.mxu0 %v18692_v40  ;;  %15228 = vmatpush3.msra.mxu0 %v18520_v36  ;;  %v3227_v36 = vand.u32 4294901760, %v3226_v5  ;;  %v3233_v40 = vsub.f32 %v18911_v1, %v18925_v49  ;;  %v18937_v60 = vand.u32 4294901760, %v18928_v46 }
 0x2d2   : > { %15285 = vmatprep.subr.mxu0 %v18797_v19 }
 0x2d3   : > { %15219 = vmatmul.mubr.f32.gmra.mxu1 %v18839_v20  ;;  %v3234_v6 = vand.u32 4294901760, %v3233_v40  ;;  %v3240_v5 = vsub.f32 %v18928_v46, %v18937_v60  ;;  %v24413_v40 = vld [vmem:[#allocation24_spill] sm:$0xff] }
 0x2d4   : > { %15175 = vmatmul.mubr.f32.gmra.mxu0 %v18699_v18  ;;  %15261 = vmatprep.mubr.f32.mxu1 %v18543_v3 }
 0x2d5   : > { %15177 = vmatprep.mubr.f32.mxu0 %v18702_v44 }
 0x2d7   : > { %15262 = vmatmul.mubr.f32.vlgmr.msra.gmra.mxu1 %v18556_v35 }
 0x2d8   : > { %15178 = vmatmul.mubr.f32.gmra.mxu0 %v18753_v58  ;;  %15264 = vmatprep.mubr.f32.mxu1 %v18560_v11  ;;  %v3241_v58 = vand.u32 4294901760, %v3240_v5  ;;  %v24417_v5 = vld [vmem:[#allocation37_spill] sm:$0xff] }
 0x2d9   : > { %15180 = vmatprep.mubr.f32.mxu0 %v18762_v27  ;;  %15318 = vmatpush3.msra.mxu1 %v3220_v17  ;;  %v24414_v17 = vld [vmem:[#allocation25_spill] sm:$0xff] }
 0x2da   : > { %15319 = vmatprep.subr.mxu1 %v3227_v36 }
 0x2db   : > { %15265 = vmatmul.mubr.f32.gmra.mxu1 %v18574_v33 }
 0x2dc   : > { %15181 = vmatmul.mubr.f32.gmra.mxu0 %v18783_v47  ;;  %15267 = vmatprep.mubr.f32.mxu1 %v18582_v25 }
 0x2dd   : > { %15183 = vmatprep.mubr.f32.mxu0 %v18786_v56  ;;  %15320 = vmatpush3.msra.mxu1 %v3227_v36  ;;  %v24415_v36 = vld [vmem:[#allocation31_spill] sm:$0xff] }
 0x2de   : > { %15321 = vmatprep.subr.mxu1 %v3234_v6 }
 0x2df   : > { %15268 = vmatmul.mubr.f32.gmra.mxu1 %v18604_v12 }
 0x2e0   : > { %15184 = vmatmul.mubr.f32.gmra.mxu0 %v18792_v9  ;;  %15270 = vmatprep.mubr.f32.mxu1 %v18611_v14 }
 0x2e1   : > { %15186 = vmatprep.mubr.f32.mxu0 %v18795_v41  ;;  %15322 = vmatpush3.msra.mxu1 %v3234_v6  ;;  %v24416_v6 = vld [vmem:[#allocation32_spill] sm:$0xff] }
 0x2e2   : > { %15323 = vmatprep.subr.mxu1 %v3241_v58 }
 0x2e3   : > { %15271 = vmatmul.mubr.f32.gmra.mxu1 %v18635_v4 }
 0x2e4   : > { %15187 = vmatmul.mubr.f32.gmra.mxu0 %v18816_v21  ;;  %15273 = vmatprep.mubr.f32.mxu1 %v18643_v48 }
 0x2e5   : > { %15229 = vmatprep.mubr.f32.mxu0 %v18543_v3  ;;  %15324 = vmatpush3.msra.mxu1 %v3241_v58  ;;  %v24412_v58 = vld [vmem:[#allocation44_spill] sm:$0xff] }
 0x2e6   : > { %15381 = vmatprep.subr.mxu1 %v18797_v19 }
 0x2e7   : > { %15274 = vmatmul.mubr.f32.gmra.mxu1 %v18667_v43 }
 0x2e8   : > { %15230 = vmatmul.mubr.f32.vlgmr.msra.gmra.mxu0 %v18556_v35  ;;  %15276 = vmatprep.mubr.f32.mxu1 %v18674_v23 }
 0x2e9   : > { %15232 = vmatprep.mubr.f32.mxu0 %v18560_v11  ;;  %15286 = vmatpush3.msra.mxu0 %v18797_v19 }
 0x2ea   : > { %15287 = vmatprep.subr.mxu0 %v18881_v16 }
 0x2eb   : > { %15288 = vmatpush3.msra.mxu0 %v18881_v16  ;;  %15277 = vmatmul.mubr.f32.gmra.mxu1 %v18704_v31 }
 0x2ec   : > { %15233 = vmatmul.mubr.f32.gmra.mxu0 %v18574_v33  ;;  %15279 = vmatprep.mubr.f32.mxu1 %v18711_v2 }
 0x2ed   : > { %15235 = vmatprep.mubr.f32.mxu0 %v18582_v25  ;;  %15289 = vmatprep.subr.mxu0 %v18895_v61 }
 0x2ee   : > { %15290 = vmatpush3.msra.mxu0 %v18895_v61 }
 0x2ef   : > { %15280 = vmatmul.mubr.f32.gmra.mxu1 %v18739_v50  ;;  %15291 = vmatprep.subr.mxu0 %v18913_v28 }
 0x2f0   : > { %15236 = vmatmul.mubr.f32.gmra.mxu0 %v18604_v12  ;;  %15282 = vmatprep.mubr.f32.mxu1 %v18767_v0 }
 0x2f1   : > { %15238 = vmatprep.mubr.f32.mxu0 %v18611_v14  ;;  %15292 = vmatpush3.msra.mxu0 %v18913_v28 }
 0x2f2   : > { %15349 = vmatprep.subr.mxu0 %v18829_v59 }
 0x2f3   : > { %15283 = vmatmul.mubr.f32.gmra.mxu1 %v24412_v58 }
 0x2f4   : > { %15239 = vmatmul.mubr.f32.gmra.mxu0 %v18635_v4  ;;  %15325 = vmatprep.mubr.f32.mxu1 %v18543_v3 }
 0x2f5   : > { %15241 = vmatprep.mubr.f32.mxu0 %v18643_v48 }
 0x2f7   : > { %15326 = vmatmul.mubr.f32.vlgmr.msra.gmra.mxu1 %v18556_v35 }
 0x2f8   : > { %15242 = vmatmul.mubr.f32.gmra.mxu0 %v18667_v43  ;;  %15328 = vmatprep.mubr.f32.mxu1 %v18560_v11 }
 0x2f9   : > { %15244 = vmatprep.mubr.f32.mxu0 %v18674_v23  ;;  %15382 = vmatpush3.msra.mxu1 %v18797_v19 }
 0x2fa   : > { %15383 = vmatprep.subr.mxu1 %v18881_v16 }
 0x2fb   : > { %15329 = vmatmul.mubr.f32.gmra.mxu1 %v18574_v33 }
 0x2fc   : > { %15245 = vmatmul.mubr.f32.gmra.mxu0 %v18704_v31  ;;  %15331 = vmatprep.mubr.f32.mxu1 %v18582_v25 }
 0x2fd   : > { %15247 = vmatprep.mubr.f32.mxu0 %v18711_v2  ;;  %15384 = vmatpush3.msra.mxu1 %v18881_v16 }
 0x2fe   : > { %15385 = vmatprep.subr.mxu1 %v18895_v61 }
 0x2ff   : > { %15332 = vmatmul.mubr.f32.gmra.mxu1 %v18604_v12 }
 0x300   : > { %15248 = vmatmul.mubr.f32.gmra.mxu0 %v18739_v50  ;;  %15334 = vmatprep.mubr.f32.mxu1 %v18611_v14 }
 0x301   : > { %15250 = vmatprep.mubr.f32.mxu0 %v18767_v0  ;;  %15386 = vmatpush3.msra.mxu1 %v18895_v61 }
 0x302   : > { %15387 = vmatprep.subr.mxu1 %v18913_v28 }
 0x303   : > { %15335 = vmatmul.mubr.f32.gmra.mxu1 %v18635_v4 }
 0x304   : > { %15251 = vmatmul.mubr.f32.gmra.mxu0 %v24412_v58  ;;  %15337 = vmatprep.mubr.f32.mxu1 %v18643_v48 }
 0x305   : > { %15293 = vmatprep.mubr.f32.mxu0 %v24413_v40  ;;  %15388 = vmatpush3.msra.mxu1 %v18913_v28 }
 0x306   : > { %15445 = vmatprep.subr.mxu1 %v18797_v19 }
 0x307   : > { %15338 = vmatmul.mubr.f32.gmra.mxu1 %v18667_v43 }
 0x308   : > { %15294 = vmatmul.mubr.f32.vlgmr.msra.gmra.mxu0 %v24414_v17  ;;  %15340 = vmatprep.mubr.f32.mxu1 %v18674_v23  ;;  %v24422_v17 = vld [vmem:[#allocation43_spill] sm:$0xff] }
 0x309   : > { %15296 = vmatprep.mubr.f32.mxu0 %v24415_v36  ;;  %15350 = vmatpush3.msra.mxu0 %v18829_v59  ;;  %v187_v59 = vld [vmem:[%s23891_s1 + $0xd8] sm:$0xff]  ;;  %v24421_v36 = vld [vmem:[#allocation11_spill] sm:$0xff] }
 0x30a   : > { %15351 = vmatprep.subr.mxu0 %v18893_v34 }
 0x30b   : > { %15352 = vmatpush3.msra.mxu0 %v18893_v34  ;;  %15341 = vmatmul.mubr.f32.gmra.mxu1 %v18704_v31  ;;  %v24418_v34 = vld [vmem:[#allocation39_spill] sm:$0xff] }
 0x30c   : > { %15297 = vmatmul.mubr.f32.gmra.mxu0 %v24416_v6  ;;  %15343 = vmatprep.mubr.f32.mxu1 %v18711_v2  ;;  %v24419_v6 = vld [vmem:[#allocation41_spill] sm:$0xff] }
 0x30d   : > { %15299 = vmatprep.mubr.f32.mxu0 %v24417_v5  ;;  %15353 = vmatprep.subr.mxu0 %v18911_v1  ;;  %v19029_v5 = vand.u32 4294901760, %v187_v59 }
 0x30e   : > { %15354 = vmatpush3.msra.mxu0 %v18911_v1  ;;  %v24420_v1 = vld [vmem:[#allocation42_spill] sm:$0xff] }
 0x30f   : > { %15344 = vmatmul.mubr.f32.gmra.mxu1 %v18739_v50  ;;  %15355 = vmatprep.subr.mxu0 %v18928_v46 }
 0x310   : > { %15300 = vmatmul.mubr.f32.gmra.mxu0 %v24418_v34  ;;  %15346 = vmatprep.mubr.f32.mxu1 %v18767_v0  ;;  %v19036_v34 = vsub.f32 %v187_v59, %v19029_v5 }
 0x311   : > { %15302 = vmatprep.mubr.f32.mxu0 %v24419_v6  ;;  %15356 = vmatpush3.msra.mxu0 %v18928_v46  ;;  %v24423_v46 = vld [vmem:[#allocation28_spill] sm:$0xff] }
 0x312   : > { %15413 = vmatprep.subr.mxu0 %v18849_v13  ;;  %v24424_v6 = vld [vmem:[#allocation52_spill] sm:$0xff] }
 0x313   : > { %15347 = vmatmul.mubr.f32.gmra.mxu1 %v24412_v58 }
 0x314   : > { %15303 = vmatmul.mubr.f32.gmra.mxu0 %v24420_v1  ;;  %15389 = vmatprep.mubr.f32.mxu1 %v24421_v36  ;;  %v19045_v1 = vand.u32 4294901760, %v19036_v34 }
 0x315   : > { %15305 = vmatprep.mubr.f32.mxu0 %v24422_v17 }
 0x317   : > { %15390 = vmatmul.mubr.f32.vlgmr.msra.gmra.mxu1 %v18600_v51 }
 0x318   : > { %15306 = vmatmul.mubr.f32.gmra.mxu0 %v18809_v37  ;;  %15392 = vmatprep.mubr.f32.mxu1 %v24423_v46 }
 0x319   : > { %15308 = vmatprep.mubr.f32.mxu0 %v24424_v6  ;;  %15446 = vmatpush3.msra.mxu1 %v18797_v19  ;;  %v4349_v19 = vsub.f32 %v19036_v34, %v19045_v1 }
 0x31a   : > { %15447 = vmatprep.subr.mxu1 %v18881_v16 }
 0x31b   : > { %15393 = vmatmul.mubr.f32.gmra.mxu1 %v18649_v55  ;;  %v4350_v59 = vand.u32 4294901760, %v4349_v19  ;;  %v24425_v19 = vld [vmem:[#allocation3_spill] sm:$0xff] }
 0x31c   : > { %15309 = vmatmul.mubr.f32.gmra.mxu0 %v18833_v24  ;;  %15395 = vmatprep.mubr.f32.mxu1 %v18684_v10 }
 0x31d   : > { %15311 = vmatprep.mubr.f32.mxu0 %v18842_v42  ;;  %15448 = vmatpush3.msra.mxu1 %v18881_v16  ;;  %v186_v16 = vld [vmem:[%s23891_s1 + $0xd0] sm:$0xff] }
 0x31e   : > { %15449 = vmatprep.subr.mxu1 %v18895_v61 }
 0x31f   : > { %15396 = vmatmul.mubr.f32.gmra.mxu1 %v18716_v52 }
 0x320   : > { %15312 = vmatmul.mubr.f32.gmra.mxu0 %v18853_v38  ;;  %15398 = vmatprep.mubr.f32.mxu1 %v18723_v63 }
 0x321   : > { %15314 = vmatprep.mubr.f32.mxu0 %v18859_v30  ;;  %15450 = vmatpush3.msra.mxu1 %v18895_v61  ;;  %v19069_v30 = vand.u32 4294901760, %v186_v16  ;;  %v185_v61 = vld [vmem:[%s23891_s1 + $0xc8] sm:$0xff] }
 0x322   : > { %15451 = vmatprep.subr.mxu1 %v18913_v28 }
 0x323   : > { %15399 = vmatmul.mubr.f32.gmra.mxu1 %v18726_v8 }
 0x324   : > { %15315 = vmatmul.mubr.f32.gmra.mxu0 %v18867_v54  ;;  %15401 = vmatprep.mubr.f32.mxu1 %v18735_v26 }
 0x325   : > { %15357 = vmatprep.mubr.f32.mxu0 %v18552_v22  ;;  %15452 = vmatpush3.msra.mxu1 %v18913_v28  ;;  %v19081_v28 = vsub.f32 %v186_v16, %v19069_v30  ;;  %v19083_v22 = vand.u32 4294901760, %v185_v61 }
 0x326   : > { %15509 = vmatprep.subr.mxu1 %v4350_v59 }
 0x327   : > { %15402 = vmatmul.mubr.f32.gmra.mxu1 %v18774_v39 }
 0x328   : > { %15358 = vmatmul.mubr.f32.vlgmr.msra.gmra.mxu0 %v24425_v19  ;;  %15404 = vmatprep.mubr.f32.mxu1 %v18780_v45  ;;  %v184_v19 = vld [vmem:[%s23891_s1 + $0xc0] sm:$0xff] }
 0x329   : > { %15360 = vmatprep.mubr.f32.mxu0 %v18624_v62  ;;  %15414 = vmatpush3.msra.mxu0 %v18849_v13  ;;  %v19096_v13 = vand.u32 4294901760, %v19081_v28  ;;  %v19101_v16 = vand.u32 4294901760, %v184_v19 }
 0x32a   : > { %15415 = vmatprep.subr.mxu0 %v18908_v15 }
 0x32b   : > { %15416 = vmatpush3.msra.mxu0 %v18908_v15  ;;  %15405 = vmatmul.mubr.f32.gmra.mxu1 %v18802_v7  ;;  %v19099_v15 = vsub.f32 %v185_v61, %v19083_v22  ;;  %v24426_v7 = vld [vmem:[#allocation50_spill] sm:$0xff] }
 0x32c   : > { %15361 = vmatmul.mubr.f32.gmra.mxu0 %v18633_v32  ;;  %15407 = vmatprep.mubr.f32.mxu1 %v18806_v29  ;;  %v24427_v29 = vld [vmem:[#allocation53_spill] sm:$0xff]  ;;  %v19115_v32 = vsub.f32 %v184_v19, %v19101_v16  ;;  %v24429_v19 = vld [vmem:[#allocation40_spill] sm:$0xff] }
 0x32d   : > { %15363 = vmatprep.mubr.f32.mxu0 %v18663_v53  ;;  %15417 = vmatprep.subr.mxu0 %v18925_v49  ;;  %v24428_v53 = vld [vmem:[#allocation33_spill] sm:$0xff]  ;;  %v19112_v61 = vand.u32 4294901760, %v19099_v15 }
 0x32e   : > { %15418 = vmatpush3.msra.mxu0 %v18925_v49  ;;  %v4356_v49 = vsub.f32 %v19081_v28, %v19096_v13 }
 0x32f   : > { %15408 = vmatmul.mubr.f32.gmra.mxu1 %v24426_v7  ;;  %15419 = vmatprep.subr.mxu0 %v18937_v60 }
 0x330   : > { %15364 = vmatmul.mubr.f32.gmra.mxu0 %v18688_v57  ;;  %15410 = vmatprep.mubr.f32.mxu1 %v24427_v29  ;;  %v19125_v29 = vand.u32 4294901760, %v19115_v32 }
 0x331   : > { %15366 = vmatprep.mubr.f32.mxu0 %v24428_v53  ;;  %15420 = vmatpush3.msra.mxu0 %v18937_v60  ;;  %v4357_v60 = vand.u32 4294901760, %v4356_v49  ;;  %v4363_v53 = vsub.f32 %v19099_v15, %v19112_v61 }
 0x332   : > { %15477 = vmatprep.subr.mxu0 %v19029_v5  ;;  %v4370_v49 = vsub.f32 %v19115_v32, %v19125_v29 }
 0x333   : > { %15411 = vmatmul.mubr.f32.gmra.mxu1 %v18839_v20 }
 0x334   : > { %15367 = vmatmul.mubr.f32.gmra.mxu0 %v18699_v18  ;;  %15453 = vmatprep.mubr.f32.mxu1 %v18543_v3  ;;  %v4364_v18 = vand.u32 4294901760, %v4363_v53 }
 0x335   : > { %15369 = vmatprep.mubr.f32.mxu0 %v18702_v44 }
 0x337   : > { %15454 = vmatmul.mubr.f32.vlgmr.msra.gmra.mxu1 %v18556_v35 }
 0x338   : > { %15370 = vmatmul.mubr.f32.gmra.mxu0 %v24429_v19  ;;  %15456 = vmatprep.mubr.f32.mxu1 %v18560_v11  ;;  %v4371_v19 = vand.u32 4294901760, %v4370_v49 }
 0x339   : > { %15372 = vmatprep.mubr.f32.mxu0 %v18762_v27  ;;  %15510 = vmatpush3.msra.mxu1 %v4350_v59 }
 0x33a   : > { %15511 = vmatprep.subr.mxu1 %v4357_v60 }
 0x33b   : > { %15457 = vmatmul.mubr.f32.gmra.mxu1 %v18574_v33 }
 0x33c   : > { %15373 = vmatmul.mubr.f32.gmra.mxu0 %v18783_v47  ;;  %15459 = vmatprep.mubr.f32.mxu1 %v18582_v25 }
 0x33d   : > { %15375 = vmatprep.mubr.f32.mxu0 %v18786_v56  ;;  %15512 = vmatpush3.msra.mxu1 %v4357_v60 }
 0x33e   : > { %15513 = vmatprep.subr.mxu1 %v4364_v18 }
 0x33f   : > { %15460 = vmatmul.mubr.f32.gmra.mxu1 %v18604_v12 }
 0x340   : > { %15376 = vmatmul.mubr.f32.gmra.mxu0 %v18792_v9  ;;  %15462 = vmatprep.mubr.f32.mxu1 %v18611_v14 }
 0x341   : > { %15378 = vmatprep.mubr.f32.mxu0 %v18795_v41  ;;  %15514 = vmatpush3.msra.mxu1 %v4364_v18 }
 0x342   : > { %15515 = vmatprep.subr.mxu1 %v4371_v19 }
 0x343   : > { %15463 = vmatmul.mubr.f32.gmra.mxu1 %v18635_v4 }
 0x344   : > { %15379 = vmatmul.mubr.f32.gmra.mxu0 %v18816_v21  ;;  %15465 = vmatprep.mubr.f32.mxu1 %v18643_v48 }
 0x345   : > { %15421 = vmatprep.mubr.f32.mxu0 %v18543_v3  ;;  %15516 = vmatpush3.msra.mxu1 %v4371_v19 }
 0x346   : > { %15573 = vmatprep.subr.mxu1 %v19029_v5 }
 0x347   : > { %15466 = vmatmul.mubr.f32.gmra.mxu1 %v18667_v43 }
 0x348   : > { %15422 = vmatmul.mubr.f32.vlgmr.msra.gmra.mxu0 %v18556_v35  ;;  %15468 = vmatprep.mubr.f32.mxu1 %v18674_v23 }
 0x349   : > { %15424 = vmatprep.mubr.f32.mxu0 %v18560_v11  ;;  %15478 = vmatpush3.msra.mxu0 %v19029_v5 }
 0x34a   : > { %15479 = vmatprep.subr.mxu0 %v19069_v30 }
 0x34b   : > { %15469 = vmatmul.mubr.f32.gmra.mxu1 %v18704_v31  ;;  %15480 = vmatpush3.msra.mxu0 %v19069_v30 }
 0x34c   : > { %15425 = vmatmul.mubr.f32.gmra.mxu0 %v18574_v33  ;;  %15471 = vmatprep.mubr.f32.mxu1 %v18711_v2 }
 0x34d   : > { %15427 = vmatprep.mubr.f32.mxu0 %v18582_v25  ;;  %15481 = vmatprep.subr.mxu0 %v19083_v22 }
 0x34e   : > { %15482 = vmatpush3.msra.mxu0 %v19083_v22 }
 0x34f   : > { %15472 = vmatmul.mubr.f32.gmra.mxu1 %v18739_v50  ;;  %15483 = vmatprep.subr.mxu0 %v19101_v16 }
 0x350   : > { %15428 = vmatmul.mubr.f32.gmra.mxu0 %v18604_v12  ;;  %15474 = vmatprep.mubr.f32.mxu1 %v18767_v0 }
 0x351   : > { %15430 = vmatprep.mubr.f32.mxu0 %v18611_v14  ;;  %15484 = vmatpush3.msra.mxu0 %v19101_v16 }
 0x352   : > { %15541 = vmatprep.subr.mxu0 %v19036_v34 }
 0x353   : > { %15475 = vmatmul.mubr.f32.gmra.mxu1 %v24412_v58 }
 0x354   : > { %15431 = vmatmul.mubr.f32.gmra.mxu0 %v18635_v4  ;;  %15517 = vmatprep.mubr.f32.mxu1 %v18543_v3 }
 0x355   : > { %15433 = vmatprep.mubr.f32.mxu0 %v18643_v48 }
 0x356   : > { %v15135_v53 = vpop.f32.mrf.mxu1 }
 0x357   : > { %15518 = vmatmul.mubr.f32.vlgmr.msra.gmra.mxu1 %v18556_v35 }
 0x358   : > { %15434 = vmatmul.mubr.f32.gmra.mxu0 %v18667_v43  ;;  %15520 = vmatprep.mubr.f32.mxu1 %v18560_v11  ;;  %v19174_v18 = vpop.f32.mrf.mxu1 }
 0x359   : > { %15436 = vmatprep.mubr.f32.mxu0 %v18674_v23  ;;  %24430 = vst [vmem:[#allocation44_spill] sm:$0xff] %v19174_v18  ;;  %15574 = vmatpush3.msra.mxu1 %v19029_v5 }
 0x35a   : > { %15575 = vmatprep.subr.mxu1 %v19069_v30  ;;  %v15138_v59 = vpop.f32.mrf.mxu1 }
 0x35b   : > { %15521 = vmatmul.mubr.f32.gmra.mxu1 %v18574_v33 }
 0x35c   : > { %15437 = vmatmul.mubr.f32.gmra.mxu0 %v18704_v31  ;;  %15523 = vmatprep.mubr.f32.mxu1 %v18582_v25  ;;  %v2160_v60 = vpop.f32.mrf.mxu1 }
 0x35d   : > { %15439 = vmatprep.mubr.f32.mxu0 %v18711_v2  ;;  %15576 = vmatpush3.msra.mxu1 %v19069_v30 }
 0x35e   : > { %15577 = vmatprep.subr.mxu1 %v19083_v22  ;;  %v15141_v19 = vpop.f32.mrf.mxu1 }
 0x35f   : > { %15524 = vmatmul.mubr.f32.gmra.mxu1 %v18604_v12 }
 0x360   : > { %15440 = vmatmul.mubr.f32.gmra.mxu0 %v18739_v50  ;;  %15526 = vmatprep.mubr.f32.mxu1 %v18611_v14  ;;  %v2172_v49 = vpop.f32.mrf.mxu1 }
 0x361   : > { %15442 = vmatprep.mubr.f32.mxu0 %v18767_v0  ;;  %15578 = vmatpush3.msra.mxu1 %v19083_v22  ;;  %v15103_v21 = vpop.f32.mrf.mxu0 }
 0x362   : > { %15579 = vmatprep.subr.mxu1 %v19101_v16  ;;  %v19190_v18 = vadd.f32 %v15135_v53, %v15103_v21  ;;  %v24432_v21 = vld [vmem:[#allocation25_spill] sm:$0xff] }
 0x363   : > { %v15144_v41 = vpop.f32.mrf.mxu1  ;;  %15527 = vmatmul.mubr.f32.gmra.mxu1 %v18635_v4  ;;  %v19194_v9 = vpop.f32.mrf.mxu0  ;;  %v24433_v4 = vld [vmem:[#allocation31_spill] sm:$0xff] }
 0x364   : > { %15443 = vmatmul.mubr.f32.gmra.mxu0 %v24412_v58  ;;  %24431 = vst [vmem:[#allocation24_spill] sm:$0xff] %v19194_v9  ;;  %15529 = vmatprep.mubr.f32.mxu1 %v18643_v48 }
 0x365   : > { %15485 = vmatprep.mubr.f32.mxu0 %v24413_v40  ;;  %v2184_v14 = vpop.f32.mrf.mxu1  ;;  %15580 = vmatpush3.msra.mxu1 %v19101_v16 }
 0x366   : > { %15637 = vmatprep.subr.mxu1 %v19029_v5 }
 0x367   : > { %v15147_v12 = vpop.f32.mrf.mxu1  ;;  %15530 = vmatmul.mubr.f32.gmra.mxu1 %v18667_v43  ;;  %v15106_v53 = vpop.f32.mrf.mxu0 }
 0x368   : > { %15486 = vmatmul.mubr.f32.vlgmr.msra.gmra.mxu0 %v24432_v21  ;;  %15532 = vmatprep.mubr.f32.mxu1 %v18674_v23  ;;  %v19204_v9 = vadd.f32 %v15138_v59, %v15106_v53  ;;  %v24434_v21 = vld [vmem:[#allocation32_spill] sm:$0xff]  ;;  %v24436_v53 = vld [vmem:[#allocation39_spill] sm:$0xff] }
 0x369   : > { %15488 = vmatprep.mubr.f32.mxu0 %v24433_v4  ;;  %v2196_v48 = vpop.f32.mrf.mxu1  ;;  %15542 = vmatpush3.msra.mxu0 %v19036_v34  ;;  %v1927_v40 = vpop.f32.mrf.mxu0  ;;  %v24435_v4 = vld [vmem:[#allocation37_spill] sm:$0xff] }
 0x36a   : > { %15543 = vmatprep.subr.mxu0 %v19081_v28  ;;  %v19208_v56 = vadd.f32 %v2160_v60, %v1927_v40  ;;  %v24437_v40 = vld [vmem:[#allocation41_spill] sm:$0xff] }
 0x36b   : > { %v15150_v25 = vpop.f32.mrf.mxu1  ;;  %15533 = vmatmul.mubr.f32.gmra.mxu1 %v18704_v31  ;;  %15544 = vmatpush3.msra.mxu0 %v19081_v28  ;;  %v24438_v31 = vld [vmem:[#allocation42_spill] sm:$0xff] }
 0x36c   : > { %15489 = vmatmul.mubr.f32.gmra.mxu0 %v24434_v21  ;;  %15535 = vmatprep.mubr.f32.mxu1 %v18711_v2 }
 0x36d   : > { %15491 = vmatprep.mubr.f32.mxu0 %v24435_v4  ;;  %v2208_v59 = vpop.f32.mrf.mxu1  ;;  %15545 = vmatprep.subr.mxu0 %v19099_v15 }
 0x36e   : > { %15546 = vmatpush3.msra.mxu0 %v19099_v15 }
 0x36f   : > { %v15153_v34 = vpop.f32.mrf.mxu1  ;;  %15536 = vmatmul.mubr.f32.gmra.mxu1 %v18739_v50  ;;  %15547 = vmatprep.subr.mxu0 %v19115_v32 }
 0x370   : > { %v15109_v60 = vpop.f32.mrf.mxu0  ;;  %15492 = vmatmul.mubr.f32.gmra.mxu0 %v24436_v53  ;;  %15538 = vmatprep.mubr.f32.mxu1 %v18767_v0 }
 0x371   : > { %v19221_v28 = vadd.f32 %v15141_v19, %v15109_v60  ;;  %15494 = vmatprep.mubr.f32.mxu0 %v24437_v40  ;;  %v2220_v21 = vpop.f32.mrf.mxu1  ;;  %15548 = vmatpush3.msra.mxu0 %v19115_v32 }
 0x372   : > { %v1947_v4 = vpop.f32.mrf.mxu0  ;;  %15605 = vmatprep.subr.mxu0 %v19045_v1 }
 0x373   : > { %v19226_v15 = vadd.f32 %v2172_v49, %v1947_v4  ;;  %v15156_v50 = vpop.f32.mrf.mxu1  ;;  %15539 = vmatmul.mubr.f32.gmra.mxu1 %v24412_v58 }
 0x374   : > { %v15112_v2 = vpop.f32.mrf.mxu0  ;;  %15495 = vmatmul.mubr.f32.gmra.mxu0 %v24438_v31  ;;  %15581 = vmatprep.mubr.f32.mxu1 %v24421_v36 }
 0x375   : > { %v19231_v19 = vadd.f32 %v15144_v41, %v15112_v2  ;;  %15497 = vmatprep.mubr.f32.mxu0 %v24422_v17  ;;  %v2232_v60 = vpop.f32.mrf.mxu1 }
 0x376   : > { %v1967_v53 = vpop.f32.mrf.mxu0 }
 0x377   : > { %v19234_v32 = vadd.f32 %v2184_v14, %v1967_v53  ;;  %v15199_v40 = vpop.f32.mrf.mxu1  ;;  %15582 = vmatmul.mubr.f32.vlgmr.msra.gmra.mxu1 %v18600_v51 }
 0x378   : > { %v15115_v49 = vpop.f32.mrf.mxu0  ;;  %15498 = vmatmul.mubr.f32.gmra.mxu0 %v18809_v37  ;;  %15584 = vmatprep.mubr.f32.mxu1 %v24423_v46 }
 0x379   : > { %v19239_v4 = vadd.f32 %v15147_v12, %v15115_v49  ;;  %15500 = vmatprep.mubr.f32.mxu0 %v24424_v6  ;;  %v19242_v31 = vpop.f32.mrf.mxu1  ;;  %15638 = vmatpush3.msra.mxu1 %v19029_v5 }
 0x37a   : > { %v1987_v2 = vpop.f32.mrf.mxu0  ;;  %15639 = vmatprep.subr.mxu1 %v19069_v30 }
 0x37b   : > { %v19246_v14 = vadd.f32 %v2196_v48, %v1987_v2  ;;  %v19248_v41 = vpop.f32.mrf.mxu1  ;;  %15585 = vmatmul.mubr.f32.gmra.mxu1 %v18649_v55 }
 0x37c   : > { %v15118_v51 = vpop.f32.mrf.mxu0  ;;  %15501 = vmatmul.mubr.f32.gmra.mxu0 %v18833_v24  ;;  %15587 = vmatprep.mubr.f32.mxu1 %v18684_v10  ;;  %v24439_v10 = vld [vmem:[#allocation54_spill] sm:$0xff] }
 0x37d   : > { %v19253_v12 = vadd.f32 %v15150_v25, %v15118_v51  ;;  %15503 = vmatprep.mubr.f32.mxu0 %v18842_v42  ;;  %v19256_v37 = vpop.f32.mrf.mxu1  ;;  %15640 = vmatpush3.msra.mxu1 %v19069_v30  ;;  %v24446_v51 = vld [vmem:[#allocation53_spill] sm:$0xff] }
 0x37e   : > { %v2007_v17 = vpop.f32.mrf.mxu0  ;;  %15641 = vmatprep.subr.mxu1 %v19083_v22 }
 0x37f   : > { %v19260_v48 = vadd.f32 %v2208_v59, %v2007_v17  ;;  %v19262_v36 = vpop.f32.mrf.mxu1  ;;  %15588 = vmatmul.mubr.f32.gmra.mxu1 %v18716_v52 }
 0x380   : > { %v15121_v55 = vpop.f32.mrf.mxu0  ;;  %15504 = vmatmul.mubr.f32.gmra.mxu0 %v18853_v38  ;;  %15590 = vmatprep.mubr.f32.mxu1 %v18723_v63  ;;  %v24440_v63 = vld [vmem:[#allocation13_spill] sm:$0xff] }
 0x381   : > { %v19267_v25 = vadd.f32 %v15153_v34, %v15121_v55  ;;  %15506 = vmatprep.mubr.f32.mxu0 %v24439_v10  ;;  %v19270_v42 = vpop.f32.mrf.mxu1  ;;  %15642 = vmatpush3.msra.mxu1 %v19083_v22  ;;  %v24441_v34 = vld [vmem:[#allocation3_spill] sm:$0xff]  ;;  %v24447_v55 = vld [vmem:[#allocation33_spill] sm:$0xff] }
 0x382   : > { %v2027_v30 = vpop.f32.mrf.mxu0  ;;  %15643 = vmatprep.subr.mxu1 %v19101_v16 }
 0x383   : > { %v19274_v24 = vadd.f32 %v2220_v21, %v2027_v30  ;;  %v19276_v6 = vpop.f32.mrf.mxu1  ;;  %15591 = vmatmul.mubr.f32.gmra.mxu1 %v18726_v8  ;;  %v24449_v30 = vld [vmem:[#allocation34_spill] sm:$0xff] }
 0x384   : > { %v15124_v38 = vpop.f32.mrf.mxu0  ;;  %15507 = vmatmul.mubr.f32.gmra.mxu0 %v18867_v54  ;;  %15593 = vmatprep.mubr.f32.mxu1 %v18735_v26 }
 0x385   : > { %v19281_v52 = vadd.f32 %v15156_v50, %v15124_v38  ;;  %15549 = vmatprep.mubr.f32.mxu0 %v24440_v63  ;;  %v19284_v5 = vpop.f32.mrf.mxu1  ;;  %15644 = vmatpush3.msra.mxu1 %v19101_v16 }
 0x386   : > { %v2047_v22 = vpop.f32.mrf.mxu0 }
 0x387   : > { %v19287_v46 = vadd.f32 %v2232_v60, %v2047_v22  ;;  %v19289_v59 = vpop.f32.mrf.mxu1  ;;  %15594 = vmatmul.mubr.f32.gmra.mxu1 %v18774_v39  ;;  %v24442_v39 = vld [vmem:[#allocation48_spill] sm:$0xff] }
 0x388   : > { %v15167_v8 = vpop.f32.mrf.mxu0  ;;  %15550 = vmatmul.mubr.f32.vlgmr.msra.gmra.mxu0 %v24441_v34  ;;  %15596 = vmatprep.mubr.f32.mxu1 %v18780_v45 }
 0x389   : > { %v2326_v26 = vadd.f32 %v15167_v8, %v19190_v18  ;;  %15552 = vmatprep.mubr.f32.mxu0 %v18624_v62  ;;  %v19296_v50 = vpop.f32.mrf.mxu1  ;;  %15606 = vmatpush3.msra.mxu0 %v19045_v1  ;;  %v24443_v18 = vld [vmem:[#allocation26_spill] sm:$0xff]  ;;  %v24444_v62 = vld [vmem:[#allocation49_spill] sm:$0xff]  ;;  %v24451_v8 = vld [vmem:[#allocation40_spill] sm:$0xff] }
 0x38a   : > { %v19299_v54 = vpop.f32.mrf.mxu0  ;;  %15607 = vmatprep.subr.mxu0 %v19096_v13  ;;  %v24445_v1 = vld [vmem:[#allocation30_spill] sm:$0xff] }
 0x38b   : > { %v19302_v16 = vpop.f32.mrf.mxu1  ;;  %15597 = vmatmul.mubr.f32.gmra.mxu1 %v24442_v39  ;;  %15608 = vmatpush3.msra.mxu0 %v19096_v13  ;;  %v19306_v21 = vadd.f32 %v15199_v40, %v2326_v26 }
 0x38c   : > { %v15170_v45 = vpop.f32.mrf.mxu0  ;;  %15553 = vmatmul.mubr.f32.gmra.mxu0 %v24443_v18  ;;  %15599 = vmatprep.mubr.f32.mxu1 %v24444_v62 }
 0x38d   : > { %v2340_v60 = vadd.f32 %v15170_v45, %v19204_v9  ;;  %15555 = vmatprep.mubr.f32.mxu0 %v24445_v1  ;;  %v19312_v53 = vpop.f32.mrf.mxu1  ;;  %15609 = vmatprep.subr.mxu0 %v19112_v61  ;;  %v24454_v45 = vld [vmem:[#allocation45_spill] sm:$0xff] }
 0x38e   : > { %v2332_v49 = vpop.f32.mrf.mxu0  ;;  %15610 = vmatpush3.msra.mxu0 %v19112_v61 }
 0x38f   : > { %v2333_v13 = vadd.f32 %v2332_v49, %v19208_v56  ;;  %v19317_v40 = vpop.f32.mrf.mxu1  ;;  %15600 = vmatmul.mubr.f32.gmra.mxu1 %v24426_v7  ;;  %15611 = vmatprep.subr.mxu0 %v19125_v29  ;;  %v19322_v2 = vadd.f32 %v19248_v41, %v2340_v60  ;;  %v24458_v49 = vld [vmem:[#allocation46_spill] sm:$0xff] }
 0x390   : > { %v15173_v9 = vpop.f32.mrf.mxu0  ;;  %15556 = vmatmul.mubr.f32.gmra.mxu0 %v18688_v57  ;;  %15602 = vmatprep.mubr.f32.mxu1 %v24446_v51 }
 0x391   : > { %v2354_v17 = vadd.f32 %v15173_v9, %v19221_v28  ;;  %15558 = vmatprep.mubr.f32.mxu0 %v24447_v55  ;;  %v19328_v61 = vpop.f32.mrf.mxu1  ;;  %15612 = vmatpush3.msra.mxu0 %v19125_v29  ;;  %v19332_v56 = vadd.f32 %v19256_v37, %v2333_v13  ;;  %v24460_v9 = vld [vmem:[#allocation47_spill] sm:$0xff]  ;;  %v24464_v55 = vld [vmem:[#allocation44_spill] sm:$0xff] }
 0x392   : > { %v2346_v7 = vpop.f32.mrf.mxu0 }
 0x393   : > { %24448 = vst [vmem:[#allocation11_spill] sm:$0xff] %v19332_v56  ;;  %v2347_v41 = vadd.f32 %v2346_v7, %v19226_v15  ;;  %v19335_v10 = vpop.f32.mrf.mxu1  ;;  %15603 = vmatmul.mubr.f32.gmra.mxu1 %v18839_v20  ;;  %v19339_v57 = vadd.f32 %v19262_v36, %v2354_v17  ;;  %v24463_v17 = vld [vmem:[#allocation24_spill] sm:$0xff] }
 0x394   : > { %v15176_v28 = vpop.f32.mrf.mxu0  ;;  %15559 = vmatmul.mubr.f32.gmra.mxu0 %v24449_v30  ;;  %15645 = vmatprep.mubr.f32.mxu1 %v18543_v3  ;;  %v2149_v7 = vadd.f32 %v24464_v55, %v24463_v17 }
 0x395   : > { %v2368_v29 = vadd.f32 %v15176_v28, %v19231_v19  ;;  %15561 = vmatprep.mubr.f32.mxu0 %v18702_v44  ;;  %v19345_v37 = vpop.f32.mrf.mxu1  ;;  %v19348_v15 = vadd.f32 %v19270_v42, %v2347_v41  ;;  %v24465_v28 = vld [vmem:[#allocation27_spill] sm:$0xff] }
 0x396   : > { %v2360_v38 = vpop.f32.mrf.mxu0 }
 0x397   : > { %24450 = vst [vmem:[#allocation43_spill] sm:$0xff] %v19348_v15  ;;  %v2361_v20 = vadd.f32 %v2360_v38, %v19234_v32  ;;  %v15263_v63 = vpop.f32.mrf.mxu1  ;;  %15646 = vmatmul.mubr.f32.vlgmr.msra.gmra.mxu1 %v18556_v35  ;;  %v19353_v36 = vadd.f32 %v19276_v6, %v2368_v29  ;;  %v24466_v29 = vld [vmem:[#allocation51_spill] sm:$0xff]  ;;  %v24467_v38 = vld [vmem:[#allocation29_spill] sm:$0xff] }
 0x398   : > { %v15179_v22 = vpop.f32.mrf.mxu0  ;;  %15562 = vmatmul.mubr.f32.gmra.mxu0 %v24451_v8  ;;  %15648 = vmatprep.mubr.f32.mxu1 %v18560_v11 }
 0x399   : > { %v2382_v44 = vadd.f32 %v15179_v22, %v19239_v4  ;;  %15564 = vmatprep.mubr.f32.mxu0 %v18762_v27  ;;  %v2868_v19 = vpop.f32.mrf.mxu1  ;;  %v19360_v42 = vadd.f32 %v19284_v5, %v2361_v20  ;;  %v24453_v4 = vld [vmem:[#allocation9_spill] sm:$0xff] }
 0x39a   : > { %v2374_v32 = vpop.f32.mrf.mxu0 }
 0x39b   : > { %24452 = vst [vmem:[#allocation28_spill] sm:$0xff] %v19360_v42  ;;  %v2375_v34 = vadd.f32 %v2374_v32, %v19246_v14  ;;  %v19363_v26 = vpop.f32.mrf.mxu1  ;;  %15649 = vmatmul.mubr.f32.gmra.mxu1 %v18574_v33  ;;  %v19367_v6 = vadd.f32 %v19289_v59, %v2382_v44  ;;  %v24457_v59 = vld [vmem:[#allocation7_spill] sm:$0xff] }
 0x39c   : > { %v15182_v39 = vpop.f32.mrf.mxu0  ;;  %15565 = vmatmul.mubr.f32.gmra.mxu0 %v18783_v47  ;;  %15651 = vmatprep.mubr.f32.mxu1 %v24453_v4 }
 0x39d   : > { %v2396_v27 = vadd.f32 %v15182_v39, %v19253_v12  ;;  %15567 = vmatprep.mubr.f32.mxu0 %v24454_v45  ;;  %v19373_v5 = vpop.f32.mrf.mxu1  ;;  %v19376_v14 = vadd.f32 %v19296_v50, %v2375_v34  ;;  %v24459_v12 = vld [vmem:[#allocation15_spill] sm:$0xff] }
 0x39e   : > { %24455 = vst [vmem:[#allocation52_spill] sm:$0xff] %v19373_v5  ;;  %v2388_v18 = vpop.f32.mrf.mxu0  ;;  %v24473_v45 = vld [vmem:[#allocation35_spill] sm:$0xff] }
 0x39f   : > { %24456 = vst [vmem:[#allocation50_spill] sm:$0xff] %v19376_v14  ;;  %v2389_v62 = vadd.f32 %v2388_v18, %v19260_v48  ;;  %v15269_v60 = vpop.f32.mrf.mxu1  ;;  %15652 = vmatmul.mubr.f32.gmra.mxu1 %v24457_v59  ;;  %v19381_v1 = vadd.f32 %v19302_v16, %v2396_v27 }
 0x3a0   : > { %v15185_v47 = vpop.f32.mrf.mxu0  ;;  %15568 = vmatmul.mubr.f32.gmra.mxu0 %v24458_v49  ;;  %15654 = vmatprep.mubr.f32.mxu1 %v24459_v12  ;;  %v24478_v49 = vld [vmem:[#allocation38_spill] sm:$0xff] }
 0x3a1   : > { %v2410_v13 = vadd.f32 %v15185_v47, %v19267_v25  ;;  %15570 = vmatprep.mubr.f32.mxu0 %v24460_v9  ;;  %v19387_v50 = vpop.f32.mrf.mxu1  ;;  %v19390_v51 = vadd.f32 %v19312_v53, %v2389_v62  ;;  %v2319_v53 = vadd.f32 %v19299_v54, %v2149_v7 }
 0x3a2   : > { %24461 = vst [vmem:[#allocation25_spill] sm:$0xff] %v19387_v50  ;;  %v2402_v48 = vpop.f32.mrf.mxu0 }
 0x3a3   : > { %24462 = vst [vmem:[#allocation31_spill] sm:$0xff] %v19390_v51  ;;  %v2403_v16 = vadd.f32 %v2402_v48, %v19274_v24  ;;  %v15272_v41 = vpop.f32.mrf.mxu1  ;;  %15655 = vmatmul.mubr.f32.gmra.mxu1 %v24465_v28  ;;  %v19397_v30 = vadd.f32 %v19317_v40, %v2410_v13 }
 0x3a4   : > { %v15188_v25 = vpop.f32.mrf.mxu0  ;;  %15571 = vmatmul.mubr.f32.gmra.mxu0 %v24466_v29  ;;  %15657 = vmatprep.mubr.f32.mxu1 %v24467_v38 }
 0x3a5   : > { %v2424_v20 = vadd.f32 %v15188_v25, %v19281_v52  ;;  %15613 = vmatprep.mubr.f32.mxu0 %v18543_v3  ;;  %v19404_v22 = vpop.f32.mrf.mxu1  ;;  %v19407_v24 = vadd.f32 %v19328_v61, %v2403_v16  ;;  %v2501_v52 = vadd.f32 %v19242_v31, %v2319_v53 }
 0x3a6   : > { %24468 = vst [vmem:[#allocation32_spill] sm:$0xff] %v19404_v22  ;;  %v2416_v8 = vpop.f32.mrf.mxu0 }
 0x3a7   : > { %24469 = vst [vmem:[#allocation37_spill] sm:$0xff] %v19407_v24  ;;  %v2417_v40 = vadd.f32 %v2416_v8, %v19287_v46  ;;  %v15275_v44 = vpop.f32.mrf.mxu1  ;;  %15658 = vmatmul.mubr.f32.gmra.mxu1 %v18667_v43  ;;  %v19412_v32 = vadd.f32 %v19335_v10, %v2424_v20 }
 0x3a8   : > { %v15231_v34 = vpop.f32.mrf.mxu0  ;;  %15614 = vmatmul.mubr.f32.vlgmr.msra.gmra.mxu0 %v18556_v35  ;;  %15660 = vmatprep.mubr.f32.mxu1 %v18674_v23 }
 0x3a9   : > { %v2710_v3 = vadd.f32 %v15231_v34, %v19306_v21  ;;  %15616 = vmatprep.mubr.f32.mxu0 %v18560_v11  ;;  %v19419_v54 = vpop.f32.mrf.mxu1  ;;  %v19422_v46 = vadd.f32 %v19345_v37, %v2417_v40  ;;  %v24474_v21 = vld [vmem:[#allocation36_spill] sm:$0xff] }
 0x3aa   : > { %24470 = vst [vmem:[#allocation39_spill] sm:$0xff] %v19419_v54  ;;  %v2703_v61 = vpop.f32.mrf.mxu0 }
 0x3ab   : > { %24471 = vst [vmem:[#allocation41_spill] sm:$0xff] %v19422_v46  ;;  %v19424_v39 = vadd.f32 %v15263_v63, %v2710_v3  ;;  %v2704_v10 = vadd.f32 %v2703_v61, %v2501_v52  ;;  %v15278_v27 = vpop.f32.mrf.mxu1  ;;  %15661 = vmatmul.mubr.f32.gmra.mxu1 %v24473_v45 }
 0x3ac   : > { %v15234_v35 = vpop.f32.mrf.mxu0  ;;  %15617 = vmatmul.mubr.f32.gmra.mxu0 %v18574_v33  ;;  %15663 = vmatprep.mubr.f32.mxu1 %v24474_v21 }
 0x3ad   : > { %24472 = vst [vmem:[#allocation42_spill] sm:$0xff] %v19424_v39  ;;  %v2869_v11 = vadd.f32 %v2868_v19, %v2704_v10  ;;  %v2722_v31 = vadd.f32 %v15234_v35, %v19322_v2  ;;  %15619 = vmatprep.mubr.f32.mxu0 %v24453_v4  ;;  %v19431_v18 = vpop.f32.mrf.mxu1 }
 0x3ae   : > { %24475 = vst [vmem:[#allocation54_spill] sm:$0xff] %v19431_v18  ;;  %v19433_v37 = vpop.f32.mrf.mxu0 }
 0x3af   : > { %24476 = vst [vmem:[#allocation13_spill] sm:$0xff] %v19433_v37  ;;  %v5223_v63 = vsel %vm1534_vm0, %v2869_v11, 0  ;;  %v19437_v62 = vadd.f32 %v19363_v26, %v2722_v31  ;;  %v15281_v47 = vpop.f32.mrf.mxu1  ;;  %15664 = vmatmul.mubr.f32.gmra.mxu1 %v24478_v49 }
 0x3b0   : > { %v15237_v33 = vpop.f32.mrf.mxu0  ;;  %15620 = vmatmul.mubr.f32.gmra.mxu0 %v24457_v59  ;;  %15666 = vmatprep.mubr.f32.mxu1 %v18767_v0  ;;  %v19446_v4 = vand.u32 4294901760, %v5223_v63 }
 0x3b1   : > { %24477 = vst [vmem:[#allocation3_spill] sm:$0xff] %v19437_v62  ;;  %v2734_v2 = vadd.f32 %v15237_v33, %v19339_v57  ;;  %15622 = vmatprep.mubr.f32.mxu0 %v24459_v12  ;;  %v19444_v19 = vpop.f32.mrf.mxu1 }
 0x3b2   : > { %24479 = vst [vmem:[#allocation48_spill] sm:$0xff] %v19444_v19  ;;  %24480 = vst [vmem:[#allocation26_spill] sm:$0xff] %v19446_v4  ;;  %v19448_v13 = vpop.f32.mrf.mxu0  ;;  %v19462_v17 = vsub.f32 %v5223_v63, %v19446_v4 }
 0x3b3   : > { %24481 = vst [vmem:[#allocation49_spill] sm:$0xff] %v19448_v13  ;;  %v19450_v26 = vadd.f32 %v15269_v60, %v2734_v2  ;;  %v15284_v9 = vpop.f32.mrf.mxu1  ;;  %15667 = vmatmul.mubr.f32.gmra.mxu1 %v24412_v58 }
 0x3b4   : > { %v15240_v48 = vpop.f32.mrf.mxu0  ;;  %15623 = vmatmul.mubr.f32.gmra.mxu0 %v24465_v28  ;;  %15757 = vmatprep.mubr.f32.mxu1 %v19446_v4  ;;  %24485 = vst [vmem:[#allocation34_spill] sm:$0xff] %v19462_v17 }
 0x3b5   : > { %24482 = vst [vmem:[#allocation30_spill] sm:$0xff] %v19450_v26  ;;  %v2746_v57 = vadd.f32 %v15240_v48, %v19353_v36  ;;  %15625 = vmatprep.mubr.f32.mxu0 %v24467_v38  ;;  %v19457_v59 = vpop.f32.mrf.mxu1  ;;  %v24011_v38 = vand.u32 4294901760, %v19462_v17 }
 0x3b6   : > { %24483 = vst [vmem:[#allocation53_spill] sm:$0xff] %v19457_v59  ;;  %v19459_v12 = vpop.f32.mrf.mxu0 }
 0x3b7   : > { %24484 = vst [vmem:[#allocation33_spill] sm:$0xff] %v19459_v12  ;;  %v19464_v60 = vadd.f32 %v15272_v41, %v2746_v57  ;;  %v15327_v55 = vpop.f32.mrf.mxu1  ;;  %v5402_v20 = vsub.f32 %v19462_v17, %v24011_v38 }
 0x3b8   : > { %v15243_v7 = vpop.f32.mrf.mxu0  ;;  %15626 = vmatmul.mubr.f32.gmra.mxu0 %v18667_v43 }
 0x3b9   : > { %24486 = vst [vmem:[#allocation40_spill] sm:$0xff] %v19464_v60  ;;  %v2758_v16 = vadd.f32 %v15243_v7, %v19367_v6  ;;  %15628 = vmatprep.mubr.f32.mxu0 %v18674_v23  ;;  %v19469_v36 = vpop.f32.mrf.mxu1  ;;  %v5403_v52 = vand.u32 4294901760, %v5402_v20 }
 0x3ba   : > { %24487 = vst [vmem:[#allocation9_spill] sm:$0xff] %v19469_v36  ;;  %v19471_v28 = vpop.f32.mrf.mxu0 }
 0x3bb   : > { %24488 = vst [vmem:[#allocation45_spill] sm:$0xff] %v19471_v28  ;;  %v19473_v25 = vadd.f32 %v15275_v44, %v2758_v16  ;;  %v15330_v29 = vpop.f32.mrf.mxu1 }
 0x3bc   : > { %v15246_v53 = vpop.f32.mrf.mxu0  ;;  %15629 = vmatmul.mubr.f32.gmra.mxu0 %v24473_v45 }
 0x3bd   : > { %24489 = vst [vmem:[#allocation7_spill] sm:$0xff] %v19473_v25  ;;  %v2770_v41 = vadd.f32 %v15246_v53, %v19381_v1  ;;  %15631 = vmatprep.mubr.f32.mxu0 %v24474_v21  ;;  %v19479_v43 = vpop.f32.mrf.mxu1 }
 0x3be   : > { %24490 = vst [vmem:[#allocation46_spill] sm:$0xff] %v19479_v43  ;;  %v19481_v6 = vpop.f32.mrf.mxu0 }
 0x3bf   : > { %24491 = vst [vmem:[#allocation15_spill] sm:$0xff] %v19481_v6  ;;  %v19483_v23 = vadd.f32 %v15278_v27, %v2770_v41  ;;  %v15333_v8 = vpop.f32.mrf.mxu1 }
 0x3c0   : > { %v15249_v40 = vpop.f32.mrf.mxu0  ;;  %15632 = vmatmul.mubr.f32.gmra.mxu0 %v24478_v49 }
 0x3c1   : > { %24492 = vst [vmem:[#allocation47_spill] sm:$0xff] %v19483_v23  ;;  %v2782_v44 = vadd.f32 %v15249_v40, %v19397_v30  ;;  %15634 = vmatprep.mubr.f32.mxu0 %v18767_v0  ;;  %v19491_v1 = vpop.f32.mrf.mxu1 }
 0x3c2   : > { %v19493_v34 = vpop.f32.mrf.mxu0 }
 0x3c3   : > { %24493 = vst [vmem:[#allocation24_spill] sm:$0xff] %v19493_v34  ;;  %v19495_v3 = vadd.f32 %v15281_v47, %v2782_v44  ;;  %v15336_v61 = vpop.f32.mrf.mxu1 }
 0x3c4   : > { %v15252_v10 = vpop.f32.mrf.mxu0  ;;  %15635 = vmatmul.mubr.f32.gmra.mxu0 %v24412_v58 }
 0x3c5   : > { %24494 = vst [vmem:[#allocation44_spill] sm:$0xff] %v19495_v3  ;;  %v2794_v27 = vadd.f32 %v15252_v10, %v19412_v32  ;;  %15701 = vmatprep.mubr.f32.mxu0 %v5403_v52  ;;  %v19499_v45 = vpop.f32.mrf.mxu1 }
 0x3c6   : > { %v19501_v35 = vpop.f32.mrf.mxu0 }
 0x3c7   : > { %24495 = vst [vmem:[#allocation27_spill] sm:$0xff] %v19501_v35  ;;  %v19503_v30 = vadd.f32 %v15284_v9, %v2794_v27  ;;  %v15339_v0 = vpop.f32.mrf.mxu1 }
 0x3c8   : > { %v15295_v21 = vpop.f32.mrf.mxu0 }
 0x3c9   : > { %24496 = vst [vmem:[#allocation51_spill] sm:$0xff] %v19503_v30  ;;  %v3285_v11 = vadd.f32 %v15327_v55, %v15295_v21  ;;  %v19505_v31 = vpop.f32.mrf.mxu1 }
 0x3ca   : > { %v19507_v63 = vpop.f32.mrf.mxu0 }
 0x3cb   : > { %24497 = vst [vmem:[#allocation29_spill] sm:$0xff] %v19507_v63  ;;  %v15342_v47 = vpop.f32.mrf.mxu1 }
 0x3cc   : > { %v15298_v49 = vpop.f32.mrf.mxu0 }
 0x3cd   : > { %v3297_v33 = vadd.f32 %v15330_v29, %v15298_v49  ;;  %v19509_v58 = vpop.f32.mrf.mxu1 }
 0x3ce   : > { %v19511_v32 = vpop.f32.mrf.mxu0 }
 0x3cf   : > { %24498 = vst [vmem:[#allocation35_spill] sm:$0xff] %v19511_v32  ;;  %v15345_v2 = vpop.f32.mrf.mxu1 }
 0x3d0   : > { %v15301_v48 = vpop.f32.mrf.mxu0 }
 0x3d1   : > { %v3309_v57 = vadd.f32 %v15333_v8, %v15301_v48  ;;  %v19513_v7 = vpop.f32.mrf.mxu1 }
 0x3d2   : > { %v19515_v9 = vpop.f32.mrf.mxu0 }
 0x3d3   : > { %v19517_v16 = vpop.f32.mrf.mxu1 }
 0x3d4   : > { %v15304_v55 = vpop.f32.mrf.mxu0 }
 0x3d5   : > { %v3321_v53 = vadd.f32 %v15336_v61, %v15304_v55  ;;  %v19519_v41 = vpop.f32.mrf.mxu1 }
 0x3d6   : > { %v19521_v20 = vpop.f32.mrf.mxu0 }
 0x3d7   : > { %v15391_v29 = vpop.f32.mrf.mxu1 }
 0x3d8   : > { %v15307_v40 = vpop.f32.mrf.mxu0 }
 0x3d9   : > { %v19523_v44 = vadd.f32 %v15339_v0, %v15307_v40  ;;  %v19525_v52 = vpop.f32.mrf.mxu1 }
 0x3da   : > { %24499 = vst [vmem:[#allocation36_spill] sm:$0xff] %v19525_v52  ;;  %v19527_v10 = vpop.f32.mrf.mxu0 }
 0x3db   : > { %v15394_v8 = vpop.f32.mrf.mxu1 }
 0x3dc   : > { %v15310_v27 = vpop.f32.mrf.mxu0 }
 0x3dd   : > { %v19529_v21 = vadd.f32 %v15342_v47, %v15310_v27  ;;  %v19531_v49 = vpop.f32.mrf.mxu1 }
 0x3de   : > { %24500 = vst [vmem:[#allocation38_spill] sm:$0xff] %v19531_v49  ;;  %v19533_v48 = vpop.f32.mrf.mxu0 }
 0x3df   : > { %v15397_v61 = vpop.f32.mrf.mxu1 }
 0x3e0   : > { %v15313_v55 = vpop.f32.mrf.mxu0 }
 0x3e1   : > { %v19535_v38 = vadd.f32 %v15345_v2, %v15313_v55  ;;  %v19537_v4 = vpop.f32.mrf.mxu1 }
 0x3e2   : > { %24501 = vst [vmem:[#allocation55_spill] sm:$0xff] %v19537_v4  ;;  %v19539_v0 = vpop.f32.mrf.mxu0 }
 0x3e3   : > { %v15400_v40 = vpop.f32.mrf.mxu1 }
 0x3e4   : > { %v19541_v17 = vpop.f32.mrf.mxu0 }
 0x3e5   : > { %v19543_v30 = vpop.f32.mrf.mxu1 }
 0x3e6   : > { %v19545_v3 = vpop.f32.mrf.mxu0 }
 0x3e7   : > { %v19547_v47 = vpop.f32.mrf.mxu1 }
 0x3e8   : > { %v15359_v27 = vpop.f32.mrf.mxu0 }
 0x3e9   : > { %v3456_v59 = vadd.f32 %v15359_v27, %v3285_v11  ;;  %v19549_v23 = vpop.f32.mrf.mxu1 }
 0x3ea   : > { %v19551_v35 = vpop.f32.mrf.mxu0 }
 0x3eb   : > { %24502 = vst [vmem:[#allocation56_spill] sm:$0xff] %v19551_v35  ;;  %v19553_v2 = vpop.f32.mrf.mxu1  ;;  %v3639_v55 = vadd.f32 %v15391_v29, %v3456_v59 }
 0x3ec   : > { %v15362_v46 = vpop.f32.mrf.mxu0 }
 0x3ed   : > { %v3470_v19 = vadd.f32 %v15362_v46, %v3297_v33  ;;  %v19555_v25 = vpop.f32.mrf.mxu1 }
 0x3ee   : > { %v19557_v34 = vpop.f32.mrf.mxu0 }
 0x3ef   : > { %24503 = vst [vmem:[#allocation57_spill] sm:$0xff] %v19557_v34  ;;  %v19559_v24 = vpop.f32.mrf.mxu1  ;;  %v3655_v18 = vadd.f32 %v15394_v8, %v3470_v19 }
 0x3f0   : > { %v15365_v60 = vpop.f32.mrf.mxu0 }
 0x3f1   : > { %v3484_v6 = vadd.f32 %v15365_v60, %v3309_v57  ;;  %v19561_v51 = vpop.f32.mrf.mxu1 }
 0x3f2   : > { %v19563_v11 = vpop.f32.mrf.mxu0 }
 0x3f3   : > { %v19565_v27 = vpop.f32.mrf.mxu1  ;;  %v19567_v54 = vadd.f32 %v15397_v61, %v3484_v6 }
 0x3f4   : > { %v15368_v59 = vpop.f32.mrf.mxu0 }
 0x3f5   : > { %v3498_v29 = vadd.f32 %v15368_v59, %v3321_v53  ;;  %v19569_v46 = vpop.f32.mrf.mxu1 }
 0x3f6   : > { %v19571_v33 = vpop.f32.mrf.mxu0 }
 0x3f7   : > { %v15455_v26 = vpop.f32.mrf.mxu1  ;;  %v19573_v28 = vadd.f32 %v15400_v40, %v3498_v29 }
 0x3f8   : > { %v19575_v19 = vpop.f32.mrf.mxu0 }
 0x3f9   : > { %v19577_v60 = vpop.f32.mrf.mxu1 }
 0x3fa   : > { %24504 = vst [vmem:[#allocation58_spill] sm:$0xff] %v19577_v60  ;;  %v19579_v57 = vpop.f32.mrf.mxu0 }
 0x3fb   : > { %v15458_v8 = vpop.f32.mrf.mxu1 }
 0x3fc   : > { %v15374_v14 = vpop.f32.mrf.mxu0 }
 0x3fd   : > { %v19581_v22 = vpop.f32.mrf.mxu1  ;;  %v3526_v43 = vadd.f32 %v15374_v14, %v19529_v21 }
 0x3fe   : > { %24505 = vst [vmem:[#allocation59_spill] sm:$0xff] %v19581_v22  ;;  %v3518_v6 = vpop.f32.mrf.mxu0 }
 0x3ff   : > { %v19583_v61 = vpop.f32.mrf.mxu1 }
 0x400   : > { %24506 = vst [vmem:[#allocation60_spill] sm:$0xff] %v19583_v61  ;;  %v15377_v53 = vpop.f32.mrf.mxu0 }
 0x401   : > { %v19585_v59 = vpop.f32.mrf.mxu1 }
 0x402   : > { %24507 = vst [vmem:[#allocation61_spill] sm:$0xff] %v19585_v59  ;;  %v3532_v62 = vpop.f32.mrf.mxu0 }
 0x403   : > { %v19587_v12 = vpop.f32.mrf.mxu1 }
 0x404   : > { %v15380_v40 = vpop.f32.mrf.mxu0 }
 0x405   : > { %v19589_v29 = vpop.f32.mrf.mxu1 }
 0x406   : > { %24508 = vst [vmem:[#allocation62_spill] sm:$0xff] %v19589_v29  ;;  %v3546_v42 = vpop.f32.mrf.mxu0 }
 0x407   : > { %v19591_v50 = vpop.f32.mrf.mxu1 }
 0x408   : > { %v15423_v60 = vpop.f32.mrf.mxu0 }
 0x409   : > { %v3840_v13 = vadd.f32 %v15423_v60, %v3639_v55  ;;  %v19593_v15 = vpop.f32.mrf.mxu1 }
 0x40a   : > { %v19595_v5 = vpop.f32.mrf.mxu0 }
 0x40b   : > { %24509 = vst [vmem:[#allocation63_spill] sm:$0xff] %v19595_v5  ;;  %v19597_v39 = vadd.f32 %v15455_v26, %v3840_v13  ;;  %v15470_v52 = vpop.f32.mrf.mxu1 }
 0x40c   : > { %v15426_v37 = vpop.f32.mrf.mxu0 }
 0x40d   : > { %24510 = vst [vmem:[#allocation64_spill] sm:$0xff] %v19597_v39  ;;  %v3852_v56 = vadd.f32 %v15426_v37, %v3655_v18  ;;  %v19599_v22 = vpop.f32.mrf.mxu1 }
 0x40e   : > { %v19601_v35 = vpop.f32.mrf.mxu0 }
 0x40f   : > { %24511 = vst [vmem:[#allocation65_spill] sm:$0xff] %v19601_v35  ;;  %v19603_v36 = vadd.f32 %v15458_v8, %v3852_v56  ;;  %v15473_v63 = vpop.f32.mrf.mxu1  ;;  %v3351_v56 = vadd.f32 %v19513_v7, %v19539_v0  ;;  %v3540_v8 = vadd.f32 %v15377_v53, %v19535_v38  ;;  %v3339_v38 = vadd.f32 %v19509_v58, %v19533_v48 }
 0x410   : > { %v19605_v49 = vpop.f32.mrf.mxu0  ;;  %v3512_v58 = vadd.f32 %v19575_v19, %v19523_v44  ;;  %v3327_v44 = vadd.f32 %v19505_v31, %v19527_v10 }
 0x411   : > { %24512 = vst [vmem:[#allocation66_spill] sm:$0xff] %v19603_v36  ;;  %24513 = vst [vmem:[#allocation67_spill] sm:$0xff] %v19605_v49  ;;  %v4070_v59 = vpop.f32.mrf.mxu1  ;;  %v3533_v32 = vadd.f32 %v3532_v62, %v3351_v56  ;;  %v3735_v49 = vadd.f32 %v19559_v24, %v3540_v8  ;;  %v3519_v21 = vadd.f32 %v3518_v6, %v3339_v38 }
 0x412   : > { %v19607_v55 = vpop.f32.mrf.mxu0  ;;  %v3703_v19 = vadd.f32 %v19547_v47, %v3512_v58  ;;  %v3505_v31 = vadd.f32 %v19579_v57, %v3327_v44 }
 0x413   : > { %24514 = vst [vmem:[#allocation68_spill] sm:$0xff] %v19607_v55  ;;  %v15476_v60 = vpop.f32.mrf.mxu1  ;;  %v3369_v55 = vadd.f32 %v19517_v16, %v19541_v17  ;;  %v3719_v17 = vadd.f32 %v19553_v2, %v3526_v43  ;;  %v3727_v62 = vadd.f32 %v19561_v51, %v3533_v32 }
 0x414   : > { %v19609_v34 = vpop.f32.mrf.mxu0 }
 0x415   : > { %v4082_v13 = vpop.f32.mrf.mxu1  ;;  %v3554_v29 = vadd.f32 %v15380_v40, %v3369_v55 }
 0x416   : > { %v19611_v26 = vpop.f32.mrf.mxu0 }
 0x417   : > { %v15519_v39 = vpop.f32.mrf.mxu1  ;;  %v3751_v24 = vadd.f32 %v19565_v27, %v3554_v29 }
 0x418   : > { %v15435_v18 = vpop.f32.mrf.mxu0 }
 0x419   : > { %v19613_v37 = vpop.f32.mrf.mxu1  ;;  %v3888_v10 = vadd.f32 %v15435_v18, %v3703_v19 }
 0x41a   : > { %24515 = vst [vmem:[#allocation69_spill] sm:$0xff] %v19613_v37  ;;  %v19615_v5 = vpop.f32.mrf.mxu0  ;;  %v3363_v37 = vadd.f32 %v19519_v41, %v19545_v3 }
 0x41b   : > { %v15522_v36 = vpop.f32.mrf.mxu1 }
 0x41c   : > { %v15438_v35 = vpop.f32.mrf.mxu0  ;;  %v3547_v53 = vadd.f32 %v3546_v42, %v3363_v37 }
 0x41d   : > { %v19623_v4 = vpop.f32.mrf.mxu1  ;;  %v3900_v3 = vadd.f32 %v15438_v35, %v3719_v17  ;;  %v3711_v35 = vadd.f32 %v19555_v25, %v3519_v21 }
 0x41e   : > { %24516 = vst [vmem:[#allocation70_spill] sm:$0xff] %v19623_v4  ;;  %v3893_v61 = vpop.f32.mrf.mxu0  ;;  %v3743_v51 = vadd.f32 %v19569_v46, %v3547_v53  ;;  %v24551_v4 = vld [vmem:[#allocation57_spill] sm:$0xff] }
 0x41f   : > { %v19628_v7 = vpop.f32.mrf.mxu1  ;;  %v4065_v2 = vadd.f32 %v15470_v52, %v3900_v3  ;;  %v3894_v37 = vadd.f32 %v3893_v61, %v3711_v35 }
 0x420   : > { %v15441_v0 = vpop.f32.mrf.mxu0 }
 0x421   : > { %v3912_v14 = vadd.f32 %v15441_v0, %v3735_v49  ;;  %v19634_v16 = vpop.f32.mrf.mxu1  ;;  %v5304_v47 = vsel %vm1534_vm0, %v4065_v2, 0  ;;  %v4059_v57 = vadd.f32 %v19599_v22, %v3894_v37  ;;  %v3695_v22 = vadd.f32 %v19549_v23, %v3505_v31 }
 0x422   : > { %24517 = vst [vmem:[#allocation71_spill] sm:$0xff] %v19634_v16  ;;  %v3905_v56 = vpop.f32.mrf.mxu0 }
 0x423   : > { %v4077_v41 = vadd.f32 %v15473_v63, %v3912_v14  ;;  %v3906_v40 = vadd.f32 %v3905_v56, %v3727_v62  ;;  %v19637_v55 = vpop.f32.mrf.mxu1  ;;  %v3882_v23 = vadd.f32 %v19615_v5, %v3695_v22  ;;  %v5301_v35 = vsel %vm1534_vm0, %v4059_v57, 0 }
 0x424   : > { %v15444_v42 = vpop.f32.mrf.mxu0  ;;  %v3876_v5 = vadd.f32 %v19609_v34, %v19573_v28  ;;  %v19735_v37 = vand.u32 4294901760, %v5301_v35 }
 0x425   : > { %v5310_v43 = vsel %vm1534_vm0, %v4077_v41, 0  ;;  %v4071_v49 = vadd.f32 %v4070_v59, %v3906_v40  ;;  %v3924_v48 = vadd.f32 %v15444_v42, %v3751_v24  ;;  %v19643_v32 = vpop.f32.mrf.mxu1  ;;  %v4053_v24 = vadd.f32 %v19591_v50, %v3888_v10 }
 0x426   : > { %24518 = vst [vmem:[#allocation72_spill] sm:$0xff] %v19643_v32  ;;  %v3917_v63 = vpop.f32.mrf.mxu0  ;;  %v19651_v59 = vand.u32 4294901760, %v5310_v43  ;;  %v3315_v50 = vadd.f32 %v19499_v45, %v19521_v20  ;;  %v4047_v28 = vadd.f32 %v19593_v15, %v3882_v23  ;;  %v4041_v10 = vadd.f32 %v19587_v12, %v3876_v5 }
 0x427   : > { %v4089_v6 = vadd.f32 %v15476_v60, %v3924_v48  ;;  %v3918_v27 = vadd.f32 %v3917_v63, %v3743_v51  ;;  %v19646_v29 = vpop.f32.mrf.mxu1  ;;  %v5307_v46 = vsel %vm1534_vm0, %v4071_v49, 0  ;;  %v5298_v20 = vsel %vm1534_vm0, %v4053_v24, 0 }
 0x428   : > { %v15487_v8 = vpop.f32.mrf.mxu0  ;;  %v19669_v14 = vsub.f32 %v5310_v43, %v19651_v59  ;;  %v3491_v45 = vadd.f32 %v19571_v33, %v3315_v50  ;;  %v3303_v12 = vadd.f32 %v19491_v1, %v19515_v9  ;;  %v24536_v1 = vld [vmem:[#allocation67_spill] sm:$0xff] }
 0x429   : > { %v5316_v38 = vsel %vm1534_vm0, %v4089_v6, 0  ;;  %v4083_v25 = vadd.f32 %v4082_v13, %v3918_v27  ;;  %v19655_v0 = vadd.f32 %v15519_v39, %v15487_v8  ;;  %v19657_v52 = vpop.f32.mrf.mxu1  ;;  %v19671_v39 = vand.u32 4294901760, %v5307_v46 }
 0x42a   : > { %24519 = vst [vmem:[#allocation73_spill] sm:$0xff] %v19657_v52  ;;  %v19659_v60 = vand.u32 4294901760, %v5316_v38  ;;  %v19661_v53 = vpop.f32.mrf.mxu0  ;;  %v19709_v51 = vand.u32 4294901760, %v19669_v14  ;;  %v3864_v9 = vadd.f32 %v24536_v1, %v19567_v54  ;;  %v24560_v52 = vld [vmem:[#allocation9_spill] sm:$0xff] }
 0x42b   : > { %24520 = vst [vmem:[#allocation74_spill] sm:$0xff] %v19661_v53  ;;  %v5313_v61 = vsel %vm1534_vm0, %v4083_v25, 0  ;;  %v19666_v17 = vpop.f32.mrf.mxu1  ;;  %v19701_v42 = vsub.f32 %v5307_v46, %v19671_v39 }
 0x42c   : > { %v19674_v13 = vsub.f32 %v5316_v38, %v19659_v60  ;;  %v19676_v62 = vand.u32 4294901760, %v5313_v61  ;;  %v15490_v21 = vpop.f32.mrf.mxu0  ;;  %15669 = vmatprep.subr.mxu0 %v19659_v60  ;;  %24525 = vst [vmem:[#allocation79_spill] sm:$0xff] %v19709_v51  ;;  %v5577_v38 = vsub.f32 %v19669_v14, %v19709_v51 }
 0x42d   : > { %v19680_v18 = vadd.f32 %v15522_v36, %v15490_v21  ;;  %15670 = vmatpush3.xpose.msra.mxu0 %v19659_v60  ;;  %v19683_v56 = vpop.f32.mrf.mxu1  ;;  %v19696_v36 = vand.u32 4294901760, %v5304_v47  ;;  %v19740_v33 = vand.u32 4294901760, %v19701_v42 }
 0x42e   : > { %24521 = vst [vmem:[#allocation75_spill] sm:$0xff] %v19683_v56  ;;  %v19686_v3 = vsub.f32 %v5313_v61, %v19676_v62  ;;  %v19688_v41 = vpop.f32.mrf.mxu0  ;;  %15671 = vmatprep.subr.mxu0 %v19676_v62  ;;  %v19692_v40 = vand.u32 4294901760, %v19674_v13  ;;  %v19754_v61 = vand.u32 4294901760, %v5298_v20  ;;  %v5578_v57 = vand.u32 4294901760, %v5577_v38  ;;  %v24564_v56 = vld [vmem:[#allocation56_spill] sm:$0xff] }
 0x42f   : > { %24522 = vst [vmem:[#allocation76_spill] sm:$0xff] %v19688_v41  ;;  %v19698_v58 = vpop.f32.mrf.mxu1  ;;  %24529 = vst [vmem:[#allocation83_spill] sm:$0xff] %v19740_v33  ;;  %v5584_v24 = vsub.f32 %v19701_v42, %v19740_v33  ;;  %v24623_v33 = vld [vmem:[#allocation37_spill] sm:$0xff] }
 0x430   : > { %24523 = vst [vmem:[#allocation77_spill] sm:$0xff] %v19692_v40  ;;  %v15493_v43 = vpop.f32.mrf.mxu0  ;;  %v5563_v49 = vsub.f32 %v19674_v13, %v19692_v40  ;;  %v19706_v48 = vand.u32 4294901760, %v19686_v3 }
 0x431   : > { %v19716_v63 = vadd.f32 %v19628_v7, %v15493_v43  ;;  %15672 = vmatpush3.xpose.msra.mxu0 %v19676_v62  ;;  %v19719_v2 = vpop.f32.mrf.mxu1  ;;  %v19731_v7 = vsub.f32 %v5304_v47, %v19696_v36  ;;  %v3679_v47 = vadd.f32 %v19543_v30, %v3491_v45  ;;  %v5295_v43 = vsel %vm1534_vm0, %v4047_v28, 0 }
 0x432   : > { %24524 = vst [vmem:[#allocation78_spill] sm:$0xff] %v19706_v48  ;;  %24526 = vst [vmem:[#allocation80_spill] sm:$0xff] %v19719_v2  ;;  %v19721_v6 = vpop.f32.mrf.mxu0  ;;  %15673 = vmatprep.subr.mxu0 %v19651_v59  ;;  %v5564_v27 = vand.u32 4294901760, %v5563_v49  ;;  %v5570_v44 = vsub.f32 %v19686_v3, %v19706_v48  ;;  %v5585_v5 = vand.u32 4294901760, %v5584_v24 }
 0x433   : > { %24527 = vst [vmem:[#allocation81_spill] sm:$0xff] %v19721_v6  ;;  %v19733_v19 = vpop.f32.mrf.mxu1  ;;  %v19764_v22 = vand.u32 4294901760, %v19731_v7  ;;  %v3870_v30 = vadd.f32 %v19611_v26, %v3679_v47  ;;  %v5292_v26 = vsel %vm1534_vm0, %v4041_v10, 0  ;;  %v24542_v10 = vld [vmem:[#allocation60_spill] sm:$0xff] }
 0x434   : > { %24528 = vst [vmem:[#allocation82_spill] sm:$0xff] %v19733_v19  ;;  %v15496_v8 = vpop.f32.mrf.mxu0  ;;  %15725 = vmatprep.subr.mxu1 %v5564_v27  ;;  %v5571_v46 = vand.u32 4294901760, %v5570_v44  ;;  %v19788_v44 = vand.u32 4294901760, %v5295_v43  ;;  %v4029_v47 = vadd.f32 %v24542_v10, %v3864_v9  ;;  %v24547_v10 = vld [vmem:[#allocation68_spill] sm:$0xff] }
 0x435   : > { %v19744_v34 = vadd.f32 %v19637_v55, %v15496_v8  ;;  %15674 = vmatpush3.xpose.msra.mxu0 %v19651_v59  ;;  %15726 = vmatpush3.xpose.msra.mxu1 %v5564_v27  ;;  %v19747_v25 = vpop.f32.mrf.mxu1  ;;  %v19759_v55 = vsub.f32 %v5301_v35, %v19735_v37  ;;  %24532 = vst [vmem:[#allocation86_spill] sm:$0xff] %v19764_v22 }
 0x436   : > { %24530 = vst [vmem:[#allocation84_spill] sm:$0xff] %v19747_v25  ;;  %v19749_v31 = vpop.f32.mrf.mxu0  ;;  %15675 = vmatprep.subr.mxu0 %v19671_v39  ;;  %15727 = vmatprep.subr.mxu1 %v5571_v46  ;;  %v3477_v35 = vadd.f32 %v19563_v11, %v3303_v12  ;;  %v5591_v8 = vsub.f32 %v19731_v7, %v19764_v22  ;;  %v24538_v11 = vld [vmem:[#allocation62_spill] sm:$0xff]  ;;  %v19807_v12 = vand.u32 4294901760, %v5292_v26 }
 0x437   : > { %24531 = vst [vmem:[#allocation85_spill] sm:$0xff] %v19749_v31  ;;  %v19756_v15 = vpop.f32.mrf.mxu1  ;;  %v4035_v38 = vadd.f32 %v24538_v11, %v3870_v30 }
 0x438   : > { %v15499_v21 = vpop.f32.mrf.mxu0 }
 0x439   : > { %v19771_v49 = vadd.f32 %v19646_v29, %v15499_v21  ;;  %15676 = vmatpush3.xpose.msra.mxu0 %v19671_v39  ;;  %15728 = vmatpush3.xpose.msra.mxu1 %v5571_v46  ;;  %v19774_v50 = vpop.f32.mrf.mxu1  ;;  %v19784_v29 = vsub.f32 %v5298_v20, %v19754_v61  ;;  %v19793_v46 = vand.u32 4294901760, %v19759_v55  ;;  %v24543_v21 = vld [vmem:[#allocation55_spill] sm:$0xff] }
 0x43a   : > { %24534 = vst [vmem:[#allocation88_spill] sm:$0xff] %v19774_v50  ;;  %v19776_v23 = vpop.f32.mrf.mxu0  ;;  %15677 = vmatprep.subr.mxu0 %v19696_v36  ;;  %15729 = vmatprep.subr.mxu1 %v5578_v57  ;;  %v3663_v24 = vadd.f32 %v24543_v21, %v3477_v35  ;;  %v24545_v50 = vld [vmem:[#allocation35_spill] sm:$0xff]  ;;  %v5289_v21 = vsel %vm1534_vm0, %v4035_v38, 0 }
 0x43b   : > { %24533 = vst [vmem:[#allocation87_spill] sm:$0xff] %v19771_v49  ;;  %24535 = vst [vmem:[#allocation89_spill] sm:$0xff] %v19776_v23  ;;  %v19786_v27 = vpop.f32.mrf.mxu1  ;;  %v19817_v11 = vand.u32 4294901760, %v19784_v29  ;;  %v24561_v49 = vld [vmem:[#allocation65_spill] sm:$0xff] }
 0x43c   : > { %v15502_v45 = vpop.f32.mrf.mxu0  ;;  %24537 = vst [vmem:[#allocation67_spill] sm:$0xff] %v19793_v46  ;;  %v3858_v35 = vadd.f32 %v24547_v10, %v3663_v24 }
 0x43d   : > { %v19797_v54 = vadd.f32 %v19666_v17, %v15502_v45  ;;  %15678 = vmatpush3.xpose.msra.mxu0 %v19696_v36  ;;  %15730 = vmatpush3.xpose.msra.mxu1 %v5578_v57  ;;  %v19800_v20 = vpop.f32.mrf.mxu1  ;;  %v19812_v17 = vsub.f32 %v5295_v43, %v19788_v44  ;;  %v5592_v57 = vand.u32 4294901760, %v5591_v8  ;;  %v5598_v45 = vsub.f32 %v19759_v55, %v19793_v46 }
 0x43e   : > { %24540 = vst [vmem:[#allocation90_spill] sm:$0xff] %v19800_v20  ;;  %v19802_v28 = vpop.f32.mrf.mxu0  ;;  %15679 = vmatprep.subr.mxu0 %v19735_v37  ;;  %15731 = vmatprep.subr.mxu1 %v5585_v5  ;;  %24544 = vst [vmem:[#allocation60_spill] sm:$0xff] %v19817_v11  ;;  %v24546_v20 = vld [vmem:[#allocation46_spill] sm:$0xff] }
 0x43f   : > { %24539 = vst [vmem:[#allocation62_spill] sm:$0xff] %v19797_v54  ;;  %24541 = vst [vmem:[#allocation91_spill] sm:$0xff] %v19802_v28  ;;  %v19809_v30 = vpop.f32.mrf.mxu1  ;;  %v3291_v9 = vadd.f32 %v24546_v20, %v24545_v50  ;;  %v5286_v50 = vsel %vm1534_vm0, %v4029_v47, 0  ;;  %v19835_v20 = vsub.f32 %v5292_v26, %v19807_v12  ;;  %v19846_v10 = vand.u32 4294901760, %v19812_v17  ;;  %v24565_v54 = vld [vmem:[#allocation66_spill] sm:$0xff] }
 0x440   : > { %v15505_v1 = vpop.f32.mrf.mxu0  ;;  %v19856_v16 = vand.u32 4294901760, %v5286_v50 }
 0x441   : > { %v19824_v53 = vadd.f32 %v19698_v58, %v15505_v1  ;;  %15680 = vmatpush3.xpose.msra.mxu0 %v19735_v37  ;;  %15732 = vmatpush3.xpose.msra.mxu1 %v5585_v5  ;;  %v19827_v43 = vpop.f32.mrf.mxu1  ;;  %v3463_v41 = vadd.f32 %v24551_v4, %v3291_v9  ;;  %v19839_v58 = vand.u32 4294901760, %v5289_v21  ;;  %v5599_v5 = vand.u32 4294901760, %v5598_v45  ;;  %24553 = vst [vmem:[#allocation57_spill] sm:$0xff] %v19846_v10  ;;  %v24557_v9 = vld [vmem:[#allocation38_spill] sm:$0xff] }
 0x442   : > { %24549 = vst [vmem:[#allocation35_spill] sm:$0xff] %v19827_v43  ;;  %v19829_v8 = vpop.f32.mrf.mxu0  ;;  %15681 = vmatprep.subr.mxu0 %v19754_v61  ;;  %15733 = vmatprep.subr.mxu1 %v5592_v57  ;;  %v5605_v1 = vsub.f32 %v19784_v29, %v19817_v11  ;;  %v24554_v43 = vld [vmem:[#allocation61_spill] sm:$0xff] }
 0x443   : > { %24548 = vst [vmem:[#allocation55_spill] sm:$0xff] %v19824_v53  ;;  %24550 = vst [vmem:[#allocation46_spill] sm:$0xff] %v19829_v8  ;;  %v19837_v38 = vpop.f32.mrf.mxu1  ;;  %v4023_v4 = vadd.f32 %v24554_v43, %v3858_v35  ;;  %v3647_v45 = vadd.f32 %v24557_v9, %v3463_v41  ;;  %v19859_v6 = vsub.f32 %v5289_v21, %v19839_v58  ;;  %v24559_v43 = vld [vmem:[#allocation29_spill] sm:$0xff]  ;;  %v24584_v53 = vld [vmem:[#allocation64_spill] sm:$0xff] }
 0x444   : > { %v19841_v24 = vpop.f32.mrf.mxu0  ;;  %v5606_v31 = vand.u32 4294901760, %v5605_v1  ;;  %v5612_v35 = vsub.f32 %v19812_v17, %v19846_v10  ;;  %v3279_v23 = vadd.f32 %v24560_v52, %v24559_v43  ;;  %v5280_v52 = vsel %vm1534_vm0, %v24565_v54, 0 }
 0x445   : > { %24552 = vst [vmem:[#allocation68_spill] sm:$0xff] %v19841_v24  ;;  %15682 = vmatpush3.xpose.msra.mxu0 %v19754_v61  ;;  %15734 = vmatpush3.xpose.msra.mxu1 %v5592_v57  ;;  %v19853_v47 = vpop.f32.mrf.mxu1  ;;  %v19864_v57 = vand.u32 4294901760, %v19835_v20  ;;  %v5283_v41 = vsel %vm1534_vm0, %v4023_v4, 0  ;;  %v19891_v43 = vand.u32 4294901760, %v19859_v6  ;;  %v19904_v8 = vand.u32 4294901760, %v5280_v52 }
 0x446   : > { %v19850_v26 = vpop.f32.mrf.mxu0  ;;  %15683 = vmatprep.subr.mxu0 %v19788_v44  ;;  %15735 = vmatprep.subr.mxu1 %v5599_v5  ;;  %24556 = vst [vmem:[#allocation92_spill] sm:$0xff] %v19853_v47  ;;  %v3846_v47 = vadd.f32 %v24561_v49, %v3647_v45  ;;  %v3449_v28 = vadd.f32 %v24564_v56, %v3279_v23  ;;  %v5613_v4 = vand.u32 4294901760, %v5612_v35  ;;  %v24568_v56 = vld [vmem:[#allocation59_spill] sm:$0xff] }
 0x447   : > { %24555 = vst [vmem:[#allocation61_spill] sm:$0xff] %v19850_v26  ;;  %24558 = vst [vmem:[#allocation38_spill] sm:$0xff] %v19864_v57  ;;  %v19875_v1 = vpop.f32.mrf.mxu1  ;;  %v19881_v49 = vsub.f32 %v5286_v50, %v19856_v16  ;;  %v5619_v45 = vsub.f32 %v19835_v20, %v19864_v57  ;;  %v24569_v50 = vld [vmem:[#allocation11_spill] sm:$0xff]  ;;  %v24592_v26 = vld [vmem:[#allocation28_spill] sm:$0xff] }
 0x448   : > { %v15551_v32 = vpop.f32.mrf.mxu0  ;;  %24563 = vst [vmem:[#allocation9_spill] sm:$0xff] %v19875_v1  ;;  %24567 = vst [vmem:[#allocation56_spill] sm:$0xff] %v19891_v43  ;;  %v4011_v23 = vadd.f32 %v24568_v56, %v3846_v47  ;;  %v24573_v1 = vld [vmem:[#allocation36_spill] sm:$0xff]  ;;  %v5626_v56 = vsub.f32 %v19859_v6, %v19891_v43  ;;  %v24615_v57 = vld [vmem:[#allocation15_spill] sm:$0xff] }
 0x449   : > { %v4586_v9 = vadd.f32 %v15551_v32, %v19655_v0  ;;  %15684 = vmatpush3.xpose.msra.mxu0 %v19788_v44  ;;  %15736 = vmatpush3.xpose.msra.mxu1 %v5599_v5  ;;  %v19886_v0 = vand.u32 4294901760, %v5283_v41  ;;  %v19901_v35 = vpop.f32.mrf.mxu1  ;;  %v3631_v2 = vadd.f32 %v24573_v1, %v3449_v28  ;;  %24574 = vst [vmem:[#allocation11_spill] sm:$0xff] %v19904_v8 }
 0x44a   : > { %v19872_v21 = vpop.f32.mrf.mxu0  ;;  %15685 = vmatprep.subr.mxu0 %v19807_v12  ;;  %15737 = vmatprep.subr.mxu1 %v5606_v31  ;;  %24572 = vst [vmem:[#allocation59_spill] sm:$0xff] %v19901_v35  ;;  %v5277_v28 = vsel %vm1534_vm0, %v4011_v23, 0 }
 0x44b   : > { %24562 = vst [vmem:[#allocation29_spill] sm:$0xff] %v19872_v21  ;;  %v19884_v32 = vadd.f32 %v19756_v15, %v4586_v9  ;;  %24566 = vst [vmem:[#allocation65_spill] sm:$0xff] %v19886_v0  ;;  %v24570_v15 = vld [vmem:[#allocation13_spill] sm:$0xff]  ;;  %v19927_v35 = vpop.f32.mrf.mxu1 }
 0x44c   : > { %v15554_v5 = vpop.f32.mrf.mxu0  ;;  %v2716_v9 = vadd.f32 %v24570_v15, %v24569_v50  ;;  %v19915_v50 = vand.u32 4294901760, %v19881_v49  ;;  %v24577_v15 = vld [vmem:[#allocation63_spill] sm:$0xff] }
 0x44d   : > { %v4600_v54 = vadd.f32 %v15554_v5, %v19680_v18  ;;  %15686 = vmatpush3.xpose.msra.mxu0 %v19807_v12  ;;  %15738 = vmatpush3.xpose.msra.mxu1 %v5606_v31  ;;  %v19910_v18 = vsub.f32 %v5283_v41, %v19886_v0  ;;  %v5620_v5 = vand.u32 4294901760, %v5619_v45 }
 0x44e   : > { %v19898_v21 = vpop.f32.mrf.mxu0  ;;  %15687 = vmatprep.subr.mxu0 %v19839_v58  ;;  %15739 = vmatprep.subr.mxu1 %v5613_v4  ;;  %24576 = vst [vmem:[#allocation36_spill] sm:$0xff] %v19915_v50 }
 0x44f   : > { %24571 = vst [vmem:[#allocation66_spill] sm:$0xff] %v19898_v21  ;;  %v19907_v47 = vadd.f32 %v19786_v27, %v4600_v54  ;;  %v3834_v21 = vadd.f32 %v24577_v15, %v3631_v2  ;;  %v24578_v27 = vld [vmem:[#allocation42_spill] sm:$0xff]  ;;  %v24579_v54 = vld [vmem:[#allocation52_spill] sm:$0xff]  ;;  %v24582_v2 = vld [vmem:[#allocation43_spill] sm:$0xff] }
 0x450   : > { %v15557_v31 = vpop.f32.mrf.mxu0  ;;  %v5226_v41 = vsel %vm1534_vm0, %v24578_v27, 0  ;;  %v2881_v45 = vadd.f32 %v24579_v54, %v2716_v9  ;;  %24581 = vst [vmem:[#allocation42_spill] sm:$0xff] %v19927_v35  ;;  %v24583_v15 = vld [vmem:[#allocation49_spill] sm:$0xff]  ;;  %v19939_v9 = vand.u32 4294901760, %v5277_v28  ;;  %v5627_v54 = vand.u32 4294901760, %v5626_v56  ;;  %v19954_v56 = vpop.f32.mrf.mxu1 }
 0x451   : > { %24575 = vst [vmem:[#allocation13_spill] sm:$0xff] %v19907_v47  ;;  %v4614_v1 = vadd.f32 %v15557_v31, %v19716_v63  ;;  %15688 = vmatpush3.xpose.msra.mxu0 %v19839_v58  ;;  %15740 = vmatpush3.xpose.msra.mxu1 %v5613_v4  ;;  %v2728_v23 = vadd.f32 %v24583_v15, %v24582_v2  ;;  %v5274_v63 = vsel %vm1534_vm0, %v24584_v53, 0  ;;  %v19944_v35 = vand.u32 4294901760, %v19910_v18  ;;  %v24588_v2 = vld [vmem:[#allocation58_spill] sm:$0xff] }
 0x452   : > { %v19924_v47 = vpop.f32.mrf.mxu0  ;;  %15689 = vmatprep.subr.mxu0 %v19856_v16  ;;  %15741 = vmatprep.subr.mxu1 %v5620_v5  ;;  %v19934_v4 = vsub.f32 %v5280_v52, %v19904_v8  ;;  %24586 = vst [vmem:[#allocation43_spill] sm:$0xff] %v19939_v9  ;;  %v3999_v15 = vadd.f32 %v24588_v2, %v3834_v21  ;;  %v19949_v52 = vand.u32 4294901760, %v5226_v41  ;;  %24590 = vst [vmem:[#allocation58_spill] sm:$0xff] %v19954_v56  ;;  %v24593_v21 = vld [vmem:[#allocation33_spill] sm:$0xff] }
 0x453   : > { %24580 = vst [vmem:[#allocation63_spill] sm:$0xff] %v19924_v47  ;;  %v19937_v31 = vadd.f32 %v19809_v30, %v4614_v1  ;;  %v5633_v47 = vsub.f32 %v19881_v49, %v19915_v50  ;;  %24587 = vst [vmem:[#allocation49_spill] sm:$0xff] %v19944_v35  ;;  %v5229_v30 = vsel %vm1534_vm0, %v2881_v45, 0  ;;  %v2740_v2 = vadd.f32 %v24593_v21, %v24592_v26  ;;  %v24600_v26 = vld [vmem:[#allocation3_spill] sm:$0xff]  ;;  %v24603_v21 = vld [vmem:[#allocation32_spill] sm:$0xff] }
 0x454   : > { %v15560_v27 = vpop.f32.mrf.mxu0  ;;  %v5640_v56 = vsub.f32 %v19910_v18, %v19944_v35  ;;  %v19973_v50 = vand.u32 4294901760, %v19934_v4 }
 0x455   : > { %24585 = vst [vmem:[#allocation52_spill] sm:$0xff] %v19937_v31  ;;  %v4628_v53 = vadd.f32 %v15560_v27, %v19744_v34  ;;  %15690 = vmatpush3.xpose.msra.mxu0 %v19856_v16  ;;  %15742 = vmatpush3.xpose.msra.mxu1 %v5620_v5  ;;  %v24591_v31 = vld [vmem:[#allocation25_spill] sm:$0xff]  ;;  %v19960_v34 = vand.u32 4294901760, %v5274_v63  ;;  %v19966_v27 = vsub.f32 %v5277_v28, %v19939_v9  ;;  %v5232_v28 = vsel %vm1534_vm0, %v24600_v26, 0 }
 0x456   : > { %v19952_v1 = vpop.f32.mrf.mxu0  ;;  %15691 = vmatprep.subr.mxu0 %v19886_v0  ;;  %15743 = vmatprep.subr.mxu1 %v5627_v54  ;;  %v2893_v25 = vadd.f32 %v24591_v31, %v2728_v23  ;;  %24598 = vst [vmem:[#allocation94_spill] sm:$0xff] %v19973_v50  ;;  %v5271_v23 = vsel %vm1534_vm0, %v3999_v15, 0  ;;  %v19982_v31 = vand.u32 4294901760, %v5229_v30 }
 0x457   : > { %24589 = vst [vmem:[#allocation64_spill] sm:$0xff] %v19952_v1  ;;  %24594 = vst [vmem:[#allocation25_spill] sm:$0xff] %v19960_v34  ;;  %v19963_v5 = vadd.f32 %v19837_v38, %v4628_v53  ;;  %v5634_v1 = vand.u32 4294901760, %v5633_v47  ;;  %v19978_v38 = vsub.f32 %v5226_v41, %v19949_v52  ;;  %v19984_v47 = vpop.f32.mrf.mxu1  ;;  %v19994_v35 = vsub.f32 %v5274_v63, %v19960_v34 }
 0x458   : > { %24596 = vst [vmem:[#allocation33_spill] sm:$0xff] %v19966_v27  ;;  %v19968_v45 = vpop.f32.mrf.mxu0  ;;  %24601 = vst [vmem:[#allocation3_spill] sm:$0xff] %v19984_v47  ;;  %v5235_v15 = vsel %vm1534_vm0, %v2893_v25, 0  ;;  %v19996_v26 = vand.u32 4294901760, %v5271_v23  ;;  %v5641_v47 = vand.u32 4294901760, %v5640_v56  ;;  %v20003_v24 = vand.u32 4294901760, %v19966_v27 }
 0x459   : > { %24595 = vst [vmem:[#allocation28_spill] sm:$0xff] %v19963_v5  ;;  %24597 = vst [vmem:[#allocation93_spill] sm:$0xff] %v19968_v45  ;;  %15692 = vmatpush3.xpose.msra.mxu0 %v19886_v0  ;;  %15744 = vmatpush3.xpose.msra.mxu1 %v5627_v54  ;;  %v2905_v5 = vadd.f32 %v24603_v21, %v2740_v2  ;;  %v24604_v54 = vld [vmem:[#allocation50_spill] sm:$0xff]  ;;  %v24605_v45 = vld [vmem:[#allocation45_spill] sm:$0xff]  ;;  %v20005_v25 = vand.u32 4294901760, %v5232_v28  ;;  %v20010_v63 = vsub.f32 %v5229_v30, %v19982_v31  ;;  %v20014_v56 = vpop.f32.mrf.mxu1 }
 0x45a   : > { %24599 = vst [vmem:[#allocation95_spill] sm:$0xff] %v19978_v38  ;;  %v19986_v53 = vpop.f32.mrf.mxu0  ;;  %15693 = vmatprep.subr.mxu0 %v19904_v8  ;;  %15745 = vmatprep.subr.mxu1 %v5634_v1  ;;  %v2752_v41 = vadd.f32 %v24605_v45, %v24604_v54  ;;  %24606 = vst [vmem:[#allocation32_spill] sm:$0xff] %v19994_v35  ;;  %v24610_v45 = vld [vmem:[#allocation30_spill] sm:$0xff]  ;;  %v24614_v2 = vld [vmem:[#allocation31_spill] sm:$0xff]  ;;  %v20026_v10 = vsub.f32 %v5271_v23, %v19996_v26  ;;  %v20033_v11 = vand.u32 4294901760, %v19994_v35 }
 0x45b   : > { %24602 = vst [vmem:[#allocation96_spill] sm:$0xff] %v19986_v53  ;;  %24607 = vst [vmem:[#allocation50_spill] sm:$0xff] %v19996_v26  ;;  %v5647_v53 = vsub.f32 %v19934_v4, %v19973_v50  ;;  %v5238_v21 = vsel %vm1534_vm0, %v24610_v45, 0  ;;  %v5241_v50 = vsel %vm1534_vm0, %v2905_v5, 0  ;;  %v2764_v30 = vadd.f32 %v24615_v57, %v24614_v2  ;;  %v24618_v57 = vld [vmem:[#allocation40_spill] sm:$0xff] }
 0x45c   : > { %v19998_v19 = vpop.f32.mrf.mxu0  ;;  %24609 = vst [vmem:[#allocation97_spill] sm:$0xff] %v20003_v24  ;;  %24611 = vst [vmem:[#allocation30_spill] sm:$0xff] %v20014_v56  ;;  %v20036_v46 = vsub.f32 %v5232_v28, %v20005_v25  ;;  %v20038_v5 = vand.u32 4294901760, %v5238_v21  ;;  %v5244_v23 = vsel %vm1534_vm0, %v24618_v57, 0  ;;  %v5661_v28 = vsub.f32 %v19994_v35, %v20033_v11 }
 0x45d   : > { %24608 = vst [vmem:[#allocation45_spill] sm:$0xff] %v19998_v19  ;;  %15694 = vmatpush3.xpose.msra.mxu0 %v19904_v8  ;;  %15746 = vmatpush3.xpose.msra.mxu1 %v5634_v1  ;;  %v20019_v19 = vand.u32 4294901760, %v5235_v15  ;;  %v24613_v1 = vld [vmem:[#allocation39_spill] sm:$0xff]  ;;  %v5648_v56 = vand.u32 4294901760, %v5647_v53  ;;  %24617 = vst [vmem:[#allocation31_spill] sm:$0xff] %v20033_v11  ;;  %v20045_v53 = vpop.f32.mrf.mxu1  ;;  %v20066_v40 = vand.u32 4294901760, %v20026_v10 }
 0x45e   : > { %v20016_v54 = vpop.f32.mrf.mxu0  ;;  %15695 = vmatprep.subr.mxu0 %v19939_v9  ;;  %15747 = vmatprep.subr.mxu1 %v5641_v47  ;;  %v2917_v43 = vadd.f32 %v24613_v1, %v2752_v41  ;;  %v20043_v41 = vand.u32 4294901760, %v5241_v50  ;;  %24619 = vst [vmem:[#allocation15_spill] sm:$0xff] %v20045_v53  ;;  %v24621_v1 = vand.u32 4294901760, %v19978_v38  ;;  %v24624_v53 = vld [vmem:[#allocation24_spill] sm:$0xff]  ;;  %v5662_v35 = vand.u32 4294901760, %v5661_v28 }
 0x45f   : > { %24612 = vst [vmem:[#allocation98_spill] sm:$0xff] %v20016_v54  ;;  %v5654_v54 = vsub.f32 %v19966_v27, %v20003_v24  ;;  %v2776_v51 = vadd.f32 %v24624_v53, %v24623_v33  ;;  %24626 = vst [vmem:[#allocation37_spill] sm:$0xff] %v20066_v40  ;;  %v20082_v53 = vpop.f32.mrf.mxu1 }
 0x460   : > { %v20028_v45 = vpop.f32.mrf.mxu0  ;;  %v5412_v24 = vsub.f32 %v19978_v38, %v24621_v1  ;;  %v5247_v57 = vsel %vm1534_vm0, %v2917_v43, 0  ;;  %v20069_v1 = vsub.f32 %v5238_v21, %v20038_v5  ;;  %v20076_v33 = vsub.f32 %v5241_v50, %v20043_v41  ;;  %24628 = vst [vmem:[#allocation24_spill] sm:$0xff] %v20082_v53  ;;  %v24631_v38 = vld [vmem:[#allocation48_spill] sm:$0xff] }
 0x461   : > { %24616 = vst [vmem:[#allocation39_spill] sm:$0xff] %v20028_v45  ;;  %15696 = vmatpush3.xpose.msra.mxu0 %v19939_v9  ;;  %15748 = vmatpush3.xpose.msra.mxu1 %v5641_v47  ;;  %v20055_v47 = vsub.f32 %v5235_v15, %v20019_v19  ;;  %v24622_v45 = vld [vmem:[#allocation54_spill] sm:$0xff]  ;;  %v5655_v48 = vand.u32 4294901760, %v5654_v54  ;;  %v20071_v15 = vand.u32 4294901760, %v5244_v23  ;;  %v24627_v54 = vld [vmem:[#allocation7_spill] sm:$0xff]  ;;  %v24630_v21 = vand.u32 4294901760, %v20010_v63 }
 0x462   : > { %v20047_v2 = vpop.f32.mrf.mxu0  ;;  %15697 = vmatprep.subr.mxu0 %v19960_v34  ;;  %15749 = vmatprep.subr.mxu1 %v5648_v56  ;;  %v2929_v22 = vadd.f32 %v24622_v45, %v2764_v30  ;;  %v5250_v30 = vsel %vm1534_vm0, %v24627_v54, 0  ;;  %v20080_v45 = vand.u32 4294901760, %v5247_v57  ;;  %v5413_v43 = vand.u32 4294901760, %v5412_v24  ;;  %v24633_v9 = vld [vmem:[#allocation27_spill] sm:$0xff] }
 0x463   : > { %24620 = vst [vmem:[#allocation40_spill] sm:$0xff] %v20047_v2  ;;  %v2941_v54 = vadd.f32 %v24631_v38, %v2776_v51  ;;  %v20098_v0 = vsub.f32 %v5244_v23, %v20071_v15  ;;  %v20100_v27 = vand.u32 4294901760, %v5250_v30  ;;  %v24634_v38 = vand.u32 4294901760, %v20036_v46 }
 0x464   : > { %v20061_v2 = vpop.f32.mrf.mxu0  ;;  %v5253_v50 = vsel %vm1534_vm0, %v2929_v22, 0  ;;  %v20106_v22 = vsub.f32 %v5247_v57, %v20080_v45 }
 0x465   : > { %24625 = vst [vmem:[#allocation54_spill] sm:$0xff] %v20061_v2  ;;  %15698 = vmatpush3.xpose.msra.mxu0 %v19960_v34  ;;  %15750 = vmatpush3.xpose.msra.mxu1 %v5648_v56  ;;  %v5422_v56 = vsub.f32 %v20010_v63, %v24630_v21  ;;  %v24064_v2 = vand.u32 4294901760, %v20055_v47  ;;  %v24632_v34 = vld [vmem:[#allocation41_spill] sm:$0xff]  ;;  %v5432_v23 = vsub.f32 %v20036_v46, %v24634_v38  ;;  %v5259_v51 = vsel %vm1534_vm0, %v2941_v54, 0 }
 0x466   : > { %v20084_v11 = vpop.f32.mrf.mxu0  ;;  %15699 = vmatprep.subr.mxu0 %v19996_v26  ;;  %15751 = vmatprep.subr.mxu1 %v5655_v48  ;;  %v2788_v8 = vadd.f32 %v24633_v9, %v24632_v34  ;;  %v15647_v9 = vpop.f32.mrf.mxu1  ;;  %v20125_v38 = vsub.f32 %v5250_v30, %v20100_v27  ;;  %v24639_v30 = vld [vmem:[#allocation44_spill] sm:$0xff] }
 0x467   : > { %24629 = vst [vmem:[#allocation7_spill] sm:$0xff] %v20084_v11  ;;  %v5668_v11 = vsub.f32 %v20026_v10, %v20066_v40  ;;  %v5423_v34 = vand.u32 4294901760, %v5422_v56  ;;  %v5442_v57 = vsub.f32 %v20055_v47, %v24064_v2  ;;  %v24636_v56 = vld [vmem:[#allocation53_spill] sm:$0xff]  ;;  %v5433_v54 = vand.u32 4294901760, %v5432_v23 }
 0x468   : > { %v15615_v53 = vpop.f32.mrf.mxu0  ;;  %v2953_v40 = vadd.f32 %v24636_v56, %v2788_v8  ;;  %v24638_v8 = vand.u32 4294901760, %v20076_v33  ;;  %v20143_v56 = vand.u32 4294901760, %v5259_v51 }
 0x469   : > { %v4970_v24 = vadd.f32 %v15615_v53, %v19884_v32  ;;  %15700 = vmatpush3.xpose.msra.mxu0 %v19996_v26  ;;  %15752 = vmatpush3.xpose.msra.mxu1 %v5655_v48  ;;  %v24635_v32 = vld [vmem:[#allocation47_spill] sm:$0xff]  ;;  %v20115_v48 = vand.u32 4294901760, %v5253_v50  ;;  %v5669_v26 = vand.u32 4294901760, %v5668_v11 }
 0x46a   : > { %15753 = vmatprep.subr.mxu1 %v5662_v35  ;;  %15781 = vmatprep.subr.mxu0 %v19674_v13  ;;  %v5256_v53 = vsel %vm1534_vm0, %v24635_v32, 0  ;;  %v24637_v32 = vand.u32 4294901760, %v20069_v1  ;;  %v5462_v11 = vsub.f32 %v20076_v33, %v24638_v8 }
 0x46b   : > { %v20117_v21 = vadd.f32 %v15647_v9, %v4970_v24  ;;  %v5471_v9 = vand.u32 4294901760, %v20098_v0  ;;  %v20131_v28 = vand.u32 4294901760, %v5256_v53 }
 0x46c   : > { %15702 = vmatmul.mubr.f32.vlgmr.msra.gmra.mxu0 %v5413_v43  ;;  %v5452_v24 = vsub.f32 %v20069_v1, %v24637_v32  ;;  %v5481_v43 = vand.u32 4294901760, %v20106_v22  ;;  %v5443_v32 = vand.u32 4294901760, %v5442_v57  ;;  %v20162_v57 = vsub.f32 %v5259_v51, %v20143_v56 }
 0x46d   : > { %15704 = vmatprep.mubr.f32.mxu0 %v5423_v34  ;;  %15754 = vmatpush3.xpose.msra.mxu1 %v5662_v35  ;;  %v20139_v35 = vsub.f32 %v5253_v50, %v20115_v48  ;;  %v5262_v34 = vsel %vm1534_vm0, %v24639_v30, 0  ;;  %v5472_v8 = vsub.f32 %v20098_v0, %v5471_v9  ;;  %v24066_v50 = vand.u32 4294901760, %v20125_v38 }
 0x46e   : > { %15782 = vmatpush3.xpose.msra.mxu0 %v19674_v13  ;;  %15755 = vmatprep.subr.mxu1 %v5669_v26  ;;  %v5265_v13 = vsel %vm1534_vm0, %v2953_v40, 0  ;;  %v5453_v23 = vand.u32 4294901760, %v5452_v24  ;;  %v20152_v2 = vsub.f32 %v5256_v53, %v20131_v28  ;;  %v20154_v30 = vand.u32 4294901760, %v5262_v34  ;;  %v24641_v24 = vld [vmem:[#allocation51_spill] sm:$0xff] }
 0x46f   : > { %15783 = vmatprep.subr.mxu0 %v19686_v3  ;;  %v5463_v40 = vand.u32 4294901760, %v5462_v11  ;;  %v24065_v53 = vand.u32 4294901760, %v20139_v35 }
 0x470   : > { %15705 = vmatmul.mubr.f32.gmra.mxu0 %v5433_v54  ;;  %24640 = vst [vmem:[#allocation48_spill] sm:$0xff] %v20154_v30  ;;  %v5268_v54 = vsel %vm1534_vm0, %v24641_v24, 0  ;;  %v20173_v11 = vsub.f32 %v5262_v34, %v20154_v30  ;;  %v5492_v24 = vsub.f32 %v20125_v38, %v24066_v50 }
 0x471   : > { %15707 = vmatprep.mubr.f32.mxu0 %v5443_v32  ;;  %15756 = vmatpush3.xpose.msra.mxu1 %v5669_v26  ;;  %v5482_v26 = vsub.f32 %v20106_v22, %v5481_v43  ;;  %v20166_v32 = vand.u32 4294901760, %v5265_v13  ;;  %v20175_v51 = vand.u32 4294901760, %v5268_v54 }
 0x472   : > { %15784 = vmatpush3.xpose.msra.mxu0 %v19686_v3  ;;  %15837 = vmatprep.subr.mxu1 %v19659_v60  ;;  %v5473_v3 = vand.u32 4294901760, %v5472_v8  ;;  %v24070_v8 = vand.u32 4294901760, %v20162_v57  ;;  %v24069_v50 = vand.u32 4294901760, %v20173_v11 }
 0x473   : > { %24642 = vst [vmem:[#allocation41_spill] sm:$0xff] %v20166_v32  ;;  %15785 = vmatprep.subr.mxu0 %v19669_v14  ;;  %24643 = vst [vmem:[#allocation27_spill] sm:$0xff] %v20175_v51  ;;  %v5483_v34 = vand.u32 4294901760, %v5482_v26  ;;  %v5493_v26 = vand.u32 4294901760, %v5492_v24 }
 0x474   : > { %15708 = vmatmul.mubr.f32.gmra.mxu0 %v5453_v23  ;;  %15758 = vmatmul.mubr.f32.vlgmr.msra.gmra.mxu1 %v19949_v52  ;;  %v5511_v23 = vand.u32 4294901760, %v20152_v2 }
 0x475   : > { %15710 = vmatprep.mubr.f32.mxu0 %v5463_v40  ;;  %15760 = vmatprep.mubr.f32.mxu1 %v19982_v31  ;;  %v20184_v40 = vsub.f32 %v5265_v13, %v20166_v32  ;;  %v20195_v13 = vsub.f32 %v5268_v54, %v20175_v51  ;;  %v5522_v54 = vsub.f32 %v20162_v57, %v24070_v8  ;;  %v24659_v8 = vld [vmem:[#allocation83_spill] sm:$0xff] }
 0x476   : > { %15786 = vmatpush3.xpose.msra.mxu0 %v19669_v14  ;;  %15838 = vmatpush3.xpose.msra.mxu1 %v19659_v60  ;;  %v5502_v14 = vsub.f32 %v20139_v35, %v24065_v53  ;;  %v5512_v53 = vsub.f32 %v20152_v2, %v5511_v23 }
 0x477   : > { %15787 = vmatprep.subr.mxu0 %v19701_v42  ;;  %15839 = vmatprep.subr.mxu1 %v19676_v62 }
 0x478   : > { %15711 = vmatmul.mubr.f32.gmra.mxu0 %v5473_v3  ;;  %15761 = vmatmul.mubr.f32.gmra.mxu1 %v20005_v25  ;;  %v5503_v3 = vand.u32 4294901760, %v5502_v14  ;;  %v5513_v24 = vand.u32 4294901760, %v5512_v53  ;;  %v24067_v14 = vand.u32 4294901760, %v20195_v13 }
 0x479   : > { %15713 = vmatprep.mubr.f32.mxu0 %v5483_v34  ;;  %15763 = vmatprep.mubr.f32.mxu1 %v20019_v19  ;;  %v5532_v34 = vsub.f32 %v20173_v11, %v24069_v50  ;;  %v24658_v50 = vand.u32 4294901760, %v20010_v63 }
 0x47a   : > { %15788 = vmatpush3.xpose.msra.mxu0 %v19701_v42  ;;  %15840 = vmatpush3.xpose.msra.mxu1 %v19676_v62  ;;  %v24068_v42 = vand.u32 4294901760, %v20184_v40  ;;  %v5552_v53 = vsub.f32 %v20195_v13, %v24067_v14 }
 0x47b   : > { %15789 = vmatprep.subr.mxu0 %v19731_v7  ;;  %15841 = vmatprep.subr.mxu1 %v19651_v59 }
 0x47c   : > { %15714 = vmatmul.mubr.f32.gmra.mxu0 %v5493_v26  ;;  %15764 = vmatmul.mubr.f32.gmra.mxu1 %v20038_v5  ;;  %v5523_v26 = vand.u32 4294901760, %v5522_v54 }
 0x47d   : > { %15716 = vmatprep.mubr.f32.mxu0 %v5503_v3  ;;  %15766 = vmatprep.mubr.f32.mxu1 %v20043_v41  ;;  %v5542_v3 = vsub.f32 %v20184_v40, %v24068_v42 }
 0x47e   : > { %15790 = vmatpush3.xpose.msra.mxu0 %v19731_v7  ;;  %15842 = vmatpush3.xpose.msra.mxu1 %v19651_v59  ;;  %v5533_v7 = vand.u32 4294901760, %v5532_v34 }
 0x47f   : > { %15791 = vmatprep.subr.mxu0 %v19759_v55  ;;  %15843 = vmatprep.subr.mxu1 %v19671_v39  ;;  %v5543_v54 = vand.u32 4294901760, %v5542_v3  ;;  %v24651_v3 = vld [vmem:[#allocation25_spill] sm:$0xff] }
 0x480   : > { %15717 = vmatmul.mubr.f32.gmra.mxu0 %v5513_v24  ;;  %15767 = vmatmul.mubr.f32.gmra.mxu1 %v20071_v15  ;;  %v24644_v24 = vld [vmem:[#allocation34_spill] sm:$0xff] }
 0x481   : > { %15719 = vmatprep.mubr.f32.mxu0 %v5523_v26  ;;  %15769 = vmatprep.mubr.f32.mxu1 %v20080_v45  ;;  %v20281_v26 = vpop.f32.mrf.mxu1 }
 0x482   : > { %15792 = vmatpush3.xpose.msra.mxu0 %v19759_v55  ;;  %15844 = vmatpush3.xpose.msra.mxu1 %v19671_v39  ;;  %v5553_v55 = vand.u32 4294901760, %v5552_v53 }
 0x483   : > { %15793 = vmatprep.subr.mxu0 %v19784_v29  ;;  %15845 = vmatprep.subr.mxu1 %v19696_v36 }
 0x484   : > { %15720 = vmatmul.mubr.f32.gmra.mxu0 %v5533_v7  ;;  %15770 = vmatmul.mubr.f32.gmra.mxu1 %v20100_v27  ;;  %v24652_v7 = vld [vmem:[#allocation77_spill] sm:$0xff] }
 0x485   : > { %15722 = vmatprep.mubr.f32.mxu0 %v5543_v54  ;;  %15772 = vmatprep.mubr.f32.mxu1 %v20115_v48  ;;  %v24653_v54 = vld [vmem:[#allocation95_spill] sm:$0xff] }
 0x486   : > { %15794 = vmatpush3.xpose.msra.mxu0 %v19784_v29  ;;  %15846 = vmatpush3.xpose.msra.mxu1 %v19696_v36  ;;  %v24645_v29 = vand.u32 4294901760, %v24644_v24  ;;  %v24657_v14 = vand.u32 4294901760, %v24653_v54 }
 0x487   : > { %15795 = vmatprep.subr.mxu0 %v19812_v17  ;;  %15847 = vmatprep.subr.mxu1 %v19735_v37 }
 0x488   : > { %15723 = vmatmul.mubr.f32.gmra.mxu0 %v5553_v55  ;;  %15773 = vmatmul.mubr.f32.gmra.mxu1 %v20131_v28  ;;  %v20290_v55 = vpop.f32.mrf.mxu1 }
 0x489   : > { %15775 = vmatprep.mubr.f32.mxu1 %v20143_v56  ;;  %15813 = vmatprep.mubr.f32.mxu0 %v24644_v24  ;;  %v24654_v24 = vld [vmem:[#allocation50_spill] sm:$0xff] }
 0x48a   : > { %15796 = vmatpush3.xpose.msra.mxu0 %v19812_v17  ;;  %15848 = vmatpush3.xpose.msra.mxu1 %v19735_v37  ;;  %v24647_v17 = vld [vmem:[#allocation65_spill] sm:$0xff] }
 0x48b   : > { %15797 = vmatprep.subr.mxu0 %v19835_v20  ;;  %15849 = vmatprep.subr.mxu1 %v19754_v61 }
 0x48c   : > { %15776 = vmatmul.mubr.f32.gmra.mxu1 %v20154_v30  ;;  %v24691_v30 = vld [vmem:[#allocation24_spill] sm:$0xff] }
 0x48d   : > { %15778 = vmatprep.mubr.f32.mxu1 %v20166_v32 }
 0x48e   : > { %15798 = vmatpush3.xpose.msra.mxu0 %v19835_v20  ;;  %15850 = vmatpush3.xpose.msra.mxu1 %v19754_v61  ;;  %v24648_v20 = vld [vmem:[#allocation32_spill] sm:$0xff] }
 0x48f   : > { %15799 = vmatprep.subr.mxu0 %v19859_v6  ;;  %15851 = vmatprep.subr.mxu1 %v19788_v44 }
 0x490   : > { %15779 = vmatmul.mubr.f32.gmra.mxu1 %v20175_v51 }
 0x491   : > { %15869 = vmatprep.mubr.f32.mxu1 %v24645_v29  ;;  %v24655_v29 = vld [vmem:[#allocation78_spill] sm:$0xff] }
 0x492   : > { %15800 = vmatpush3.xpose.msra.mxu0 %v19859_v6  ;;  %15852 = vmatpush3.xpose.msra.mxu1 %v19788_v44  ;;  %v24646_v6 = vld [vmem:[#allocation33_spill] sm:$0xff] }
 0x493   : > { %15801 = vmatprep.subr.mxu0 %v19881_v49  ;;  %15853 = vmatprep.subr.mxu1 %v19807_v12 }
 0x496   : > { %15802 = vmatpush3.xpose.msra.mxu0 %v19881_v49  ;;  %15854 = vmatpush3.xpose.msra.mxu1 %v19807_v12  ;;  %v24649_v49 = vld [vmem:[#allocation11_spill] sm:$0xff] }
 0x497   : > { %15803 = vmatprep.subr.mxu0 %v19910_v18  ;;  %15855 = vmatprep.subr.mxu1 %v19839_v58 }
 0x49a   : > { %15804 = vmatpush3.xpose.msra.mxu0 %v19910_v18  ;;  %15856 = vmatpush3.xpose.msra.mxu1 %v19839_v58  ;;  %v20273_v18 = vpop.f32.mrf.mxu0 }
 0x49b   : > { %15805 = vmatprep.subr.mxu0 %v19934_v4  ;;  %15857 = vmatprep.subr.mxu1 %v19856_v16 }
 0x49c   : > { %v20279_v34 = vpop.f32.mrf.mxu0 }
 0x49e   : > { %15806 = vmatpush3.xpose.msra.mxu0 %v19934_v4  ;;  %15858 = vmatpush3.xpose.msra.mxu1 %v19856_v16  ;;  %v24650_v4 = vld [vmem:[#allocation43_spill] sm:$0xff]  ;;  %v20287_v53 = vpop.f32.mrf.mxu0 }
 0x49f   : > { %15807 = vmatprep.subr.mxu0 %v24646_v6  ;;  %15859 = vmatprep.subr.mxu1 %v24647_v17 }
 0x4a2   : > { %15808 = vmatpush3.xpose.msra.mxu0 %v24646_v6  ;;  %15860 = vmatpush3.xpose.msra.mxu1 %v24647_v17  ;;  %v20300_v6 = vpop.f32.mrf.mxu1 }
 0x4a3   : > { %15809 = vmatprep.subr.mxu0 %v24648_v20  ;;  %15861 = vmatprep.subr.mxu1 %v24649_v49 }
 0x4a4   : > { %v20312_v42 = vpop.f32.mrf.mxu1 }
 0x4a6   : > { %15810 = vmatpush3.xpose.msra.mxu0 %v24648_v20  ;;  %15862 = vmatpush3.xpose.msra.mxu1 %v24649_v49 }
 0x4a7   : > { %15811 = vmatprep.subr.mxu0 %v20026_v10  ;;  %15863 = vmatprep.subr.mxu1 %v24650_v4 }
 0x4aa   : > { %15812 = vmatpush3.xpose.msra.mxu0 %v20026_v10  ;;  %15864 = vmatpush3.xpose.msra.mxu1 %v24650_v4  ;;  %v20296_v10 = vpop.f32.mrf.mxu0 }
 0x4ab   : > { %15865 = vmatprep.subr.mxu1 %v24651_v3  ;;  %15893 = vmatprep.subr.mxu0 %v24652_v7 }
 0x4ac   : > { %v20306_v20 = vpop.f32.mrf.mxu0 }
 0x4ad   : > { %15814 = vmatmul.mubr.f32.vlgmr.msra.gmra.mxu0 %v24653_v54  ;;  %v20326_v54 = vpop.f32.mrf.mxu1 }
 0x4ae   : > { %15816 = vmatprep.mubr.f32.mxu0 %v20010_v63  ;;  %15866 = vmatpush3.xpose.msra.mxu1 %v24651_v3  ;;  %v24661_v63 = vand.u32 4294901760, %v20055_v47 }
 0x4af   : > { %15894 = vmatpush3.xpose.msra.mxu0 %v24652_v7  ;;  %15867 = vmatprep.subr.mxu1 %v24654_v24  ;;  %v24656_v7 = vld [vmem:[#allocation79_spill] sm:$0xff] }
 0x4b0   : > { %15895 = vmatprep.subr.mxu0 %v24655_v29 }
 0x4b1   : > { %15817 = vmatmul.mubr.f32.gmra.mxu0 %v20036_v46 }
 0x4b2   : > { %15819 = vmatprep.mubr.f32.mxu0 %v20055_v47  ;;  %15868 = vmatpush3.xpose.msra.mxu1 %v24654_v24  ;;  %v24664_v47 = vand.u32 4294901760, %v20076_v33 }
 0x4b3   : > { %15896 = vmatpush3.xpose.msra.mxu0 %v24655_v29  ;;  %15949 = vmatprep.subr.mxu1 %v19659_v60  ;;  %v20319_v29 = vpop.f32.mrf.mxu0 }
 0x4b4   : > { %15897 = vmatprep.subr.mxu0 %v24656_v7 }
 0x4b5   : > { %15820 = vmatmul.mubr.f32.gmra.mxu0 %v20069_v1  ;;  %15870 = vmatmul.mubr.f32.vlgmr.msra.gmra.mxu1 %v24657_v14  ;;  %v24660_v14 = vand.u32 4294901760, %v20036_v46  ;;  %v24663_v46 = vand.u32 4294901760, %v20069_v1 }
 0x4b6   : > { %15822 = vmatprep.mubr.f32.mxu0 %v20076_v33  ;;  %15872 = vmatprep.mubr.f32.mxu1 %v24658_v50  ;;  %v24662_v50 = vld [vmem:[#allocation86_spill] sm:$0xff]  ;;  %v24666_v33 = vld [vmem:[#allocation60_spill] sm:$0xff] }
 0x4b7   : > { %15898 = vmatpush3.xpose.msra.mxu0 %v24656_v7  ;;  %15950 = vmatpush3.xpose.msra.mxu1 %v19659_v60  ;;  %v20333_v60 = vpop.f32.mrf.mxu0  ;;  %v20340_v7 = vpop.f32.mrf.mxu1 }
 0x4b8   : > { %15899 = vmatprep.subr.mxu0 %v24659_v8  ;;  %15951 = vmatprep.subr.mxu1 %v19676_v62 }
 0x4b9   : > { %15823 = vmatmul.mubr.f32.gmra.mxu0 %v20098_v0  ;;  %15873 = vmatmul.mubr.f32.gmra.mxu1 %v24660_v14  ;;  %v20354_v1 = vpop.f32.mrf.mxu1  ;;  %v24667_v0 = vand.u32 4294901760, %v20125_v38  ;;  %v24671_v14 = vld [vmem:[#allocation26_spill] sm:$0xff] }
 0x4ba   : > { %15825 = vmatprep.mubr.f32.mxu0 %v20106_v22  ;;  %15875 = vmatprep.mubr.f32.mxu1 %v24661_v63  ;;  %v24668_v22 = vand.u32 4294901760, %v20139_v35  ;;  %v24672_v63 = vld [vmem:[#allocation38_spill] sm:$0xff] }
 0x4bb   : > { %15900 = vmatpush3.xpose.msra.mxu0 %v24659_v8  ;;  %15952 = vmatpush3.xpose.msra.mxu1 %v19676_v62  ;;  %v20347_v62 = vpop.f32.mrf.mxu0  ;;  %v24665_v8 = vld [vmem:[#allocation67_spill] sm:$0xff] }
 0x4bc   : > { %15901 = vmatprep.subr.mxu0 %v24662_v50  ;;  %15953 = vmatprep.subr.mxu1 %v19651_v59 }
 0x4bd   : > { %15826 = vmatmul.mubr.f32.gmra.mxu0 %v20125_v38  ;;  %15876 = vmatmul.mubr.f32.gmra.mxu1 %v24663_v46  ;;  %v24676_v46 = vand.u32 4294901760, %v20195_v13 }
 0x4be   : > { %15828 = vmatprep.mubr.f32.mxu0 %v20139_v35  ;;  %15878 = vmatprep.mubr.f32.mxu1 %v24664_v47  ;;  %v24670_v35 = vand.u32 4294901760, %v20162_v57 }
 0x4bf   : > { %15902 = vmatpush3.xpose.msra.mxu0 %v24662_v50  ;;  %15954 = vmatpush3.xpose.msra.mxu1 %v19651_v59  ;;  %v20361_v59 = vpop.f32.mrf.mxu0 }
 0x4c0   : > { %15903 = vmatprep.subr.mxu0 %v24665_v8  ;;  %15955 = vmatprep.subr.mxu1 %v19671_v39 }
 0x4c1   : > { %15829 = vmatmul.mubr.f32.gmra.mxu0 %v20152_v2  ;;  %15879 = vmatmul.mubr.f32.gmra.mxu1 %v5471_v9  ;;  %v20368_v9 = vpop.f32.mrf.mxu1  ;;  %v24673_v2 = vand.u32 4294901760, %v20173_v11 }
 0x4c2   : > { %15831 = vmatprep.mubr.f32.mxu0 %v20162_v57  ;;  %15881 = vmatprep.mubr.f32.mxu1 %v5481_v43  ;;  %v24669_v43 = vld [vmem:[#allocation57_spill] sm:$0xff]  ;;  %v24674_v57 = vand.u32 4294901760, %v20184_v40 }
 0x4c3   : > { %15904 = vmatpush3.xpose.msra.mxu0 %v24665_v8  ;;  %15956 = vmatpush3.xpose.msra.mxu1 %v19671_v39  ;;  %v20375_v39 = vpop.f32.mrf.mxu0  ;;  %v20382_v38 = vpop.f32.mrf.mxu1  ;;  %v24678_v8 = vld [vmem:[#allocation82_spill] sm:$0xff] }
 0x4c4   : > { %15905 = vmatprep.subr.mxu0 %v24666_v33  ;;  %15957 = vmatprep.subr.mxu1 %v19696_v36 }
 0x4c5   : > { %15832 = vmatmul.mubr.f32.gmra.mxu0 %v20173_v11  ;;  %15882 = vmatmul.mubr.f32.gmra.mxu1 %v24667_v0  ;;  %v24677_v11 = vld [vmem:[#allocation68_spill] sm:$0xff]  ;;  %v24680_v0 = vld [vmem:[#allocation54_spill] sm:$0xff] }
 0x4c6   : > { %15834 = vmatprep.mubr.f32.mxu0 %v20184_v40  ;;  %15884 = vmatprep.mubr.f32.mxu1 %v24668_v22  ;;  %v4499_v40 = vadd.f32 %v24678_v8, %v24677_v11 }
 0x4c7   : > { %15906 = vmatpush3.xpose.msra.mxu0 %v24666_v33  ;;  %15958 = vmatpush3.xpose.msra.mxu1 %v19696_v36  ;;  %v20389_v36 = vpop.f32.mrf.mxu0  ;;  %v24679_v33 = vld [vmem:[#allocation36_spill] sm:$0xff] }
 0x4c8   : > { %15907 = vmatprep.subr.mxu0 %v24669_v43  ;;  %15959 = vmatprep.subr.mxu1 %v19735_v37  ;;  %v4684_v22 = vadd.f32 %v24680_v0, %v4499_v40  ;;  %v24686_v40 = vld [vmem:[#allocation94_spill] sm:$0xff] }
 0x4c9   : > { %15835 = vmatmul.mubr.f32.gmra.mxu0 %v20195_v13  ;;  %15885 = vmatmul.mubr.f32.gmra.mxu1 %v5511_v23  ;;  %v20395_v23 = vpop.f32.mrf.mxu1  ;;  %v15633_v50 = vpop.f32.mrf.mxu0 }
 0x4ca   : > { %15887 = vmatprep.mubr.f32.mxu1 %v24670_v35  ;;  %15925 = vmatprep.mubr.f32.mxu0 %v24671_v14  ;;  %v24681_v35 = vld [vmem:[#allocation49_spill] sm:$0xff] }
 0x4cb   : > { %15908 = vmatpush3.xpose.msra.mxu0 %v24669_v43  ;;  %15960 = vmatpush3.xpose.msra.mxu1 %v19735_v37  ;;  %v24675_v37 = vld [vmem:[#allocation56_spill] sm:$0xff]  ;;  %v20405_v47 = vpop.f32.mrf.mxu1 }
 0x4cc   : > { %15909 = vmatprep.subr.mxu0 %v24672_v63  ;;  %15961 = vmatprep.subr.mxu1 %v19754_v61 }
 0x4cd   : > { %15888 = vmatmul.mubr.f32.gmra.mxu1 %v24673_v2  ;;  %v15665_v13 = vpop.f32.mrf.mxu1  ;;  %v24684_v2 = vld [vmem:[#allocation15_spill] sm:$0xff] }
 0x4ce   : > { %15890 = vmatprep.mubr.f32.mxu1 %v24674_v57  ;;  %v4881_v57 = vadd.f32 %v24684_v2, %v4684_v22 }
 0x4cf   : > { %15910 = vmatpush3.xpose.msra.mxu0 %v24672_v63  ;;  %15962 = vmatpush3.xpose.msra.mxu1 %v19754_v61  ;;  %v5035_v61 = vpop.f32.mrf.mxu0  ;;  %v24683_v63 = vld [vmem:[#allocation84_spill] sm:$0xff] }
 0x4d0   : > { %15911 = vmatprep.subr.mxu0 %v24675_v37  ;;  %15963 = vmatprep.subr.mxu1 %v19788_v44 }
 0x4d1   : > { %15891 = vmatmul.mubr.f32.gmra.mxu1 %v24676_v46  ;;  %v15636_v43 = vpop.f32.mrf.mxu0  ;;  %v24685_v46 = vld [vmem:[#allocation7_spill] sm:$0xff] }
 0x4d2   : > { %15981 = vmatprep.mubr.f32.mxu1 %v24671_v14  ;;  %v24682_v14 = vld [vmem:[#allocation61_spill] sm:$0xff]  ;;  %v5054_v8 = vadd.f32 %v15636_v43, %v4881_v57  ;;  %v24693_v43 = vld [vmem:[#allocation40_spill] sm:$0xff] }
 0x4d3   : > { %15912 = vmatpush3.xpose.msra.mxu0 %v24675_v37  ;;  %15964 = vmatpush3.xpose.msra.mxu1 %v19788_v44  ;;  %v4493_v44 = vadd.f32 %v24683_v63, %v24682_v14  ;;  %v5200_v37 = vpop.f32.mrf.mxu1  ;;  %v5047_v32 = vpop.f32.mrf.mxu0  ;;  %v24689_v14 = vld [vmem:[#allocation46_spill] sm:$0xff]  ;;  %v24690_v63 = vld [vmem:[#allocation80_spill] sm:$0xff] }
 0x4d4   : > { %15913 = vmatprep.subr.mxu0 %v24679_v33  ;;  %15965 = vmatprep.subr.mxu1 %v19807_v12  ;;  %v4481_v22 = vadd.f32 %v24690_v63, %v24689_v14  ;;  %v24699_v14 = vld [vmem:[#allocation91_spill] sm:$0xff] }
 0x4d5   : > { %v4677_v11 = vadd.f32 %v24685_v46, %v4493_v44  ;;  %v15668_v51 = vpop.f32.mrf.mxu1  ;;  %v24694_v46 = vld [vmem:[#allocation3_spill] sm:$0xff] }
 0x4d6   : > { %v5219_v2 = vadd.f32 %v15668_v51, %v5054_v8  ;;  %v24697_v51 = vld [vmem:[#allocation45_spill] sm:$0xff]  ;;  %v24700_v63 = vld [vmem:[#allocation75_spill] sm:$0xff] }
 0x4d7   : > { %15914 = vmatpush3.xpose.msra.mxu0 %v24679_v33  ;;  %15966 = vmatpush3.xpose.msra.mxu1 %v19807_v12  ;;  %v24687_v12 = vld [vmem:[#allocation55_spill] sm:$0xff]  ;;  %v4873_v44 = vadd.f32 %v24691_v30, %v4677_v11  ;;  %v24696_v30 = vld [vmem:[#allocation62_spill] sm:$0xff]  ;;  %v5212_v8 = vpop.f32.mrf.mxu1 }
 0x4d8   : > { %15915 = vmatprep.subr.mxu0 %v24681_v35  ;;  %15967 = vmatprep.subr.mxu1 %v19839_v58  ;;  %v24688_v33 = vld [vmem:[#allocation39_spill] sm:$0xff]  ;;  %v4656_v11 = vadd.f32 %v24697_v51, %v24696_v30  ;;  %v24705_v51 = vld [vmem:[#allocation37_spill] sm:$0xff] }
 0x4d9   : > { %v4670_v0 = vadd.f32 %v24688_v33, %v24687_v12  ;;  %v5048_v57 = vadd.f32 %v5047_v32, %v4873_v44  ;;  %v20438_v33 = vand.u32 4294901760, %v5219_v2  ;;  %v4469_v32 = vadd.f32 %v24700_v63, %v24699_v14  ;;  %v24710_v63 = vld [vmem:[#allocation73_spill] sm:$0xff] }
 0x4db   : > { %15916 = vmatpush3.xpose.msra.mxu0 %v24681_v35  ;;  %15968 = vmatpush3.xpose.msra.mxu1 %v19839_v58  ;;  %v24692_v58 = vld [vmem:[#allocation97_spill] sm:$0xff]  ;;  %v4663_v35 = vadd.f32 %v24693_v43, %v4481_v22  ;;  %v4865_v12 = vadd.f32 %v24694_v46, %v4670_v0  ;;  %24695 = vst [vmem:[#allocation47_spill] sm:$0xff] %v20438_v33  ;;  %v24701_v22 = vld [vmem:[#allocation30_spill] sm:$0xff] }
 0x4dc   : > { %15917 = vmatprep.subr.mxu0 %v24686_v40  ;;  %15969 = vmatprep.subr.mxu1 %v19856_v16  ;;  %v5213_v44 = vadd.f32 %v5212_v8, %v5048_v57  ;;  %v24702_v43 = vld [vmem:[#allocation98_spill] sm:$0xff]  ;;  %v24708_v57 = vld [vmem:[#allocation93_spill] sm:$0xff] }
 0x4dd   : > { %v4857_v0 = vadd.f32 %v24701_v22, %v4663_v35  ;;  %v4649_v46 = vadd.f32 %v24702_v43, %v4469_v32  ;;  %v24707_v35 = vld [vmem:[#allocation87_spill] sm:$0xff] }
 0x4de   : > { %v20458_v14 = vand.u32 4294901760, %v5213_v44  ;;  %v4642_v8 = vadd.f32 %v24708_v57, %v24707_v35  ;;  %v24721_v35 = vld [vmem:[#allocation59_spill] sm:$0xff] }
 0x4df   : > { %15918 = vmatpush3.xpose.msra.mxu0 %v24686_v40  ;;  %15970 = vmatpush3.xpose.msra.mxu1 %v19856_v16  ;;  %v5042_v16 = vadd.f32 %v15633_v50, %v4865_v12  ;;  %v24698_v40 = vld [vmem:[#allocation31_spill] sm:$0xff]  ;;  %v24704_v50 = vld [vmem:[#allocation42_spill] sm:$0xff] }
 0x4e0   : > { %15919 = vmatprep.subr.mxu0 %v24692_v58  ;;  %15971 = vmatprep.subr.mxu1 %v24647_v17  ;;  %v4849_v12 = vadd.f32 %v24704_v50, %v4656_v11  ;;  %24706 = vst [vmem:[#allocation44_spill] sm:$0xff] %v20458_v14  ;;  %v20478_v43 = vsub.f32 %v5213_v44, %v20458_v14 }
 0x4e1   : > { %v5207_v30 = vadd.f32 %v15665_v13, %v5042_v16 }
 0x4e2   : > { %24715 = vst [vmem:[#allocation33_spill] sm:$0xff] %v20478_v43 }
 0x4e3   : > { %15920 = vmatpush3.xpose.msra.mxu0 %v24692_v58  ;;  %15972 = vmatpush3.xpose.msra.mxu1 %v24647_v17  ;;  %v5036_v58 = vadd.f32 %v5035_v61, %v4857_v0  ;;  %v20451_v17 = vsub.f32 %v5219_v2, %v20438_v33  ;;  %v5030_v61 = vadd.f32 %v20375_v39, %v4849_v12  ;;  %v24709_v2 = vld [vmem:[#allocation89_spill] sm:$0xff]  ;;  %v20471_v11 = vand.u32 4294901760, %v5207_v30  ;;  %v24714_v39 = vld [vmem:[#allocation96_spill] sm:$0xff] }
 0x4e4   : > { %15921 = vmatprep.subr.mxu0 %v24698_v40  ;;  %15973 = vmatprep.subr.mxu1 %v24649_v49  ;;  %v4457_v32 = vadd.f32 %v24710_v63, %v24709_v2  ;;  %v24720_v12 = vld [vmem:[#allocation72_spill] sm:$0xff] }
 0x4e5   : > { %24703 = vst [vmem:[#allocation53_spill] sm:$0xff] %v20451_v17  ;;  %v20469_v13 = vand.u32 4294901760, %v20451_v17  ;;  %24713 = vst [vmem:[#allocation34_spill] sm:$0xff] %v20471_v11  ;;  %v20491_v44 = vsub.f32 %v5207_v30, %v20471_v11  ;;  %v24724_v30 = vld [vmem:[#allocation64_spill] sm:$0xff] }
 0x4e6   : > { %v4635_v16 = vadd.f32 %v24714_v39, %v4457_v32 }
 0x4e7   : > { %15922 = vmatpush3.xpose.msra.mxu0 %v24698_v40  ;;  %15974 = vmatpush3.xpose.msra.mxu1 %v24649_v49  ;;  %v24711_v40 = vld [vmem:[#allocation58_spill] sm:$0xff]  ;;  %v5201_v49 = vadd.f32 %v5200_v37, %v5036_v58  ;;  %24712 = vst [vmem:[#allocation51_spill] sm:$0xff] %v20469_v13  ;;  %v24716_v37 = vld [vmem:[#allocation9_spill] sm:$0xff]  ;;  %v7025_v50 = vsub.f32 %v20451_v17, %v20469_v13  ;;  %24718 = vst [vmem:[#allocation32_spill] sm:$0xff] %v20491_v44 }
 0x4e8   : > { %15923 = vmatprep.subr.mxu0 %v24705_v51  ;;  %15975 = vmatprep.subr.mxu1 %v24650_v4  ;;  %v4841_v22 = vadd.f32 %v24711_v40, %v4649_v46  ;;  %v4833_v46 = vadd.f32 %v24716_v37, %v4642_v8  ;;  %v4825_v57 = vadd.f32 %v24721_v35, %v4635_v16  ;;  %v20517_v40 = vand.u32 4294901760, %v20491_v44  ;;  %v24731_v16 = vld [vmem:[#allocation71_spill] sm:$0xff]  ;;  %v24732_v37 = vld [vmem:[#allocation92_spill] sm:$0xff] }
 0x4e9   : > { %v20483_v58 = vand.u32 4294901760, %v5201_v49 }
 0x4ea   : > { %v5024_v0 = vadd.f32 %v20389_v36, %v4841_v22  ;;  %v5018_v36 = vadd.f32 %v20347_v62, %v4833_v46  ;;  %v5012_v2 = vadd.f32 %v20361_v59, %v4825_v57  ;;  %24726 = vst [vmem:[#allocation77_spill] sm:$0xff] %v20517_v40 }
 0x4eb   : > { %15924 = vmatpush3.xpose.msra.mxu0 %v24705_v51  ;;  %15976 = vmatpush3.xpose.msra.mxu1 %v24650_v4  ;;  %v5195_v4 = vadd.f32 %v20395_v23, %v5030_v61  ;;  %24717 = vst [vmem:[#allocation65_spill] sm:$0xff] %v20483_v58  ;;  %v24719_v23 = vld [vmem:[#allocation85_spill] sm:$0xff]  ;;  %v20509_v63 = vsub.f32 %v5201_v49, %v20483_v58  ;;  %v24728_v49 = vld [vmem:[#allocation28_spill] sm:$0xff] }
 0x4ec   : > { %15977 = vmatprep.subr.mxu1 %v24651_v3  ;;  %16005 = vmatprep.subr.mxu0 %v20438_v33  ;;  %v4445_v51 = vadd.f32 %v24720_v12, %v24719_v23  ;;  %v5189_v8 = vadd.f32 %v20405_v47, %v5024_v0  ;;  %v7026_v47 = vand.u32 4294901760, %v7025_v50  ;;  %v5183_v32 = vadd.f32 %v20368_v9, %v5018_v36  ;;  %v24735_v23 = vld [vmem:[#allocation63_spill] sm:$0xff] }
 0x4ed   : > { %v20503_v62 = vand.u32 4294901760, %v5195_v4  ;;  %24725 = vst [vmem:[#allocation25_spill] sm:$0xff] %v20509_v63  ;;  %v5006_v39 = vadd.f32 %v20319_v29, %v24728_v49  ;;  %v5177_v50 = vadd.f32 %v20382_v38, %v5012_v2  ;;  %v20537_v36 = vand.u32 4294901760, %v20509_v63  ;;  %v24743_v49 = vld [vmem:[#allocation66_spill] sm:$0xff] }
 0x4ee   : > { %15926 = vmatmul.mubr.f32.vlgmr.msra.gmra.mxu0 %v19949_v52  ;;  %v4621_v61 = vadd.f32 %v24724_v30, %v4445_v51  ;;  %v20519_v22 = vand.u32 4294901760, %v5189_v8  ;;  %v20539_v29 = vand.u32 4294901760, %v5183_v32  ;;  %v24738_v30 = vld [vmem:[#allocation76_spill] sm:$0xff] }
 0x4ef   : > { %15928 = vmatprep.mubr.f32.mxu0 %v19982_v31  ;;  %15978 = vmatpush3.xpose.msra.mxu1 %v24651_v3  ;;  %v20501_v3 = vand.u32 4294901760, %v20478_v43  ;;  %24723 = vst [vmem:[#allocation43_spill] sm:$0xff] %v20503_v62  ;;  %v20527_v9 = vsub.f32 %v5195_v4, %v20503_v62  ;;  %24733 = vst [vmem:[#allocation78_spill] sm:$0xff] %v20537_v36  ;;  %v7039_v4 = vsub.f32 %v20491_v44, %v20517_v40 }
 0x4f0   : > { %16006 = vmatpush3.msra.mxu0 %v20438_v33  ;;  %15979 = vmatprep.subr.mxu1 %v24654_v24  ;;  %24727 = vst [vmem:[#allocation95_spill] sm:$0xff] %v20519_v22  ;;  %v4809_v46 = vadd.f32 %v24732_v37, %v4621_v61  ;;  %24734 = vst [vmem:[#allocation79_spill] sm:$0xff] %v20539_v29  ;;  %v20548_v51 = vsub.f32 %v5189_v8, %v20519_v22  ;;  %v24739_v61 = vld [vmem:[#allocation70_spill] sm:$0xff]  ;;  %v24741_v8 = vld [vmem:[#allocation52_spill] sm:$0xff] }
 0x4f1   : > { %16007 = vmatprep.subr.mxu0 %v20458_v14  ;;  %24722 = vst [vmem:[#allocation11_spill] sm:$0xff] %v20501_v3  ;;  %v7032_v59 = vsub.f32 %v20478_v43, %v20501_v3  ;;  %24729 = vst [vmem:[#allocation50_spill] sm:$0xff] %v20527_v9  ;;  %v5171_v35 = vadd.f32 %v20340_v7, %v5006_v39  ;;  %v20555_v57 = vand.u32 4294901760, %v20527_v9 }
 0x4f2   : > { %16008 = vmatpush3.msra.mxu0 %v20458_v14  ;;  %v5000_v38 = vadd.f32 %v20333_v60, %v4809_v46  ;;  %24736 = vst [vmem:[#allocation83_spill] sm:$0xff] %v20548_v51  ;;  %v4421_v2 = vadd.f32 %v24739_v61, %v24738_v30  ;;  %v20559_v60 = vand.u32 4294901760, %v5177_v50  ;;  %v4994_v7 = vadd.f32 %v20296_v10, %v24741_v8  ;;  %v24746_v10 = vld [vmem:[#allocation74_spill] sm:$0xff] }
 0x4f3   : > { %15929 = vmatmul.mubr.f32.gmra.mxu0 %v20005_v25  ;;  %16009 = vmatprep.subr.mxu0 %v20471_v11  ;;  %24737 = vst [vmem:[#allocation86_spill] sm:$0xff] %v20555_v57  ;;  %v20576_v37 = vand.u32 4294901760, %v20548_v51 }
 0x4f4   : > { %15931 = vmatprep.mubr.f32.mxu0 %v20019_v19  ;;  %15980 = vmatpush3.xpose.msra.mxu1 %v24654_v24  ;;  %v24730_v24 = vld [vmem:[#allocation81_spill] sm:$0xff]  ;;  %24740 = vst [vmem:[#allocation67_spill] sm:$0xff] %v20559_v60  ;;  %v4593_v39 = vadd.f32 %v24743_v49, %v4421_v2  ;;  %v5159_v30 = vadd.f32 %v20312_v42, %v4994_v7 }
 0x4f5   : > { %16010 = vmatpush3.msra.mxu0 %v20471_v11  ;;  %16061 = vmatprep.subr.mxu1 %v7026_v47  ;;  %v4433_v0 = vadd.f32 %v24731_v16, %v24730_v24  ;;  %v24744_v24 = vld [vmem:[#allocation35_spill] sm:$0xff]  ;;  %24745 = vst [vmem:[#allocation57_spill] sm:$0xff] %v20576_v37  ;;  %v24752_v2 = vld [vmem:[#allocation13_spill] sm:$0xff] }
 0x4f6   : > { %16011 = vmatprep.subr.mxu0 %v20483_v58 }
 0x4f7   : > { %16012 = vmatpush3.msra.mxu0 %v20483_v58  ;;  %15982 = vmatmul.mubr.f32.vlgmr.msra.gmra.mxu1 %v19949_v52  ;;  %v4607_v12 = vadd.f32 %v24735_v23, %v4433_v0  ;;  %v7033_v52 = vand.u32 4294901760, %v7032_v59  ;;  %v20567_v59 = vsub.f32 %v5183_v32, %v20539_v29  ;;  %v5165_v0 = vadd.f32 %v20354_v1, %v5000_v38  ;;  %v24747_v32 = vld [vmem:[#allocation69_spill] sm:$0xff] }
 0x4f8   : > { %15932 = vmatmul.mubr.f32.gmra.mxu0 %v20038_v5  ;;  %16013 = vmatprep.subr.mxu0 %v20503_v62  ;;  %v4409_v46 = vadd.f32 %v24747_v32, %v24746_v10  ;;  %v20580_v23 = vand.u32 4294901760, %v5171_v35  ;;  %v24750_v38 = vld [vmem:[#allocation29_spill] sm:$0xff] }
 0x4f9   : > { %15934 = vmatprep.mubr.f32.mxu0 %v20043_v41  ;;  %15984 = vmatprep.mubr.f32.mxu1 %v19982_v31  ;;  %v7046_v31 = vsub.f32 %v20509_v63, %v20537_v36  ;;  %24742 = vst [vmem:[#allocation60_spill] sm:$0xff] %v20567_v59  ;;  %v4793_v16 = vadd.f32 %v24744_v24, %v4607_v12  ;;  %v20595_v61 = vand.u32 4294901760, %v20567_v59  ;;  %v20600_v49 = vand.u32 4294901760, %v5165_v0  ;;  %v24758_v24 = vld [vmem:[#allocation88_spill] sm:$0xff] }
 0x4fa   : > { %16014 = vmatpush3.msra.mxu0 %v20503_v62  ;;  %16062 = vmatpush3.msra.mxu1 %v7026_v47  ;;  %v7040_v47 = vand.u32 4294901760, %v7039_v4  ;;  %24748 = vst [vmem:[#allocation26_spill] sm:$0xff] %v20580_v23  ;;  %v7053_v4 = vsub.f32 %v20527_v9, %v20555_v57  ;;  %v20587_v12 = vsub.f32 %v5177_v50, %v20559_v60  ;;  %v24753_v50 = vld [vmem:[#allocation90_spill] sm:$0xff] }
 0x4fb   : > { %16015 = vmatprep.subr.mxu0 %v20519_v22  ;;  %16063 = vmatprep.subr.mxu1 %v7033_v52  ;;  %v4988_v1 = vadd.f32 %v20306_v20, %v4793_v16  ;;  %24751 = vst [vmem:[#allocation56_spill] sm:$0xff] %v20595_v61  ;;  %v4982_v20 = vadd.f32 %v20279_v34, %v24752_v2  ;;  %24754 = vst [vmem:[#allocation68_spill] sm:$0xff] %v20600_v49  ;;  %v20666_v2 = vand.u32 4294901760, %v20117_v21 }
 0x4fc   : > { %16016 = vmatpush3.msra.mxu0 %v20519_v22  ;;  %16064 = vmatpush3.msra.mxu1 %v7033_v52  ;;  %24749 = vst [vmem:[#allocation38_spill] sm:$0xff] %v20587_v12  ;;  %v4579_v52 = vadd.f32 %v24750_v38, %v4409_v46  ;;  %v4777_v8 = vadd.f32 %v24753_v50, %v4593_v39  ;;  %v20616_v39 = vand.u32 4294901760, %v5159_v30 }
 0x4fd   : > { %15935 = vmatmul.mubr.f32.gmra.mxu0 %v20071_v15  ;;  %15985 = vmatmul.mubr.f32.gmra.mxu1 %v20005_v25  ;;  %v7047_v25 = vand.u32 4294901760, %v7046_v31  ;;  %v20606_v42 = vsub.f32 %v5171_v35, %v20580_v23  ;;  %v7054_v31 = vand.u32 4294901760, %v7053_v4  ;;  %v5153_v34 = vadd.f32 %v20326_v54, %v4988_v1  ;;  %24768 = vst [vmem:[#allocation80_spill] sm:$0xff] %v20666_v2 }
 0x4fe   : > { %16017 = vmatprep.subr.mxu0 %v20539_v29  ;;  %16065 = vmatprep.subr.mxu1 %v7040_v47  ;;  %v4976_v7 = vadd.f32 %v20287_v53, %v4777_v8  ;;  %24757 = vst [vmem:[#allocation54_spill] sm:$0xff] %v20616_v39  ;;  %v7067_v35 = vsub.f32 %v20567_v59, %v20595_v61 }
 0x4ff   : > { %15937 = vmatprep.mubr.f32.mxu0 %v20080_v45  ;;  %15987 = vmatprep.mubr.f32.mxu1 %v20019_v19  ;;  %v7060_v19 = vsub.f32 %v20548_v51, %v20576_v37  ;;  %24755 = vst [vmem:[#allocation82_spill] sm:$0xff] %v20606_v42  ;;  %v4761_v16 = vadd.f32 %v24758_v24, %v4579_v52  ;;  %v20630_v10 = vand.u32 4294901760, %v20606_v42  ;;  %v20634_v4 = vand.u32 4294901760, %v5153_v34 }
 0x500   : > { %16018 = vmatpush3.msra.mxu0 %v20539_v29  ;;  %16066 = vmatpush3.msra.mxu1 %v7040_v47  ;;  %v20614_v47 = vand.u32 4294901760, %v20587_v12  ;;  %v5147_v53 = vadd.f32 %v20290_v55, %v4982_v20  ;;  %v20624_v54 = vsub.f32 %v5165_v0, %v20600_v49  ;;  %v5141_v46 = vadd.f32 %v20300_v6, %v4976_v7 }
 0x501   : > { %16019 = vmatprep.subr.mxu0 %v20559_v60  ;;  %16067 = vmatprep.subr.mxu1 %v7047_v25  ;;  %24760 = vst [vmem:[#allocation61_spill] sm:$0xff] %v20630_v10  ;;  %v4964_v32 = vadd.f32 %v20273_v18, %v4761_v16  ;;  %24761 = vst [vmem:[#allocation84_spill] sm:$0xff] %v20634_v4  ;;  %v7068_v0 = vand.u32 4294901760, %v7067_v35  ;;  %v7081_v6 = vsub.f32 %v20606_v42, %v20630_v10  ;;  %v24775_v35 = vld [vmem:[#allocation41_spill] sm:$0xff] }
 0x502   : > { %16020 = vmatpush3.msra.mxu0 %v20559_v60  ;;  %16068 = vmatpush3.msra.mxu1 %v7047_v25  ;;  %24756 = vst [vmem:[#allocation36_spill] sm:$0xff] %v20614_v47  ;;  %24759 = vst [vmem:[#allocation49_spill] sm:$0xff] %v20624_v54  ;;  %v7074_v55 = vsub.f32 %v20587_v12, %v20614_v47  ;;  %v20643_v1 = vand.u32 4294901760, %v5147_v53  ;;  %v20648_v18 = vand.u32 4294901760, %v20624_v54  ;;  %v20654_v38 = vand.u32 4294901760, %v5141_v46 }
 0x503   : > { %15938 = vmatmul.mubr.f32.gmra.mxu0 %v20100_v27  ;;  %15988 = vmatmul.mubr.f32.gmra.mxu1 %v20038_v5  ;;  %v7061_v5 = vand.u32 4294901760, %v7060_v19  ;;  %v5129_v25 = vadd.f32 %v20281_v26, %v4964_v32  ;;  %v20657_v52 = vsub.f32 %v5153_v34, %v20634_v4  ;;  %v24772_v19 = vld [vmem:[#allocation48_spill] sm:$0xff]  ;;  %v20690_v34 = vsub.f32 %v20117_v21, %v20666_v2 }
 0x504   : > { %16021 = vmatprep.subr.mxu0 %v20580_v23  ;;  %16069 = vmatprep.subr.mxu1 %v7054_v31  ;;  %24763 = vst [vmem:[#allocation7_spill] sm:$0xff] %v20643_v1  ;;  %24764 = vst [vmem:[#allocation94_spill] sm:$0xff] %v20648_v18  ;;  %v20669_v26 = vsub.f32 %v5147_v53, %v20643_v1  ;;  %v7088_v20 = vsub.f32 %v20624_v54, %v20648_v18 }
 0x505   : > { %15940 = vmatprep.mubr.f32.mxu0 %v20115_v48  ;;  %15990 = vmatprep.mubr.f32.mxu1 %v20043_v41  ;;  %v20640_v41 = vsub.f32 %v5159_v30, %v20616_v39  ;;  %24765 = vst [vmem:[#allocation55_spill] sm:$0xff] %v20654_v38  ;;  %24766 = vst [vmem:[#allocation39_spill] sm:$0xff] %v20657_v52  ;;  %v20675_v50 = vand.u32 4294901760, %v5129_v25  ;;  %v20678_v8 = vsub.f32 %v5141_v46, %v20654_v38 }
 0x506   : > { %16022 = vmatpush3.msra.mxu0 %v20580_v23  ;;  %16070 = vmatpush3.msra.mxu1 %v7054_v31  ;;  %24769 = vst [vmem:[#allocation24_spill] sm:$0xff] %v20669_v26  ;;  %v20683_v31 = vand.u32 4294901760, %v20657_v52  ;;  %24774 = vst [vmem:[#allocation62_spill] sm:$0xff] %v20690_v34  ;;  %v7089_v24 = vand.u32 4294901760, %v7088_v20  ;;  %v20713_v46 = vand.u32 4294901760, %v20690_v34 }
 0x507   : > { %16023 = vmatprep.subr.mxu0 %v20600_v49  ;;  %16071 = vmatprep.subr.mxu1 %v7061_v5  ;;  %24762 = vst [vmem:[#allocation15_spill] sm:$0xff] %v20640_v41  ;;  %v20663_v30 = vand.u32 4294901760, %v20640_v41  ;;  %24770 = vst [vmem:[#allocation97_spill] sm:$0xff] %v20675_v50  ;;  %v20699_v16 = vsub.f32 %v5129_v25, %v20675_v50  ;;  %v20705_v53 = vand.u32 4294901760, %v20678_v8 }
 0x508   : > { %16024 = vmatpush3.msra.mxu0 %v20600_v49  ;;  %16072 = vmatpush3.msra.mxu1 %v7061_v5  ;;  %24771 = vst [vmem:[#allocation40_spill] sm:$0xff] %v20678_v8  ;;  %24773 = vst [vmem:[#allocation3_spill] sm:$0xff] %v20683_v31  ;;  %v7102_v21 = vsub.f32 %v20657_v52, %v20683_v31  ;;  %v24779_v5 = vld [vmem:[#allocation27_spill] sm:$0xff]  ;;  %v7123_v25 = vsub.f32 %v20690_v34, %v20713_v46 }
 0x509   : > { %15941 = vmatmul.mubr.f32.gmra.mxu0 %v20131_v28  ;;  %15991 = vmatmul.mubr.f32.gmra.mxu1 %v20071_v15  ;;  %v7075_v15 = vand.u32 4294901760, %v7074_v55  ;;  %24767 = vst [vmem:[#allocation46_spill] sm:$0xff] %v20663_v30  ;;  %v7095_v7 = vsub.f32 %v20640_v41, %v20663_v30  ;;  %24777 = vst [vmem:[#allocation31_spill] sm:$0xff] %v20699_v16 }
 0x50a   : > { %16025 = vmatprep.subr.mxu0 %v20616_v39  ;;  %16073 = vmatprep.subr.mxu1 %v7068_v0  ;;  %24778 = vst [vmem:[#allocation91_spill] sm:$0xff] %v20705_v53  ;;  %24780 = vst [vmem:[#allocation75_spill] sm:$0xff] %v20713_v46  ;;  %v7103_v55 = vand.u32 4294901760, %v7102_v21  ;;  %v7124_v20 = vand.u32 4294901760, %v7123_v25 }
 0x50b   : > { %15943 = vmatprep.mubr.f32.mxu0 %v20143_v56  ;;  %15993 = vmatprep.mubr.f32.mxu1 %v20080_v45  ;;  %v7082_v45 = vand.u32 4294901760, %v7081_v6  ;;  %v20721_v6 = vand.u32 4294901760, %v20699_v16 }
 0x50c   : > { %16026 = vmatpush3.msra.mxu0 %v20616_v39  ;;  %16074 = vmatpush3.msra.mxu1 %v7068_v0  ;;  %v7116_v0 = vsub.f32 %v20678_v8, %v20705_v53 }
 0x50d   : > { %16027 = vmatprep.subr.mxu0 %v20634_v4  ;;  %16075 = vmatprep.subr.mxu1 %v7075_v15  ;;  %24781 = vst [vmem:[#allocation30_spill] sm:$0xff] %v20721_v6 }
 0x50e   : > { %16028 = vmatpush3.msra.mxu0 %v20634_v4  ;;  %16076 = vmatpush3.msra.mxu1 %v7075_v15  ;;  %v7130_v15 = vsub.f32 %v20699_v16, %v20721_v6 }
 0x50f   : > { %15944 = vmatmul.mubr.f32.gmra.mxu0 %v24772_v19  ;;  %15994 = vmatmul.mubr.f32.gmra.mxu1 %v20100_v27  ;;  %v20695_v27 = vand.u32 4294901760, %v20669_v26 }
 0x510   : > { %16029 = vmatprep.subr.mxu0 %v20643_v1  ;;  %16077 = vmatprep.subr.mxu1 %v7082_v45 }
 0x511   : > { %15946 = vmatprep.mubr.f32.mxu0 %v24775_v35  ;;  %15996 = vmatprep.mubr.f32.mxu1 %v20115_v48  ;;  %24776 = vst [vmem:[#allocation45_spill] sm:$0xff] %v20695_v27  ;;  %v7096_v48 = vand.u32 4294901760, %v7095_v7  ;;  %v7109_v32 = vsub.f32 %v20669_v26, %v20695_v27 }
 0x512   : > { %16030 = vmatpush3.msra.mxu0 %v20643_v1  ;;  %16078 = vmatpush3.msra.mxu1 %v7082_v45  ;;  %v7131_v45 = vand.u32 4294901760, %v7130_v15 }
 0x513   : > { %16031 = vmatprep.subr.mxu0 %v20654_v38  ;;  %16079 = vmatprep.subr.mxu1 %v7089_v24 }
 0x514   : > { %16032 = vmatpush3.msra.mxu0 %v20654_v38  ;;  %16080 = vmatpush3.msra.mxu1 %v7089_v24 }
 0x515   : > { %15947 = vmatmul.mubr.f32.gmra.mxu0 %v24779_v5  ;;  %15997 = vmatmul.mubr.f32.gmra.mxu1 %v20131_v28  ;;  %v7110_v28 = vand.u32 4294901760, %v7109_v32 }
 0x516   : > { %16033 = vmatprep.subr.mxu0 %v20666_v2  ;;  %16081 = vmatprep.subr.mxu1 %v7096_v48 }
 0x517   : > { %15999 = vmatprep.mubr.f32.mxu1 %v20143_v56  ;;  %16034 = vmatpush3.msra.mxu0 %v20666_v2  ;;  %v7117_v56 = vand.u32 4294901760, %v7116_v0 }
 0x518   : > { %16082 = vmatpush3.msra.mxu1 %v7096_v48  ;;  %16035 = vmatprep.subr.mxu0 %v20675_v50 }
 0x519   : > { %16083 = vmatprep.subr.mxu1 %v7103_v55  ;;  %16036 = vmatpush3.msra.mxu0 %v20675_v50 }
 0x51a   : > { %16084 = vmatpush3.msra.mxu1 %v7103_v55  ;;  %16117 = vmatprep.subr.mxu0 %v20451_v17 }
 0x51b   : > { %16000 = vmatmul.mubr.f32.gmra.mxu1 %v24772_v19  ;;  %16085 = vmatprep.subr.mxu1 %v7110_v28 }
 0x51c   : > { %16002 = vmatprep.mubr.f32.mxu1 %v24775_v35  ;;  %16086 = vmatpush3.msra.mxu1 %v7110_v28 }
 0x51d   : > { %16087 = vmatprep.subr.mxu1 %v7117_v56 }
 0x51e   : > { %16088 = vmatpush3.msra.mxu1 %v7117_v56 }
 0x51f   : > { %16003 = vmatmul.mubr.f32.gmra.mxu1 %v24779_v5  ;;  %16089 = vmatprep.subr.mxu1 %v7124_v20 }
 0x520   : > { %16090 = vmatpush3.msra.mxu1 %v7124_v20 }
 0x521   : > { %16091 = vmatprep.subr.mxu1 %v7131_v45 }
 0x522   : > { %16092 = vmatpush3.msra.mxu1 %v7131_v45 }
 0x523   : > { %16173 = vmatprep.subr.mxu1 %v20438_v33 }
 0x52c   : > { %v20734_v19 = vpop.f32.mrf.mxu0 }
 0x52e   : > { %v20736_v7 = vpop.f32.mrf.mxu0 }
 0x530   : > { %v20738_v24 = vpop.f32.mrf.mxu0 }
 0x532   : > { %v20740_v35 = vpop.f32.mrf.mxu0 }
 0x534   : > { %v20742_v21 = vpop.f32.mrf.mxu0  ;;  %v15759_v48 = vpop.f32.mrf.mxu1 }
 0x535   : > { %v5713_v62 = vadd.f32 %v15759_v48, %v20734_v19 }
 0x536   : > { %v20744_v32 = vpop.f32.mrf.mxu0  ;;  %v20746_v5 = vpop.f32.mrf.mxu1 }
 0x537   : > { %v5707_v14 = vadd.f32 %v20746_v5, %v20736_v7 }
 0x538   : > { %v20748_v55 = vpop.f32.mrf.mxu0  ;;  %v20750_v0 = vpop.f32.mrf.mxu1 }
 0x53a   : > { %v20752_v28 = vpop.f32.mrf.mxu0  ;;  %v20754_v25 = vpop.f32.mrf.mxu1 }
 0x53b   : > { %v5719_v19 = vadd.f32 %v20754_v25, %v20740_v35 }
 0x53c   : > { %v15715_v56 = vpop.f32.mrf.mxu0  ;;  %v20756_v15 = vpop.f32.mrf.mxu1 }
 0x53e   : > { %v20758_v20 = vpop.f32.mrf.mxu0  ;;  %v20760_v45 = vpop.f32.mrf.mxu1 }
 0x540   : > { %v15718_v6 = vpop.f32.mrf.mxu0  ;;  %v20762_v46 = vpop.f32.mrf.mxu1 }
 0x542   : > { %v20764_v53 = vpop.f32.mrf.mxu1  ;;  %v20766_v27 = vpop.f32.mrf.mxu0 }
 0x544   : > { %v15771_v31 = vpop.f32.mrf.mxu1  ;;  %v15721_v10 = vpop.f32.mrf.mxu0 }
 0x545   : > { %v20768_v30 = vadd.f32 %v15771_v31, %v15715_v56 }
 0x546   : > { %v20770_v18 = vpop.f32.mrf.mxu1  ;;  %v20776_v57 = vpop.f32.mrf.mxu0 }
 0x548   : > { %v15774_v47 = vpop.f32.mrf.mxu1  ;;  %v15724_v13 = vpop.f32.mrf.mxu0 }
 0x549   : > { %v20772_v61 = vadd.f32 %v15774_v47, %v15718_v6 }
 0x54a   : > { %v20774_v37 = vpop.f32.mrf.mxu1  ;;  %v20784_v31 = vpop.f32.mrf.mxu0 }
 0x54b   : > { %24784 = vst [vmem:[#allocation37_spill] sm:$0xff] %v20784_v31 }
 0x54c   : > { %v15777_v36 = vpop.f32.mrf.mxu1 }
 0x54d   : > { %v20778_v40 = vadd.f32 %v15777_v36, %v15721_v10 }
 0x54e   : > { %v20780_v3 = vpop.f32.mrf.mxu1 }
 0x54f   : > { %24782 = vst [vmem:[#allocation98_spill] sm:$0xff] %v20778_v40 }
 0x550   : > { %v15780_v16 = vpop.f32.mrf.mxu1 }
 0x551   : > { %v20782_v34 = vadd.f32 %v15780_v16, %v15724_v13 }
 0x552   : > { %v20786_v26 = vpop.f32.mrf.mxu1 }
 0x553   : > { %24783 = vst [vmem:[#allocation42_spill] sm:$0xff] %v20782_v34  ;;  %24785 = vst [vmem:[#allocation87_spill] sm:$0xff] %v20786_v26 }
 0x56d   : > { %v15815_v56 = vpop.f32.mrf.mxu0 }
 0x56e   : > { %v5908_v33 = vadd.f32 %v15815_v56, %v5713_v62 }
 0x56f   : > { %v5900_v8 = vpop.f32.mrf.mxu0 }
 0x570   : > { %v5901_v26 = vadd.f32 %v5900_v8, %v5707_v14 }
 0x571   : > { %v15818_v47 = vpop.f32.mrf.mxu0 }
 0x573   : > { %v5914_v50 = vpop.f32.mrf.mxu0 }
 0x574   : > { %v5915_v14 = vadd.f32 %v5914_v50, %v5719_v19 }
 0x575   : > { %v15871_v6 = vpop.f32.mrf.mxu1  ;;  %v15821_v2 = vpop.f32.mrf.mxu0 }
 0x576   : > { %v6103_v31 = vadd.f32 %v15871_v6, %v5908_v33  ;;  %v225_v33 = vld [vmem:[%s23891_s1 + $0x208] sm:$0xff] }
 0x577   : > { %v6094_v52 = vpop.f32.mrf.mxu1  ;;  %v20788_v36 = vpop.f32.mrf.mxu0 }
 0x579   : > { %v15874_v41 = vpop.f32.mrf.mxu1  ;;  %v20790_v38 = vpop.f32.mrf.mxu0 }
 0x57b   : > { %v6110_v10 = vpop.f32.mrf.mxu1  ;;  %v20794_v13 = vpop.f32.mrf.mxu0 }
 0x57d   : > { %v20792_v54 = vpop.f32.mrf.mxu1  ;;  %v20798_v1 = vpop.f32.mrf.mxu0 }
 0x57f   : > { %v20796_v16 = vpop.f32.mrf.mxu1  ;;  %v20802_v4 = vpop.f32.mrf.mxu0 }
 0x581   : > { %v20800_v42 = vpop.f32.mrf.mxu1  ;;  %v20806_v39 = vpop.f32.mrf.mxu0 }
 0x583   : > { %v20804_v12 = vpop.f32.mrf.mxu1  ;;  %v20810_v49 = vpop.f32.mrf.mxu0 }
 0x585   : > { %v20808_v59 = vpop.f32.mrf.mxu1  ;;  %v20814_v23 = vpop.f32.mrf.mxu0 }
 0x586   : > { %24786 = vst [vmem:[#allocation93_spill] sm:$0xff] %v20814_v23 }
 0x587   : > { %v20812_v51 = vpop.f32.mrf.mxu1  ;;  %v20818_v60 = vpop.f32.mrf.mxu0 }
 0x588   : > { %24787 = vst [vmem:[#allocation89_spill] sm:$0xff] %v20818_v60 }
 0x589   : > { %v20816_v9 = vpop.f32.mrf.mxu1  ;;  %v20822_v29 = vpop.f32.mrf.mxu0 }
 0x58a   : > { %24788 = vst [vmem:[#allocation73_spill] sm:$0xff] %v20822_v29 }
 0x58b   : > { %v20820_v63 = vpop.f32.mrf.mxu1  ;;  %v20826_v22 = vpop.f32.mrf.mxu0 }
 0x58c   : > { %24790 = vst [vmem:[#allocation96_spill] sm:$0xff] %v20826_v22  ;;  %v5725_v22 = vadd.f32 %v20750_v0, %v20738_v24 }
 0x58d   : > { %v20824_v44 = vpop.f32.mrf.mxu1 }
 0x58e   : > { %24789 = vst [vmem:[#allocation58_spill] sm:$0xff] %v20824_v44  ;;  %v5922_v48 = vadd.f32 %v15818_v47, %v5725_v22  ;;  %v224_v22 = vld [vmem:[%s23891_s1 + $0x200] sm:$0xff] }
 0x58f   : > { %v20828_v43 = vpop.f32.mrf.mxu1 }
 0x590   : > { %24791 = vst [vmem:[#allocation9_spill] sm:$0xff] %v20828_v43  ;;  %v6095_v43 = vadd.f32 %v6094_v52, %v5901_v26  ;;  %v6119_v8 = vadd.f32 %v15874_v41, %v5922_v48  ;;  %v5731_v52 = vadd.f32 %v20760_v45, %v20744_v32 }
 0x591   : > { %v20831_v11 = vpop.f32.mrf.mxu1 }
 0x592   : > { %24792 = vst [vmem:[#allocation85_spill] sm:$0xff] %v20831_v11 }
 0x593   : > { %v20835_v29 = vpop.f32.mrf.mxu1 }
 0x5ae   : > { %v15927_v17 = vpop.f32.mrf.mxu0 }
 0x5af   : > { %v6340_v60 = vadd.f32 %v15927_v17, %v6103_v31  ;;  %v5737_v17 = vadd.f32 %v20756_v15, %v20742_v21  ;;  %v5929_v15 = vadd.f32 %v20788_v36, %v5731_v52 }
 0x5b0   : > { %v6333_v58 = vpop.f32.mrf.mxu0 }
 0x5b1   : > { %v6334_v11 = vadd.f32 %v6333_v58, %v6095_v43  ;;  %v6111_v43 = vadd.f32 %v6110_v10, %v5915_v14  ;;  %v5936_v50 = vadd.f32 %v15821_v2, %v5737_v17  ;;  %v226_v2 = vld [vmem:[%s23891_s1 + $0x210] sm:$0xff]  ;;  %v6127_v47 = vadd.f32 %v20796_v16, %v5929_v15 }
 0x5b3   : > { %v15930_v34 = vpop.f32.mrf.mxu0  ;;  %v6135_v31 = vadd.f32 %v20792_v54, %v5936_v50  ;;  %v5743_v54 = vadd.f32 %v20764_v53, %v20752_v28 }
 0x5b4   : > { %v6352_v58 = vadd.f32 %v15930_v34, %v6119_v8  ;;  %v227_v34 = vld [vmem:[%s23891_s1 + $0x218] sm:$0xff] }
 0x5b5   : > { %v6345_v44 = vpop.f32.mrf.mxu0  ;;  %v5943_v16 = vadd.f32 %v20794_v13, %v5743_v54 }
 0x5b6   : > { %v6346_v35 = vadd.f32 %v6345_v44, %v6111_v43  ;;  %v5749_v44 = vadd.f32 %v20762_v46, %v20748_v55 }
 0x5b7   : > { %v15983_v23 = vpop.f32.mrf.mxu1 }
 0x5b8   : > { %v15933_v40 = vpop.f32.mrf.mxu0  ;;  %v6517_v7 = vadd.f32 %v15983_v23, %v6340_v60 }
 0x5b9   : > { %v6510_v62 = vpop.f32.mrf.mxu1  ;;  %v6364_v6 = vadd.f32 %v15933_v40, %v6135_v31  ;;  %v229_v40 = vld [vmem:[%s23891_s1 + $0x228] sm:$0xff] }
 0x5ba   : > { %v6605_v5 = vmul.f32 0.17677669, %v6517_v7  ;;  %v6357_v56 = vpop.f32.mrf.mxu0  ;;  %v6511_v24 = vadd.f32 %v6510_v62, %v6334_v11  ;;  %v5950_v7 = vadd.f32 %v20790_v38, %v5749_v44  ;;  %v228_v38 = vld [vmem:[%s23891_s1 + $0x220] sm:$0xff] }
 0x5bb   : > { %v6358_v62 = vadd.f32 %v6357_v56, %v6127_v47 }
 0x5bc   : > { %v6604_v60 = vmul.f32 0.17677669, %v6511_v24  ;;  %v20849_v23 = vadd.f32 %v6605_v5, %v225_v33  ;;  %v6151_v53 = vadd.f32 %v20800_v42, %v5950_v7  ;;  %v6143_v5 = vadd.f32 %v20804_v12, %v5943_v16  ;;  %v231_v12 = vld [vmem:[%s23891_s1 + $0x238] sm:$0xff] }
 0x5bd   : > { %v15936_v26 = vpop.f32.mrf.mxu0  ;;  %v15986_v41 = vpop.f32.mrf.mxu1  ;;  %v5964_v42 = vadd.f32 %v20798_v1, %v20768_v30  ;;  %v230_v30 = vld [vmem:[%s23891_s1 + $0x230] sm:$0xff]  ;;  %v24794_v7 = vld [vmem:[#allocation93_spill] sm:$0xff] }
 0x5be   : > { %v6529_v11 = vadd.f32 %v15986_v41, %v6352_v58  ;;  %6638 = vmax.xlane.f32.xlu1 %v20849_v23  ;;  %v20854_v21 = vadd.f32 %v6604_v60, %v224_v22  ;;  %v6376_v56 = vadd.f32 %v15936_v26, %v6151_v53  ;;  %v5755_v22 = vadd.f32 %v20770_v18, %v20758_v20  ;;  %v24795_v16 = vld [vmem:[#allocation89_spill] sm:$0xff] }
 0x5bf   : > { %v6369_v0 = vpop.f32.mrf.mxu0  ;;  %v6522_v25 = vpop.f32.mrf.mxu1  ;;  %v6167_v18 = vadd.f32 %v20808_v59, %v5964_v42  ;;  %v5978_v59 = vadd.f32 %v20806_v39, %v20772_v61  ;;  %v232_v61 = vld [vmem:[%s23891_s1 + $0x240] sm:$0xff]  ;;  %v234_v42 = vld [vmem:[%s23891_s1 + $0x250] sm:$0xff] }
 0x5c0   : > { %v6607_v32 = vmul.f32 0.17677669, %v6529_v11  ;;  %v6523_v45 = vadd.f32 %v6522_v25, %v6346_v35  ;;  %6636 = vmax.xlane.f32.xlu0 %v20854_v21  ;;  %v6370_v58 = vadd.f32 %v6369_v0, %v6143_v5  ;;  %v5957_v26 = vadd.f32 %v20802_v4, %v5755_v22  ;;  %v24798_v5 = vld [vmem:[#allocation87_spill] sm:$0xff]  ;;  %v24800_v22 = vld [vmem:[#allocation73_spill] sm:$0xff] }
 0x5c1   : > { %v5767_v4 = vadd.f32 %v20774_v37, %v20766_v27  ;;  %v6183_v37 = vadd.f32 %v20816_v9, %v5978_v59  ;;  %v24793_v9 = vld [vmem:[#allocation98_spill] sm:$0xff]  ;;  %v237_v59 = vld [vmem:[%s23891_s1 + $0x268] sm:$0xff] }
 0x5c2   : > { %v6606_v10 = vmul.f32 0.17677669, %v6523_v45  ;;  %v20868_v19 = vadd.f32 %v6607_v32, %v227_v34  ;;  %v6159_v35 = vadd.f32 %v20812_v51, %v5957_v26  ;;  %v233_v51 = vld [vmem:[%s23891_s1 + $0x248] sm:$0xff] }
 0x5c3   : > { %v15939_v36 = vpop.f32.mrf.mxu0  ;;  %v15989_v48 = vpop.f32.mrf.mxu1 }
 0x5c4   : > { %v6541_v33 = vadd.f32 %v15989_v48, %v6364_v6  ;;  %6642 = vmax.xlane.f32.xlu1 %v20868_v19  ;;  %v20874_v46 = vadd.f32 %v6606_v10, %v226_v2  ;;  %v6388_v11 = vadd.f32 %v15939_v36, %v6167_v18  ;;  %v5971_v2 = vadd.f32 %v20810_v49, %v5767_v4  ;;  %v24802_v18 = vld [vmem:[#allocation96_spill] sm:$0xff] }
 0x5c5   : > { %v6381_v55 = vpop.f32.mrf.mxu0  ;;  %v6534_v14 = vpop.f32.mrf.mxu1  ;;  %v5779_v36 = vadd.f32 %v20780_v3, %v20776_v57 }
 0x5c6   : > { %v6609_v28 = vmul.f32 0.17677669, %v6541_v33  ;;  %v6535_v8 = vadd.f32 %v6534_v14, %v6358_v62  ;;  %6640 = vmax.xlane.f32.xlu0 %v20874_v46  ;;  %v6382_v15 = vadd.f32 %v6381_v55, %v6159_v35  ;;  %v6175_v39 = vadd.f32 %v20820_v63, %v5971_v2  ;;  %v235_v63 = vld [vmem:[%s23891_s1 + $0x258] sm:$0xff]  ;;  %v236_v2 = vld [vmem:[%s23891_s1 + $0x260] sm:$0xff] }
 0x5c7   : > { %v5992_v62 = vadd.f32 %v24794_v7, %v24793_v9  ;;  %v5985_v53 = vadd.f32 %v24795_v16, %v5779_v36 }
 0x5c8   : > { %v6608_v24 = vmul.f32 0.17677669, %v6535_v8  ;;  %v20886_v17 = vadd.f32 %v6609_v28, %v229_v40  ;;  %v24796_v28 = vld [vmem:[#allocation58_spill] sm:$0xff] }
 0x5c9   : > { %v15942_v13 = vpop.f32.mrf.mxu0  ;;  %v15992_v43 = vpop.f32.mrf.mxu1  ;;  %v6199_v3 = vadd.f32 %v24796_v28, %v5992_v62 }
 0x5ca   : > { %v6553_v60 = vadd.f32 %v15992_v43, %v6376_v56  ;;  %6646 = vmax.xlane.f32.xlu1 %v20886_v17  ;;  %v20893_v52 = vadd.f32 %v6608_v24, %v228_v38  ;;  %v6400_v6 = vadd.f32 %v15942_v13, %v6183_v37  ;;  %v24797_v38 = vld [vmem:[#allocation37_spill] sm:$0xff]  ;;  %v24799_v24 = vld [vmem:[#allocation42_spill] sm:$0xff] }
 0x5cb   : > { %v6546_v41 = vpop.f32.mrf.mxu1  ;;  %v6393_v1 = vpop.f32.mrf.mxu0  ;;  %v5791_v56 = vadd.f32 %v24798_v5, %v24797_v38  ;;  %v6006_v13 = vadd.f32 %v24800_v22, %v24799_v24 }
 0x5cc   : > { %v6611_v20 = vmul.f32 0.17677669, %v6553_v60  ;;  %v6547_v50 = vadd.f32 %v6546_v41, %v6370_v58  ;;  %6644 = vmax.xlane.f32.xlu0 %v20893_v52  ;;  %v6394_v33 = vadd.f32 %v6393_v1, %v6175_v39  ;;  %v24801_v58 = vld [vmem:[#allocation9_spill] sm:$0xff] }
 0x5cd   : > { %v6191_v60 = vadd.f32 %v24801_v58, %v5985_v53  ;;  %v24803_v1 = vld [vmem:[#allocation85_spill] sm:$0xff] }
 0x5ce   : > { %v6610_v0 = vmul.f32 0.17677669, %v6547_v50  ;;  %v20905_v25 = vadd.f32 %v6611_v20, %v231_v12  ;;  %v5999_v20 = vadd.f32 %v24802_v18, %v5791_v56 }
 0x5cf   : > { %v15995_v34 = vpop.f32.mrf.mxu1  ;;  %v15945_v45 = vpop.f32.mrf.mxu0 }
 0x5d0   : > { %v6565_v31 = vadd.f32 %v15995_v34, %v6388_v11  ;;  %6650 = vmax.xlane.f32.xlu1 %v20905_v25  ;;  %v20912_v32 = vadd.f32 %v6610_v0, %v230_v30  ;;  %v6412_v41 = vadd.f32 %v15945_v45, %v6199_v3  ;;  %v6215_v30 = vadd.f32 %v24803_v1, %v6006_v13 }
 0x5d1   : > { %v6558_v44 = vpop.f32.mrf.mxu1  ;;  %v6405_v49 = vpop.f32.mrf.mxu0 }
 0x5d2   : > { %v6613_v27 = vmul.f32 0.17677669, %v6565_v31  ;;  %v6559_v47 = vadd.f32 %v6558_v44, %v6382_v15  ;;  %6648 = vmax.xlane.f32.xlu0 %v20912_v32  ;;  %v6406_v35 = vadd.f32 %v6405_v49, %v6191_v60  ;;  %v6207_v15 = vadd.f32 %v20835_v29, %v5999_v20  ;;  %v239_v29 = vld [vmem:[%s23891_s1 + $0x278] sm:$0xff]  ;;  %v238_v49 = vld [vmem:[%s23891_s1 + $0x270] sm:$0xff] }
 0x5d4   : > { %v6612_v10 = vmul.f32 0.17677669, %v6559_v47  ;;  %v20924_v54 = vadd.f32 %v6613_v27, %v233_v51 }
 0x5d5   : > { %v15998_v48 = vpop.f32.mrf.mxu1  ;;  %v15948_v43 = vpop.f32.mrf.mxu0 }
 0x5d6   : > { %v6577_v55 = vadd.f32 %v15998_v48, %v6400_v6  ;;  %6654 = vmax.xlane.f32.xlu1 %v20924_v54  ;;  %v20931_v14 = vadd.f32 %v6612_v10, %v232_v61  ;;  %v6424_v31 = vadd.f32 %v15948_v43, %v6215_v30 }
 0x5d7   : > { %v6570_v40 = vpop.f32.mrf.mxu1  ;;  %v6417_v4 = vpop.f32.mrf.mxu0 }
 0x5d8   : > { %v6615_v57 = vmul.f32 0.17677669, %v6577_v55  ;;  %v6571_v8 = vadd.f32 %v6570_v40, %v6394_v33  ;;  %6652 = vmax.xlane.f32.xlu0 %v20931_v14  ;;  %v6418_v37 = vadd.f32 %v6417_v4, %v6207_v15 }
 0x5da   : > { %v6614_v12 = vmul.f32 0.17677669, %v6571_v8  ;;  %v20947_v26 = vadd.f32 %v6615_v57, %v235_v63 }
 0x5db   : > { %v16001_v50 = vpop.f32.mrf.mxu1 }
 0x5dc   : > { %v6589_v11 = vadd.f32 %v16001_v50, %v6412_v41  ;;  %6658 = vmax.xlane.f32.xlu1 %v20947_v26  ;;  %v20952_v0 = vadd.f32 %v6614_v12, %v234_v42 }
 0x5dd   : > { %v6582_v34 = vpop.f32.mrf.mxu1 }
 0x5de   : > { %v6617_v45 = vmul.f32 0.17677669, %v6589_v11  ;;  %v6583_v44 = vadd.f32 %v6582_v34, %v6406_v35  ;;  %6656 = vmax.xlane.f32.xlu0 %v20952_v0 }
 0x5df   : > { %v16004_v51 = vpop.f32.mrf.mxu1 }
 0x5e0   : > { %v6616_v27 = vmul.f32 0.17677669, %v6583_v44  ;;  %v6601_v47 = vadd.f32 %v16004_v51, %v6424_v31  ;;  %v20962_v61 = vadd.f32 %v6617_v45, %v237_v59 }
 0x5e1   : > { %v6594_v39 = vpop.f32.mrf.mxu1 }
 0x5e2   : > { %v6619_v6 = vmul.f32 0.17677669, %v6601_v47  ;;  %v6595_v10 = vadd.f32 %v6594_v39, %v6418_v37  ;;  %6662 = vmax.xlane.f32.xlu1 %v20962_v61  ;;  %v20968_v36 = vadd.f32 %v6616_v27, %v236_v2 }
 0x5e4   : > { %v6618_v48 = vmul.f32 0.17677669, %v6595_v10  ;;  %6660 = vmax.xlane.f32.xlu0 %v20968_v36  ;;  %v20974_v9 = vadd.f32 %v6619_v6, %v239_v29 }
 0x5e6   : > { %6666 = vmax.xlane.f32.xlu1 %v20974_v9  ;;  %v20977_v7 = vadd.f32 %v6618_v48, %v238_v49 }
 0x5e8   : > { %6664 = vmax.xlane.f32.xlu0 %v20977_v7 }
 0x647   : > { %v6639_v62 = vpop.xlane.xlu1 %6638 }
 0x648   : > { %v6669_v33 = vsub.f32 %v20849_v23, %v6639_v62 }
 0x649   : > { %v6637_v55 = vpop.xlane.xlu0 %6636 }
 0x64a   : > { %v6686_v40 = vmul.f32 1.442695, %v6669_v33  ;;  %v6668_v63 = vsub.f32 %v20854_v21, %v6637_v55 }
 0x64c   : > { %17283 = vpow2.f32 %v6686_v40  ;;  %v6684_v16 = vmul.f32 1.442695, %v6668_v63 }
 0x64d   : > { %v6643_v53 = vpop.xlane.xlu1 %6642 }
 0x64e   : > { %17285 = vpow2.f32 %v6684_v16  ;;  %v6671_v28 = vsub.f32 %v20868_v19, %v6643_v53 }
 0x64f   : > { %v6641_v3 = vpop.xlane.xlu0 %6640 }
 0x650   : > { %v6690_v57 = vmul.f32 1.442695, %v6671_v28  ;;  %v6670_v8 = vsub.f32 %v20874_v46, %v6641_v3 }
 0x652   : > { %17287 = vpow2.f32 %v6690_v57  ;;  %v6688_v38 = vmul.f32 1.442695, %v6670_v8 }
 0x653   : > { %v6647_v5 = vpop.xlane.xlu1 %6646 }
 0x654   : > { %17289 = vpow2.f32 %v6688_v38  ;;  %v6673_v23 = vsub.f32 %v20886_v17, %v6647_v5 }
 0x655   : > { %v6645_v56 = vpop.xlane.xlu0 %6644 }
 0x656   : > { %v6694_v24 = vmul.f32 1.442695, %v6673_v23  ;;  %v6672_v21 = vsub.f32 %v20893_v52, %v6645_v56 }
 0x658   : > { %17291 = vpow2.f32 %v6694_v24  ;;  %v6692_v22 = vmul.f32 1.442695, %v6672_v21 }
 0x659   : > { %v20986_v13 = vpop.eup %17283  ;;  %v6651_v43 = vpop.xlane.xlu1 %6650 }
 0x65a   : > { %17293 = vpow2.f32 %v6692_v22  ;;  %v6675_v19 = vsub.f32 %v20905_v25, %v6651_v43  ;;  %6718 = vadd.xlane.f32.xlu1 %v20986_v13 }
 0x65b   : > { %v20990_v46 = vpop.eup %17285  ;;  %v6649_v42 = vpop.xlane.xlu0 %6648 }
 0x65c   : > { %v6698_v58 = vmul.f32 1.442695, %v6675_v19  ;;  %v6674_v17 = vsub.f32 %v20912_v32, %v6649_v42  ;;  %6716 = vadd.xlane.f32.xlu0 %v20990_v46  ;;  %v24804_v19 = vld [vmem:[#allocation47_spill] sm:$0xff] }
 0x65e   : > { %17295 = vpow2.f32 %v6698_v58  ;;  %v6696_v52 = vmul.f32 1.442695, %v6674_v17 }
 0x65f   : > { %v20994_v60 = vpop.eup %17287  ;;  %v6655_v41 = vpop.xlane.xlu1 %6654 }
 0x660   : > { %17297 = vpow2.f32 %v6696_v52  ;;  %v6677_v12 = vsub.f32 %v20924_v54, %v6655_v41  ;;  %6722 = vadd.xlane.f32.xlu1 %v20994_v60  ;;  %v24805_v52 = vld [vmem:[#allocation44_spill] sm:$0xff] }
 0x661   : > { %v20998_v25 = vpop.eup %17289  ;;  %v6653_v18 = vpop.xlane.xlu0 %6652 }
 0x662   : > { %v6702_v20 = vmul.f32 1.442695, %v6677_v12  ;;  %v6676_v50 = vsub.f32 %v20931_v14, %v6653_v18  ;;  %6720 = vadd.xlane.f32.xlu0 %v20998_v25 }
 0x664   : > { %17299 = vpow2.f32 %v6702_v20  ;;  %v6700_v32 = vmul.f32 1.442695, %v6676_v50  ;;  %v24806_v50 = vld [vmem:[#allocation34_spill] sm:$0xff] }
 0x665   : > { %v21002_v1 = vpop.eup %17291  ;;  %v6659_v30 = vpop.xlane.xlu1 %6658 }
 0x666   : > { %17301 = vpow2.f32 %v6700_v32  ;;  %v6679_v35 = vsub.f32 %v20947_v26, %v6659_v30  ;;  %6726 = vadd.xlane.f32.xlu1 %v21002_v1 }
 0x667   : > { %v21006_v54 = vpop.eup %17293  ;;  %v6657_v11 = vpop.xlane.xlu0 %6656 }
 0x668   : > { %v6706_v4 = vmul.f32 1.442695, %v6679_v35  ;;  %v6678_v34 = vsub.f32 %v20952_v0, %v6657_v11  ;;  %6724 = vadd.xlane.f32.xlu0 %v21006_v54 }
 0x66a   : > { %17303 = vpow2.f32 %v6706_v4  ;;  %v6704_v14 = vmul.f32 1.442695, %v6678_v34  ;;  %v24807_v4 = vld [vmem:[#allocation65_spill] sm:$0xff] }
 0x66b   : > { %v21010_v59 = vpop.eup %17295  ;;  %v6663_v15 = vpop.xlane.xlu1 %6662 }
 0x66c   : > { %17305 = vpow2.f32 %v6704_v14  ;;  %v6681_v31 = vsub.f32 %v20962_v61, %v6663_v15  ;;  %6730 = vadd.xlane.f32.xlu1 %v21010_v59 }
 0x66d   : > { %v21014_v26 = vpop.eup %17297  ;;  %v6661_v45 = vpop.xlane.xlu0 %6660 }
 0x66e   : > { %v6710_v44 = vmul.f32 1.442695, %v6681_v31  ;;  %v6680_v51 = vsub.f32 %v20968_v36, %v6661_v45  ;;  %6728 = vadd.xlane.f32.xlu0 %v21014_v26 }
 0x66f   : > { %v6667_v0 = vpop.xlane.xlu1 %6666 }
 0x670   : > { %17307 = vpow2.f32 %v6710_v44  ;;  %v6708_v2 = vmul.f32 1.442695, %v6680_v51  ;;  %v6683_v37 = vsub.f32 %v20974_v9, %v6667_v0  ;;  %v24808_v44 = vld [vmem:[#allocation43_spill] sm:$0xff] }
 0x671   : > { %v21019_v27 = vpop.eup %17299  ;;  %v6665_v47 = vpop.xlane.xlu0 %6664 }
 0x672   : > { %17309 = vpow2.f32 %v6708_v2  ;;  %v6714_v61 = vmul.f32 1.442695, %v6683_v37  ;;  %v6682_v39 = vsub.f32 %v20977_v7, %v6665_v47  ;;  %6734 = vadd.xlane.f32.xlu1 %v21019_v27  ;;  %v24809_v37 = vld [vmem:[#allocation53_spill] sm:$0xff] }
 0x673   : > { %v21023_v29 = vpop.eup %17301 }
 0x674   : > { %17311 = vpow2.f32 %v6714_v61  ;;  %v6712_v6 = vmul.f32 1.442695, %v6682_v39  ;;  %6732 = vadd.xlane.f32.xlu0 %v21023_v29  ;;  %v24810_v39 = vld [vmem:[#allocation33_spill] sm:$0xff] }
 0x676   : > { %17313 = vpow2.f32 %v6712_v6  ;;  %v24811_v6 = vld [vmem:[#allocation95_spill] sm:$0xff] }
 0x677   : > { %v21026_v10 = vpop.eup %17303 }
 0x678   : > { %6738 = vadd.xlane.f32.xlu1 %v21026_v10 }
 0x679   : > { %v21029_v36 = vpop.eup %17305 }
 0x67a   : > { %6736 = vadd.xlane.f32.xlu0 %v21029_v36 }
 0x67d   : > { %v21032_v49 = vpop.eup %17307 }
 0x67e   : > { %6742 = vadd.xlane.f32.xlu1 %v21032_v49 }
 0x67f   : > { %v21035_v48 = vpop.eup %17309 }
 0x680   : > { %6740 = vadd.xlane.f32.xlu0 %v21035_v48 }
 0x681   : > { %v21038_v9 = vpop.eup %17311 }
 0x682   : > { %6746 = vadd.xlane.f32.xlu1 %v21038_v9 }
 0x683   : > { %v21041_v7 = vpop.eup %17313 }
 0x684   : > { %6744 = vadd.xlane.f32.xlu0 %v21041_v7 }
 0x6e3   : > { %v6719_v62 = vpop.xlane.xlu1 %6718 }
 0x6e4   : > { %17315 = vrcp.f32 %v6719_v62 }
 0x6e5   : > { %v6717_v33 = vpop.xlane.xlu0 %6716 }
 0x6e6   : > { %17317 = vrcp.f32 %v6717_v33 }
 0x6e9   : > { %v6723_v55 = vpop.xlane.xlu1 %6722 }
 0x6ea   : > { %17319 = vrcp.f32 %v6723_v55 }
 0x6eb   : > { %v6721_v40 = vpop.xlane.xlu0 %6720 }
 0x6ec   : > { %17321 = vrcp.f32 %v6721_v40 }
 0x6ef   : > { %v6727_v63 = vpop.xlane.xlu1 %6726 }
 0x6f0   : > { %17323 = vrcp.f32 %v6727_v63  ;;  %v24812_v63 = vld [vmem:[#allocation32_spill] sm:$0xff] }
 0x6f1   : > { %v17316_v16 = vpop.eup %17315  ;;  %v6725_v53 = vpop.xlane.xlu0 %6724 }
 0x6f2   : > { %v6751_v28 = vmul.f32 %v17316_v16, %v20986_v13  ;;  %17325 = vrcp.f32 %v6725_v53 }
 0x6f3   : > { %v17318_v3 = vpop.eup %17317 }
 0x6f4   : > { %v21045_v57 = vand.u32 4294901760, %v6751_v28  ;;  %v6749_v8 = vmul.f32 %v17318_v3, %v20990_v46 }
 0x6f5   : > { %v6731_v38 = vpop.xlane.xlu1 %6730 }
 0x6f6   : > { %v21049_v5 = vsub.f32 %v6751_v28, %v21045_v57  ;;  %17327 = vrcp.f32 %v6731_v38  ;;  %v21051_v23 = vand.u32 4294901760, %v6749_v8  ;;  %v24813_v38 = vld [vmem:[#allocation79_spill] sm:$0xff] }
 0x6f7   : > { %v17320_v56 = vpop.eup %17319  ;;  %v6729_v24 = vpop.xlane.xlu0 %6728 }
 0x6f8   : > { %17329 = vrcp.f32 %v6729_v24  ;;  %16093 = vmatprep.mubr.f32.mxu1 %v21051_v23  ;;  %v6755_v21 = vmul.f32 %v17320_v56, %v20994_v60  ;;  %v21056_v22 = vsub.f32 %v6749_v8, %v21051_v23  ;;  %v6873_v13 = vand.u32 4294901760, %v21049_v5 }
 0x6f9   : > { %v17322_v43 = vpop.eup %17321  ;;  %16094 = vmatmul.mubr.f32.vlgmr.msra.gmra.mxu1 %v21045_v57 }
 0x6fa   : > { %16174 = vmatpush3.msra.mxu1 %v24804_v19  ;;  %v6753_v46 = vmul.f32 %v17322_v43, %v20998_v25  ;;  %v21062_v42 = vand.u32 4294901760, %v6755_v21  ;;  %v6863_v58 = vand.u32 4294901760, %v21056_v22  ;;  %v6874_v60 = vsub.f32 %v21049_v5, %v6873_v13 }
 0x6fb   : > { %v6735_v17 = vpop.xlane.xlu1 %6734  ;;  %16175 = vmatprep.subr.mxu1 %v24805_v52 }
 0x6fc   : > { %17331 = vrcp.f32 %v6735_v17  ;;  %16176 = vmatpush3.msra.mxu1 %v24805_v52  ;;  %v21070_v41 = vand.u32 4294901760, %v6753_v46  ;;  %v21073_v12 = vsub.f32 %v6755_v21, %v21062_v42  ;;  %v6864_v25 = vsub.f32 %v21056_v22, %v6863_v58  ;;  %v24814_v17 = vld [vmem:[#allocation25_spill] sm:$0xff] }
 0x6fd   : > { %v17324_v18 = vpop.eup %17323  ;;  %v6733_v20 = vpop.xlane.xlu0 %6732  ;;  %16177 = vmatprep.subr.mxu1 %v24806_v50  ;;  %v6875_v34 = vand.u32 4294901760, %v6874_v60  ;;  %v24815_v60 = vld [vmem:[#allocation67_spill] sm:$0xff] }
 0x6fe   : > { %17333 = vrcp.f32 %v6733_v20  ;;  %16096 = vmatprep.mubr.f32.mxu1 %v21070_v41  ;;  %16178 = vmatpush3.msra.mxu1 %v24806_v50  ;;  %v6865_v32 = vand.u32 4294901760, %v6864_v25  ;;  %v6759_v30 = vmul.f32 %v17324_v18, %v21002_v1  ;;  %v21083_v35 = vsub.f32 %v6753_v46, %v21070_v41 }
 0x6ff   : > { %v17326_v11 = vpop.eup %17325  ;;  %16097 = vmatmul.mubr.f32.gmra.mxu1 %v21062_v42  ;;  %16179 = vmatprep.subr.mxu1 %v24807_v4  ;;  %v6893_v14 = vand.u32 4294901760, %v21073_v12 }
 0x700   : > { %16180 = vmatpush3.msra.mxu1 %v24807_v4  ;;  %16037 = vmatprep.mubr.f32.mxu0 %v6865_v32  ;;  %v6757_v15 = vmul.f32 %v17326_v11, %v21006_v54  ;;  %v21090_v31 = vand.u32 4294901760, %v6759_v30  ;;  %v6883_v1 = vand.u32 4294901760, %v21083_v35  ;;  %v24816_v11 = vld [vmem:[#allocation50_spill] sm:$0xff] }
 0x701   : > { %v6739_v45 = vpop.xlane.xlu1 %6738  ;;  %16181 = vmatprep.subr.mxu1 %v24808_v44  ;;  %16038 = vmatmul.mubr.f32.vlgmr.msra.gmra.mxu0 %v6875_v34  ;;  %v6894_v51 = vsub.f32 %v21073_v12, %v6893_v14 }
 0x702   : > { %17335 = vrcp.f32 %v6739_v45  ;;  %v21097_v0 = vand.u32 4294901760, %v6757_v15  ;;  %v21100_v2 = vsub.f32 %v6759_v30, %v21090_v31  ;;  %16118 = vmatpush3.msra.mxu0 %v24809_v37  ;;  %16182 = vmatpush3.msra.mxu1 %v24808_v44  ;;  %v6884_v54 = vsub.f32 %v21083_v35, %v6883_v1 }
 0x703   : > { %v17328_v47 = vpop.eup %17327  ;;  %v6737_v61 = vpop.xlane.xlu0 %6736  ;;  %16119 = vmatprep.subr.mxu0 %v24810_v39  ;;  %16183 = vmatprep.subr.mxu1 %v24811_v6  ;;  %v6895_v16 = vand.u32 4294901760, %v6894_v51 }
 0x704   : > { %17337 = vrcp.f32 %v6737_v61  ;;  %16099 = vmatprep.mubr.f32.mxu1 %v21097_v0  ;;  %16120 = vmatpush3.msra.mxu0 %v24810_v39  ;;  %v6885_v62 = vand.u32 4294901760, %v6884_v54  ;;  %v6763_v33 = vmul.f32 %v17328_v47, %v21010_v59  ;;  %v21113_v55 = vsub.f32 %v6757_v15, %v21097_v0  ;;  %v24817_v54 = vld [vmem:[#allocation26_spill] sm:$0xff] }
 0x705   : > { %v17330_v40 = vpop.eup %17329  ;;  %16100 = vmatmul.mubr.f32.gmra.mxu1 %v21090_v31  ;;  %16121 = vmatprep.subr.mxu0 %v24812_v63  ;;  %v6913_v53 = vand.u32 4294901760, %v21100_v2 }
 0x706   : > { %16184 = vmatpush3.msra.mxu1 %v24811_v6  ;;  %16040 = vmatprep.mubr.f32.mxu0 %v6885_v62  ;;  %v6761_v28 = vmul.f32 %v17330_v40, %v21014_v26  ;;  %v21120_v3 = vand.u32 4294901760, %v6763_v33  ;;  %v6903_v59 = vand.u32 4294901760, %v21113_v55  ;;  %v24819_v40 = vld [vmem:[#allocation68_spill] sm:$0xff] }
 0x707   : > { %v6743_v8 = vpop.xlane.xlu1 %6742  ;;  %16185 = vmatprep.subr.mxu1 %v24813_v38  ;;  %16041 = vmatmul.mubr.f32.gmra.mxu0 %v6895_v16  ;;  %v6914_v56 = vsub.f32 %v21100_v2, %v6913_v53 }
 0x708   : > { %17339 = vrcp.f32 %v6743_v8  ;;  %v21127_v24 = vand.u32 4294901760, %v6761_v28  ;;  %v21130_v21 = vsub.f32 %v6763_v33, %v21120_v3  ;;  %16122 = vmatpush3.msra.mxu0 %v24812_v63  ;;  %16186 = vmatpush3.msra.mxu1 %v24813_v38  ;;  %v6904_v26 = vsub.f32 %v21113_v55, %v6903_v59  ;;  %v24818_v33 = vld [vmem:[#allocation83_spill] sm:$0xff] }
 0x709   : > { %v17332_v43 = vpop.eup %17331  ;;  %v6741_v46 = vpop.xlane.xlu0 %6740  ;;  %16123 = vmatprep.subr.mxu0 %v24814_v17  ;;  %16187 = vmatprep.subr.mxu1 %v24815_v60  ;;  %v6915_v34 = vand.u32 4294901760, %v6914_v56 }
 0x70a   : > { %17341 = vrcp.f32 %v6741_v46  ;;  %16102 = vmatprep.mubr.f32.mxu1 %v21127_v24  ;;  %16124 = vmatpush3.msra.mxu0 %v24814_v17  ;;  %v6905_v25 = vand.u32 4294901760, %v6904_v26  ;;  %v6767_v18 = vmul.f32 %v17332_v43, %v21019_v27  ;;  %v21143_v20 = vsub.f32 %v6761_v28, %v21127_v24  ;;  %v24820_v26 = vld [vmem:[#allocation60_spill] sm:$0xff] }
 0x70b   : > { %v17334_v32 = vpop.eup %17333  ;;  %v6747_v30 = vpop.xlane.xlu1 %6746  ;;  %16103 = vmatmul.mubr.f32.gmra.mxu1 %v21120_v3  ;;  %16125 = vmatprep.subr.mxu0 %v24816_v11  ;;  %v24176_v15 = vand.u32 4294901760, %v21130_v21 }
 0x70c   : > { %17343 = vrcp.f32 %v6747_v30  ;;  %16188 = vmatpush3.msra.mxu1 %v24815_v60  ;;  %16043 = vmatprep.mubr.f32.mxu0 %v6905_v25  ;;  %v6765_v45 = vmul.f32 %v17334_v32, %v21023_v29  ;;  %v21150_v51 = vand.u32 4294901760, %v6767_v18  ;;  %v6923_v27 = vand.u32 4294901760, %v21143_v20  ;;  %v24821_v25 = vld [vmem:[#allocation54_spill] sm:$0xff] }
 0x70d   : > { %v6745_v37 = vpop.xlane.xlu0 %6744  ;;  %16189 = vmatprep.subr.mxu1 %v24817_v54  ;;  %16044 = vmatmul.mubr.f32.gmra.mxu0 %v6915_v34  ;;  %v6934_v47 = vsub.f32 %v21130_v21, %v24176_v15  ;;  %v24822_v34 = vld [vmem:[#allocation38_spill] sm:$0xff] }
 0x70e   : > { %17345 = vrcp.f32 %v6745_v37  ;;  %v21157_v61 = vand.u32 4294901760, %v6765_v45  ;;  %v21160_v39 = vsub.f32 %v6767_v18, %v21150_v51  ;;  %16126 = vmatpush3.msra.mxu0 %v24816_v11  ;;  %16190 = vmatpush3.msra.mxu1 %v24817_v54  ;;  %v6924_v29 = vsub.f32 %v21143_v20, %v6923_v27 }
 0x70f   : > { %v17336_v62 = vpop.eup %17335  ;;  %16127 = vmatprep.subr.mxu0 %v24818_v33  ;;  %16191 = vmatprep.subr.mxu1 %v24819_v40  ;;  %v6935_v43 = vand.u32 4294901760, %v6934_v47 }
 0x710   : > { %16105 = vmatprep.mubr.f32.mxu1 %v21157_v61  ;;  %16128 = vmatpush3.msra.mxu0 %v24818_v33  ;;  %v6925_v63 = vand.u32 4294901760, %v6924_v29  ;;  %v6771_v16 = vmul.f32 %v17336_v62, %v21026_v10  ;;  %v21173_v28 = vsub.f32 %v6765_v45, %v21157_v61  ;;  %v24173_v8 = vand.u32 4294901760, %v21160_v39  ;;  %v24823_v45 = vld [vmem:[#allocation84_spill] sm:$0xff] }
 0x711   : > { %v17338_v56 = vpop.eup %17337  ;;  %16106 = vmatmul.mubr.f32.gmra.mxu1 %v21150_v51  ;;  %16129 = vmatprep.subr.mxu0 %v24820_v26 }
 0x712   : > { %16192 = vmatpush3.msra.mxu1 %v24819_v40  ;;  %16046 = vmatprep.mubr.f32.mxu0 %v6925_v63  ;;  %v6769_v46 = vmul.f32 %v17338_v56, %v21029_v36  ;;  %v21180_v17 = vand.u32 4294901760, %v6771_v16  ;;  %v24175_v10 = vand.u32 4294901760, %v21173_v28  ;;  %v6954_v18 = vsub.f32 %v21160_v39, %v24173_v8  ;;  %v24824_v63 = vld [vmem:[#allocation82_spill] sm:$0xff] }
 0x713   : > { %16193 = vmatprep.subr.mxu1 %v24821_v25  ;;  %16047 = vmatmul.mubr.f32.gmra.mxu0 %v6935_v43 }
 0x714   : > { %v21187_v32 = vand.u32 4294901760, %v6769_v46  ;;  %v21190_v30 = vsub.f32 %v6771_v16, %v21180_v17  ;;  %16130 = vmatpush3.msra.mxu0 %v24820_v26  ;;  %16194 = vmatpush3.msra.mxu1 %v24821_v25  ;;  %v6944_v36 = vsub.f32 %v21173_v28, %v24175_v10  ;;  %v6955_v16 = vand.u32 4294901760, %v6954_v18 }
 0x715   : > { %v17340_v11 = vpop.eup %17339  ;;  %16131 = vmatprep.subr.mxu0 %v24822_v34  ;;  %16195 = vmatprep.subr.mxu1 %v24823_v45 }
 0x716   : > { %16108 = vmatprep.mubr.f32.mxu1 %v21187_v32  ;;  %16132 = vmatpush3.msra.mxu0 %v24822_v34  ;;  %v6945_v37 = vand.u32 4294901760, %v6944_v36  ;;  %v6775_v47 = vmul.f32 %v17340_v11, %v21032_v49  ;;  %v21203_v29 = vsub.f32 %v6769_v46, %v21187_v32  ;;  %v24172_v62 = vand.u32 4294901760, %v21190_v30  ;;  %v24825_v46 = vld [vmem:[#allocation7_spill] sm:$0xff] }
 0x717   : > { %v17342_v33 = vpop.eup %17341  ;;  %16109 = vmatmul.mubr.f32.gmra.mxu1 %v21180_v17  ;;  %16133 = vmatprep.subr.mxu0 %v24824_v63 }
 0x718   : > { %16196 = vmatpush3.msra.mxu1 %v24823_v45  ;;  %16049 = vmatprep.mubr.f32.mxu0 %v6945_v37  ;;  %v6773_v56 = vmul.f32 %v17342_v33, %v21035_v48  ;;  %v21210_v26 = vand.u32 4294901760, %v6775_v47  ;;  %v24174_v49 = vand.u32 4294901760, %v21203_v29  ;;  %v6974_v36 = vsub.f32 %v21190_v30, %v24172_v62  ;;  %v24826_v37 = vld [vmem:[#allocation49_spill] sm:$0xff]  ;;  %v24827_v33 = vld [vmem:[#allocation55_spill] sm:$0xff] }
 0x719   : > { %v17344_v43 = vpop.eup %17343  ;;  %16197 = vmatprep.subr.mxu1 %v24825_v46  ;;  %16050 = vmatmul.mubr.f32.gmra.mxu0 %v6955_v16 }
 0x71a   : > { %v21217_v11 = vand.u32 4294901760, %v6773_v56  ;;  %v21220_v18 = vsub.f32 %v6775_v47, %v21210_v26  ;;  %16134 = vmatpush3.msra.mxu0 %v24824_v63  ;;  %16198 = vmatpush3.msra.mxu1 %v24825_v46  ;;  %v6964_v48 = vsub.f32 %v21203_v29, %v24174_v49  ;;  %v6779_v16 = vmul.f32 %v17344_v43, %v21038_v9  ;;  %v24828_v49 = vld [vmem:[#allocation15_spill] sm:$0xff] }
 0x71b   : > { %v17346_v34 = vpop.eup %17345  ;;  %16135 = vmatprep.subr.mxu0 %v24826_v37  ;;  %16199 = vmatprep.subr.mxu1 %v24827_v33  ;;  %v6975_v10 = vand.u32 4294901760, %v6974_v36 }
 0x71c   : > { %16111 = vmatprep.mubr.f32.mxu1 %v21217_v11  ;;  %16136 = vmatpush3.msra.mxu0 %v24826_v37  ;;  %v6965_v47 = vand.u32 4294901760, %v6964_v48  ;;  %v6777_v63 = vmul.f32 %v17346_v34, %v21041_v7  ;;  %v21234_v62 = vsub.f32 %v6773_v56, %v21217_v11  ;;  %v24177_v8 = vand.u32 4294901760, %v21220_v18  ;;  %v24829_v7 = vld [vmem:[#allocation80_spill] sm:$0xff] }
 0x71d   : > { %16112 = vmatmul.mubr.f32.gmra.mxu1 %v21210_v26  ;;  %16137 = vmatprep.subr.mxu0 %v24828_v49  ;;  %v21239_v15 = vand.u32 4294901760, %v6779_v16 }
 0x71e   : > { %16200 = vmatpush3.msra.mxu1 %v24827_v33  ;;  %16052 = vmatprep.mubr.f32.mxu0 %v6965_v47  ;;  %v21242_v9 = vand.u32 4294901760, %v6777_v63  ;;  %v24178_v43 = vand.u32 4294901760, %v21234_v62  ;;  %v6994_v48 = vsub.f32 %v21220_v18, %v24177_v8  ;;  %v24831_v47 = vld [vmem:[#allocation97_spill] sm:$0xff] }
 0x71f   : > { %16201 = vmatprep.subr.mxu1 %v24829_v7  ;;  %16053 = vmatmul.mubr.f32.gmra.mxu0 %v6975_v10  ;;  %v21247_v56 = vsub.f32 %v6779_v16, %v21239_v15  ;;  %v24830_v10 = vld [vmem:[#allocation39_spill] sm:$0xff] }
 0x720   : > { %16114 = vmatprep.mubr.f32.mxu1 %v21242_v9  ;;  %16138 = vmatpush3.msra.mxu0 %v24828_v49  ;;  %v6984_v36 = vsub.f32 %v21234_v62, %v24178_v43  ;;  %v21258_v34 = vsub.f32 %v6777_v63, %v21242_v9  ;;  %v6995_v63 = vand.u32 4294901760, %v6994_v48  ;;  %v24832_v43 = vld [vmem:[#allocation24_spill] sm:$0xff] }
 0x721   : > { %16115 = vmatmul.mubr.f32.gmra.mxu1 %v21239_v15  ;;  %16139 = vmatprep.subr.mxu0 %v24830_v10  ;;  %v7013_v16 = vand.u32 4294901760, %v21247_v56  ;;  %v24833_v48 = vld [vmem:[#allocation40_spill] sm:$0xff] }
 0x722   : > { %16202 = vmatpush3.msra.mxu1 %v24829_v7  ;;  %16205 = vmatprep.mubr.f32.mxu1 %v6863_v58  ;;  %v6985_v49 = vand.u32 4294901760, %v6984_v36  ;;  %v7003_v37 = vand.u32 4294901760, %v21258_v34 }
 0x723   : > { %16203 = vmatprep.subr.mxu1 %v24831_v47  ;;  %16140 = vmatpush3.msra.mxu0 %v24830_v10  ;;  %v7014_v36 = vsub.f32 %v21247_v56, %v7013_v16 }
 0x724   : > { %16204 = vmatpush3.msra.mxu1 %v24831_v47  ;;  %16055 = vmatprep.mubr.f32.mxu0 %v6985_v49  ;;  %v7004_v8 = vsub.f32 %v21258_v34, %v7003_v37 }
 0x725   : > { %16141 = vmatprep.subr.mxu0 %v24832_v43  ;;  %16285 = vmatprep.subr.mxu1 %v24804_v19 }
 0x726   : > { %16056 = vmatmul.mubr.f32.gmra.mxu0 %v6995_v63  ;;  %16206 = vmatmul.mubr.f32.vlgmr.msra.gmra.mxu1 %v6873_v13  ;;  %v7005_v58 = vand.u32 4294901760, %v7004_v8  ;;  %v7015_v13 = vand.u32 4294901760, %v7014_v36  ;;  %v24834_v8 = vld [vmem:[#allocation62_spill] sm:$0xff] }
 0x727   : > { %16142 = vmatpush3.msra.mxu0 %v24832_v43  ;;  %16286 = vmatpush3.msra.mxu1 %v24804_v19  ;;  %v24835_v19 = vld [vmem:[#allocation31_spill] sm:$0xff] }
 0x728   : > { %16143 = vmatprep.subr.mxu0 %v24833_v48  ;;  %16208 = vmatprep.mubr.f32.mxu1 %v6883_v1  ;;  %v24844_v1 = vand.u32 4294901760, %v21203_v29 }
 0x729   : > { %16287 = vmatprep.subr.mxu1 %v24805_v52  ;;  %16144 = vmatpush3.msra.mxu0 %v24833_v48 }
 0x72a   : > { %16288 = vmatpush3.msra.mxu1 %v24805_v52  ;;  %16058 = vmatprep.mubr.f32.mxu0 %v7005_v58  ;;  %v24836_v52 = vld [vmem:[#allocation51_spill] sm:$0xff] }
 0x72b   : > { %16145 = vmatprep.subr.mxu0 %v24834_v8  ;;  %16289 = vmatprep.subr.mxu1 %v24806_v50 }
 0x72c   : > { %16059 = vmatmul.mubr.f32.gmra.mxu0 %v7015_v13  ;;  %16209 = vmatmul.mubr.f32.gmra.mxu1 %v6893_v14  ;;  %v24843_v14 = vand.u32 4294901760, %v21160_v39 }
 0x72d   : > { %16146 = vmatpush3.msra.mxu0 %v24834_v8  ;;  %16290 = vmatpush3.msra.mxu1 %v24806_v50  ;;  %v24839_v50 = vand.u32 4294901760, %v21130_v21 }
 0x72e   : > { %16147 = vmatprep.subr.mxu0 %v24835_v19  ;;  %16149 = vmatprep.mubr.f32.mxu0 %v21056_v22  ;;  %v24837_v22 = vld [vmem:[#allocation11_spill] sm:$0xff] }
 0x72f   : > { %16211 = vmatprep.mubr.f32.mxu1 %v6903_v59  ;;  %16291 = vmatprep.subr.mxu1 %v24807_v4  ;;  %v24850_v59 = vld [vmem:[#allocation61_spill] sm:$0xff] }
 0x730   : > { %16148 = vmatpush3.msra.mxu0 %v24835_v19  ;;  %16292 = vmatpush3.msra.mxu1 %v24807_v4  ;;  %v24841_v4 = vld [vmem:[#allocation78_spill] sm:$0xff] }
 0x731   : > { %16229 = vmatprep.subr.mxu0 %v24836_v52  ;;  %16293 = vmatprep.subr.mxu1 %v24808_v44 }
 0x732   : > { %16150 = vmatmul.mubr.f32.vlgmr.msra.gmra.mxu0 %v21049_v5  ;;  %16212 = vmatmul.mubr.f32.gmra.mxu1 %v6913_v53  ;;  %v24838_v5 = vld [vmem:[#allocation77_spill] sm:$0xff]  ;;  %v24849_v53 = vld [vmem:[#allocation36_spill] sm:$0xff] }
 0x733   : > { %16230 = vmatpush3.msra.mxu0 %v24836_v52  ;;  %16294 = vmatpush3.msra.mxu1 %v24808_v44  ;;  %v24845_v44 = vld [vmem:[#allocation57_spill] sm:$0xff] }
 0x734   : > { %16152 = vmatprep.mubr.f32.mxu0 %v21083_v35  ;;  %16214 = vmatprep.mubr.f32.mxu1 %v6923_v27  ;;  %v24840_v35 = vand.u32 4294901760, %v21173_v28  ;;  %v24855_v27 = vld [vmem:[#allocation45_spill] sm:$0xff] }
 0x735   : > { %16231 = vmatprep.subr.mxu0 %v24837_v22  ;;  %16295 = vmatprep.subr.mxu1 %v24811_v6 }
 0x736   : > { %16232 = vmatpush3.msra.mxu0 %v24837_v22  ;;  %16296 = vmatpush3.msra.mxu1 %v24811_v6  ;;  %v24847_v6 = vand.u32 4294901760, %v21190_v30 }
 0x737   : > { %16233 = vmatprep.subr.mxu0 %v24838_v5  ;;  %16297 = vmatprep.subr.mxu1 %v24813_v38 }
 0x738   : > { %16153 = vmatmul.mubr.f32.gmra.mxu0 %v21073_v12  ;;  %16215 = vmatmul.mubr.f32.gmra.mxu1 %v24839_v50  ;;  %v24842_v12 = vld [vmem:[#allocation86_spill] sm:$0xff] }
 0x739   : > { %16234 = vmatpush3.msra.mxu0 %v24838_v5  ;;  %16298 = vmatpush3.msra.mxu1 %v24813_v38  ;;  %v24851_v38 = vand.u32 4294901760, %v21220_v18 }
 0x73a   : > { %16155 = vmatprep.mubr.f32.mxu0 %v21113_v55  ;;  %16217 = vmatprep.mubr.f32.mxu1 %v24840_v35  ;;  %v24848_v55 = vand.u32 4294901760, %v21234_v62 }
 0x73b   : > { %16235 = vmatprep.subr.mxu0 %v24841_v4  ;;  %16299 = vmatprep.subr.mxu1 %v24815_v60 }
 0x73c   : > { %16236 = vmatpush3.msra.mxu0 %v24841_v4  ;;  %16300 = vmatpush3.msra.mxu1 %v24815_v60  ;;  %v24853_v60 = vld [vmem:[#allocation46_spill] sm:$0xff] }
 0x73d   : > { %16237 = vmatprep.subr.mxu0 %v24842_v12  ;;  %16301 = vmatprep.subr.mxu1 %v24817_v54 }
 0x73e   : > { %16156 = vmatmul.mubr.f32.gmra.mxu0 %v21100_v2  ;;  %16218 = vmatmul.mubr.f32.gmra.mxu1 %v24843_v14  ;;  %v24846_v2 = vld [vmem:[#allocation56_spill] sm:$0xff] }
 0x73f   : > { %16238 = vmatpush3.msra.mxu0 %v24842_v12  ;;  %16302 = vmatpush3.msra.mxu1 %v24817_v54  ;;  %v24856_v54 = vld [vmem:[#allocation91_spill] sm:$0xff] }
 0x740   : > { %16158 = vmatprep.mubr.f32.mxu0 %v21143_v20  ;;  %16220 = vmatprep.mubr.f32.mxu1 %v24844_v1  ;;  %v24854_v20 = vld [vmem:[#allocation3_spill] sm:$0xff] }
 0x741   : > { %16239 = vmatprep.subr.mxu0 %v24845_v44  ;;  %16303 = vmatprep.subr.mxu1 %v24819_v40 }
 0x742   : > { %16240 = vmatpush3.msra.mxu0 %v24845_v44  ;;  %16304 = vmatpush3.msra.mxu1 %v24819_v40  ;;  %v24858_v40 = vld [vmem:[#allocation30_spill] sm:$0xff] }
 0x743   : > { %16241 = vmatprep.subr.mxu0 %v24846_v2  ;;  %16305 = vmatprep.subr.mxu1 %v24821_v25 }
 0x744   : > { %16159 = vmatmul.mubr.f32.gmra.mxu0 %v21130_v21  ;;  %16221 = vmatmul.mubr.f32.gmra.mxu1 %v24847_v6  ;;  %v24852_v21 = vld [vmem:[#allocation94_spill] sm:$0xff] }
 0x745   : > { %16242 = vmatpush3.msra.mxu0 %v24846_v2  ;;  %16306 = vmatpush3.msra.mxu1 %v24821_v25 }
 0x746   : > { %16161 = vmatprep.mubr.f32.mxu0 %v21173_v28  ;;  %16223 = vmatprep.mubr.f32.mxu1 %v24848_v55 }
 0x747   : > { %16243 = vmatprep.subr.mxu0 %v24849_v53  ;;  %16307 = vmatprep.subr.mxu1 %v24823_v45 }
 0x748   : > { %16244 = vmatpush3.msra.mxu0 %v24849_v53  ;;  %16308 = vmatpush3.msra.mxu1 %v24823_v45 }
 0x749   : > { %16245 = vmatprep.subr.mxu0 %v24850_v59  ;;  %16309 = vmatprep.subr.mxu1 %v24825_v46 }
 0x74a   : > { %16162 = vmatmul.mubr.f32.gmra.mxu0 %v21160_v39  ;;  %16224 = vmatmul.mubr.f32.gmra.mxu1 %v24851_v38  ;;  %v24857_v39 = vld [vmem:[#allocation75_spill] sm:$0xff] }
 0x74b   : > { %16246 = vmatpush3.msra.mxu0 %v24850_v59  ;;  %16310 = vmatpush3.msra.mxu1 %v24825_v46 }
 0x74c   : > { %16164 = vmatprep.mubr.f32.mxu0 %v21203_v29  ;;  %16226 = vmatprep.mubr.f32.mxu1 %v7003_v37 }
 0x74d   : > { %16247 = vmatprep.subr.mxu0 %v24852_v21  ;;  %16311 = vmatprep.subr.mxu1 %v24827_v33 }
 0x74e   : > { %16248 = vmatpush3.msra.mxu0 %v24852_v21  ;;  %16312 = vmatpush3.msra.mxu1 %v24827_v33 }
 0x74f   : > { %16249 = vmatprep.subr.mxu0 %v24853_v60  ;;  %16313 = vmatprep.subr.mxu1 %v24829_v7 }
 0x750   : > { %16165 = vmatmul.mubr.f32.gmra.mxu0 %v21190_v30  ;;  %16227 = vmatmul.mubr.f32.gmra.mxu1 %v7013_v16 }
 0x751   : > { %16250 = vmatpush3.msra.mxu0 %v24853_v60  ;;  %16314 = vmatpush3.msra.mxu1 %v24829_v7 }
 0x752   : > { %16167 = vmatprep.mubr.f32.mxu0 %v21234_v62  ;;  %16251 = vmatprep.subr.mxu0 %v24854_v20 }
 0x753   : > { %16315 = vmatprep.subr.mxu1 %v24831_v47  ;;  %16317 = vmatprep.mubr.f32.mxu1 %v21051_v23 }
 0x754   : > { %16252 = vmatpush3.msra.mxu0 %v24854_v20  ;;  %16316 = vmatpush3.msra.mxu1 %v24831_v47 }
 0x755   : > { %16253 = vmatprep.subr.mxu0 %v24855_v27  ;;  %16168 = vmatmul.mubr.f32.gmra.mxu0 %v21220_v18 }
 0x756   : > { %16254 = vmatpush3.msra.mxu0 %v24855_v27  ;;  %16318 = vmatmul.mubr.f32.vlgmr.msra.gmra.mxu1 %v21045_v57 }
 0x757   : > { %16170 = vmatprep.mubr.f32.mxu0 %v21258_v34  ;;  %16255 = vmatprep.subr.mxu0 %v24856_v54 }
 0x758   : > { %16320 = vmatprep.mubr.f32.mxu1 %v21070_v41  ;;  %16256 = vmatpush3.msra.mxu0 %v24856_v54 }
 0x759   : > { %16257 = vmatprep.subr.mxu0 %v24857_v39  ;;  %16171 = vmatmul.mubr.f32.gmra.mxu0 %v21247_v56 }
 0x75a   : > { %16258 = vmatpush3.msra.mxu0 %v24857_v39  ;;  %16321 = vmatmul.mubr.f32.gmra.mxu1 %v21062_v42 }
 0x75b   : > { %16259 = vmatprep.subr.mxu0 %v24858_v40  ;;  %16261 = vmatprep.mubr.f32.mxu0 %v21051_v23 }
 0x75c   : > { %16323 = vmatprep.mubr.f32.mxu1 %v21097_v0  ;;  %16260 = vmatpush3.msra.mxu0 %v24858_v40 }
 0x75d   : > { %16262 = vmatmul.mubr.f32.vlgmr.msra.gmra.mxu0 %v21045_v57  ;;  %v191_v57 = vld [vmem:[%s23891_s1 + $0xf8] sm:$0xff] }
 0x75e   : > { %16324 = vmatmul.mubr.f32.gmra.mxu1 %v21090_v31  ;;  %16264 = vmatprep.mubr.f32.mxu0 %v21070_v41  ;;  %v21429_v23 = vand.u32 4294901760, %v191_v57 }
 0x75f   : > { %16326 = vmatprep.mubr.f32.mxu1 %v21127_v24 }
 0x760   : > { %24859 = vst [vmem:[#allocation72_spill] sm:$0xff] %v21429_v23  ;;  %16341 = vmatprep.subr.mxu0 %v21429_v23 }
 0x761   : > { %16265 = vmatmul.mubr.f32.gmra.mxu0 %v21062_v42  ;;  %v21434_v42 = vsub.f32 %v191_v57, %v21429_v23 }
 0x762   : > { %16327 = vmatmul.mubr.f32.gmra.mxu1 %v21120_v3  ;;  %16267 = vmatprep.mubr.f32.mxu0 %v21097_v0 }
 0x763   : > { %16329 = vmatprep.mubr.f32.mxu1 %v21157_v61  ;;  %16342 = vmatpush3.msra.mxu0 %v21429_v23  ;;  %24860 = vst [vmem:[#allocation59_spill] sm:$0xff] %v21434_v42  ;;  %v21437_v41 = vand.u32 4294901760, %v21434_v42 }
 0x765   : > { %16268 = vmatmul.mubr.f32.gmra.mxu0 %v21090_v31  ;;  %24861 = vst [vmem:[#allocation64_spill] sm:$0xff] %v21437_v41  ;;  %v8371_v31 = vsub.f32 %v21434_v42, %v21437_v41 }
 0x766   : > { %16330 = vmatmul.mubr.f32.gmra.mxu1 %v21150_v51  ;;  %16270 = vmatprep.mubr.f32.mxu0 %v21127_v24 }
 0x767   : > { %16332 = vmatprep.mubr.f32.mxu1 %v21187_v32  ;;  %v8372_v0 = vand.u32 4294901760, %v8371_v31 }
 0x769   : > { %16271 = vmatmul.mubr.f32.gmra.mxu0 %v21120_v3  ;;  %v190_v3 = vld [vmem:[%s23891_s1 + $0xf0] sm:$0xff]  ;;  %16373 = vmatprep.subr.mxu1 %v8372_v0 }
 0x76a   : > { %16333 = vmatmul.mubr.f32.gmra.mxu1 %v21180_v17  ;;  %16273 = vmatprep.mubr.f32.mxu0 %v21157_v61  ;;  %v21444_v24 = vand.u32 4294901760, %v190_v3 }
 0x76b   : > { %16335 = vmatprep.mubr.f32.mxu1 %v21217_v11  ;;  %16374 = vmatpush3.msra.mxu1 %v8372_v0 }
 0x76c   : > { %24862 = vst [vmem:[#allocation28_spill] sm:$0xff] %v21444_v24  ;;  %16343 = vmatprep.subr.mxu0 %v21444_v24 }
 0x76d   : > { %16274 = vmatmul.mubr.f32.gmra.mxu0 %v21150_v51  ;;  %v189_v51 = vld [vmem:[%s23891_s1 + $0xe8] sm:$0xff] }
 0x76e   : > { %16336 = vmatmul.mubr.f32.gmra.mxu1 %v21210_v26  ;;  %16276 = vmatprep.mubr.f32.mxu0 %v21187_v32  ;;  %v21454_v61 = vand.u32 4294901760, %v189_v51 }
 0x76f   : > { %16338 = vmatprep.mubr.f32.mxu1 %v21242_v9  ;;  %16344 = vmatpush3.msra.mxu0 %v21444_v24 }
 0x770   : > { %24864 = vst [vmem:[#allocation71_spill] sm:$0xff] %v21454_v61  ;;  %16345 = vmatprep.subr.mxu0 %v21454_v61  ;;  %v21464_v25 = vsub.f32 %v189_v51, %v21454_v61 }
 0x771   : > { %16277 = vmatmul.mubr.f32.gmra.mxu0 %v21180_v17  ;;  %v188_v17 = vld [vmem:[%s23891_s1 + $0xe0] sm:$0xff] }
 0x772   : > { %16339 = vmatmul.mubr.f32.gmra.mxu1 %v21239_v15  ;;  %16279 = vmatprep.mubr.f32.mxu0 %v21217_v11  ;;  %24866 = vst [vmem:[#allocation63_spill] sm:$0xff] %v21464_v25  ;;  %v21466_v32 = vand.u32 4294901760, %v188_v17  ;;  %v21472_v45 = vand.u32 4294901760, %v21464_v25 }
 0x773   : > { %16346 = vmatpush3.msra.mxu0 %v21454_v61 }
 0x774   : > { %24867 = vst [vmem:[#allocation76_spill] sm:$0xff] %v21466_v32  ;;  %24868 = vst [vmem:[#allocation70_spill] sm:$0xff] %v21472_v45  ;;  %v21475_v29 = vsub.f32 %v188_v17, %v21466_v32  ;;  %16347 = vmatprep.subr.mxu0 %v21466_v32 }
 0x775   : > { %16280 = vmatmul.mubr.f32.gmra.mxu0 %v21210_v26  ;;  %v8385_v26 = vsub.f32 %v21464_v25, %v21472_v45 }
 0x776   : > { %16282 = vmatprep.mubr.f32.mxu0 %v21242_v9  ;;  %24869 = vst [vmem:[#allocation52_spill] sm:$0xff] %v21475_v29  ;;  %16348 = vmatpush3.msra.mxu0 %v21466_v32  ;;  %v21482_v46 = vand.u32 4294901760, %v21475_v29 }
 0x777   : > { %16405 = vmatprep.subr.mxu0 %v21434_v42  ;;  %v8386_v11 = vand.u32 4294901760, %v8385_v26 }
 0x778   : > { %24870 = vst [vmem:[#allocation66_spill] sm:$0xff] %v21482_v46  ;;  %v8392_v18 = vsub.f32 %v21475_v29, %v21482_v46 }
 0x779   : > { %16283 = vmatmul.mubr.f32.gmra.mxu0 %v21239_v15  ;;  %v21448_v15 = vsub.f32 %v190_v3, %v21444_v24 }
 0x77a   : > { %v8393_v33 = vand.u32 4294901760, %v8392_v18 }
 0x77b   : > { %24863 = vst [vmem:[#allocation81_spill] sm:$0xff] %v21448_v15  ;;  %v21457_v28 = vand.u32 4294901760, %v21448_v15 }
 0x77d   : > { %24865 = vst [vmem:[#allocation92_spill] sm:$0xff] %v21457_v28  ;;  %v8378_v30 = vsub.f32 %v21448_v15, %v21457_v28 }
 0x77f   : > { %v8379_v62 = vand.u32 4294901760, %v8378_v30 }
 0x781   : > { %16375 = vmatprep.subr.mxu1 %v8379_v62 }
 0x782   : > { %16376 = vmatpush3.msra.mxu1 %v8379_v62 }
 0x783   : > { %16377 = vmatprep.subr.mxu1 %v8386_v11 }
 0x784   : > { %16378 = vmatpush3.msra.mxu1 %v8386_v11 }
 0x785   : > { %16379 = vmatprep.subr.mxu1 %v8393_v33 }
 0x786   : > { %16380 = vmatpush3.msra.mxu1 %v8393_v33 }
 0x787   : > { %16437 = vmatprep.subr.mxu1 %v21429_v23 }
 0x7b9   : > { %v16095_v9 = vpop.f32.mrf.mxu1 }
 0x7bb   : > { %v21488_v43 = vpop.f32.mrf.mxu1 }
 0x7bf   : > { %v21490_v7 = vpop.f32.mrf.mxu1 }
 0x7c1   : > { %v21492_v56 = vpop.f32.mrf.mxu1  ;;  %v16039_v34 = vpop.f32.mrf.mxu0 }
 0x7c2   : > { %v7175_v61 = vadd.f32 %v16095_v9, %v16039_v34 }
 0x7c3   : > { %v6867_v10 = vpop.f32.mrf.mxu0 }
 0x7c5   : > { %v21494_v49 = vpop.f32.mrf.mxu1 }
 0x7c7   : > { %v21496_v37 = vpop.f32.mrf.mxu1  ;;  %v16042_v16 = vpop.f32.mrf.mxu0 }
 0x7c9   : > { %v6887_v47 = vpop.f32.mrf.mxu0 }
 0x7cb   : > { %v16104_v63 = vpop.f32.mrf.mxu1 }
 0x7cd   : > { %v7204_v58 = vpop.f32.mrf.mxu1  ;;  %v16045_v36 = vpop.f32.mrf.mxu0 }
 0x7cf   : > { %v6907_v48 = vpop.f32.mrf.mxu0 }
 0x7d1   : > { %v16107_v13 = vpop.f32.mrf.mxu1 }
 0x7d3   : > { %v7216_v8 = vpop.f32.mrf.mxu1  ;;  %v16048_v19 = vpop.f32.mrf.mxu0 }
 0x7d5   : > { %v6927_v52 = vpop.f32.mrf.mxu0 }
 0x7d7   : > { %v16110_v22 = vpop.f32.mrf.mxu1 }
 0x7d9   : > { %v7228_v5 = vpop.f32.mrf.mxu1  ;;  %v16051_v50 = vpop.f32.mrf.mxu0 }
 0x7db   : > { %v6947_v35 = vpop.f32.mrf.mxu0 }
 0x7dd   : > { %v16113_v4 = vpop.f32.mrf.mxu1 }
 0x7df   : > { %v21498_v12 = vpop.f32.mrf.mxu1  ;;  %v16054_v14 = vpop.f32.mrf.mxu0 }
 0x7e1   : > { %v21500_v1 = vpop.f32.mrf.mxu1  ;;  %v6967_v44 = vpop.f32.mrf.mxu0 }
 0x7e3   : > { %v21502_v2 = vpop.f32.mrf.mxu1 }
 0x7e6   : > { %v16057_v6 = vpop.f32.mrf.mxu0  ;;  %v16207_v55 = vpop.f32.mrf.mxu1 }
 0x7e8   : > { %v6987_v53 = vpop.f32.mrf.mxu0  ;;  %v21504_v59 = vpop.f32.mrf.mxu1 }
 0x7ec   : > { %v16060_v38 = vpop.f32.mrf.mxu0  ;;  %v21506_v21 = vpop.f32.mrf.mxu1 }
 0x7ed   : > { %24871 = vst [vmem:[#allocation35_spill] sm:$0xff] %v21506_v21  ;;  %v7229_v21 = vadd.f32 %v7228_v5, %v6967_v44 }
 0x7ee   : > { %v7007_v60 = vpop.f32.mrf.mxu0  ;;  %v21508_v20 = vpop.f32.mrf.mxu1 }
 0x7ef   : > { %24872 = vst [vmem:[#allocation74_spill] sm:$0xff] %v21508_v20  ;;  %v7235_v20 = vadd.f32 %v16110_v22, %v16054_v14 }
 0x7f2   : > { %v16151_v27 = vpop.f32.mrf.mxu0  ;;  %v21510_v54 = vpop.f32.mrf.mxu1 }
 0x7f3   : > { %24873 = vst [vmem:[#allocation69_spill] sm:$0xff] %v21510_v54  ;;  %v7217_v54 = vadd.f32 %v7216_v8, %v6947_v35 }
 0x7f4   : > { %v7362_v39 = vpop.f32.mrf.mxu0  ;;  %v21512_v40 = vpop.f32.mrf.mxu1  ;;  %v24885_v5 = vld [vmem:[#allocation35_spill] sm:$0xff] }
 0x7f5   : > { %24874 = vst [vmem:[#allocation29_spill] sm:$0xff] %v21512_v40  ;;  %v7205_v40 = vadd.f32 %v7204_v58, %v6927_v52 }
 0x7f6   : > { %v24886_v35 = vld [vmem:[#allocation74_spill] sm:$0xff] }
 0x7f8   : > { %v16154_v57 = vpop.f32.mrf.mxu0  ;;  %v21514_v31 = vpop.f32.mrf.mxu1 }
 0x7f9   : > { %24875 = vst [vmem:[#allocation13_spill] sm:$0xff] %v21514_v31 }
 0x7fa   : > { %v7376_v0 = vpop.f32.mrf.mxu0  ;;  %v21516_v3 = vpop.f32.mrf.mxu1 }
 0x7fb   : > { %24876 = vst [vmem:[#allocation90_spill] sm:$0xff] %v21516_v3  ;;  %v7193_v3 = vadd.f32 %v21496_v37, %v6907_v48  ;;  %v7259_v37 = vadd.f32 %v21500_v1, %v16060_v38  ;;  %v7253_v48 = vadd.f32 %v21502_v2, %v7007_v60 }
 0x7fe   : > { %v16157_v51 = vpop.f32.mrf.mxu0  ;;  %v21518_v17 = vpop.f32.mrf.mxu1 }
 0x7ff   : > { %24877 = vst [vmem:[#allocation88_spill] sm:$0xff] %v21518_v17 }
 0x800   : > { %v7390_v30 = vpop.f32.mrf.mxu0  ;;  %v21520_v62 = vpop.f32.mrf.mxu1 }
 0x801   : > { %24878 = vst [vmem:[#allocation48_spill] sm:$0xff] %v21520_v62  ;;  %v7370_v62 = vadd.f32 %v16151_v27, %v7175_v61  ;;  %v7247_v61 = vadd.f32 %v16113_v4, %v16057_v6  ;;  %v7391_v27 = vadd.f32 %v7390_v30, %v7193_v3  ;;  %v24888_v6 = vld [vmem:[#allocation29_spill] sm:$0xff] }
 0x804   : > { %v16160_v26 = vpop.f32.mrf.mxu0  ;;  %v21522_v11 = vpop.f32.mrf.mxu1 }
 0x805   : > { %24879 = vst [vmem:[#allocation41_spill] sm:$0xff] %v21522_v11  ;;  %v7169_v11 = vadd.f32 %v21488_v43, %v6867_v10 }
 0x806   : > { %v7404_v18 = vpop.f32.mrf.mxu0  ;;  %v21524_v33 = vpop.f32.mrf.mxu1 }
 0x807   : > { %24880 = vst [vmem:[#allocation27_spill] sm:$0xff] %v21524_v33  ;;  %v7187_v33 = vadd.f32 %v21490_v7, %v16042_v16  ;;  %v7363_v9 = vadd.f32 %v7362_v39, %v7169_v11  ;;  %v7405_v58 = vadd.f32 %v7404_v18, %v7205_v40  ;;  %v24891_v39 = vld [vmem:[#allocation88_spill] sm:$0xff] }
 0x808   : > { %v24892_v3 = vld [vmem:[#allocation48_spill] sm:$0xff] }
 0x809   : > { %v7384_v43 = vadd.f32 %v16154_v57, %v7187_v33 }
 0x80a   : > { %v16163_v46 = vpop.f32.mrf.mxu0  ;;  %v21526_v45 = vpop.f32.mrf.mxu1 }
 0x80b   : > { %24881 = vst [vmem:[#allocation98_spill] sm:$0xff] %v21526_v45  ;;  %v7181_v45 = vadd.f32 %v21492_v56, %v6887_v47  ;;  %v7565_v47 = vadd.f32 %v16207_v55, %v7370_v62  ;;  %v7589_v55 = vadd.f32 %v24888_v6, %v7391_v27 }
 0x80c   : > { %v7418_v28 = vpop.f32.mrf.mxu0  ;;  %v21528_v41 = vpop.f32.mrf.mxu1 }
 0x80d   : > { %24882 = vst [vmem:[#allocation93_spill] sm:$0xff] %v21528_v41  ;;  %v7199_v41 = vadd.f32 %v21494_v49, %v16045_v36  ;;  %v7377_v10 = vadd.f32 %v7376_v0, %v7181_v45  ;;  %v7241_v49 = vadd.f32 %v21498_v12, %v6987_v53  ;;  %v7557_v45 = vadd.f32 %v21504_v59, %v7363_v9  ;;  %v24889_v53 = vld [vmem:[#allocation13_spill] sm:$0xff]  ;;  %v24890_v59 = vld [vmem:[#allocation90_spill] sm:$0xff] }
 0x80e   : > { %v7419_v52 = vadd.f32 %v7418_v28, %v7217_v54  ;;  %v7605_v28 = vadd.f32 %v24890_v59, %v7405_v58  ;;  %v24894_v33 = vld [vmem:[#allocation27_spill] sm:$0xff] }
 0x80f   : > { %v7398_v16 = vadd.f32 %v16157_v51, %v7199_v41  ;;  %v7573_v4 = vadd.f32 %v24886_v35, %v7377_v10 }
 0x810   : > { %v16166_v29 = vpop.f32.mrf.mxu0  ;;  %v21530_v25 = vpop.f32.mrf.mxu1 }
 0x811   : > { %24883 = vst [vmem:[#allocation89_spill] sm:$0xff] %v21530_v25  ;;  %v7211_v25 = vadd.f32 %v16104_v63, %v16048_v19  ;;  %v7440_v22 = vadd.f32 %v16166_v29, %v7235_v20 }
 0x812   : > { %v7432_v15 = vpop.f32.mrf.mxu0  ;;  %v21532_v42 = vpop.f32.mrf.mxu1 }
 0x813   : > { %24884 = vst [vmem:[#allocation58_spill] sm:$0xff] %v21532_v42  ;;  %v7223_v42 = vadd.f32 %v16107_v13, %v16051_v50  ;;  %v7412_v63 = vadd.f32 %v16160_v26, %v7211_v25  ;;  %v7581_v50 = vadd.f32 %v24885_v5, %v7384_v43  ;;  %v24887_v25 = vld [vmem:[#allocation69_spill] sm:$0xff]  ;;  %v7433_v2 = vadd.f32 %v7432_v15, %v7229_v21  ;;  %v24895_v43 = vld [vmem:[#allocation98_spill] sm:$0xff] }
 0x814   : > { %v7597_v44 = vadd.f32 %v24887_v25, %v7398_v16  ;;  %v21556_v15 = vadd.f32 %v24892_v3, %v7419_v52  ;;  %v24896_v58 = vld [vmem:[#allocation93_spill] sm:$0xff]  ;;  %v24899_v25 = vld [vmem:[#allocation28_spill] sm:$0xff] }
 0x815   : > { %v16169_v32 = vpop.f32.mrf.mxu0  ;;  %v7426_v13 = vadd.f32 %v16163_v46, %v7223_v42  ;;  %v7613_v38 = vadd.f32 %v24889_v53, %v7412_v63  ;;  %v21568_v9 = vadd.f32 %v24894_v33, %v7433_v2 }
 0x816   : > { %v16319_v24 = vpop.f32.mrf.mxu1  ;;  %v7454_v42 = vadd.f32 %v16169_v32, %v7247_v61  ;;  %v24893_v32 = vld [vmem:[#allocation41_spill] sm:$0xff] }
 0x817   : > { %v7446_v23 = vpop.f32.mrf.mxu0  ;;  %v21559_v21 = vadd.f32 %v24893_v32, %v7440_v22 }
 0x818   : > { %v7972_v17 = vpop.f32.mrf.mxu1  ;;  %v7447_v40 = vadd.f32 %v7446_v23, %v7241_v49  ;;  %v21571_v10 = vadd.f32 %v24895_v43, %v7454_v42 }
 0x819   : > { %v16172_v31 = vpop.f32.mrf.mxu0 }
 0x81a   : > { %v16322_v34 = vpop.f32.mrf.mxu1  ;;  %v7468_v51 = vadd.f32 %v16172_v31, %v7259_v37 }
 0x81b   : > { %v7460_v7 = vpop.f32.mrf.mxu0 }
 0x81c   : > { %v7984_v56 = vpop.f32.mrf.mxu1  ;;  %v7461_v61 = vadd.f32 %v7460_v7, %v7253_v48 }
 0x81d   : > { %v16263_v36 = vpop.f32.mrf.mxu0 }
 0x81e   : > { %v7802_v8 = vadd.f32 %v16263_v36, %v7565_v47  ;;  %v16325_v19 = vpop.f32.mrf.mxu1  ;;  %v21582_v36 = vadd.f32 %v24896_v58, %v7447_v40 }
 0x81f   : > { %v7795_v41 = vpop.f32.mrf.mxu0 }
 0x820   : > { %v7979_v12 = vadd.f32 %v16319_v24, %v7802_v8  ;;  %v7796_v14 = vadd.f32 %v7795_v41, %v7557_v45  ;;  %v7996_v1 = vpop.f32.mrf.mxu1  ;;  %v21551_v24 = vadd.f32 %v24891_v39, %v7426_v13  ;;  %v24897_v8 = vld [vmem:[#allocation89_spill] sm:$0xff] }
 0x821   : > { %v16266_v46 = vpop.f32.mrf.mxu0  ;;  %v21587_v45 = vadd.f32 %v24897_v8, %v7468_v51 }
 0x822   : > { %v8070_v29 = vsel %vm1534_vm0, %v7979_v12, 0  ;;  %v7973_v60 = vadd.f32 %v7972_v17, %v7796_v14  ;;  %v7814_v20 = vadd.f32 %v16266_v46, %v7581_v50  ;;  %v16328_v54 = vpop.f32.mrf.mxu1 }
 0x823   : > { %v21553_v57 = vand.u32 4294901760, %v8070_v29  ;;  %v7807_v0 = vpop.f32.mrf.mxu0 }
 0x824   : > { %v8067_v30 = vsel %vm1534_vm0, %v7973_v60, 0  ;;  %v7991_v62 = vadd.f32 %v16322_v34, %v7814_v20  ;;  %v7808_v17 = vadd.f32 %v7807_v0, %v7573_v4  ;;  %v8008_v26 = vpop.f32.mrf.mxu1  ;;  %v24901_v60 = vld [vmem:[#allocation71_spill] sm:$0xff] }
 0x825   : > { %v21563_v11 = vsub.f32 %v8070_v29, %v21553_v57  ;;  %v21565_v18 = vand.u32 4294901760, %v8067_v30  ;;  %v16269_v23 = vpop.f32.mrf.mxu0 }
 0x826   : > { %v8076_v31 = vsel %vm1534_vm0, %v7991_v62, 0  ;;  %v7985_v16 = vadd.f32 %v7984_v56, %v7808_v17  ;;  %v7826_v27 = vadd.f32 %v16269_v23, %v7597_v44  ;;  %v16331_v34 = vpop.f32.mrf.mxu1  ;;  %v24900_v44 = vld [vmem:[#allocation58_spill] sm:$0xff]  ;;  %v24902_v62 = vld [vmem:[#allocation76_spill] sm:$0xff] }
 0x827   : > { %v8195_v47 = vand.u32 4294901760, %v21563_v11  ;;  %v21576_v49 = vsub.f32 %v8067_v30, %v21565_v18  ;;  %v21578_v37 = vand.u32 4294901760, %v8076_v31  ;;  %v7819_v63 = vpop.f32.mrf.mxu0  ;;  %16381 = vmatprep.mubr.f32.mxu1 %v21565_v18  ;;  %v21604_v6 = vadd.f32 %v24900_v44, %v7461_v61 }
 0x828   : > { %v8073_v7 = vsel %vm1534_vm0, %v7985_v16, 0  ;;  %v8003_v48 = vadd.f32 %v16325_v19, %v7826_v27  ;;  %v7820_v13 = vadd.f32 %v7819_v63, %v7589_v55  ;;  %v8020_v56 = vpop.f32.mrf.mxu1  ;;  %16382 = vmatmul.mubr.f32.vlgmr.msra.gmra.mxu1 %v21553_v57  ;;  %v24898_v19 = vld [vmem:[#allocation72_spill] sm:$0xff] }
 0x829   : > { %v8196_v52 = vsub.f32 %v21563_v11, %v8195_v47  ;;  %v21593_v22 = vsub.f32 %v8076_v31, %v21578_v37  ;;  %v21595_v41 = vand.u32 4294901760, %v8073_v7  ;;  %v16272_v5 = vpop.f32.mrf.mxu0  ;;  %v8185_v50 = vand.u32 4294901760, %v21576_v49  ;;  %16438 = vmatpush3.msra.mxu1 %v24898_v19 }
 0x82a   : > { %v8082_v35 = vsel %vm1534_vm0, %v8003_v48, 0  ;;  %v7997_v4 = vadd.f32 %v7996_v1, %v7820_v13  ;;  %v7838_v12 = vadd.f32 %v16272_v5, %v7613_v38  ;;  %v21600_v14 = vpop.f32.mrf.mxu1  ;;  %16439 = vmatprep.subr.mxu1 %v24899_v25  ;;  %v24903_v48 = vld [vmem:[#allocation59_spill] sm:$0xff] }
 0x82b   : > { %v8197_v55 = vand.u32 4294901760, %v8196_v52  ;;  %v21607_v2 = vsub.f32 %v8073_v7, %v21595_v41  ;;  %v21609_v42 = vand.u32 4294901760, %v8082_v35  ;;  %v7831_v46 = vpop.f32.mrf.mxu0  ;;  %16384 = vmatprep.mubr.f32.mxu1 %v21595_v41  ;;  %v8186_v1 = vsub.f32 %v21576_v49, %v8185_v50  ;;  %16440 = vmatpush3.msra.mxu1 %v24899_v25 }
 0x82c   : > { %v8079_v53 = vsel %vm1534_vm0, %v7997_v4, 0  ;;  %v8015_v38 = vadd.f32 %v16328_v54, %v7838_v12  ;;  %v7832_v59 = vadd.f32 %v7831_v46, %v7605_v28  ;;  %16385 = vmatmul.mubr.f32.gmra.mxu1 %v21578_v37  ;;  %v8215_v29 = vand.u32 4294901760, %v21593_v22  ;;  %16441 = vmatprep.subr.mxu1 %v24901_v60  ;;  %v8032_v40 = vpop.f32.mrf.mxu1 }
 0x82d   : > { %v21621_v20 = vsub.f32 %v8082_v35, %v21609_v42  ;;  %v21623_v39 = vand.u32 4294901760, %v8079_v53  ;;  %v16275_v0 = vpop.f32.mrf.mxu0  ;;  %v8187_v3 = vand.u32 4294901760, %v8186_v1  ;;  %v8205_v32 = vand.u32 4294901760, %v21607_v2  ;;  %16442 = vmatpush3.msra.mxu1 %v24901_v60  ;;  %v24904_v35 = vld [vmem:[#allocation81_spill] sm:$0xff] }
 0x82e   : > { %v8088_v28 = vsel %vm1534_vm0, %v8015_v38, 0  ;;  %v8009_v54 = vadd.f32 %v8008_v26, %v7832_v59  ;;  %v7850_v51 = vadd.f32 %v16275_v0, %v21551_v24  ;;  %v8216_v30 = vsub.f32 %v21593_v22, %v8215_v29  ;;  %16443 = vmatprep.subr.mxu1 %v24902_v62  ;;  %v16337_v58 = vpop.f32.mrf.mxu1 }
 0x82f   : > { %v21634_v17 = vsub.f32 %v8079_v53, %v21623_v39  ;;  %v21636_v23 = vand.u32 4294901760, %v8088_v28  ;;  %v7843_v33 = vpop.f32.mrf.mxu0  ;;  %16349 = vmatprep.mubr.f32.mxu0 %v8187_v3  ;;  %16387 = vmatprep.mubr.f32.mxu1 %v21623_v39  ;;  %v8206_v26 = vsub.f32 %v21607_v2, %v8205_v32  ;;  %v8235_v24 = vand.u32 4294901760, %v21621_v20 }
 0x830   : > { %v8085_v43 = vsel %vm1534_vm0, %v8009_v54, 0  ;;  %v8027_v61 = vadd.f32 %v16331_v34, %v7850_v51  ;;  %v7844_v31 = vadd.f32 %v7843_v33, %v21556_v15  ;;  %16350 = vmatmul.mubr.f32.vlgmr.msra.gmra.mxu0 %v8197_v55  ;;  %16388 = vmatmul.mubr.f32.gmra.mxu1 %v21609_v42  ;;  %v8217_v16 = vand.u32 4294901760, %v8216_v30  ;;  %v8044_v0 = vpop.f32.mrf.mxu1  ;;  %v24905_v33 = vld [vmem:[#allocation63_spill] sm:$0xff] }
 0x831   : > { %v21647_v27 = vsub.f32 %v8088_v28, %v21636_v23  ;;  %v21649_v63 = vand.u32 4294901760, %v8085_v43  ;;  %v16278_v7 = vpop.f32.mrf.mxu0  ;;  %16406 = vmatpush3.msra.mxu0 %v24903_v48  ;;  %v8207_v13 = vand.u32 4294901760, %v8206_v26  ;;  %v8225_v8 = vand.u32 4294901760, %v21634_v17  ;;  %16444 = vmatpush3.msra.mxu1 %v24902_v62 }
 0x832   : > { %v8094_v15 = vsel %vm1534_vm0, %v8027_v61, 0  ;;  %v8021_v34 = vadd.f32 %v8020_v56, %v7844_v31  ;;  %v7862_v52 = vadd.f32 %v16278_v7, %v21559_v21  ;;  %v8236_v5 = vsub.f32 %v21621_v20, %v8235_v24  ;;  %16407 = vmatprep.subr.mxu0 %v24904_v35  ;;  %16501 = vmatprep.subr.mxu1 %v24898_v19 }
 0x833   : > { %v21662_v4 = vsub.f32 %v8085_v43, %v21649_v63  ;;  %v21664_v12 = vand.u32 4294901760, %v8094_v15  ;;  %v7855_v44 = vpop.f32.mrf.mxu0  ;;  %16352 = vmatprep.mubr.f32.mxu0 %v8207_v13  ;;  %16390 = vmatprep.mubr.f32.mxu1 %v21649_v63  ;;  %v8226_v21 = vsub.f32 %v21634_v17, %v8225_v8  ;;  %v8255_v56 = vand.u32 4294901760, %v21647_v27 }
 0x834   : > { %v8091_v55 = vsel %vm1534_vm0, %v8021_v34, 0  ;;  %v8039_v46 = vadd.f32 %v21600_v14, %v7862_v52  ;;  %v7856_v1 = vadd.f32 %v7855_v44, %v21568_v9  ;;  %16353 = vmatmul.mubr.f32.gmra.mxu0 %v8217_v16  ;;  %16391 = vmatmul.mubr.f32.gmra.mxu1 %v21636_v23  ;;  %v8237_v53 = vand.u32 4294901760, %v8236_v5 }
 0x835   : > { %v21676_v38 = vsub.f32 %v8094_v15, %v21664_v12  ;;  %v21678_v59 = vand.u32 4294901760, %v8091_v55  ;;  %v16281_v3 = vpop.f32.mrf.mxu0  ;;  %v8227_v28 = vand.u32 4294901760, %v8226_v21  ;;  %16408 = vmatpush3.msra.mxu0 %v24904_v35  ;;  %v8245_v54 = vand.u32 4294901760, %v21662_v4  ;;  %v16340_v15 = vpop.f32.mrf.mxu1 }
 0x836   : > { %v8100_v14 = vsel %vm1534_vm0, %v8039_v46, 0  ;;  %v8033_v51 = vadd.f32 %v8032_v40, %v7856_v1  ;;  %v7874_v9 = vadd.f32 %v16281_v3, %v21571_v10  ;;  %v8256_v30 = vsub.f32 %v21647_v27, %v8255_v56  ;;  %16409 = vmatprep.subr.mxu0 %v24905_v33 }
 0x837   : > { %v21689_v26 = vsub.f32 %v8091_v55, %v21678_v59  ;;  %v21691_v43 = vand.u32 4294901760, %v8100_v14  ;;  %v7867_v61 = vpop.f32.mrf.mxu0  ;;  %16355 = vmatprep.mubr.f32.mxu0 %v8227_v28  ;;  %16393 = vmatprep.mubr.f32.mxu1 %v21678_v59  ;;  %v8246_v40 = vsub.f32 %v21662_v4, %v8245_v54  ;;  %v8275_v10 = vand.u32 4294901760, %v21676_v38  ;;  %v24906_v55 = vld [vmem:[#allocation52_spill] sm:$0xff] }
 0x838   : > { %v8097_v31 = vsel %vm1534_vm0, %v8033_v51, 0  ;;  %v8051_v16 = vadd.f32 %v16337_v58, %v7874_v9  ;;  %v7868_v7 = vadd.f32 %v7867_v61, %v21582_v36  ;;  %16356 = vmatmul.mubr.f32.gmra.mxu0 %v8237_v53  ;;  %16394 = vmatmul.mubr.f32.gmra.mxu1 %v21664_v12  ;;  %v8257_v48 = vand.u32 4294901760, %v8256_v30  ;;  %v8056_v51 = vpop.f32.mrf.mxu1 }
 0x839   : > { %v21702_v13 = vsub.f32 %v8100_v14, %v21691_v43  ;;  %v21704_v34 = vand.u32 4294901760, %v8097_v31  ;;  %v16284_v52 = vpop.f32.mrf.mxu0  ;;  %v8247_v5 = vand.u32 4294901760, %v8246_v40  ;;  %v8265_v35 = vand.u32 4294901760, %v21689_v26  ;;  %16410 = vmatpush3.msra.mxu0 %v24905_v33 }
 0x83a   : > { %v8106_v58 = vsel %vm1534_vm0, %v8051_v16, 0  ;;  %v8045_v44 = vadd.f32 %v8044_v0, %v7868_v7  ;;  %v7886_v36 = vadd.f32 %v16284_v52, %v21587_v45  ;;  %v8276_v21 = vsub.f32 %v21676_v38, %v8275_v10  ;;  %16411 = vmatprep.subr.mxu0 %v24906_v55  ;;  %v24907_v7 = vld [vmem:[#allocation64_spill] sm:$0xff] }
 0x83b   : > { %v21715_v46 = vsub.f32 %v8097_v31, %v21704_v34  ;;  %v21717_v1 = vand.u32 4294901760, %v8106_v58  ;;  %v7879_v53 = vpop.f32.mrf.mxu0  ;;  %16358 = vmatprep.mubr.f32.mxu0 %v8247_v5  ;;  %16396 = vmatprep.mubr.f32.mxu1 %v21704_v34  ;;  %v8266_v0 = vsub.f32 %v21689_v26, %v8265_v35  ;;  %v8295_v45 = vand.u32 4294901760, %v21702_v13 }
 0x83c   : > { %v8103_v3 = vsel %vm1534_vm0, %v8045_v44, 0  ;;  %v8063_v28 = vadd.f32 %v16340_v15, %v7886_v36  ;;  %v7880_v14 = vadd.f32 %v7879_v53, %v21604_v6  ;;  %16359 = vmatmul.mubr.f32.gmra.mxu0 %v8257_v48  ;;  %16397 = vmatmul.mubr.f32.gmra.mxu1 %v21691_v43  ;;  %v8277_v16 = vand.u32 4294901760, %v8276_v21 }
 0x83d   : > { %v21728_v9 = vsub.f32 %v8106_v58, %v21717_v1  ;;  %v21730_v30 = vand.u32 4294901760, %v8103_v3  ;;  %v8267_v33 = vand.u32 4294901760, %v8266_v0  ;;  %v8285_v61 = vand.u32 4294901760, %v21715_v46  ;;  %16412 = vmatpush3.msra.mxu0 %v24906_v55 }
 0x83e   : > { %v8112_v40 = vsel %vm1534_vm0, %v8063_v28, 0  ;;  %v8057_v31 = vadd.f32 %v8056_v51, %v7880_v14  ;;  %v8296_v6 = vsub.f32 %v21702_v13, %v8295_v45  ;;  %16469 = vmatprep.subr.mxu0 %v24907_v7 }
 0x83f   : > { %v21740_v48 = vsub.f32 %v8103_v3, %v21730_v30  ;;  %v21742_v15 = vand.u32 4294901760, %v8112_v40  ;;  %16361 = vmatprep.mubr.f32.mxu0 %v8267_v33  ;;  %16399 = vmatprep.mubr.f32.mxu1 %v21730_v30  ;;  %v8286_v52 = vsub.f32 %v21715_v46, %v8285_v61  ;;  %v8315_v5 = vand.u32 4294901760, %v21728_v9 }
 0x840   : > { %v8109_v58 = vsel %vm1534_vm0, %v8057_v31, 0  ;;  %16362 = vmatmul.mubr.f32.gmra.mxu0 %v8277_v16  ;;  %16400 = vmatmul.mubr.f32.gmra.mxu1 %v21717_v1  ;;  %v8297_v53 = vand.u32 4294901760, %v8296_v6 }
 0x841   : > { %v21752_v44 = vsub.f32 %v8112_v40, %v21742_v15  ;;  %v21754_v36 = vand.u32 4294901760, %v8109_v58  ;;  %v8287_v21 = vand.u32 4294901760, %v8286_v52  ;;  %v8305_v55 = vand.u32 4294901760, %v21740_v48 }
 0x842   : > { %v8316_v0 = vsub.f32 %v21728_v9, %v8315_v5 }
 0x843   : > { %v21761_v3 = vsub.f32 %v8109_v58, %v21754_v36  ;;  %16364 = vmatprep.mubr.f32.mxu0 %v8287_v21  ;;  %16402 = vmatprep.mubr.f32.mxu1 %v21754_v36  ;;  %v8306_v28 = vsub.f32 %v21740_v48, %v8305_v55  ;;  %v8335_v14 = vand.u32 4294901760, %v21752_v44 }
 0x844   : > { %16365 = vmatmul.mubr.f32.gmra.mxu0 %v8297_v53  ;;  %16403 = vmatmul.mubr.f32.gmra.mxu1 %v21742_v15  ;;  %v8317_v40 = vand.u32 4294901760, %v8316_v0 }
 0x845   : > { %16445 = vmatprep.mubr.f32.mxu1 %v8185_v50  ;;  %v8307_v51 = vand.u32 4294901760, %v8306_v28  ;;  %v8325_v33 = vand.u32 4294901760, %v21761_v3  ;;  %v8336_v31 = vsub.f32 %v21752_v44, %v8335_v14 }
 0x847   : > { %16367 = vmatprep.mubr.f32.mxu0 %v8307_v51  ;;  %v8326_v16 = vsub.f32 %v21761_v3, %v8325_v33  ;;  %v8337_v50 = vand.u32 4294901760, %v8336_v31 }
 0x848   : > { %16368 = vmatmul.mubr.f32.gmra.mxu0 %v8317_v40  ;;  %16446 = vmatmul.mubr.f32.vlgmr.msra.gmra.mxu1 %v8195_v47  ;;  %v24908_v47 = vld [vmem:[#allocation92_spill] sm:$0xff] }
 0x849   : > { %16448 = vmatprep.mubr.f32.mxu1 %v8205_v32  ;;  %v8327_v6 = vand.u32 4294901760, %v8326_v16  ;;  %16502 = vmatpush3.msra.mxu1 %v24898_v19 }
 0x84a   : > { %16503 = vmatprep.subr.mxu1 %v24899_v25 }
 0x84b   : > { %16370 = vmatprep.mubr.f32.mxu0 %v8327_v6  ;;  %16504 = vmatpush3.msra.mxu1 %v24899_v25 }
 0x84c   : > { %16371 = vmatmul.mubr.f32.gmra.mxu0 %v8337_v50  ;;  %16449 = vmatmul.mubr.f32.gmra.mxu1 %v8215_v29 }
 0x84d   : > { %16413 = vmatprep.mubr.f32.mxu0 %v21576_v49  ;;  %16451 = vmatprep.mubr.f32.mxu1 %v8225_v8  ;;  %v24910_v49 = vld [vmem:[#allocation66_spill] sm:$0xff] }
 0x84e   : > { %16505 = vmatprep.subr.mxu1 %v24901_v60 }
 0x84f   : > { %16506 = vmatpush3.msra.mxu1 %v24901_v60 }
 0x850   : > { %16414 = vmatmul.mubr.f32.vlgmr.msra.gmra.mxu0 %v21563_v11  ;;  %16452 = vmatmul.mubr.f32.gmra.mxu1 %v8235_v24  ;;  %v24909_v11 = vld [vmem:[#allocation70_spill] sm:$0xff] }
 0x851   : > { %16416 = vmatprep.mubr.f32.mxu0 %v21607_v2  ;;  %16454 = vmatprep.mubr.f32.mxu1 %v8245_v54 }
 0x852   : > { %16470 = vmatpush3.msra.mxu0 %v24907_v7  ;;  %16507 = vmatprep.subr.mxu1 %v24902_v62 }
 0x853   : > { %16471 = vmatprep.subr.mxu0 %v24908_v47  ;;  %16508 = vmatpush3.msra.mxu1 %v24902_v62 }
 0x854   : > { %16417 = vmatmul.mubr.f32.gmra.mxu0 %v21593_v22  ;;  %16455 = vmatmul.mubr.f32.gmra.mxu1 %v8255_v56 }
 0x855   : > { %16419 = vmatprep.mubr.f32.mxu0 %v21634_v17  ;;  %16457 = vmatprep.mubr.f32.mxu1 %v8265_v35 }
 0x856   : > { %16472 = vmatpush3.msra.mxu0 %v24908_v47 }
 0x857   : > { %16473 = vmatprep.subr.mxu0 %v24909_v11 }
 0x858   : > { %16420 = vmatmul.mubr.f32.gmra.mxu0 %v21621_v20  ;;  %16458 = vmatmul.mubr.f32.gmra.mxu1 %v8275_v10 }
 0x859   : > { %16422 = vmatprep.mubr.f32.mxu0 %v21662_v4  ;;  %16460 = vmatprep.mubr.f32.mxu1 %v8285_v61 }
 0x85a   : > { %16474 = vmatpush3.msra.mxu0 %v24909_v11 }
 0x85b   : > { %16475 = vmatprep.subr.mxu0 %v24910_v49 }
 0x85c   : > { %16423 = vmatmul.mubr.f32.gmra.mxu0 %v21647_v27  ;;  %16461 = vmatmul.mubr.f32.gmra.mxu1 %v8295_v45 }
 0x85d   : > { %16425 = vmatprep.mubr.f32.mxu0 %v21689_v26  ;;  %16463 = vmatprep.mubr.f32.mxu1 %v8305_v55 }
 0x85e   : > { %16476 = vmatpush3.msra.mxu0 %v24910_v49 }
 0x860   : > { %16426 = vmatmul.mubr.f32.gmra.mxu0 %v21676_v38  ;;  %16464 = vmatmul.mubr.f32.gmra.mxu1 %v8315_v5 }
 0x861   : > { %16428 = vmatprep.mubr.f32.mxu0 %v21715_v46  ;;  %16466 = vmatprep.mubr.f32.mxu1 %v8325_v33 }
 0x864   : > { %16429 = vmatmul.mubr.f32.gmra.mxu0 %v21702_v13  ;;  %16467 = vmatmul.mubr.f32.gmra.mxu1 %v8335_v14 }
 0x865   : > { %16431 = vmatprep.mubr.f32.mxu0 %v21740_v48  ;;  %16509 = vmatprep.mubr.f32.mxu1 %v21565_v18 }
 0x868   : > { %16432 = vmatmul.mubr.f32.gmra.mxu0 %v21728_v9  ;;  %16510 = vmatmul.mubr.f32.vlgmr.msra.gmra.mxu1 %v21553_v57 }
 0x869   : > { %16434 = vmatprep.mubr.f32.mxu0 %v21761_v3  ;;  %16512 = vmatprep.mubr.f32.mxu1 %v21595_v41 }
 0x86c   : > { %16435 = vmatmul.mubr.f32.gmra.mxu0 %v21752_v44  ;;  %16513 = vmatmul.mubr.f32.gmra.mxu1 %v21578_v37 }
 0x86d   : > { %16477 = vmatprep.mubr.f32.mxu0 %v21565_v18  ;;  %16515 = vmatprep.mubr.f32.mxu1 %v21623_v39 }
 0x870   : > { %16478 = vmatmul.mubr.f32.vlgmr.msra.gmra.mxu0 %v21553_v57  ;;  %16516 = vmatmul.mubr.f32.gmra.mxu1 %v21609_v42 }
 0x871   : > { %16480 = vmatprep.mubr.f32.mxu0 %v21595_v41  ;;  %16518 = vmatprep.mubr.f32.mxu1 %v21649_v63 }
 0x874   : > { %16481 = vmatmul.mubr.f32.gmra.mxu0 %v21578_v37  ;;  %16519 = vmatmul.mubr.f32.gmra.mxu1 %v21636_v23 }
 0x875   : > { %16483 = vmatprep.mubr.f32.mxu0 %v21623_v39  ;;  %16521 = vmatprep.mubr.f32.mxu1 %v21678_v59 }
 0x878   : > { %16484 = vmatmul.mubr.f32.gmra.mxu0 %v21609_v42  ;;  %16522 = vmatmul.mubr.f32.gmra.mxu1 %v21664_v12 }
 0x879   : > { %16486 = vmatprep.mubr.f32.mxu0 %v21649_v63  ;;  %16524 = vmatprep.mubr.f32.mxu1 %v21704_v34 }
 0x87c   : > { %16487 = vmatmul.mubr.f32.gmra.mxu0 %v21636_v23  ;;  %16525 = vmatmul.mubr.f32.gmra.mxu1 %v21691_v43 }
 0x87d   : > { %16489 = vmatprep.mubr.f32.mxu0 %v21678_v59  ;;  %16527 = vmatprep.mubr.f32.mxu1 %v21730_v30 }
 0x880   : > { %16490 = vmatmul.mubr.f32.gmra.mxu0 %v21664_v12  ;;  %16528 = vmatmul.mubr.f32.gmra.mxu1 %v21717_v1 }
 0x881   : > { %16492 = vmatprep.mubr.f32.mxu0 %v21704_v34  ;;  %16530 = vmatprep.mubr.f32.mxu1 %v21754_v36 }
 0x884   : > { %16493 = vmatmul.mubr.f32.gmra.mxu0 %v21691_v43  ;;  %16531 = vmatmul.mubr.f32.gmra.mxu1 %v21742_v15 }
 0x885   : > { %16495 = vmatprep.mubr.f32.mxu0 %v21730_v30 }
 0x888   : > { %16496 = vmatmul.mubr.f32.gmra.mxu0 %v21717_v1 }
 0x889   : > { %16498 = vmatprep.mubr.f32.mxu0 %v21754_v36 }
 0x88c   : > { %16499 = vmatmul.mubr.f32.gmra.mxu0 %v21742_v15 }
 0x8e8   : > { %v16383_v57 = vpop.f32.mrf.mxu1 }
 0x8ea   : > { %v21858_v18 = vpop.f32.mrf.mxu1 }
 0x8ec   : > { %v21860_v37 = vpop.f32.mrf.mxu1 }
 0x8ee   : > { %v21862_v22 = vpop.f32.mrf.mxu1 }
 0x8f0   : > { %v16351_v41 = vpop.f32.mrf.mxu0  ;;  %v21864_v19 = vpop.f32.mrf.mxu1 }
 0x8f1   : > { %v8437_v11 = vadd.f32 %v16383_v57, %v16351_v41 }
 0x8f2   : > { %v8189_v25 = vpop.f32.mrf.mxu0  ;;  %v21866_v2 = vpop.f32.mrf.mxu1 }
 0x8f4   : > { %v16354_v42 = vpop.f32.mrf.mxu0  ;;  %v21868_v29 = vpop.f32.mrf.mxu1 }
 0x8f6   : > { %v21870_v60 = vpop.f32.mrf.mxu0  ;;  %v21872_v20 = vpop.f32.mrf.mxu1 }
 0x8f8   : > { %v21874_v39 = vpop.f32.mrf.mxu0  ;;  %v21876_v32 = vpop.f32.mrf.mxu1 }
 0x8f9   : > { %v8461_v41 = vadd.f32 %v21864_v19, %v21874_v39  ;;  %v24926_v39 = vld [vmem:[#allocation17_spill] sm:$0xff] }
 0x8fa   : > { %v21878_v62 = vpop.f32.mrf.mxu0  ;;  %v21880_v17 = vpop.f32.mrf.mxu1 }
 0x8fc   : > { %v21882_v23 = vpop.f32.mrf.mxu0  ;;  %v21884_v24 = vpop.f32.mrf.mxu1 }
 0x8fe   : > { %v21886_v27 = vpop.f32.mrf.mxu0  ;;  %v21888_v63 = vpop.f32.mrf.mxu1 }
 0x900   : > { %v21890_v8 = vpop.f32.mrf.mxu0  ;;  %v21892_v4 = vpop.f32.mrf.mxu1 }
 0x902   : > { %v21894_v12 = vpop.f32.mrf.mxu0  ;;  %v21896_v56 = vpop.f32.mrf.mxu1 }
 0x903   : > { %24911 = vst [vmem:[#allocation37_spill] sm:$0xff] %v21896_v56 }
 0x904   : > { %v21898_v38 = vpop.f32.mrf.mxu0  ;;  %v21900_v59 = vpop.f32.mrf.mxu1 }
 0x905   : > { %24912 = vst [vmem:[#allocation87_spill] sm:$0xff] %v21900_v59  ;;  %v8449_v59 = vadd.f32 %v21860_v37, %v16354_v42  ;;  %v8455_v37 = vadd.f32 %v21866_v2, %v21878_v62  ;;  %v8467_v2 = vadd.f32 %v21872_v20, %v21886_v27 }
 0x906   : > { %v21902_v54 = vpop.f32.mrf.mxu0  ;;  %v21904_v26 = vpop.f32.mrf.mxu1 }
 0x907   : > { %24913 = vst [vmem:[#allocation42_spill] sm:$0xff] %v21904_v26 }
 0x908   : > { %v21906_v43 = vpop.f32.mrf.mxu0  ;;  %v16447_v10 = vpop.f32.mrf.mxu1 }
 0x90a   : > { %v21908_v13 = vpop.f32.mrf.mxu0  ;;  %v8782_v34 = vpop.f32.mrf.mxu1 }
 0x90c   : > { %v21910_v35 = vpop.f32.mrf.mxu0  ;;  %v16450_v46 = vpop.f32.mrf.mxu1 }
 0x90d   : > { %24914 = vst [vmem:[#allocation73_spill] sm:$0xff] %v21910_v35 }
 0x90e   : > { %v21912_v1 = vpop.f32.mrf.mxu0  ;;  %v8798_v45 = vpop.f32.mrf.mxu1 }
 0x90f   : > { %24915 = vst [vmem:[#allocation9_spill] sm:$0xff] %v21912_v1 }
 0x910   : > { %v16415_v9 = vpop.f32.mrf.mxu0  ;;  %v21914_v30 = vpop.f32.mrf.mxu1 }
 0x911   : > { %v8608_v1 = vadd.f32 %v16415_v9, %v8437_v11 }
 0x912   : > { %v8600_v61 = vpop.f32.mrf.mxu0  ;;  %v21916_v7 = vpop.f32.mrf.mxu1 }
 0x913   : > { %v8791_v57 = vadd.f32 %v16447_v10, %v8608_v1 }
 0x914   : > { %v16418_v48 = vpop.f32.mrf.mxu0  ;;  %v21918_v15 = vpop.f32.mrf.mxu1 }
 0x916   : > { %v8614_v52 = vpop.f32.mrf.mxu0  ;;  %v21920_v5 = vpop.f32.mrf.mxu1 }
 0x918   : > { %v16421_v58 = vpop.f32.mrf.mxu0  ;;  %v21922_v44 = vpop.f32.mrf.mxu1 }
 0x919   : > { %v8636_v42 = vadd.f32 %v16421_v58, %v8461_v41 }
 0x91a   : > { %v8628_v36 = vpop.f32.mrf.mxu0  ;;  %v21924_v21 = vpop.f32.mrf.mxu1 }
 0x91c   : > { %v16424_v55 = vpop.f32.mrf.mxu0  ;;  %v21926_v53 = vpop.f32.mrf.mxu1 }
 0x91d   : > { %24916 = vst [vmem:[#allocation96_spill] sm:$0xff] %v21926_v53 }
 0x91e   : > { %v8642_v0 = vpop.f32.mrf.mxu0  ;;  %v21928_v3 = vpop.f32.mrf.mxu1 }
 0x91f   : > { %24917 = vst [vmem:[#allocation85_spill] sm:$0xff] %v21928_v3 }
 0x920   : > { %v21930_v28 = vpop.f32.mrf.mxu0  ;;  %v21932_v14 = vpop.f32.mrf.mxu1 }
 0x921   : > { %24918 = vst [vmem:[#allocation47_spill] sm:$0xff] %v21932_v14  ;;  %v8431_v14 = vadd.f32 %v21858_v18, %v8189_v25 }
 0x922   : > { %v21934_v51 = vpop.f32.mrf.mxu0  ;;  %v21936_v33 = vpop.f32.mrf.mxu1 }
 0x923   : > { %24919 = vst [vmem:[#allocation44_spill] sm:$0xff] %v21936_v33 }
 0x924   : > { %v21938_v40 = vpop.f32.mrf.mxu0  ;;  %v21940_v31 = vpop.f32.mrf.mxu1 }
 0x925   : > { %24920 = vst [vmem:[#allocation34_spill] sm:$0xff] %v21940_v31  ;;  %v8601_v31 = vadd.f32 %v8600_v61, %v8431_v14 }
 0x926   : > { %v21942_v16 = vpop.f32.mrf.mxu0  ;;  %v21944_v6 = vpop.f32.mrf.mxu1 }
 0x927   : > { %24921 = vst [vmem:[#allocation65_spill] sm:$0xff] %v21944_v6  ;;  %v8443_v6 = vadd.f32 %v21862_v22, %v21870_v60  ;;  %v8783_v11 = vadd.f32 %v8782_v34, %v8601_v31  ;;  %v8473_v22 = vadd.f32 %v21868_v29, %v21882_v23  ;;  %v8629_v60 = vadd.f32 %v8628_v36, %v8455_v37  ;;  %v24928_v23 = vld [vmem:[#allocation16_spill] sm:$0xff] }
 0x928   : > { %v21946_v50 = vpop.f32.mrf.mxu0  ;;  %v16511_v47 = vpop.f32.mrf.mxu1 }
 0x929   : > { %24922 = vst [vmem:[#allocation43_spill] sm:$0xff] %v21946_v50  ;;  %v8622_v50 = vadd.f32 %v16418_v48, %v8449_v59  ;;  %v8615_v25 = vadd.f32 %v8614_v52, %v8443_v6  ;;  %v8650_v62 = vadd.f32 %v16424_v55, %v8473_v22  ;;  %v8815_v27 = vadd.f32 %v21916_v7, %v8629_v60 }
 0x92a   : > { %v21948_v49 = vpop.f32.mrf.mxu0  ;;  %v9150_v26 = vpop.f32.mrf.mxu1 }
 0x92b   : > { %24923 = vst [vmem:[#allocation53_spill] sm:$0xff] %v21948_v49  ;;  %v8807_v56 = vadd.f32 %v16450_v46, %v8622_v50  ;;  %v8799_v48 = vadd.f32 %v8798_v45, %v8615_v25  ;;  %v8823_v46 = vadd.f32 %v21914_v30, %v8636_v42  ;;  %v24930_v45 = vld [vmem:[#allocation19_spill] sm:$0xff]  ;;  %v8479_v50 = vadd.f32 %v21880_v17, %v21894_v12 }
 0x92c   : > { %v21951_v3 = vpop.f32.mrf.mxu0  ;;  %v16514_v33 = vpop.f32.mrf.mxu1  ;;  %v8497_v25 = vadd.f32 %v21884_v24, %v21898_v38 }
 0x92d   : > { %24924 = vst [vmem:[#allocation33_spill] sm:$0xff] %v21951_v3  ;;  %v8657_v17 = vadd.f32 %v21934_v51, %v8479_v50  ;;  %v24949_v50 = vld [vmem:[#allocation10_spill] sm:$0xff] }
 0x92e   : > { %v21954_v35 = vpop.f32.mrf.mxu0  ;;  %v9162_v53 = vpop.f32.mrf.mxu1  ;;  %v8678_v24 = vadd.f32 %v21938_v40, %v8497_v25 }
 0x92f   : > { %24925 = vst [vmem:[#allocation95_spill] sm:$0xff] %v21954_v35  ;;  %v8847_v40 = vadd.f32 %v21924_v21, %v8657_v17 }
 0x930   : > { %v16479_v49 = vpop.f32.mrf.mxu0  ;;  %v16517_v18 = vpop.f32.mrf.mxu1 }
 0x931   : > { %v8992_v9 = vadd.f32 %v16479_v49, %v8791_v57 }
 0x932   : > { %v8985_v61 = vpop.f32.mrf.mxu0  ;;  %v9174_v14 = vpop.f32.mrf.mxu1 }
 0x933   : > { %v9157_v35 = vadd.f32 %v16511_v47, %v8992_v9  ;;  %v8986_v3 = vadd.f32 %v8985_v61, %v8783_v11  ;;  %v24934_v11 = vld [vmem:[#allocation21_spill] sm:$0xff]  ;;  %v8491_v61 = vadd.f32 %v21888_v63, %v21902_v54 }
 0x934   : > { %v16482_v59 = vpop.f32.mrf.mxu0  ;;  %v16520_v19 = vpop.f32.mrf.mxu1 }
 0x935   : > { %v21965_v10 = vadd.f32 %v9157_v35, %v24926_v39  ;;  %v9151_v1 = vadd.f32 %v9150_v26, %v8986_v3  ;;  %v9004_v34 = vadd.f32 %v16482_v59, %v8807_v56  ;;  %v8485_v56 = vadd.f32 %v21876_v32, %v21890_v8  ;;  %v24936_v59 = vld [vmem:[#allocation20_spill] sm:$0xff] }
 0x936   : > { %v8997_v52 = vpop.f32.mrf.mxu0  ;;  %v9186_v58 = vpop.f32.mrf.mxu1  ;;  %v8643_v26 = vadd.f32 %v8642_v0, %v8467_v2  ;;  %v8839_v0 = vadd.f32 %v21918_v15, %v8650_v62  ;;  %v8509_v39 = vadd.f32 %v21892_v4, %v21906_v43  ;;  %v24940_v62 = vld [vmem:[#allocation37_spill] sm:$0xff] }
 0x937   : > { %24927 = vst [vmem:[#allocation32_spill] sm:$0xff] %v21965_v10  ;;  %v9169_v31 = vadd.f32 %v16514_v33, %v9004_v34  ;;  %v8998_v6 = vadd.f32 %v8997_v52, %v8799_v48  ;;  %v9263_v29 = vsel %vm1534_vm0, %v21965_v10, 0.0  ;;  %v21973_v36 = vadd.f32 %v9151_v1, %v24928_v23  ;;  %v24938_v34 = vld [vmem:[#allocation23_spill] sm:$0xff]  ;;  %v24943_v23 = vld [vmem:[#allocation22_spill] sm:$0xff] }
 0x938   : > { %v16523_v35 = vpop.f32.mrf.mxu1  ;;  %9264 = vadd.xlane.f32.xlu1 %v9263_v29  ;;  %v16485_v20 = vpop.f32.mrf.mxu0  ;;  %v8664_v47 = vadd.f32 %v21930_v28, %v8485_v56  ;;  %v8831_v9 = vadd.f32 %v21920_v5, %v8643_v26  ;;  %v8671_v1 = vadd.f32 %v21942_v16, %v8491_v61  ;;  %v8503_v52 = vadd.f32 %v24940_v62, %v21908_v13  ;;  %v24942_v16 = vld [vmem:[#allocation96_spill] sm:$0xff]  ;;  %v24945_v56 = vld [vmem:[#allocation73_spill] sm:$0xff]  ;;  %v24946_v26 = vld [vmem:[#allocation87_spill] sm:$0xff] }
 0x939   : > { %24929 = vst [vmem:[#allocation79_spill] sm:$0xff] %v21973_v36  ;;  %v21979_v55 = vadd.f32 %v9169_v31, %v24930_v45  ;;  %v9163_v30 = vadd.f32 %v9162_v53, %v8998_v6  ;;  %v9016_v3 = vadd.f32 %v16485_v20, %v8823_v46  ;;  %v9260_v33 = vsel %vm1534_vm0, %v21973_v36, 0.0  ;;  %v24932_v53 = vld [vmem:[#allocation18_spill] sm:$0xff]  ;;  %v24941_v46 = vld [vmem:[#allocation43_spill] sm:$0xff] }
 0x93a   : > { %v9009_v32 = vpop.f32.mrf.mxu0  ;;  %v9198_v8 = vpop.f32.mrf.mxu1  ;;  %9261 = vadd.xlane.f32.xlu0 %v9260_v33  ;;  %v8855_v51 = vadd.f32 %v21922_v44, %v8664_v47  ;;  %v8692_v4 = vadd.f32 %v24941_v46, %v8509_v39  ;;  %v8871_v31 = vadd.f32 %v24942_v16, %v8678_v24  ;;  %v8521_v20 = vadd.f32 %v24946_v26, %v24945_v56  ;;  %v24957_v61 = vld [vmem:[#allocation95_spill] sm:$0xff]  ;;  %v24962_v62 = vld [vmem:[#allocation14_spill] sm:$0xff]  ;;  %v24965_v16 = vld [vmem:[#allocation8_spill] sm:$0xff] }
 0x93b   : > { %24931 = vst [vmem:[#allocation25_spill] sm:$0xff] %v21979_v55  ;;  %v9181_v49 = vadd.f32 %v16517_v18, %v9016_v3  ;;  %v9010_v7 = vadd.f32 %v9009_v32, %v8815_v27  ;;  %v9269_v57 = vsel %vm1534_vm0, %v21979_v55, 0.0  ;;  %v21990_v41 = vadd.f32 %v9163_v30, %v24932_v53  ;;  %v24947_v27 = vld [vmem:[#allocation53_spill] sm:$0xff]  ;;  %v24967_v56 = vld [vmem:[#allocation6_spill] sm:$0xff] }
 0x93c   : > { %v16526_v12 = vpop.f32.mrf.mxu1  ;;  %9270 = vadd.xlane.f32.xlu1 %v9269_v57  ;;  %v16488_v28 = vpop.f32.mrf.mxu0  ;;  %v8685_v45 = vadd.f32 %v24947_v27, %v8503_v52  ;;  %v24948_v3 = vld [vmem:[#allocation85_spill] sm:$0xff] }
 0x93d   : > { %24933 = vst [vmem:[#allocation67_spill] sm:$0xff] %v21990_v41  ;;  %v21997_v15 = vadd.f32 %v9181_v49, %v24934_v11  ;;  %v9175_v18 = vadd.f32 %v9174_v14, %v9010_v7  ;;  %v9028_v37 = vadd.f32 %v16488_v28, %v8839_v0  ;;  %v9266_v42 = vsel %vm1534_vm0, %v21990_v41, 0.0  ;;  %v24951_v49 = vld [vmem:[#allocation9_spill] sm:$0xff]  ;;  %v24952_v7 = vld [vmem:[#allocation42_spill] sm:$0xff]  ;;  %v24954_v28 = vld [vmem:[#allocation47_spill] sm:$0xff] }
 0x93e   : > { %v9021_v38 = vpop.f32.mrf.mxu0  ;;  %9267 = vadd.xlane.f32.xlu0 %v9266_v42  ;;  %v9210_v63 = vpop.f32.mrf.mxu1  ;;  %v8863_v33 = vadd.f32 %v24948_v3, %v8671_v1  ;;  %v8515_v57 = vadd.f32 %v24952_v7, %v24951_v49  ;;  %v24953_v53 = vld [vmem:[#allocation33_spill] sm:$0xff]  ;;  %v24955_v42 = vld [vmem:[#allocation2_spill] sm:$0xff] }
 0x93f   : > { %24935 = vst [vmem:[#allocation50_spill] sm:$0xff] %v21997_v15  ;;  %v9193_v22 = vadd.f32 %v16520_v19, %v9028_v37  ;;  %v9022_v60 = vadd.f32 %v9021_v38, %v8831_v9  ;;  %v9275_v5 = vsel %vm1534_vm0, %v21997_v15, 0.0  ;;  %v22008_v14 = vadd.f32 %v9175_v18, %v24936_v59 }
 0x940   : > { %9276 = vadd.xlane.f32.xlu1 %v9275_v5  ;;  %v16491_v54 = vpop.f32.mrf.mxu0  ;;  %v16529_v13 = vpop.f32.mrf.mxu1  ;;  %v8706_v25 = vadd.f32 %v24953_v53, %v8521_v20  ;;  %v8887_v9 = vadd.f32 %v24954_v28, %v8692_v4  ;;  %v8699_v24 = vadd.f32 %v24957_v61, %v8515_v57  ;;  %v24959_v5 = vld [vmem:[#allocation12_spill] sm:$0xff] }
 0x941   : > { %24937 = vst [vmem:[#allocation26_spill] sm:$0xff] %v22008_v14  ;;  %v22015_v44 = vadd.f32 %v9193_v22, %v24938_v34  ;;  %v9187_v19 = vadd.f32 %v9186_v58, %v9022_v60  ;;  %v9040_v48 = vadd.f32 %v16491_v54, %v8855_v51  ;;  %v9272_v2 = vsel %vm1534_vm0, %v22008_v14, 0.0  ;;  %v24958_v22 = vld [vmem:[#allocation44_spill] sm:$0xff] }
 0x942   : > { %v9033_v43 = vpop.f32.mrf.mxu0  ;;  %9273 = vadd.xlane.f32.xlu0 %v9272_v2  ;;  %v9222_v38 = vpop.f32.mrf.mxu1  ;;  %v8879_v60 = vadd.f32 %v24958_v22, %v8685_v45 }
 0x943   : > { %24939 = vst [vmem:[#allocation83_spill] sm:$0xff] %v22015_v44  ;;  %v9205_v6 = vadd.f32 %v16523_v35, %v9040_v48  ;;  %v9034_v29 = vadd.f32 %v9033_v43, %v8847_v40  ;;  %v9281_v21 = vsel %vm1534_vm0, %v22015_v44, 0.0  ;;  %v22026_v58 = vadd.f32 %v9187_v19, %v24943_v23  ;;  %v24961_v40 = vld [vmem:[#allocation34_spill] sm:$0xff] }
 0x944   : > { %9282 = vadd.xlane.f32.xlu1 %v9281_v21  ;;  %v16494_v30 = vpop.f32.mrf.mxu0  ;;  %v8903_v34 = vadd.f32 %v24961_v40, %v8706_v25  ;;  %v16532_v46 = vpop.f32.mrf.mxu1 }
 0x945   : > { %24944 = vst [vmem:[#allocation68_spill] sm:$0xff] %v22026_v58  ;;  %v22033_v47 = vadd.f32 %v9205_v6, %v24949_v50  ;;  %v9199_v35 = vadd.f32 %v9198_v8, %v9034_v29  ;;  %v9052_v32 = vadd.f32 %v16494_v30, %v8871_v31  ;;  %v9278_v0 = vsel %vm1534_vm0, %v22026_v58, 0.0  ;;  %v24969_v30 = vld [vmem:[#allocation5_spill] sm:$0xff] }
 0x946   : > { %v9045_v17 = vpop.f32.mrf.mxu0  ;;  %9279 = vadd.xlane.f32.xlu0 %v9278_v0 }
 0x947   : > { %24950 = vst [vmem:[#allocation60_spill] sm:$0xff] %v22033_v47  ;;  %v9217_v11 = vadd.f32 %v16526_v12, %v9052_v32  ;;  %v9046_v18 = vadd.f32 %v9045_v17, %v8863_v33  ;;  %v9287_v37 = vsel %vm1534_vm0, %v22033_v47, 0.0  ;;  %v22044_v8 = vadd.f32 %v9199_v35, %v24955_v42  ;;  %v24971_v35 = vld [vmem:[#allocation4_spill] sm:$0xff] }
 0x948   : > { %9288 = vadd.xlane.f32.xlu1 %v9287_v37  ;;  %v16497_v51 = vpop.f32.mrf.mxu0 }
 0x949   : > { %24956 = vst [vmem:[#allocation54_spill] sm:$0xff] %v22044_v8  ;;  %v22049_v59 = vadd.f32 %v9217_v11, %v24959_v5  ;;  %v9211_v39 = vadd.f32 %v9210_v63, %v9046_v18  ;;  %v9064_v1 = vadd.f32 %v16497_v51, %v8887_v9  ;;  %v9284_v12 = vsel %vm1534_vm0, %v22044_v8, 0.0  ;;  %v24964_v63 = vld [vmem:[#allocation65_spill] sm:$0xff] }
 0x94a   : > { %v9057_v54 = vpop.f32.mrf.mxu0  ;;  %9285 = vadd.xlane.f32.xlu0 %v9284_v12  ;;  %v8895_v43 = vadd.f32 %v24964_v63, %v8699_v24 }
 0x94b   : > { %24960 = vst [vmem:[#allocation38_spill] sm:$0xff] %v22049_v59  ;;  %v9229_v19 = vadd.f32 %v16529_v13, %v9064_v1  ;;  %v9058_v48 = vadd.f32 %v9057_v54, %v8879_v60  ;;  %v9293_v2 = vsel %vm1534_vm0, %v22049_v59, 0.0  ;;  %v22057_v52 = vadd.f32 %v9211_v39, %v24962_v62  ;;  %v9234_v13 = vpop.f32.mrf.mxu1 }
 0x94c   : > { %9294 = vadd.xlane.f32.xlu1 %v9293_v2  ;;  %v16500_v4 = vpop.f32.mrf.mxu0 }
 0x94d   : > { %24963 = vst [vmem:[#allocation84_spill] sm:$0xff] %v22057_v52  ;;  %v22061_v31 = vadd.f32 %v9229_v19, %v24965_v16  ;;  %v9223_v6 = vadd.f32 %v9222_v38, %v9058_v48  ;;  %v9076_v29 = vadd.f32 %v16500_v4, %v8903_v34  ;;  %v9290_v21 = vsel %vm1534_vm0, %v22057_v52, 0.0 }
 0x94e   : > { %v9069_v23 = vpop.f32.mrf.mxu0  ;;  %9291 = vadd.xlane.f32.xlu0 %v9290_v21 }
 0x94f   : > { %24966 = vst [vmem:[#allocation82_spill] sm:$0xff] %v22061_v31  ;;  %v22066_v26 = vadd.f32 %v9223_v6, %v24967_v56  ;;  %v9241_v20 = vadd.f32 %v16532_v46, %v9076_v29  ;;  %v9070_v27 = vadd.f32 %v9069_v23, %v8895_v43  ;;  %v9299_v45 = vsel %vm1534_vm0, %v22061_v31, 0.0 }
 0x950   : > { %9300 = vadd.xlane.f32.xlu1 %v9299_v45 }
 0x951   : > { %24968 = vst [vmem:[#allocation7_spill] sm:$0xff] %v22066_v26  ;;  %v22071_v3 = vadd.f32 %v9241_v20, %v24969_v30  ;;  %v9235_v33 = vadd.f32 %v9234_v13, %v9070_v27  ;;  %v9296_v50 = vsel %vm1534_vm0, %v22066_v26, 0.0 }
 0x952   : > { %9297 = vadd.xlane.f32.xlu0 %v9296_v50 }
 0x953   : > { %24970 = vst [vmem:[#allocation49_spill] sm:$0xff] %v22071_v3  ;;  %v22076_v32 = vadd.f32 %v9235_v33, %v24971_v35  ;;  %v9305_v0 = vsel %vm1534_vm0, %v22071_v3, 0.0 }
 0x954   : > { %9306 = vadd.xlane.f32.xlu1 %v9305_v0 }
 0x955   : > { %24972 = vst [vmem:[#allocation55_spill] sm:$0xff] %v22076_v32  ;;  %v9302_v49 = vsel %vm1534_vm0, %v22076_v32, 0.0 }
 0x956   : > { %9303 = vadd.xlane.f32.xlu0 %v9302_v49 }
 0x9c1   : > { %v9265_v7 = vpop.xlane.xlu1 %9264 }
 0x9c2   : > { %v9309_v57 = vmul.f32 0.03125, %v9265_v7 }
 0x9c3   : > { %v9262_v53 = vpop.xlane.xlu0 %9261 }
 0x9c4   : > { %v22083_v25 = vsub.f32 %v21965_v10, %v9309_v57  ;;  %v9308_v17 = vmul.f32 0.03125, %v9262_v53 }
 0x9c5   : > { %v9271_v28 = vpop.xlane.xlu1 %9270 }
 0x9c6   : > { %v22086_v9 = vsub.f32 %v21973_v36, %v9308_v17  ;;  %v9311_v11 = vmul.f32 0.03125, %v9271_v28  ;;  %v9341_v18 = vmul.f32 %v22083_v25, %v22083_v25 }
 0x9c7   : > { %v9268_v37 = vpop.xlane.xlu0 %9267 }
 0x9c8   : > { %v22091_v42 = vsub.f32 %v21979_v55, %v9311_v11  ;;  %v9310_v61 = vmul.f32 0.03125, %v9268_v37  ;;  %v9359_v24 = vsel %vm1534_vm0, %v9341_v18, 0.0  ;;  %v9340_v38 = vmul.f32 %v22086_v9, %v22086_v9 }
 0x9c9   : > { %v9277_v51 = vpop.xlane.xlu1 %9276  ;;  %9360 = vadd.xlane.f32.xlu1 %v9359_v24 }
 0x9ca   : > { %v22097_v22 = vsub.f32 %v21990_v41, %v9310_v61  ;;  %v9313_v60 = vmul.f32 0.03125, %v9277_v51  ;;  %v9356_v5 = vsel %vm1534_vm0, %v9340_v38, 0.0  ;;  %v9343_v39 = vmul.f32 %v22091_v42, %v22091_v42 }
 0x9cb   : > { %v9274_v1 = vpop.xlane.xlu0 %9273  ;;  %9357 = vadd.xlane.f32.xlu0 %v9356_v5 }
 0x9cc   : > { %v22103_v12 = vsub.f32 %v21997_v15, %v9313_v60  ;;  %v9312_v54 = vmul.f32 0.03125, %v9274_v1  ;;  %v9365_v40 = vsel %vm1534_vm0, %v9343_v39, 0.0  ;;  %v9342_v34 = vmul.f32 %v22097_v22, %v22097_v22 }
 0x9cd   : > { %v9283_v19 = vpop.xlane.xlu1 %9282  ;;  %9366 = vadd.xlane.f32.xlu1 %v9365_v40 }
 0x9ce   : > { %v22109_v48 = vsub.f32 %v22008_v14, %v9312_v54  ;;  %v9315_v2 = vmul.f32 0.03125, %v9283_v19  ;;  %v9362_v62 = vsel %vm1534_vm0, %v9342_v34, 0.0  ;;  %v9345_v46 = vmul.f32 %v22103_v12, %v22103_v12 }
 0x9cf   : > { %v9280_v4 = vpop.xlane.xlu0 %9279  ;;  %9363 = vadd.xlane.f32.xlu0 %v9362_v62 }
 0x9d0   : > { %v22115_v63 = vsub.f32 %v22015_v44, %v9315_v2  ;;  %v9314_v43 = vmul.f32 0.03125, %v9280_v4  ;;  %v9371_v16 = vsel %vm1534_vm0, %v9345_v46, 0.0  ;;  %v9344_v6 = vmul.f32 %v22109_v48, %v22109_v48 }
 0x9d1   : > { %v9289_v29 = vpop.xlane.xlu1 %9288  ;;  %9372 = vadd.xlane.f32.xlu1 %v9371_v16 }
 0x9d2   : > { %v22121_v21 = vsub.f32 %v22026_v58, %v9314_v43  ;;  %v9317_v23 = vmul.f32 0.03125, %v9289_v29  ;;  %v9368_v56 = vsel %vm1534_vm0, %v9344_v6, 0.0  ;;  %v9347_v20 = vmul.f32 %v22115_v63, %v22115_v63  ;;  %v195_v6 = vld [vmem:[%s23891_s1 + $0x118] sm:$0xff] }
 0x9d3   : > { %v9286_v27 = vpop.xlane.xlu0 %9285  ;;  %9369 = vadd.xlane.f32.xlu0 %v9368_v56  ;;  %v22171_v29 = vand.u32 4294901760, %v195_v6 }
 0x9d4   : > { %v22127_v45 = vsub.f32 %v22033_v47, %v9317_v23  ;;  %v9316_v13 = vmul.f32 0.03125, %v9286_v27  ;;  %v9377_v30 = vsel %vm1534_vm0, %v9347_v20, 0.0  ;;  %v9346_v33 = vmul.f32 %v22121_v21, %v22121_v21  ;;  %v194_v27 = vld [vmem:[%s23891_s1 + $0x110] sm:$0xff] }
 0x9d5   : > { %v9295_v50 = vpop.xlane.xlu1 %9294  ;;  %9378 = vadd.xlane.f32.xlu1 %v9377_v30  ;;  %16533 = vmatprep.subr.mxu0 %v22171_v29  ;;  %v22186_v30 = vand.u32 4294901760, %v194_v27 }
 0x9d6   : > { %v22133_v35 = vsub.f32 %v22044_v8, %v9316_v13  ;;  %v9319_v0 = vmul.f32 0.03125, %v9295_v50  ;;  %v9374_v49 = vsel %vm1534_vm0, %v9346_v33, 0.0  ;;  %v9349_v7 = vmul.f32 %v22127_v45, %v22127_v45  ;;  %16534 = vmatpush3.msra.mxu0 %v22171_v29 }
 0x9d7   : > { %v9292_v57 = vpop.xlane.xlu0 %9291  ;;  %9375 = vadd.xlane.f32.xlu0 %v9374_v49  ;;  %v22184_v13 = vsub.f32 %v195_v6, %v22171_v29  ;;  %16535 = vmatprep.subr.mxu0 %v22186_v30 }
 0x9d8   : > { %v22139_v53 = vsub.f32 %v22049_v59, %v9319_v0  ;;  %v9318_v17 = vmul.f32 0.03125, %v9292_v57  ;;  %v9383_v28 = vsel %vm1534_vm0, %v9349_v7, 0.0  ;;  %v9348_v11 = vmul.f32 %v22133_v35, %v22133_v35  ;;  %v193_v0 = vld [vmem:[%s23891_s1 + $0x108] sm:$0xff]  ;;  %16536 = vmatpush3.msra.mxu0 %v22186_v30 }
 0x9d9   : > { %v9301_v18 = vpop.xlane.xlu1 %9300  ;;  %9384 = vadd.xlane.f32.xlu1 %v9383_v28  ;;  %v22196_v49 = vand.u32 4294901760, %v22184_v13  ;;  %v22200_v7 = vsub.f32 %v194_v27, %v22186_v30  ;;  %v22202_v57 = vand.u32 4294901760, %v193_v0  ;;  %v192_v28 = vld [vmem:[%s23891_s1 + $0x100] sm:$0xff] }
 0x9da   : > { %v22145_v37 = vsub.f32 %v22057_v52, %v9318_v17  ;;  %v9321_v61 = vmul.f32 0.03125, %v9301_v18  ;;  %v9380_v24 = vsel %vm1534_vm0, %v9348_v11, 0.0  ;;  %v9351_v38 = vmul.f32 %v22139_v53, %v22139_v53 }
 0x9db   : > { %v9298_v51 = vpop.xlane.xlu0 %9297  ;;  %9381 = vadd.xlane.f32.xlu0 %v9380_v24  ;;  %v9817_v11 = vsub.f32 %v22184_v13, %v22196_v49  ;;  %v22212_v18 = vand.u32 4294901760, %v22200_v7  ;;  %16537 = vmatprep.subr.mxu0 %v22202_v57  ;;  %v22218_v24 = vand.u32 4294901760, %v192_v28 }
 0x9dc   : > { %v22151_v60 = vsub.f32 %v22061_v31, %v9321_v61  ;;  %v9320_v5 = vmul.f32 0.03125, %v9298_v51  ;;  %v9389_v39 = vsel %vm1534_vm0, %v9351_v38, 0.0  ;;  %v9350_v1 = vmul.f32 %v22145_v37, %v22145_v37  ;;  %16538 = vmatpush3.msra.mxu0 %v22202_v57 }
 0x9dd   : > { %9390 = vadd.xlane.f32.xlu1 %v9389_v39  ;;  %v9307_v54 = vpop.xlane.xlu1 %9306  ;;  %v22216_v61 = vsub.f32 %v193_v0, %v22202_v57  ;;  %v9818_v38 = vand.u32 4294901760, %v9817_v11  ;;  %v9824_v51 = vsub.f32 %v22200_v7, %v22212_v18  ;;  %v22227_v39 = vsub.f32 %v192_v28, %v22218_v24  ;;  %16539 = vmatprep.subr.mxu0 %v22218_v24 }
 0x9de   : > { %v22157_v40 = vsub.f32 %v22066_v26, %v9320_v5  ;;  %v9323_v34 = vmul.f32 0.03125, %v9307_v54  ;;  %v9386_v19 = vsel %vm1534_vm0, %v9350_v1, 0.0  ;;  %v9353_v2 = vmul.f32 %v22151_v60, %v22151_v60  ;;  %16540 = vmatpush3.msra.mxu0 %v22218_v24 }
 0x9df   : > { %9387 = vadd.xlane.f32.xlu0 %v9386_v19  ;;  %v9304_v62 = vpop.xlane.xlu0 %9303  ;;  %v22224_v5 = vand.u32 4294901760, %v22216_v61  ;;  %16565 = vmatprep.subr.mxu1 %v9818_v38  ;;  %v9825_v1 = vand.u32 4294901760, %v9824_v51 }
 0x9e0   : > { %v22163_v46 = vsub.f32 %v22071_v3, %v9323_v34  ;;  %v9322_v4 = vmul.f32 0.03125, %v9304_v62  ;;  %v9395_v43 = vsel %vm1534_vm0, %v9353_v2, 0.0  ;;  %v9352_v16 = vmul.f32 %v22157_v40, %v22157_v40  ;;  %16597 = vmatprep.subr.mxu0 %v22184_v13  ;;  %16566 = vmatpush3.msra.mxu1 %v9818_v38 }
 0x9e1   : > { %9396 = vadd.xlane.f32.xlu1 %v9395_v43  ;;  %v9831_v54 = vsub.f32 %v22216_v61, %v22224_v5  ;;  %v22234_v34 = vand.u32 4294901760, %v22227_v39  ;;  %16567 = vmatprep.subr.mxu1 %v9825_v1 }
 0x9e2   : > { %v22174_v23 = vsub.f32 %v22076_v32, %v9322_v4  ;;  %v9392_v56 = vsel %vm1534_vm0, %v9352_v16, 0.0  ;;  %v9355_v20 = vmul.f32 %v22163_v46, %v22163_v46  ;;  %16568 = vmatpush3.msra.mxu1 %v9825_v1 }
 0x9e3   : > { %9393 = vadd.xlane.f32.xlu0 %v9392_v56  ;;  %v9832_v19 = vand.u32 4294901760, %v9831_v54  ;;  %v9838_v2 = vsub.f32 %v22227_v39, %v22234_v34 }
 0x9e4   : > { %v9401_v33 = vsel %vm1534_vm0, %v9355_v20, 0.0  ;;  %v9354_v50 = vmul.f32 %v22174_v23, %v22174_v23 }
 0x9e5   : > { %9402 = vadd.xlane.f32.xlu1 %v9401_v33  ;;  %16569 = vmatprep.subr.mxu1 %v9832_v19  ;;  %v9839_v62 = vand.u32 4294901760, %v9838_v2 }
 0x9e6   : > { %v9398_v17 = vsel %vm1534_vm0, %v9354_v50, 0.0  ;;  %16570 = vmatpush3.msra.mxu1 %v9832_v19 }
 0x9e7   : > { %9399 = vadd.xlane.f32.xlu0 %v9398_v17  ;;  %16571 = vmatprep.subr.mxu1 %v9839_v62 }
 0x9e8   : > { %16572 = vmatpush3.msra.mxu1 %v9839_v62 }
 0x9e9   : > { %16629 = vmatprep.subr.mxu1 %v22171_v29 }
 0xa52   : > { %v9361_v4 = vpop.xlane.xlu1 %9360 }
 0xa53   : > { %v9405_v43 = vmul.f32 0.03125, %v9361_v4 }
 0xa54   : > { %v9358_v16 = vpop.xlane.xlu0 %9357 }
 0xa55   : > { %v9421_v6 = vadd.f32 1e-05, %v9405_v43  ;;  %v9404_v56 = vmul.f32 0.03125, %v9358_v16 }
 0xa56   : > { %v9367_v20 = vpop.xlane.xlu1 %9366 }
 0xa57   : > { %17347 = vrsqrt.f32 %v9421_v6  ;;  %v9420_v27 = vadd.f32 1e-05, %v9404_v56  ;;  %v9407_v33 = vmul.f32 0.03125, %v9367_v20 }
 0xa58   : > { %v9364_v50 = vpop.xlane.xlu0 %9363 }
 0xa59   : > { %17349 = vrsqrt.f32 %v9420_v27  ;;  %v9423_v0 = vadd.f32 1e-05, %v9407_v33  ;;  %v9406_v17 = vmul.f32 0.03125, %v9364_v50  ;;  %v22243_v33 = vld [vmem:[%s23891_s1 + $0x298] ss:$0 sm:$0xff] }
 0xa5a   : > { %v9373_v28 = vpop.xlane.xlu1 %9372 }
 0xa5b   : > { %17351 = vrsqrt.f32 %v9423_v0  ;;  %v9422_v11 = vadd.f32 1e-05, %v9406_v17  ;;  %v9409_v38 = vmul.f32 0.03125, %v9373_v28 }
 0xa5c   : > { %v9370_v51 = vpop.xlane.xlu0 %9369 }
 0xa5d   : > { %17353 = vrsqrt.f32 %v9422_v11  ;;  %v9425_v1 = vadd.f32 1e-05, %v9409_v38  ;;  %v9408_v54 = vmul.f32 0.03125, %v9370_v51  ;;  %v22249_v11 = vld [vmem:[%s23891_s1 + $0x2a0] ss:$0 sm:$0xff] }
 0xa5e   : > { %v9379_v19 = vpop.xlane.xlu1 %9378 }
 0xa5f   : > { %17355 = vrsqrt.f32 %v9425_v1  ;;  %v9424_v2 = vadd.f32 1e-05, %v9408_v54  ;;  %v9411_v62 = vmul.f32 0.03125, %v9379_v19 }
 0xa60   : > { %v9376_v4 = vpop.xlane.xlu0 %9375 }
 0xa61   : > { %17357 = vrsqrt.f32 %v9424_v2  ;;  %v9410_v43 = vmul.f32 0.03125, %v9376_v4  ;;  %v9427_v16 = vadd.f32 1e-05, %v9411_v62 }
 0xa62   : > { %v9385_v6 = vpop.xlane.xlu1 %9384 }
 0xa63   : > { %v9426_v56 = vadd.f32 1e-05, %v9410_v43  ;;  %v9413_v20 = vmul.f32 0.03125, %v9385_v6 }
 0xa64   : > { %v17348_v27 = vpop.eup %17347  ;;  %v9382_v50 = vpop.xlane.xlu0 %9381 }
 0xa65   : > { %v9453_v0 = vmul.f32 %v17348_v27, %v22083_v25  ;;  %17359 = vrsqrt.f32 %v9426_v56  ;;  %v9412_v17 = vmul.f32 0.03125, %v9382_v50  ;;  %v9429_v38 = vadd.f32 1e-05, %v9413_v20 }
 0xa66   : > { %v17350_v28 = vpop.eup %17349  ;;  %17361 = vrsqrt.f32 %v9427_v16  ;;  %v9391_v51 = vpop.xlane.xlu1 %9390 }
 0xa67   : > { %v9473_v1 = vmul.f32 %v22243_v33, %v9453_v0  ;;  %v9428_v54 = vadd.f32 1e-05, %v9412_v17  ;;  %v9415_v19 = vmul.f32 0.03125, %v9391_v51  ;;  %v9452_v4 = vmul.f32 %v17350_v28, %v22086_v9 }
 0xa68   : > { %v17352_v2 = vpop.eup %17351  ;;  %v9388_v62 = vpop.xlane.xlu0 %9387 }
 0xa69   : > { %v9493_v25 = vadd.f32 %v22249_v11, %v9473_v1  ;;  %17363 = vrsqrt.f32 %v9428_v54  ;;  %v9431_v43 = vadd.f32 1e-05, %v9415_v19  ;;  %v9414_v6 = vmul.f32 0.03125, %v9388_v62 }
 0xa6a   : > { %v17354_v56 = vpop.eup %17353  ;;  %17365 = vrsqrt.f32 %v9429_v38  ;;  %v9397_v27 = vpop.xlane.xlu1 %9396  ;;  %v9472_v16 = vmul.f32 %v22243_v33, %v9452_v4  ;;  %v9455_v20 = vmul.f32 %v17352_v2, %v22091_v42 }
 0xa6b   : > { %17367 = vrsqrt.f32 %v9431_v43  ;;  %v9430_v50 = vadd.f32 1e-05, %v9414_v6  ;;  %v9417_v0 = vmul.f32 0.03125, %v9397_v27  ;;  %v9516_v17 = vsel %vm1534_vm0, %v9493_v25, 0 }
 0xa6c   : > { %v17356_v51 = vpop.eup %17355  ;;  %v9394_v36 = vpop.xlane.xlu0 %9393  ;;  %v9492_v9 = vadd.f32 %v22249_v11, %v9472_v16  ;;  %v22258_v28 = vand.u32 4294901760, %v9516_v17  ;;  %v9454_v1 = vmul.f32 %v17354_v56, %v22097_v22  ;;  %v9475_v38 = vmul.f32 %v22243_v33, %v9455_v20 }
 0xa6d   : > { %17369 = vrsqrt.f32 %v9430_v50  ;;  %v9433_v54 = vadd.f32 1e-05, %v9417_v0  ;;  %v9416_v19 = vmul.f32 0.03125, %v9394_v36  ;;  %v9457_v42 = vmul.f32 %v17356_v51, %v22103_v12 }
 0xa6e   : > { %v17358_v2 = vpop.eup %17357  ;;  %v9403_v62 = vpop.xlane.xlu1 %9402  ;;  %v9513_v4 = vsel %vm1534_vm0, %v9492_v9, 0  ;;  %v22265_v25 = vsub.f32 %v9516_v17, %v22258_v28  ;;  %v9474_v43 = vmul.f32 %v22243_v33, %v9454_v1  ;;  %v9495_v6 = vadd.f32 %v22249_v11, %v9475_v38 }
 0xa6f   : > { %17371 = vrsqrt.f32 %v9433_v54  ;;  %v9432_v22 = vadd.f32 1e-05, %v9416_v19  ;;  %v9419_v56 = vmul.f32 0.03125, %v9403_v62  ;;  %v22269_v27 = vand.u32 4294901760, %v9513_v4 }
 0xa70   : > { %v9400_v16 = vpop.xlane.xlu0 %9399  ;;  %v9494_v36 = vadd.f32 %v22249_v11, %v9474_v43  ;;  %v9522_v12 = vsel %vm1534_vm0, %v9495_v6, 0  ;;  %v9456_v20 = vmul.f32 %v17358_v2, %v22109_v48  ;;  %v24203_v50 = vand.u32 4294901760, %v22265_v25 }
 0xa71   : > { %17373 = vrsqrt.f32 %v9432_v22  ;;  %v9435_v0 = vadd.f32 1e-05, %v9419_v56  ;;  %16573 = vmatprep.mubr.f32.mxu1 %v22269_v27  ;;  %v9418_v17 = vmul.f32 0.03125, %v9400_v16  ;;  %v22276_v51 = vand.u32 4294901760, %v9522_v12 }
 0xa72   : > { %v17360_v9 = vpop.eup %17359  ;;  %16574 = vmatmul.mubr.f32.vlgmr.msra.gmra.mxu1 %v22258_v28  ;;  %v9519_v1 = vsel %vm1534_vm0, %v9494_v36, 0  ;;  %v22281_v38 = vsub.f32 %v9513_v4, %v22269_v27  ;;  %v9476_v54 = vmul.f32 %v22243_v33, %v9456_v20  ;;  %v9642_v48 = vsub.f32 %v22265_v25, %v24203_v50 }
 0xa73   : > { %v17362_v19 = vpop.eup %17361  ;;  %17375 = vrsqrt.f32 %v9435_v0  ;;  %v9434_v2 = vadd.f32 1e-05, %v9418_v17  ;;  %v22287_v62 = vand.u32 4294901760, %v9519_v1  ;;  %v22290_v43 = vsub.f32 %v9522_v12, %v22276_v51  ;;  %16630 = vmatpush3.msra.mxu1 %v22171_v29 }
 0xa74   : > { %v24204_v6 = vand.u32 4294901760, %v22281_v38  ;;  %v9496_v4 = vadd.f32 %v22249_v11, %v9476_v54  ;;  %v9643_v22 = vand.u32 4294901760, %v9642_v48  ;;  %v9477_v56 = vmul.f32 %v22243_v33, %v9457_v42  ;;  %16631 = vmatprep.subr.mxu1 %v22186_v30 }
 0xa75   : > { %17377 = vrsqrt.f32 %v9434_v2  ;;  %16576 = vmatprep.mubr.f32.mxu1 %v22287_v62  ;;  %v22299_v16 = vsub.f32 %v9519_v1, %v22287_v62  ;;  %v9458_v36 = vmul.f32 %v17360_v9, %v22121_v21  ;;  %v24205_v12 = vand.u32 4294901760, %v22290_v43  ;;  %16632 = vmatpush3.msra.mxu1 %v22186_v30 }
 0xa76   : > { %v17364_v20 = vpop.eup %17363  ;;  %16577 = vmatmul.mubr.f32.gmra.mxu1 %v22276_v51  ;;  %v9632_v42 = vsub.f32 %v22281_v38, %v24204_v6  ;;  %v9525_v0 = vsel %vm1534_vm0, %v9496_v4, 0  ;;  %v9497_v17 = vadd.f32 %v22249_v11, %v9477_v56  ;;  %v9459_v1 = vmul.f32 %v17362_v19, %v22115_v63  ;;  %16633 = vmatprep.subr.mxu1 %v22202_v57 }
 0xa77   : > { %v17366_v21 = vpop.eup %17365  ;;  %v22312_v9 = vand.u32 4294901760, %v9525_v0  ;;  %v24208_v54 = vand.u32 4294901760, %v22299_v16  ;;  %v9478_v48 = vmul.f32 %v22243_v33, %v9458_v36  ;;  %v9662_v2 = vsub.f32 %v22290_v43, %v24205_v12  ;;  %16634 = vmatpush3.msra.mxu1 %v22202_v57 }
 0xa78   : > { %v17368_v4 = vpop.eup %17367  ;;  %v9633_v50 = vand.u32 4294901760, %v9632_v42  ;;  %v9528_v56 = vsel %vm1534_vm0, %v9497_v17, 0  ;;  %v9479_v63 = vmul.f32 %v22243_v33, %v9459_v1  ;;  %v9460_v19 = vmul.f32 %v17364_v20, %v22133_v35  ;;  %16635 = vmatprep.subr.mxu1 %v22218_v24 }
 0xa79   : > { %16579 = vmatprep.mubr.f32.mxu1 %v22312_v9  ;;  %v22325_v6 = vand.u32 4294901760, %v9528_v56  ;;  %v9652_v36 = vsub.f32 %v22299_v16, %v24208_v54  ;;  %v9498_v12 = vadd.f32 %v22249_v11, %v9478_v48  ;;  %v9663_v10 = vand.u32 4294901760, %v9662_v2  ;;  %16636 = vmatpush3.msra.mxu1 %v22218_v24 }
 0xa7a   : > { %v17370_v42 = vpop.eup %17369  ;;  %16541 = vmatprep.mubr.f32.mxu0 %v9633_v50  ;;  %v9499_v17 = vadd.f32 %v22249_v11, %v9479_v63  ;;  %v22334_v35 = vsub.f32 %v9525_v0, %v22312_v9  ;;  %v9480_v20 = vmul.f32 %v22243_v33, %v9460_v19  ;;  %v9461_v1 = vmul.f32 %v17366_v21, %v22127_v45 }
 0xa7b   : > { %16542 = vmatmul.mubr.f32.vlgmr.msra.gmra.mxu0 %v9643_v22  ;;  %v22339_v41 = vsub.f32 %v9528_v56, %v22325_v6  ;;  %16580 = vmatmul.mubr.f32.gmra.mxu1 %v22325_v6  ;;  %v9653_v48 = vand.u32 4294901760, %v9652_v36  ;;  %v9531_v2 = vsel %vm1534_vm0, %v9498_v12, 0  ;;  %v9462_v50 = vmul.f32 %v17370_v42, %v22145_v37 }
 0xa7c   : > { %v17372_v54 = vpop.eup %17371  ;;  %16598 = vmatpush3.msra.mxu0 %v22184_v13  ;;  %v22345_v0 = vand.u32 4294901760, %v9531_v2  ;;  %v9534_v63 = vsel %vm1534_vm0, %v9499_v17, 0  ;;  %v24209_v45 = vand.u32 4294901760, %v22334_v35  ;;  %v9500_v22 = vadd.f32 %v22249_v11, %v9480_v20  ;;  %16693 = vmatprep.subr.mxu1 %v22171_v29 }
 0xa7d   : > { %16544 = vmatprep.mubr.f32.mxu0 %v9653_v48  ;;  %v22351_v21 = vand.u32 4294901760, %v9534_v63  ;;  %v24210_v12 = vand.u32 4294901760, %v22339_v41  ;;  %v9481_v37 = vmul.f32 %v22243_v33, %v9461_v1  ;;  %16599 = vmatprep.subr.mxu0 %v22200_v7  ;;  %v9482_v13 = vmul.f32 %v22243_v33, %v9462_v50 }
 0xa7e   : > { %v17374_v56 = vpop.eup %17373  ;;  %16582 = vmatprep.mubr.f32.mxu1 %v22345_v0  ;;  %v9672_v19 = vsub.f32 %v22334_v35, %v24209_v45  ;;  %v9537_v36 = vsel %vm1534_vm0, %v9500_v22, 0  ;;  %16600 = vmatpush3.msra.mxu0 %v22200_v7  ;;  %v22364_v42 = vsub.f32 %v9531_v2, %v22345_v0  ;;  %v9463_v17 = vmul.f32 %v17368_v4, %v22139_v53 }
 0xa7f   : > { %16545 = vmatmul.mubr.f32.gmra.mxu0 %v9663_v10  ;;  %v22368_v20 = vsub.f32 %v9534_v63, %v22351_v21  ;;  %16583 = vmatmul.mubr.f32.gmra.mxu1 %v22351_v21  ;;  %v22371_v1 = vand.u32 4294901760, %v9537_v36  ;;  %v9682_v48 = vsub.f32 %v22339_v41, %v24210_v12  ;;  %v9501_v50 = vadd.f32 %v22249_v11, %v9481_v37 }
 0xa80   : > { %v17376_v7 = vpop.eup %17375  ;;  %v9673_v22 = vand.u32 4294901760, %v9672_v19  ;;  %v24212_v2 = vand.u32 4294901760, %v22364_v42  ;;  %v9502_v53 = vadd.f32 %v22249_v11, %v9482_v13  ;;  %v9483_v10 = vmul.f32 %v22243_v33, %v9463_v17  ;;  %16601 = vmatprep.subr.mxu0 %v22216_v61 }
 0xa81   : > { %16585 = vmatprep.mubr.f32.mxu1 %v22371_v1  ;;  %v9683_v4 = vand.u32 4294901760, %v9682_v48  ;;  %v9540_v63 = vsel %vm1534_vm0, %v9501_v50, 0  ;;  %v24213_v45 = vand.u32 4294901760, %v22368_v20  ;;  %v22385_v12 = vsub.f32 %v9537_v36, %v22371_v1  ;;  %16602 = vmatpush3.msra.mxu0 %v22216_v61 }
 0xa82   : > { %v17378_v37 = vpop.eup %17377  ;;  %16547 = vmatprep.mubr.f32.mxu0 %v9673_v22  ;;  %v22388_v19 = vand.u32 4294901760, %v9540_v63  ;;  %v9692_v13 = vsub.f32 %v22364_v42, %v24212_v2  ;;  %v9543_v17 = vsel %vm1534_vm0, %v9502_v53, 0  ;;  %v9503_v48 = vadd.f32 %v22249_v11, %v9483_v10  ;;  %16603 = vmatprep.subr.mxu0 %v22227_v39 }
 0xa83   : > { %16548 = vmatmul.mubr.f32.gmra.mxu0 %v9683_v4  ;;  %v22396_v50 = vand.u32 4294901760, %v9543_v17  ;;  %v9702_v61 = vsub.f32 %v22368_v20, %v24213_v45  ;;  %v24217_v36 = vand.u32 4294901760, %v22385_v12  ;;  %v9464_v22 = vmul.f32 %v17374_v56, %v22157_v40 }
 0xa84   : > { %v22404_v55 = vsub.f32 %v9540_v63, %v22388_v19  ;;  %16586 = vmatmul.mubr.f32.gmra.mxu1 %v22388_v19  ;;  %v9693_v53 = vand.u32 4294901760, %v9692_v13  ;;  %v9546_v10 = vsel %vm1534_vm0, %v9503_v48, 0  ;;  %v9465_v4 = vmul.f32 %v17372_v54, %v22151_v60  ;;  %16604 = vmatpush3.msra.mxu0 %v22227_v39 }
 0xa85   : > { %16588 = vmatprep.mubr.f32.mxu1 %v22396_v50  ;;  %v9703_v2 = vand.u32 4294901760, %v9702_v61  ;;  %v22411_v45 = vand.u32 4294901760, %v9546_v10  ;;  %v9712_v40 = vsub.f32 %v22385_v12, %v24217_v36  ;;  %v9484_v56 = vmul.f32 %v22243_v33, %v9464_v22  ;;  %16661 = vmatprep.subr.mxu0 %v22196_v49 }
 0xa86   : > { %16550 = vmatprep.mubr.f32.mxu0 %v9693_v53  ;;  %v24216_v63 = vand.u32 4294901760, %v22404_v55  ;;  %v9485_v60 = vmul.f32 %v22243_v33, %v9465_v4  ;;  %v22421_v39 = vsub.f32 %v9543_v17, %v22396_v50  ;;  %v9466_v54 = vmul.f32 %v17378_v37, %v22174_v23 }
 0xa87   : > { %16551 = vmatmul.mubr.f32.gmra.mxu0 %v9703_v2  ;;  %v22425_v13 = vsub.f32 %v9546_v10, %v22411_v45  ;;  %v9713_v48 = vand.u32 4294901760, %v9712_v40  ;;  %v9504_v61 = vadd.f32 %v22249_v11, %v9484_v56  ;;  %v9467_v22 = vmul.f32 %v17376_v7, %v22163_v46 }
 0xa88   : > { %16589 = vmatmul.mubr.f32.gmra.mxu1 %v22411_v45  ;;  %v9722_v53 = vsub.f32 %v22404_v55, %v24216_v63  ;;  %v9505_v17 = vadd.f32 %v22249_v11, %v9485_v60  ;;  %v24215_v4 = vand.u32 4294901760, %v22421_v39  ;;  %v9486_v23 = vmul.f32 %v22243_v33, %v9466_v54 }
 0xa89   : > { %16553 = vmatprep.mubr.f32.mxu0 %v9713_v48  ;;  %v9549_v2 = vsel %vm1534_vm0, %v9504_v61, 0  ;;  %v24214_v37 = vand.u32 4294901760, %v22425_v13  ;;  %v9487_v10 = vmul.f32 %v22243_v33, %v9467_v22  ;;  %v24974_v14 = vand.u32 4294901760, %v22265_v25 }
 0xa8a   : > { %v22439_v46 = vand.u32 4294901760, %v9549_v2  ;;  %v9723_v7 = vand.u32 4294901760, %v9722_v53  ;;  %v9552_v40 = vsel %vm1534_vm0, %v9505_v17, 0  ;;  %v9732_v56 = vsub.f32 %v22421_v39, %v24215_v4 }
 0xa8b   : > { %v22445_v60 = vand.u32 4294901760, %v9552_v40  ;;  %v9506_v54 = vadd.f32 %v22249_v11, %v9486_v23  ;;  %v9742_v48 = vsub.f32 %v22425_v13, %v24214_v37  ;;  %v9507_v61 = vadd.f32 %v22249_v11, %v9487_v10 }
 0xa8c   : > { %16591 = vmatprep.mubr.f32.mxu1 %v22439_v46  ;;  %16554 = vmatmul.mubr.f32.gmra.mxu0 %v9723_v7  ;;  %v9733_v33 = vand.u32 4294901760, %v9732_v56  ;;  %v22454_v22 = vsub.f32 %v9549_v2, %v22439_v46 }
 0xa8d   : > { %v22457_v53 = vsub.f32 %v9552_v40, %v22445_v60  ;;  %16592 = vmatmul.mubr.f32.gmra.mxu1 %v22445_v60  ;;  %v9555_v17 = vsel %vm1534_vm0, %v9506_v54, 0  ;;  %v9558_v23 = vsel %vm1534_vm0, %v9507_v61, 0  ;;  %v9743_v11 = vand.u32 4294901760, %v9742_v48 }
 0xa8e   : > { %16556 = vmatprep.mubr.f32.mxu0 %v9733_v33  ;;  %v22462_v37 = vand.u32 4294901760, %v9555_v17  ;;  %v22464_v10 = vand.u32 4294901760, %v9558_v23  ;;  %v9751_v7 = vand.u32 4294901760, %v22454_v22  ;;  %v24973_v61 = vand.u32 4294901760, %v22281_v38 }
 0xa8f   : > { %v9761_v2 = vand.u32 4294901760, %v22457_v53 }
 0xa90   : > { %16594 = vmatprep.mubr.f32.mxu1 %v22462_v37  ;;  %16557 = vmatmul.mubr.f32.gmra.mxu0 %v9743_v11  ;;  %v22470_v40 = vsub.f32 %v9558_v23, %v22464_v10  ;;  %v9752_v56 = vsub.f32 %v22454_v22, %v9751_v7  ;;  %v9770_v54 = vsub.f32 %v9555_v17, %v22462_v37  ;;  %v24975_v17 = vand.u32 4294901760, %v22299_v16 }
 0xa91   : > { %16595 = vmatmul.mubr.f32.gmra.mxu1 %v22464_v10  ;;  %v9762_v48 = vsub.f32 %v22457_v53, %v9761_v2 }
 0xa92   : > { %16637 = vmatprep.mubr.f32.mxu1 %v24973_v61  ;;  %v9753_v33 = vand.u32 4294901760, %v9752_v56  ;;  %v9771_v4 = vand.u32 4294901760, %v9770_v54  ;;  %v9781_v63 = vand.u32 4294901760, %v22470_v40  ;;  %v24976_v56 = vand.u32 4294901760, %v22290_v43 }
 0xa93   : > { %v9763_v36 = vand.u32 4294901760, %v9762_v48 }
 0xa94   : > { %16559 = vmatprep.mubr.f32.mxu0 %v9753_v33  ;;  %v9772_v11 = vsub.f32 %v9770_v54, %v9771_v4  ;;  %v9782_v23 = vsub.f32 %v22470_v40, %v9781_v63 }
 0xa95   : > { %16560 = vmatmul.mubr.f32.gmra.mxu0 %v9763_v36  ;;  %16638 = vmatmul.mubr.f32.vlgmr.msra.gmra.mxu1 %v24974_v14  ;;  %v24977_v14 = vand.u32 4294901760, %v22334_v35 }
 0xa96   : > { %16640 = vmatprep.mubr.f32.mxu1 %v24975_v17  ;;  %v9773_v15 = vand.u32 4294901760, %v9772_v11  ;;  %16694 = vmatpush3.msra.mxu1 %v22171_v29  ;;  %v9783_v61 = vand.u32 4294901760, %v9782_v23  ;;  %v24978_v29 = vand.u32 4294901760, %v22339_v41 }
 0xa97   : > { %16695 = vmatprep.subr.mxu1 %v22186_v30 }
 0xa98   : > { %16562 = vmatprep.mubr.f32.mxu0 %v9773_v15  ;;  %16696 = vmatpush3.msra.mxu1 %v22186_v30  ;;  %v24979_v15 = vand.u32 4294901760, %v22364_v42  ;;  %v24980_v30 = vand.u32 4294901760, %v22368_v20 }
 0xa99   : > { %16563 = vmatmul.mubr.f32.gmra.mxu0 %v9783_v61  ;;  %16641 = vmatmul.mubr.f32.gmra.mxu1 %v24976_v56 }
 0xa9a   : > { %16605 = vmatprep.mubr.f32.mxu0 %v22281_v38  ;;  %16643 = vmatprep.mubr.f32.mxu1 %v24977_v14 }
 0xa9b   : > { %16697 = vmatprep.subr.mxu1 %v22202_v57 }
 0xa9c   : > { %16698 = vmatpush3.msra.mxu1 %v22202_v57  ;;  %v24981_v57 = vand.u32 4294901760, %v22385_v12 }
 0xa9d   : > { %16606 = vmatmul.mubr.f32.vlgmr.msra.gmra.mxu0 %v22265_v25  ;;  %16644 = vmatmul.mubr.f32.gmra.mxu1 %v24978_v29  ;;  %v201_v25 = vld [vmem:[%s23891_s1 + $0x148] sm:$0xff] }
 0xa9e   : > { %16608 = vmatprep.mubr.f32.mxu0 %v22299_v16  ;;  %16646 = vmatprep.mubr.f32.mxu1 %v24979_v15  ;;  %v22588_v38 = vand.u32 4294901760, %v201_v25 }
 0xa9f   : > { %16662 = vmatpush3.msra.mxu0 %v22196_v49  ;;  %16699 = vmatprep.subr.mxu1 %v22218_v24  ;;  %v24982_v49 = vand.u32 4294901760, %v22404_v55 }
 0xaa0   : > { %16663 = vmatprep.subr.mxu0 %v22212_v18  ;;  %16700 = vmatpush3.msra.mxu1 %v22218_v24  ;;  %v24983_v24 = vand.u32 4294901760, %v22421_v39  ;;  %24990 = vst [vmem:[#allocation40_spill] sm:$0xff] %v22588_v38  ;;  %v22601_v16 = vsub.f32 %v201_v25, %v22588_v38 }
 0xaa1   : > { %16609 = vmatmul.mubr.f32.gmra.mxu0 %v22290_v43  ;;  %16647 = vmatmul.mubr.f32.gmra.mxu1 %v24980_v30 }
 0xaa2   : > { %16611 = vmatprep.mubr.f32.mxu0 %v22334_v35  ;;  %16649 = vmatprep.mubr.f32.mxu1 %v24981_v57  ;;  %24992 = vst [vmem:[#allocation31_spill] sm:$0xff] %v22601_v16  ;;  %v199_v35 = vld [vmem:[%s23891_s1 + $0x138] sm:$0xff] }
 0xaa3   : > { %16664 = vmatpush3.msra.mxu0 %v22212_v18  ;;  %v24984_v18 = vand.u32 4294901760, %v22425_v13 }
 0xaa4   : > { %16665 = vmatprep.subr.mxu0 %v22224_v5 }
 0xaa5   : > { %16612 = vmatmul.mubr.f32.gmra.mxu0 %v22339_v41  ;;  %16650 = vmatmul.mubr.f32.gmra.mxu1 %v24982_v49 }
 0xaa6   : > { %16614 = vmatprep.mubr.f32.mxu0 %v22364_v42  ;;  %16652 = vmatprep.mubr.f32.mxu1 %v24983_v24  ;;  %v22619_v42 = vand.u32 4294901760, %v199_v35 }
 0xaa7   : > { %16666 = vmatpush3.msra.mxu0 %v22224_v5  ;;  %v202_v5 = vld [vmem:[%s23891_s1 + $0x150] sm:$0xff] }
 0xaa8   : > { %16667 = vmatprep.subr.mxu0 %v22234_v34  ;;  %24996 = vst [vmem:[#allocation78_spill] sm:$0xff] %v22619_v42 }
 0xaa9   : > { %16615 = vmatmul.mubr.f32.gmra.mxu0 %v22368_v20  ;;  %16653 = vmatmul.mubr.f32.gmra.mxu1 %v24984_v18  ;;  %v198_v20 = vld [vmem:[%s23891_s1 + $0x130] sm:$0xff] }
 0xaaa   : > { %16617 = vmatprep.mubr.f32.mxu0 %v22385_v12  ;;  %16655 = vmatprep.mubr.f32.mxu1 %v9751_v7  ;;  %v22629_v36 = vand.u32 4294901760, %v198_v20 }
 0xaab   : > { %16668 = vmatpush3.msra.mxu0 %v22234_v34 }
 0xaac   : > { %24998 = vst [vmem:[#allocation57_spill] sm:$0xff] %v22629_v36 }
 0xaad   : > { %16618 = vmatmul.mubr.f32.gmra.mxu0 %v22404_v55  ;;  %16656 = vmatmul.mubr.f32.gmra.mxu1 %v9761_v2  ;;  %v203_v55 = vld [vmem:[%s23891_s1 + $0x158] sm:$0xff] }
 0xaae   : > { %16620 = vmatprep.mubr.f32.mxu0 %v22421_v39  ;;  %16658 = vmatprep.mubr.f32.mxu1 %v9771_v4  ;;  %v22566_v41 = vand.u32 4294901760, %v203_v55  ;;  %v197_v39 = vld [vmem:[%s23891_s1 + $0x128] sm:$0xff] }
 0xab0   : > { %24985 = vst [vmem:[#allocation15_spill] sm:$0xff] %v22566_v41  ;;  %16725 = vmatprep.subr.mxu0 %v22566_v41  ;;  %v22573_v34 = vsub.f32 %v203_v55, %v22566_v41 }
 0xab1   : > { %16621 = vmatmul.mubr.f32.gmra.mxu0 %v22425_v13  ;;  %16659 = vmatmul.mubr.f32.gmra.mxu1 %v9781_v63  ;;  %v22633_v63 = vsub.f32 %v199_v35, %v22619_v42 }
 0xab2   : > { %16623 = vmatprep.mubr.f32.mxu0 %v22454_v22  ;;  %16701 = vmatprep.mubr.f32.mxu1 %v22269_v27  ;;  %24986 = vst [vmem:[#allocation80_spill] sm:$0xff] %v22573_v34  ;;  %v196_v22 = vld [vmem:[%s23891_s1 + $0x120] sm:$0xff] }
 0xab3   : > { %24999 = vst [vmem:[#allocation56_spill] sm:$0xff] %v22633_v63  ;;  %v22660_v2 = vand.u32 4294901760, %v196_v22 }
 0xab5   : > { %16624 = vmatmul.mubr.f32.gmra.mxu0 %v22457_v53  ;;  %16702 = vmatmul.mubr.f32.vlgmr.msra.gmra.mxu1 %v22258_v28  ;;  %25005 = vst [vmem:[#allocation45_spill] sm:$0xff] %v22660_v2  ;;  %v22671_v33 = vsub.f32 %v196_v22, %v22660_v2 }
 0xab6   : > { %16626 = vmatprep.mubr.f32.mxu0 %v9770_v54  ;;  %16704 = vmatprep.mubr.f32.mxu1 %v22287_v62 }
 0xab7   : > { %25007 = vst [vmem:[#allocation75_spill] sm:$0xff] %v22671_v33  ;;  %v22678_v61 = vand.u32 4294901760, %v22671_v33 }
 0xab9   : > { %16627 = vmatmul.mubr.f32.gmra.mxu0 %v22470_v40  ;;  %16705 = vmatmul.mubr.f32.gmra.mxu1 %v22276_v51  ;;  %25008 = vst [vmem:[#allocation30_spill] sm:$0xff] %v22678_v61  ;;  %v11185_v14 = vsub.f32 %v22671_v33, %v22678_v61 }
 0xaba   : > { %16669 = vmatprep.mubr.f32.mxu0 %v22269_v27  ;;  %16707 = vmatprep.mubr.f32.mxu1 %v22312_v9  ;;  %v22582_v27 = vand.u32 4294901760, %v22573_v34 }
 0xabb   : > { %v11186_v29 = vand.u32 4294901760, %v11185_v14 }
 0xabc   : > { %24988 = vst [vmem:[#allocation97_spill] sm:$0xff] %v22582_v27  ;;  %v11136_v43 = vsub.f32 %v22573_v34, %v22582_v27 }
 0xabd   : > { %16670 = vmatmul.mubr.f32.vlgmr.msra.gmra.mxu0 %v22258_v28  ;;  %16708 = vmatmul.mubr.f32.gmra.mxu1 %v22325_v6  ;;  %v22575_v28 = vand.u32 4294901760, %v202_v5 }
 0xabe   : > { %16672 = vmatprep.mubr.f32.mxu0 %v22287_v62  ;;  %16710 = vmatprep.mubr.f32.mxu1 %v22345_v0  ;;  %v200_v62 = vld [vmem:[%s23891_s1 + $0x140] sm:$0xff] }
 0xabf   : > { %24987 = vst [vmem:[#allocation39_spill] sm:$0xff] %v22575_v28  ;;  %16726 = vmatpush3.msra.mxu0 %v22566_v41 }
 0xac0   : > { %16727 = vmatprep.subr.mxu0 %v22575_v28 }
 0xac1   : > { %16673 = vmatmul.mubr.f32.gmra.mxu0 %v22276_v51  ;;  %16711 = vmatmul.mubr.f32.gmra.mxu1 %v22351_v21  ;;  %v22586_v51 = vsub.f32 %v202_v5, %v22575_v28 }
 0xac2   : > { %16675 = vmatprep.mubr.f32.mxu0 %v22312_v9  ;;  %16713 = vmatprep.mubr.f32.mxu1 %v22371_v1  ;;  %v22603_v9 = vand.u32 4294901760, %v200_v62 }
 0xac3   : > { %24989 = vst [vmem:[#allocation24_spill] sm:$0xff] %v22586_v51  ;;  %16728 = vmatpush3.msra.mxu0 %v22575_v28 }
 0xac4   : > { %16729 = vmatprep.subr.mxu0 %v22588_v38  ;;  %24993 = vst [vmem:[#allocation51_spill] sm:$0xff] %v22603_v9  ;;  %v22616_v12 = vsub.f32 %v200_v62, %v22603_v9 }
 0xac5   : > { %16676 = vmatmul.mubr.f32.gmra.mxu0 %v22325_v6  ;;  %16714 = vmatmul.mubr.f32.gmra.mxu1 %v22388_v19  ;;  %v22597_v6 = vand.u32 4294901760, %v22586_v51 }
 0xac6   : > { %16678 = vmatprep.mubr.f32.mxu0 %v22345_v0  ;;  %16716 = vmatprep.mubr.f32.mxu1 %v22396_v50  ;;  %v11137_v0 = vand.u32 4294901760, %v11136_v43  ;;  %24995 = vst [vmem:[#allocation77_spill] sm:$0xff] %v22616_v12 }
 0xac7   : > { %24991 = vst [vmem:[#allocation62_spill] sm:$0xff] %v22597_v6  ;;  %16730 = vmatpush3.msra.mxu0 %v22588_v38 }
 0xac8   : > { %16731 = vmatprep.subr.mxu0 %v22603_v9  ;;  %16765 = vmatprep.subr.mxu1 %v11137_v0 }
 0xac9   : > { %16679 = vmatmul.mubr.f32.gmra.mxu0 %v22351_v21  ;;  %16717 = vmatmul.mubr.f32.gmra.mxu1 %v22411_v45  ;;  %v22612_v21 = vand.u32 4294901760, %v22601_v16 }
 0xaca   : > { %16681 = vmatprep.mubr.f32.mxu0 %v22371_v1  ;;  %16719 = vmatprep.mubr.f32.mxu1 %v22439_v46 }
 0xacb   : > { %24994 = vst [vmem:[#allocation11_spill] sm:$0xff] %v22612_v21  ;;  %16732 = vmatpush3.msra.mxu0 %v22603_v9  ;;  %16766 = vmatpush3.msra.mxu1 %v11137_v0 }
 0xacc   : > { %16733 = vmatprep.subr.mxu0 %v22619_v42 }
 0xacd   : > { %16682 = vmatmul.mubr.f32.gmra.mxu0 %v22388_v19  ;;  %16720 = vmatmul.mubr.f32.gmra.mxu1 %v22445_v60  ;;  %v11150_v19 = vsub.f32 %v22601_v16, %v22612_v21 }
 0xace   : > { %16684 = vmatprep.mubr.f32.mxu0 %v22396_v50  ;;  %16722 = vmatprep.mubr.f32.mxu1 %v22462_v37  ;;  %v22627_v50 = vand.u32 4294901760, %v22616_v12 }
 0xacf   : > { %v11151_v13 = vand.u32 4294901760, %v11150_v19  ;;  %16734 = vmatpush3.msra.mxu0 %v22619_v42  ;;  %v22712_v19 = vld [vmem:[%s23891_s1 + $0x2a8] ss:$0 sm:$0xff] }
 0xad0   : > { %24997 = vst [vmem:[#allocation86_spill] sm:$0xff] %v22627_v50  ;;  %v11157_v4 = vsub.f32 %v22616_v12, %v22627_v50  ;;  %16735 = vmatprep.subr.mxu0 %v22629_v36 }
 0xad1   : > { %16685 = vmatmul.mubr.f32.gmra.mxu0 %v22411_v45  ;;  %16723 = vmatmul.mubr.f32.gmra.mxu1 %v22464_v10  ;;  %v11143_v45 = vsub.f32 %v22586_v51, %v22597_v6 }
 0xad2   : > { %16687 = vmatprep.mubr.f32.mxu0 %v22439_v46  ;;  %v22644_v46 = vand.u32 4294901760, %v197_v39  ;;  %v11158_v53 = vand.u32 4294901760, %v11157_v4  ;;  %16736 = vmatpush3.msra.mxu0 %v22629_v36 }
 0xad3   : > { %v11144_v1 = vand.u32 4294901760, %v11143_v45 }
 0xad4   : > { %25001 = vst [vmem:[#allocation61_spill] sm:$0xff] %v22644_v46  ;;  %v22657_v7 = vsub.f32 %v197_v39, %v22644_v46  ;;  %16737 = vmatprep.subr.mxu0 %v22644_v46 }
 0xad5   : > { %16688 = vmatmul.mubr.f32.gmra.mxu0 %v22445_v60  ;;  %16767 = vmatprep.subr.mxu1 %v11144_v1  ;;  %v22647_v60 = vand.u32 4294901760, %v22633_v63 }
 0xad6   : > { %16690 = vmatprep.mubr.f32.mxu0 %v22462_v37  ;;  %v22642_v37 = vsub.f32 %v198_v20, %v22629_v36  ;;  %16768 = vmatpush3.msra.mxu1 %v11144_v1  ;;  %25004 = vst [vmem:[#allocation3_spill] sm:$0xff] %v22657_v7  ;;  %v22668_v48 = vand.u32 4294901760, %v22657_v7 }
 0xad7   : > { %25002 = vst [vmem:[#allocation94_spill] sm:$0xff] %v22647_v60  ;;  %16769 = vmatprep.subr.mxu1 %v11151_v13  ;;  %v11164_v40 = vsub.f32 %v22633_v63, %v22647_v60  ;;  %16738 = vmatpush3.msra.mxu0 %v22644_v46 }
 0xad8   : > { %25000 = vst [vmem:[#allocation36_spill] sm:$0xff] %v22642_v37  ;;  %16770 = vmatpush3.msra.mxu1 %v11151_v13  ;;  %25006 = vst [vmem:[#allocation91_spill] sm:$0xff] %v22668_v48  ;;  %16739 = vmatprep.subr.mxu0 %v22660_v2  ;;  %v11178_v17 = vsub.f32 %v22657_v7, %v22668_v48 }
 0xad9   : > { %16691 = vmatmul.mubr.f32.gmra.mxu0 %v22464_v10  ;;  %v22654_v10 = vand.u32 4294901760, %v22642_v37  ;;  %16771 = vmatprep.subr.mxu1 %v11158_v53  ;;  %v11165_v11 = vand.u32 4294901760, %v11164_v40 }
 0xada   : > { %16772 = vmatpush3.msra.mxu1 %v11158_v53  ;;  %16740 = vmatpush3.msra.mxu0 %v22660_v2  ;;  %v11179_v56 = vand.u32 4294901760, %v11178_v17 }
 0xadb   : > { %25003 = vst [vmem:[#allocation46_spill] sm:$0xff] %v22654_v10  ;;  %v11171_v54 = vsub.f32 %v22642_v37, %v22654_v10  ;;  %16773 = vmatprep.subr.mxu1 %v11165_v11  ;;  %16805 = vmatprep.subr.mxu0 %v22573_v34 }
 0xadc   : > { %16774 = vmatpush3.msra.mxu1 %v11165_v11 }
 0xadd   : > { %v11172_v23 = vand.u32 4294901760, %v11171_v54 }
 0xadf   : > { %16775 = vmatprep.subr.mxu1 %v11172_v23 }
 0xae0   : > { %16776 = vmatpush3.msra.mxu1 %v11172_v23 }
 0xae1   : > { %16777 = vmatprep.subr.mxu1 %v11179_v56 }
 0xae2   : > { %16778 = vmatpush3.msra.mxu1 %v11179_v56 }
 0xae3   : > { %16779 = vmatprep.subr.mxu1 %v11186_v29 }
 0xae4   : > { %16780 = vmatpush3.msra.mxu1 %v11186_v29 }
 0xae5   : > { %16845 = vmatprep.subr.mxu1 %v22566_v41 }
 0xb32   : > { %v22685_v15 = vpop.f32.mrf.mxu1 }
 0xb34   : > { %v22687_v30 = vpop.f32.mrf.mxu1 }
 0xb36   : > { %v22689_v57 = vpop.f32.mrf.mxu1 }
 0xb38   : > { %v22691_v49 = vpop.f32.mrf.mxu1 }
 0xb3b   : > { %v22693_v24 = vpop.f32.mrf.mxu0  ;;  %v22695_v18 = vpop.f32.mrf.mxu1 }
 0xb3c   : > { %v9646_v7 = vadd.f32 %v22693_v24, %v22712_v19 }
 0xb3d   : > { %v22697_v55 = vpop.f32.mrf.mxu0  ;;  %v22699_v5 = vpop.f32.mrf.mxu1 }
 0xb3e   : > { %v9636_v46 = vadd.f32 %v22712_v19, %v22697_v55  ;;  %v9883_v42 = vadd.f32 %v22685_v15, %v9646_v7 }
 0xb3f   : > { %v22701_v25 = vpop.f32.mrf.mxu0  ;;  %v16584_v62 = vpop.f32.mrf.mxu1 }
 0xb40   : > { %v9666_v36 = vadd.f32 %v22701_v25, %v22712_v19  ;;  %v9877_v38 = vadd.f32 %v22687_v30, %v9636_v46 }
 0xb41   : > { %v22703_v43 = vpop.f32.mrf.mxu0  ;;  %v9912_v35 = vpop.f32.mrf.mxu1 }
 0xb42   : > { %v9656_v16 = vadd.f32 %v22712_v19, %v22703_v43  ;;  %v9895_v7 = vadd.f32 %v22689_v57, %v9666_v36 }
 0xb43   : > { %v22705_v0 = vpop.f32.mrf.mxu0 }
 0xb44   : > { %v16587_v45 = vpop.f32.mrf.mxu1  ;;  %v9686_v24 = vadd.f32 %v22705_v0, %v22712_v19  ;;  %v9889_v15 = vadd.f32 %v22691_v49, %v9656_v16 }
 0xb45   : > { %v22707_v20 = vpop.f32.mrf.mxu0 }
 0xb46   : > { %v9924_v1 = vpop.f32.mrf.mxu1  ;;  %v9676_v55 = vadd.f32 %v22712_v19, %v22707_v20  ;;  %v9907_v0 = vadd.f32 %v22695_v18, %v9686_v24 }
 0xb47   : > { %v16552_v39 = vpop.f32.mrf.mxu0 }
 0xb48   : > { %v9706_v13 = vadd.f32 %v16552_v39, %v22712_v19  ;;  %v16590_v4 = vpop.f32.mrf.mxu1  ;;  %v9901_v46 = vadd.f32 %v22699_v5, %v9676_v55 }
 0xb49   : > { %v9695_v22 = vpop.f32.mrf.mxu0 }
 0xb4a   : > { %v9696_v53 = vadd.f32 %v22712_v19, %v9695_v22  ;;  %v9936_v40 = vpop.f32.mrf.mxu1  ;;  %v22716_v54 = vadd.f32 %v16584_v62, %v9706_v13 }
 0xb4c   : > { %v16555_v11 = vpop.f32.mrf.mxu0  ;;  %v22718_v23 = vadd.f32 %v9912_v35, %v9696_v53 }
 0xb4d   : > { %v9726_v17 = vadd.f32 %v16555_v11, %v22712_v19  ;;  %v16593_v56 = vpop.f32.mrf.mxu1 }
 0xb4e   : > { %v9715_v14 = vpop.f32.mrf.mxu0 }
 0xb4f   : > { %v9716_v29 = vadd.f32 %v22712_v19, %v9715_v14  ;;  %v9948_v58 = vpop.f32.mrf.mxu1  ;;  %v22722_v44 = vadd.f32 %v16587_v45, %v9726_v17 }
 0xb50   : > { %v16558_v39 = vpop.f32.mrf.mxu0 }
 0xb51   : > { %v9746_v32 = vadd.f32 %v16558_v39, %v22712_v19  ;;  %v16596_v8 = vpop.f32.mrf.mxu1  ;;  %v22725_v22 = vadd.f32 %v9924_v1, %v9716_v29 }
 0xb52   : > { %v9735_v62 = vpop.f32.mrf.mxu0 }
 0xb53   : > { %v9736_v13 = vadd.f32 %v22712_v19, %v9735_v62  ;;  %v9960_v35 = vpop.f32.mrf.mxu1  ;;  %v22728_v53 = vadd.f32 %v16590_v4, %v9746_v32 }
 0xb55   : > { %v16561_v11 = vpop.f32.mrf.mxu0  ;;  %v16639_v3 = vpop.f32.mrf.mxu1  ;;  %v22730_v47 = vadd.f32 %v9936_v40, %v9736_v13 }
 0xb56   : > { %v9766_v14 = vadd.f32 %v16561_v11, %v22712_v19 }
 0xb57   : > { %v9755_v45 = vpop.f32.mrf.mxu0  ;;  %v22733_v17 = vpop.f32.mrf.mxu1 }
 0xb58   : > { %v9756_v39 = vadd.f32 %v22712_v19, %v9755_v45  ;;  %v22736_v26 = vadd.f32 %v16593_v56, %v9766_v14 }
 0xb59   : > { %v16564_v1 = vpop.f32.mrf.mxu0  ;;  %v22738_v29 = vpop.f32.mrf.mxu1 }
 0xb5a   : > { %v9786_v62 = vadd.f32 %v16564_v1, %v22712_v19  ;;  %v22741_v32 = vadd.f32 %v9948_v58, %v9756_v39 }
 0xb5b   : > { %v9775_v4 = vpop.f32.mrf.mxu0  ;;  %v22743_v52 = vpop.f32.mrf.mxu1 }
 0xb5c   : > { %v9776_v40 = vadd.f32 %v22712_v19, %v9775_v4  ;;  %v22746_v13 = vadd.f32 %v16596_v8, %v9786_v62 }
 0xb5d   : > { %v16607_v11 = vpop.f32.mrf.mxu0  ;;  %v22748_v31 = vpop.f32.mrf.mxu1 }
 0xb5e   : > { %v22750_v45 = vadd.f32 %v9960_v35, %v9776_v40  ;;  %v10054_v9 = vadd.f32 %v16607_v11, %v9883_v42 }
 0xb5f   : > { %v10046_v56 = vpop.f32.mrf.mxu0  ;;  %v22752_v14 = vpop.f32.mrf.mxu1 }
 0xb60   : > { %v10047_v41 = vadd.f32 %v10046_v56, %v9877_v38  ;;  %v10237_v42 = vadd.f32 %v16639_v3, %v10054_v9 }
 0xb61   : > { %v16610_v59 = vpop.f32.mrf.mxu0  ;;  %v22754_v61 = vpop.f32.mrf.mxu1 }
 0xb62   : > { %v10229_v38 = vadd.f32 %v22733_v17, %v10047_v41 }
 0xb63   : > { %v10060_v58 = vpop.f32.mrf.mxu0  ;;  %v22756_v39 = vpop.f32.mrf.mxu1 }
 0xb64   : > { %v10061_v11 = vadd.f32 %v10060_v58, %v9889_v15 }
 0xb65   : > { %v16613_v1 = vpop.f32.mrf.mxu0  ;;  %v22758_v48 = vpop.f32.mrf.mxu1 }
 0xb66   : > { %v10082_v19 = vadd.f32 %v16613_v1, %v9907_v0  ;;  %v10245_v1 = vadd.f32 %v22743_v52, %v10061_v11 }
 0xb67   : > { %v10074_v4 = vpop.f32.mrf.mxu0  ;;  %v22760_v8 = vpop.f32.mrf.mxu1 }
 0xb68   : > { %v10075_v56 = vadd.f32 %v10074_v4, %v9901_v46 }
 0xb69   : > { %v16616_v62 = vpop.f32.mrf.mxu0  ;;  %v22762_v10 = vpop.f32.mrf.mxu1 }
 0xb6a   : > { %v10096_v18 = vadd.f32 %v16616_v62, %v22716_v54 }
 0xb6b   : > { %v10088_v35 = vpop.f32.mrf.mxu0  ;;  %v22764_v40 = vpop.f32.mrf.mxu1 }
 0xb6c   : > { %v10089_v3 = vadd.f32 %v10088_v35, %v22718_v23 }
 0xb6d   : > { %v16619_v60 = vpop.f32.mrf.mxu0  ;;  %v22766_v50 = vpop.f32.mrf.mxu1 }
 0xb6e   : > { %v10110_v9 = vadd.f32 %v16619_v60, %v22722_v44  ;;  %v10261_v44 = vadd.f32 %v22752_v14, %v10075_v56 }
 0xb6f   : > { %v10102_v21 = vpop.f32.mrf.mxu0  ;;  %v22768_v6 = vpop.f32.mrf.mxu1 }
 0xb70   : > { %25009 = vst [vmem:[#allocation35_spill] sm:$0xff] %v22768_v6 }
 0xb71   : > { %v16622_v27 = vpop.f32.mrf.mxu0  ;;  %v22770_v33 = vpop.f32.mrf.mxu1 }
 0xb72   : > { %25010 = vst [vmem:[#allocation74_spill] sm:$0xff] %v22770_v33  ;;  %v10068_v33 = vadd.f32 %v16610_v59, %v9895_v7 }
 0xb73   : > { %v10116_v2 = vpop.f32.mrf.mxu0  ;;  %v22774_v37 = vpop.f32.mrf.mxu1 }
 0xb74   : > { %25011 = vst [vmem:[#allocation69_spill] sm:$0xff] %v22774_v37  ;;  %v10253_v59 = vadd.f32 %v22738_v29, %v10068_v33  ;;  %v10124_v33 = vadd.f32 %v16622_v27, %v22728_v53  ;;  %v10117_v54 = vadd.f32 %v10116_v2, %v22730_v47  ;;  %v10277_v27 = vadd.f32 %v22756_v39, %v10089_v3 }
 0xb75   : > { %v16625_v63 = vpop.f32.mrf.mxu0  ;;  %v16703_v12 = vpop.f32.mrf.mxu1  ;;  %v10301_v47 = vadd.f32 %v22758_v48, %v10110_v9 }
 0xb76   : > { %v10138_v35 = vadd.f32 %v16625_v63, %v22736_v26  ;;  %v10317_v63 = vadd.f32 %v22762_v10, %v10124_v33 }
 0xb77   : > { %v22783_v51 = vpop.f32.mrf.mxu0  ;;  %v10596_v34 = vpop.f32.mrf.mxu1 }
 0xb78   : > { %v22839_v10 = vadd.f32 %v22766_v50, %v10138_v35 }
 0xb79   : > { %v22790_v28 = vpop.f32.mrf.mxu0  ;;  %v16706_v25 = vpop.f32.mrf.mxu1 }
 0xb7a   : > { %v10152_v56 = vadd.f32 %v22790_v28, %v22746_v13 }
 0xb7b   : > { %v22794_v43 = vpop.f32.mrf.mxu0  ;;  %v10608_v37 = vpop.f32.mrf.mxu1 }
 0xb7d   : > { %v16671_v30 = vpop.f32.mrf.mxu0  ;;  %v16709_v20 = vpop.f32.mrf.mxu1 }
 0xb7e   : > { %v10438_v6 = vadd.f32 %v16671_v30, %v10237_v42 }
 0xb7f   : > { %v10431_v36 = vpop.f32.mrf.mxu0  ;;  %v10620_v57 = vpop.f32.mrf.mxu1 }
 0xb80   : > { %v22799_v16 = vadd.f32 %v16703_v12, %v10438_v6  ;;  %v10432_v49 = vadd.f32 %v10431_v36, %v10229_v38  ;;  %v10269_v6 = vadd.f32 %v22748_v31, %v10082_v19  ;;  %v10103_v12 = vadd.f32 %v10102_v21, %v22725_v22 }
 0xb81   : > { %v16674_v5 = vpop.f32.mrf.mxu0  ;;  %v16712_v58 = vpop.f32.mrf.mxu1  ;;  %v10285_v21 = vadd.f32 %v22754_v61, %v10096_v18  ;;  %v10309_v61 = vadd.f32 %v22764_v40, %v10117_v54 }
 0xb82   : > { %v10707_v41 = vmul.f32 0.044715, %v22799_v16  ;;  %v22807_v17 = vadd.f32 %v10596_v34, %v10432_v49  ;;  %v10450_v4 = vadd.f32 %v16674_v5, %v10253_v59  ;;  %v10293_v26 = vadd.f32 %v22760_v8, %v10103_v12 }
 0xb83   : > { %v10443_v23 = vpop.f32.mrf.mxu0  ;;  %v10632_v29 = vpop.f32.mrf.mxu1 }
 0xb84   : > { %v10723_v60 = vmul.f32 %v10707_v41, %v22799_v16  ;;  %v10706_v52 = vmul.f32 0.044715, %v22807_v17  ;;  %v22816_v62 = vadd.f32 %v16706_v25, %v10450_v4  ;;  %v10444_v34 = vadd.f32 %v10443_v23, %v10245_v1 }
 0xb85   : > { %v16677_v31 = vpop.f32.mrf.mxu0  ;;  %v16715_v24 = vpop.f32.mrf.mxu1 }
 0xb86   : > { %v10739_v2 = vmul.f32 %v10723_v60, %v22799_v16  ;;  %v10722_v22 = vmul.f32 %v10706_v52, %v22807_v17  ;;  %v10709_v53 = vmul.f32 0.044715, %v22816_v62  ;;  %v22825_v14 = vadd.f32 %v10608_v37, %v10444_v34 }
 0xb87   : > { %v10462_v55 = vadd.f32 %v16677_v31, %v10269_v6  ;;  %v10455_v25 = vpop.f32.mrf.mxu0  ;;  %v10644_v7 = vpop.f32.mrf.mxu1  ;;  %v10131_v37 = vadd.f32 %v22783_v51, %v22741_v32 }
 0xb88   : > { %v10755_v39 = vadd.f32 %v10739_v2, %v22799_v16  ;;  %v10738_v48 = vmul.f32 %v10722_v22, %v22807_v17  ;;  %v10725_v15 = vmul.f32 %v10709_v53, %v22816_v62  ;;  %v10708_v0 = vmul.f32 0.044715, %v22825_v14  ;;  %v25013_v53 = vld [vmem:[#allocation74_spill] sm:$0xff] }
 0xb89   : > { %v22836_v42 = vadd.f32 %v16709_v20, %v10462_v55  ;;  %v10456_v11 = vadd.f32 %v10455_v25, %v10261_v44  ;;  %v16680_v46 = vpop.f32.mrf.mxu0  ;;  %v16718_v8 = vpop.f32.mrf.mxu1  ;;  %v10349_v55 = vadd.f32 %v25013_v53, %v10152_v56 }
 0xb8a   : > { %v10771_v40 = vmul.f32 0.7978846, %v10755_v39  ;;  %v10754_v30 = vadd.f32 %v10738_v48, %v22807_v17  ;;  %v10741_v19 = vmul.f32 %v10725_v15, %v22816_v62  ;;  %v10724_v38 = vmul.f32 %v10708_v0, %v22825_v14 }
 0xb8b   : > { %v10711_v51 = vmul.f32 0.044715, %v22836_v42  ;;  %v22847_v32 = vadd.f32 %v10620_v57, %v10456_v11  ;;  %v10474_v20 = vadd.f32 %v16680_v46, %v10285_v21  ;;  %v10467_v36 = vpop.f32.mrf.mxu0  ;;  %v10656_v28 = vpop.f32.mrf.mxu1  ;;  %v25014_v46 = vld [vmem:[#allocation69_spill] sm:$0xff] }
 0xb8c   : > { %17379 = vtanh.f32 %v10771_v40  ;;  %v10770_v49 = vmul.f32 0.7978846, %v10754_v30  ;;  %v10757_v50 = vadd.f32 %v10741_v19, %v22816_v62  ;;  %v10740_v59 = vmul.f32 %v10724_v38, %v22825_v14 }
 0xb8d   : > { %v10727_v18 = vmul.f32 %v10711_v51, %v22836_v42  ;;  %v10710_v3 = vmul.f32 0.044715, %v22847_v32  ;;  %v22853_v9 = vadd.f32 %v16712_v58, %v10474_v20  ;;  %v10468_v5 = vadd.f32 %v10467_v36, %v10277_v27  ;;  %v16683_v13 = vpop.f32.mrf.mxu0  ;;  %v16721_v21 = vpop.f32.mrf.mxu1 }
 0xb8e   : > { %v10773_v1 = vmul.f32 0.7978846, %v10757_v50  ;;  %v10756_v57 = vadd.f32 %v10740_v59, %v22825_v14  ;;  %v10486_v41 = vadd.f32 %v16683_v13, %v10301_v47  ;;  %17381 = vtanh.f32 %v10770_v49 }
 0xb8f   : > { %v10743_v4 = vmul.f32 %v10727_v18, %v22836_v42  ;;  %v10726_v6 = vmul.f32 %v10710_v3, %v22847_v32  ;;  %v10713_v12 = vmul.f32 0.044715, %v22853_v9  ;;  %v22859_v33 = vadd.f32 %v10632_v29, %v10468_v5  ;;  %v10479_v54 = vpop.f32.mrf.mxu0  ;;  %v10668_v0 = vpop.f32.mrf.mxu1 }
 0xb90   : > { %v10145_v58 = vadd.f32 %v22794_v43, %v22750_v45  ;;  %v10772_v23 = vmul.f32 0.7978846, %v10756_v57  ;;  %v22863_v44 = vadd.f32 %v16715_v24, %v10486_v41  ;;  %v10480_v60 = vadd.f32 %v10479_v54, %v10293_v26  ;;  %v25012_v24 = vld [vmem:[#allocation35_spill] sm:$0xff] }
 0xb91   : > { %v10759_v52 = vadd.f32 %v10743_v4, %v22836_v42  ;;  %v10742_v34 = vmul.f32 %v10726_v6, %v22847_v32  ;;  %v10729_v35 = vmul.f32 %v10713_v12, %v22853_v9  ;;  %v10712_v31 = vmul.f32 0.044715, %v22859_v33  ;;  %v16686_v27 = vpop.f32.mrf.mxu0  ;;  %v16724_v3 = vpop.f32.mrf.mxu1 }
 0xb92   : > { %v10715_v29 = vmul.f32 0.044715, %v22863_v44  ;;  %v22870_v47 = vadd.f32 %v10644_v7, %v10480_v60  ;;  %v10498_v2 = vadd.f32 %v16686_v27, %v10317_v63  ;;  %17383 = vtanh.f32 %v10772_v23 }
 0xb93   : > { %v10758_v45 = vadd.f32 %v10742_v34, %v22847_v32  ;;  %v10491_v43 = vpop.f32.mrf.mxu0  ;;  %v10325_v22 = vadd.f32 %v25012_v24, %v10131_v37  ;;  %17385 = vtanh.f32 %v10773_v1  ;;  %v10728_v25 = vmul.f32 %v10712_v31, %v22859_v33  ;;  %v10680_v34 = vpop.f32.mrf.mxu1 }
 0xb94   : > { %v10714_v26 = vmul.f32 0.044715, %v22870_v47  ;;  %v22877_v39 = vadd.f32 %v16718_v8, %v10498_v2  ;;  %v10492_v48 = vadd.f32 %v10491_v43, %v10309_v61  ;;  %v10775_v7 = vmul.f32 0.7978846, %v10759_v52 }
 0xb95   : > { %v10774_v15 = vmul.f32 0.7978846, %v10758_v45  ;;  %v10745_v63 = vmul.f32 %v10729_v35, %v22853_v9  ;;  %v16689_v11 = vpop.f32.mrf.mxu0  ;;  %v10341_v40 = vadd.f32 %v25014_v46, %v10145_v58  ;;  %v10731_v37 = vmul.f32 %v10715_v29, %v22863_v44 }
 0xb96   : > { %v10730_v30 = vmul.f32 %v10714_v26, %v22870_v47  ;;  %v10717_v19 = vmul.f32 0.044715, %v22877_v39  ;;  %v22884_v38 = vadd.f32 %v10656_v28, %v10492_v48  ;;  %v10691_v8 = vmul.f32 0.5, %v22799_v16 }
 0xb97   : > { %v10510_v61 = vadd.f32 %v16689_v11, %v22839_v10  ;;  %v10503_v56 = vpop.f32.mrf.mxu0  ;;  %v10690_v51 = vmul.f32 0.5, %v22807_v17  ;;  %17387 = vtanh.f32 %v10774_v15  ;;  %v10744_v20 = vmul.f32 %v10728_v25, %v22859_v33 }
 0xb98   : > { %v10716_v36 = vmul.f32 0.044715, %v22884_v38  ;;  %v10692_v49 = vmul.f32 0.5, %v22825_v14  ;;  %v22893_v50 = vmul.f32 0.5, %v22816_v62  ;;  %v10733_v18 = vmul.f32 %v10717_v19, %v22877_v39 }
 0xb99   : > { %v17380_v59 = vpop.eup %17379  ;;  %v22896_v16 = vadd.f32 %v16721_v21, %v10510_v61  ;;  %v10504_v10 = vadd.f32 %v10503_v56, %v10325_v22  ;;  %v16692_v5 = vpop.f32.mrf.mxu0  ;;  %17389 = vtanh.f32 %v10775_v7  ;;  %v10761_v28 = vadd.f32 %v10745_v63, %v22853_v9 }
 0xb9a   : > { %v10803_v17 = vadd.f32 1.0, %v17380_v59  ;;  %v10747_v13 = vmul.f32 %v10731_v37, %v22863_v44  ;;  %v10746_v1 = vmul.f32 %v10730_v30, %v22870_v47  ;;  %v10732_v62 = vmul.f32 %v10716_v36, %v22884_v38 }
 0xb9b   : > { %v17382_v14 = vpop.eup %17381  ;;  %v10719_v57 = vmul.f32 0.044715, %v22896_v16  ;;  %v22903_v41 = vadd.f32 %v10668_v0, %v10504_v10  ;;  %v10522_v4 = vadd.f32 %v16692_v5, %v10349_v55  ;;  %v10515_v6 = vpop.f32.mrf.mxu0  ;;  %v10760_v54 = vadd.f32 %v10744_v20, %v22859_v33 }
 0xb9c   : > { %v10819_v12 = vmul.f32 %v10803_v17, %v10691_v8  ;;  %v10516_v58 = vadd.f32 %v10515_v6, %v10341_v40  ;;  %v10695_v23 = vmul.f32 0.5, %v22836_v42  ;;  %v10749_v60 = vmul.f32 %v10733_v18, %v22877_v39 }
 0xb9d   : > { %v10748_v52 = vmul.f32 %v10732_v62, %v22884_v38  ;;  %v10718_v35 = vmul.f32 0.044715, %v22903_v41  ;;  %v22910_v31 = vadd.f32 %v16724_v3, %v10522_v4  ;;  %v10802_v27 = vadd.f32 1.0, %v17382_v14  ;;  %v25015_v4 = vld [vmem:[#allocation15_spill] sm:$0xff] }
 0xb9e   : > { %v22912_v21 = vadd.f32 %v10680_v34, %v10516_v58  ;;  %v10839_v29 = vsel %vm10834_vm1, %v10819_v12, 0  ;;  %v10694_v2 = vmul.f32 0.5, %v22847_v32  ;;  %v22916_v43 = vmul.f32 0.7978846, %v10761_v28  ;;  %v25016_v58 = vld [vmem:[#allocation39_spill] sm:$0xff] }
 0xb9f   : > { %v17384_v45 = vpop.eup %17383  ;;  %v10763_v42 = vadd.f32 %v10747_v13, %v22863_v44  ;;  %v10762_v24 = vadd.f32 %v10746_v1, %v22870_v47  ;;  %v10735_v22 = vmul.f32 %v10719_v57, %v22896_v16  ;;  %v10734_v55 = vmul.f32 %v10718_v35, %v22903_v41 }
 0xba0   : > { %v17386_v53 = vpop.eup %17385  ;;  %v10818_v25 = vmul.f32 %v10802_v27, %v10690_v51  ;;  %v22922_v26 = vand.u32 4294901760, %v10839_v29  ;;  %v10804_v48 = vadd.f32 1.0, %v17384_v45  ;;  %v10776_v7 = vmul.f32 0.7978846, %v10760_v54  ;;  %v25017_v45 = vld [vmem:[#allocation40_spill] sm:$0xff] }
 0xba1   : > { %v10765_v15 = vadd.f32 %v10749_v60, %v22877_v39  ;;  %v10764_v32 = vadd.f32 %v10748_v52, %v22884_v38  ;;  %v10721_v63 = vmul.f32 0.044715, %v22910_v31  ;;  %v10720_v0 = vmul.f32 0.044715, %v22912_v21 }
 0xba2   : > { %v10836_v11 = vsel %vm10834_vm1, %v10818_v25, 0  ;;  %v22930_v46 = vsub.f32 %v10839_v29, %v22922_v26  ;;  %v10820_v40 = vmul.f32 %v10804_v48, %v10692_v49  ;;  %v10779_v37 = vmul.f32 0.7978846, %v10763_v42 }
 0xba3   : > { %v10778_v30 = vmul.f32 0.7978846, %v10762_v24  ;;  %v10751_v19 = vmul.f32 %v10735_v22, %v22896_v16  ;;  %v22933_v8 = vand.u32 4294901760, %v10836_v11  ;;  %v10750_v56 = vmul.f32 %v10734_v55, %v22903_v41 }
 0xba4   : > { %v17388_v61 = vpop.eup %17387  ;;  %v10842_v51 = vsel %vm10834_vm1, %v10820_v40, 0  ;;  %v10805_v20 = vadd.f32 1.0, %v17386_v53  ;;  %v10968_v36 = vand.u32 4294901760, %v22930_v46  ;;  %v22938_v59 = vmul.f32 0.7978846, %v10765_v15  ;;  %v25019_v40 = vld [vmem:[#allocation80_spill] sm:$0xff] }
 0xba5   : > { %v10780_v18 = vmul.f32 0.7978846, %v10764_v32  ;;  %16781 = vmatprep.mubr.f32.mxu1 %v22933_v8  ;;  %v22941_v49 = vand.u32 4294901760, %v10842_v51  ;;  %v22944_v3 = vsub.f32 %v10836_v11, %v22933_v8  ;;  %v10737_v5 = vmul.f32 %v10721_v63, %v22910_v31 }
 0xba6   : > { %v17390_v10 = vpop.eup %17389  ;;  %v10736_v17 = vmul.f32 %v10720_v0, %v22912_v21  ;;  %16782 = vmatmul.mubr.f32.vlgmr.msra.gmra.mxu1 %v22922_v26  ;;  %v10821_v28 = vmul.f32 %v10805_v20, %v22893_v50  ;;  %v10806_v13 = vadd.f32 1.0, %v17388_v61  ;;  %v10767_v1 = vadd.f32 %v10751_v19, %v22896_v16 }
 0xba7   : > { %16784 = vmatprep.mubr.f32.mxu1 %v22941_v49  ;;  %v10958_v14 = vand.u32 4294901760, %v22944_v3  ;;  %v10807_v62 = vadd.f32 1.0, %v17390_v10  ;;  %v22954_v57 = vsub.f32 %v10842_v51, %v22941_v49  ;;  %16846 = vmatpush3.msra.mxu1 %v25015_v4  ;;  %v10766_v6 = vadd.f32 %v10750_v56, %v22903_v41  ;;  %v25020_v56 = vld [vmem:[#allocation24_spill] sm:$0xff] }
 0xba8   : > { %v10845_v12 = vsel %vm10834_vm1, %v10821_v28, 0  ;;  %v10822_v54 = vmul.f32 %v10806_v13, %v10694_v2  ;;  %v10969_v50 = vsub.f32 %v22930_v46, %v10968_v36  ;;  %16847 = vmatprep.subr.mxu1 %v25016_v58  ;;  %v10753_v27 = vmul.f32 %v10737_v5, %v22910_v31  ;;  %v25021_v5 = vld [vmem:[#allocation31_spill] sm:$0xff]  ;;  %v25023_v13 = vld [vmem:[#allocation57_spill] sm:$0xff] }
 0xba9   : > { %v22963_v60 = vand.u32 4294901760, %v10845_v12  ;;  %v10959_v52 = vsub.f32 %v22944_v3, %v10958_v14  ;;  %v10823_v34 = vmul.f32 %v10807_v62, %v10695_v23  ;;  %v10978_v35 = vand.u32 4294901760, %v22954_v57  ;;  %16848 = vmatpush3.msra.mxu1 %v25016_v58  ;;  %v25024_v62 = vld [vmem:[#allocation77_spill] sm:$0xff] }
 0xbaa   : > { %v10752_v29 = vmul.f32 %v10736_v17, %v22912_v21  ;;  %v10848_v2 = vsel %vm10834_vm1, %v10822_v54, 0  ;;  %17391 = vtanh.f32 %v10776_v7  ;;  %16849 = vmatprep.subr.mxu1 %v25017_v45  ;;  %v10970_v53 = vand.u32 4294901760, %v10969_v50  ;;  %v25022_v17 = vld [vmem:[#allocation78_spill] sm:$0xff] }
 0xbab   : > { %v22975_v42 = vsub.f32 %v10845_v12, %v22963_v60  ;;  %16785 = vmatmul.mubr.f32.gmra.mxu1 %v22963_v60  ;;  %v10960_v24 = vand.u32 4294901760, %v10959_v52  ;;  %v22978_v23 = vand.u32 4294901760, %v10848_v2  ;;  %v10851_v22 = vsel %vm10834_vm1, %v10823_v34, 0  ;;  %v25025_v12 = vld [vmem:[#allocation56_spill] sm:$0xff]  ;;  %v25026_v52 = vld [vmem:[#allocation61_spill] sm:$0xff] }
 0xbac   : > { %v22981_v55 = vand.u32 4294901760, %v10851_v22  ;;  %v10979_v25 = vsub.f32 %v22954_v57, %v10978_v35  ;;  %17393 = vtanh.f32 %v22916_v43  ;;  %16850 = vmatpush3.msra.mxu1 %v25017_v45  ;;  %v10782_v48 = vmul.f32 0.7978846, %v10766_v6  ;;  %v25018_v43 = vld [vmem:[#allocation51_spill] sm:$0xff] }
 0xbad   : > { %16741 = vmatprep.mubr.f32.mxu0 %v10960_v24  ;;  %16787 = vmatprep.mubr.f32.mxu1 %v22978_v23  ;;  %v10988_v7 = vand.u32 4294901760, %v22975_v42  ;;  %v22991_v15 = vsub.f32 %v10848_v2, %v22978_v23  ;;  %17395 = vtanh.f32 %v10778_v30  ;;  %v10768_v32 = vadd.f32 %v10752_v29, %v22912_v21  ;;  %v25027_v29 = vld [vmem:[#allocation36_spill] sm:$0xff] }
 0xbae   : > { %16742 = vmatmul.mubr.f32.vlgmr.msra.gmra.mxu0 %v10970_v53  ;;  %v22995_v63 = vsub.f32 %v10851_v22, %v22981_v55  ;;  %v10980_v0 = vand.u32 4294901760, %v10979_v25  ;;  %17397 = vtanh.f32 %v10779_v37  ;;  %16851 = vmatprep.subr.mxu1 %v25018_v43  ;;  %v10769_v11 = vadd.f32 %v10753_v27, %v22910_v31 }
 0xbaf   : > { %16788 = vmatmul.mubr.f32.gmra.mxu1 %v22981_v55  ;;  %16806 = vmatpush3.msra.mxu0 %v25019_v40  ;;  %v10989_v30 = vsub.f32 %v22975_v42, %v10988_v7  ;;  %v10998_v19 = vand.u32 4294901760, %v22991_v15  ;;  %17399 = vtanh.f32 %v10780_v18  ;;  %v10783_v61 = vmul.f32 0.7978846, %v10767_v1  ;;  %v25029_v40 = vld [vmem:[#allocation3_spill] sm:$0xff] }
 0xbb0   : > { %16744 = vmatprep.mubr.f32.mxu0 %v10980_v0  ;;  %16807 = vmatprep.subr.mxu0 %v25020_v56  ;;  %v11008_v37 = vand.u32 4294901760, %v22995_v63  ;;  %17401 = vtanh.f32 %v22938_v59  ;;  %v10784_v10 = vmul.f32 0.7978846, %v10768_v32  ;;  %v10785_v59 = vmul.f32 0.7978846, %v10769_v11 }
 0xbb1   : > { %v10990_v51 = vand.u32 4294901760, %v10989_v30  ;;  %16808 = vmatpush3.msra.mxu0 %v25020_v56  ;;  %v10999_v20 = vsub.f32 %v22991_v15, %v10998_v19  ;;  %17403 = vtanh.f32 %v10782_v48  ;;  %16852 = vmatpush3.msra.mxu1 %v25018_v43  ;;  %v10696_v54 = vmul.f32 0.5, %v22859_v33  ;;  %v25028_v33 = vld [vmem:[#allocation45_spill] sm:$0xff] }
 0xbb2   : > { %v11009_v18 = vsub.f32 %v22995_v63, %v11008_v37  ;;  %16809 = vmatprep.subr.mxu0 %v25021_v5  ;;  %16853 = vmatprep.subr.mxu1 %v25022_v17  ;;  %17405 = vtanh.f32 %v10783_v61  ;;  %v10697_v27 = vmul.f32 0.5, %v22853_v9  ;;  %v10698_v53 = vmul.f32 0.5, %v22870_v47 }
 0xbb3   : > { %16745 = vmatmul.mubr.f32.gmra.mxu0 %v10990_v51  ;;  %v11000_v28 = vand.u32 4294901760, %v10999_v20  ;;  %16854 = vmatpush3.msra.mxu1 %v25022_v17  ;;  %17407 = vtanh.f32 %v10784_v10  ;;  %v10699_v25 = vmul.f32 0.5, %v22863_v44  ;;  %v10700_v0 = vmul.f32 0.5, %v22884_v38  ;;  %v25030_v10 = vld [vmem:[#allocation75_spill] sm:$0xff] }
 0xbb4   : > { %16810 = vmatpush3.msra.mxu0 %v25021_v5  ;;  %16855 = vmatprep.subr.mxu1 %v25023_v13  ;;  %v11010_v1 = vand.u32 4294901760, %v11009_v18  ;;  %17409 = vtanh.f32 %v10785_v59  ;;  %v10701_v9 = vmul.f32 0.5, %v22877_v39  ;;  %v10702_v11 = vmul.f32 0.5, %v22903_v41 }
 0xbb5   : > { %16747 = vmatprep.mubr.f32.mxu0 %v11000_v28  ;;  %16811 = vmatprep.subr.mxu0 %v25024_v62  ;;  %v10703_v56 = vmul.f32 0.5, %v22896_v16  ;;  %v10704_v20 = vmul.f32 0.5, %v22912_v21  ;;  %v10705_v16 = vmul.f32 0.5, %v22910_v31 }
 0xbb6   : > { %16812 = vmatpush3.msra.mxu0 %v25024_v62  ;;  %16856 = vmatpush3.msra.mxu1 %v25023_v13 }
 0xbb7   : > { %v17392_v6 = vpop.eup %17391  ;;  %16748 = vmatmul.mubr.f32.gmra.mxu0 %v11010_v1  ;;  %16813 = vmatprep.subr.mxu0 %v25025_v12 }
 0xbb8   : > { %v10808_v50 = vadd.f32 1.0, %v17392_v6  ;;  %16814 = vmatpush3.msra.mxu0 %v25025_v12  ;;  %16857 = vmatprep.subr.mxu1 %v25026_v52  ;;  %v25031_v12 = vld [vmem:[#allocation97_spill] sm:$0xff] }
 0xbb9   : > { %v17394_v34 = vpop.eup %17393  ;;  %16815 = vmatprep.subr.mxu0 %v25027_v29  ;;  %16858 = vmatpush3.msra.mxu1 %v25026_v52 }
 0xbba   : > { %v17396_v2 = vpop.eup %17395  ;;  %v10824_v24 = vmul.f32 %v10808_v50, %v10696_v54  ;;  %v10809_v22 = vadd.f32 1.0, %v17394_v34  ;;  %16816 = vmatpush3.msra.mxu0 %v25027_v29  ;;  %16859 = vmatprep.subr.mxu1 %v25028_v33 }
 0xbbb   : > { %v17398_v48 = vpop.eup %17397  ;;  %v10810_v32 = vadd.f32 1.0, %v17396_v2  ;;  %16860 = vmatpush3.msra.mxu1 %v25028_v33  ;;  %16817 = vmatprep.subr.mxu0 %v25029_v40 }
 0xbbc   : > { %v17400_v30 = vpop.eup %17399  ;;  %v10854_v47 = vsel %vm10834_vm1, %v10824_v24, 0  ;;  %v10825_v44 = vmul.f32 %v10809_v22, %v10697_v27  ;;  %v10811_v61 = vadd.f32 1.0, %v17398_v48  ;;  %16818 = vmatpush3.msra.mxu0 %v25029_v40  ;;  %16925 = vmatprep.subr.mxu1 %v25015_v4 }
 0xbbd   : > { %v17402_v38 = vpop.eup %17401  ;;  %v23044_v51 = vand.u32 4294901760, %v10854_v47  ;;  %v10826_v39 = vmul.f32 %v10810_v32, %v10698_v53  ;;  %v10812_v41 = vadd.f32 1.0, %v17400_v30  ;;  %16819 = vmatprep.subr.mxu0 %v25030_v10 }
 0xbbe   : > { %v17404_v18 = vpop.eup %17403  ;;  %v10857_v5 = vsel %vm10834_vm1, %v10825_v44, 0  ;;  %v10827_v59 = vmul.f32 %v10811_v61, %v10699_v25  ;;  %v10813_v28 = vadd.f32 1.0, %v17402_v38  ;;  %16820 = vmatpush3.msra.mxu0 %v25030_v10 }
 0xbbf   : > { %16790 = vmatprep.mubr.f32.mxu1 %v23044_v51  ;;  %v23052_v1 = vand.u32 4294901760, %v10857_v5  ;;  %v10860_v62 = vsel %vm10834_vm1, %v10826_v39, 0  ;;  %v23056_v6 = vsub.f32 %v10854_v47, %v23044_v51  ;;  %v10828_v21 = vmul.f32 %v10812_v41, %v10700_v0  ;;  %16885 = vmatprep.subr.mxu0 %v25031_v12  ;;  %v17406_v27 = vpop.eup %17405 }
 0xbc0   : > { %v23059_v54 = vand.u32 4294901760, %v10860_v62  ;;  %v10863_v50 = vsel %vm10834_vm1, %v10827_v59, 0  ;;  %v10829_v34 = vmul.f32 %v10813_v28, %v10701_v9  ;;  %v10814_v31 = vadd.f32 1.0, %v17404_v18  ;;  %v17408_v0 = vpop.eup %17407 }
 0xbc1   : > { %v23063_v29 = vsub.f32 %v10857_v5, %v23052_v1  ;;  %16791 = vmatmul.mubr.f32.gmra.mxu1 %v23052_v1  ;;  %v23066_v2 = vand.u32 4294901760, %v10863_v50  ;;  %v11018_v24 = vand.u32 4294901760, %v23056_v6  ;;  %v10866_v22 = vsel %vm10834_vm1, %v10828_v21, 0  ;;  %v17410_v44 = vpop.eup %17409 }
 0xbc2   : > { %16793 = vmatprep.mubr.f32.mxu1 %v23059_v54  ;;  %v23071_v53 = vand.u32 4294901760, %v10866_v22  ;;  %v10869_v25 = vsel %vm10834_vm1, %v10829_v34, 0  ;;  %v23075_v48 = vsub.f32 %v10860_v62, %v23059_v54  ;;  %v10830_v32 = vmul.f32 %v10814_v31, %v10702_v11 }
 0xbc3   : > { %v23078_v9 = vsub.f32 %v10863_v50, %v23066_v2  ;;  %v11019_v40 = vsub.f32 %v23056_v6, %v11018_v24  ;;  %v11028_v30 = vand.u32 4294901760, %v23063_v29  ;;  %v23084_v47 = vand.u32 4294901760, %v10869_v25 }
 0xbc4   : > { %v11038_v61 = vand.u32 4294901760, %v23075_v48  ;;  %v10872_v38 = vsel %vm10834_vm1, %v10830_v32, 0  ;;  %v10815_v39 = vadd.f32 1.0, %v17406_v27  ;;  %v23089_v11 = vsub.f32 %v10866_v22, %v23071_v53 }
 0xbc5   : > { %16794 = vmatmul.mubr.f32.gmra.mxu1 %v23066_v2  ;;  %v11020_v41 = vand.u32 4294901760, %v11019_v40  ;;  %v11029_v10 = vsub.f32 %v23063_v29, %v11028_v30  ;;  %v23096_v18 = vsub.f32 %v10869_v25, %v23084_v47  ;;  %v23098_v5 = vand.u32 4294901760, %v10872_v38 }
 0xbc6   : > { %16796 = vmatprep.mubr.f32.mxu1 %v23071_v53  ;;  %v11039_v59 = vsub.f32 %v23075_v48, %v11038_v61  ;;  %v11048_v28 = vand.u32 4294901760, %v23078_v9  ;;  %v10831_v62 = vmul.f32 %v10815_v39, %v10703_v56  ;;  %v11058_v21 = vand.u32 4294901760, %v23089_v11 }
 0xbc7   : > { %16750 = vmatprep.mubr.f32.mxu0 %v11020_v41  ;;  %v11030_v50 = vand.u32 4294901760, %v11029_v10  ;;  %v10816_v34 = vadd.f32 1.0, %v17408_v0  ;;  %v24277_v31 = vand.u32 4294901760, %v23096_v18  ;;  %v10817_v27 = vadd.f32 1.0, %v17410_v44 }
 0xbc8   : > { %v11040_v22 = vand.u32 4294901760, %v11039_v59  ;;  %v11049_v25 = vsub.f32 %v23078_v9, %v11048_v28  ;;  %v10875_v32 = vsel %vm10834_vm1, %v10831_v62, 0  ;;  %v11059_v40 = vsub.f32 %v23089_v11, %v11058_v21 }
 0xbc9   : > { %16751 = vmatmul.mubr.f32.gmra.mxu0 %v11030_v50  ;;  %16797 = vmatmul.mubr.f32.gmra.mxu1 %v23084_v47  ;;  %v23115_v56 = vand.u32 4294901760, %v10875_v32  ;;  %v10832_v0 = vmul.f32 %v10816_v34, %v10704_v20  ;;  %v10833_v39 = vmul.f32 %v10817_v27, %v10705_v16  ;;  %v11069_v41 = vsub.f32 %v23096_v18, %v24277_v31 }
 0xbca   : > { %16753 = vmatprep.mubr.f32.mxu0 %v11040_v22  ;;  %16799 = vmatprep.mubr.f32.mxu1 %v23098_v5  ;;  %v11060_v44 = vand.u32 4294901760, %v11059_v40  ;;  %v23122_v10 = vsub.f32 %v10872_v38, %v23098_v5  ;;  %v11050_v59 = vand.u32 4294901760, %v11049_v25 }
 0xbcb   : > { %v23125_v62 = vsub.f32 %v10875_v32, %v23115_v56  ;;  %v10878_v50 = vsel %vm10834_vm1, %v10832_v0, 0  ;;  %v10881_v20 = vsel %vm10834_vm1, %v10833_v39, 0  ;;  %v11070_v40 = vand.u32 4294901760, %v11069_v41 }
 0xbcc   : > { %v23129_v16 = vand.u32 4294901760, %v10878_v50  ;;  %v23131_v34 = vand.u32 4294901760, %v10881_v20  ;;  %v11078_v27 = vand.u32 4294901760, %v23122_v10 }
 0xbcd   : > { %16754 = vmatmul.mubr.f32.gmra.mxu0 %v11050_v59  ;;  %16800 = vmatmul.mubr.f32.gmra.mxu1 %v23115_v56  ;;  %v11088_v38 = vand.u32 4294901760, %v23125_v62 }
 0xbce   : > { %16756 = vmatprep.mubr.f32.mxu0 %v11060_v44  ;;  %16802 = vmatprep.mubr.f32.mxu1 %v23129_v16  ;;  %v23138_v22 = vsub.f32 %v10881_v20, %v23131_v34  ;;  %v11079_v25 = vsub.f32 %v23122_v10, %v11078_v27  ;;  %v23142_v32 = vsub.f32 %v10878_v50, %v23129_v16 }
 0xbcf   : > { %v11089_v0 = vsub.f32 %v23125_v62, %v11088_v38 }
 0xbd0   : > { %v11080_v39 = vand.u32 4294901760, %v11079_v25  ;;  %v11098_v59 = vand.u32 4294901760, %v23142_v32  ;;  %v11108_v44 = vand.u32 4294901760, %v23138_v22 }
 0xbd1   : > { %16757 = vmatmul.mubr.f32.gmra.mxu0 %v11070_v40  ;;  %16803 = vmatmul.mubr.f32.gmra.mxu1 %v23131_v34  ;;  %v11090_v20 = vand.u32 4294901760, %v11089_v0 }
 0xbd2   : > { %16861 = vmatprep.mubr.f32.mxu1 %v10958_v14  ;;  %16759 = vmatprep.mubr.f32.mxu0 %v11080_v39  ;;  %v11099_v50 = vsub.f32 %v23142_v32, %v11098_v59  ;;  %v11109_v41 = vsub.f32 %v23138_v22, %v11108_v44  ;;  %v25035_v14 = vand.u32 4294901760, %v23096_v18 }
 0xbd4   : > { %v11100_v31 = vand.u32 4294901760, %v11099_v50  ;;  %v11110_v25 = vand.u32 4294901760, %v11109_v41 }
 0xbd5   : > { %16760 = vmatmul.mubr.f32.gmra.mxu0 %v11090_v20  ;;  %16862 = vmatmul.mubr.f32.vlgmr.msra.gmra.mxu1 %v10968_v36  ;;  %v25032_v36 = vld [vmem:[#allocation62_spill] sm:$0xff] }
 0xbd6   : > { %16864 = vmatprep.mubr.f32.mxu1 %v10978_v35  ;;  %16762 = vmatprep.mubr.f32.mxu0 %v11100_v31  ;;  %v25039_v35 = vld [vmem:[#allocation30_spill] sm:$0xff] }
 0xbd7   : > { %16926 = vmatpush3.msra.mxu1 %v25015_v4  ;;  %v25037_v4 = vld [vmem:[#allocation46_spill] sm:$0xff] }
 0xbd8   : > { %16927 = vmatprep.subr.mxu1 %v25016_v58 }
 0xbd9   : > { %16763 = vmatmul.mubr.f32.gmra.mxu0 %v11110_v25  ;;  %16865 = vmatmul.mubr.f32.gmra.mxu1 %v10988_v7 }
 0xbda   : > { %16821 = vmatprep.mubr.f32.mxu0 %v22944_v3  ;;  %16867 = vmatprep.mubr.f32.mxu1 %v10998_v19  ;;  %v25034_v3 = vld [vmem:[#allocation86_spill] sm:$0xff] }
 0xbdb   : > { %16928 = vmatpush3.msra.mxu1 %v25016_v58  ;;  %v25038_v58 = vld [vmem:[#allocation91_spill] sm:$0xff] }
 0xbdc   : > { %16929 = vmatprep.subr.mxu1 %v25017_v45 }
 0xbdd   : > { %16822 = vmatmul.mubr.f32.vlgmr.msra.gmra.mxu0 %v22930_v46  ;;  %16868 = vmatmul.mubr.f32.gmra.mxu1 %v11008_v37  ;;  %v25033_v46 = vld [vmem:[#allocation11_spill] sm:$0xff] }
 0xbde   : > { %16824 = vmatprep.mubr.f32.mxu0 %v22954_v57  ;;  %16870 = vmatprep.mubr.f32.mxu1 %v11018_v24  ;;  %v25036_v57 = vld [vmem:[#allocation94_spill] sm:$0xff] }
 0xbdf   : > { %16886 = vmatpush3.msra.mxu0 %v25031_v12  ;;  %16930 = vmatpush3.msra.mxu1 %v25017_v45 }
 0xbe0   : > { %16887 = vmatprep.subr.mxu0 %v25032_v36  ;;  %16931 = vmatprep.subr.mxu1 %v25018_v43 }
 0xbe1   : > { %16825 = vmatmul.mubr.f32.gmra.mxu0 %v22975_v42  ;;  %16871 = vmatmul.mubr.f32.gmra.mxu1 %v11028_v30 }
 0xbe2   : > { %16827 = vmatprep.mubr.f32.mxu0 %v22991_v15  ;;  %16873 = vmatprep.mubr.f32.mxu1 %v11038_v61 }
 0xbe3   : > { %16888 = vmatpush3.msra.mxu0 %v25032_v36  ;;  %16932 = vmatpush3.msra.mxu1 %v25018_v43 }
 0xbe4   : > { %16889 = vmatprep.subr.mxu0 %v25033_v46  ;;  %16933 = vmatprep.subr.mxu1 %v25022_v17 }
 0xbe5   : > { %16828 = vmatmul.mubr.f32.gmra.mxu0 %v22995_v63  ;;  %16874 = vmatmul.mubr.f32.gmra.mxu1 %v11048_v28 }
 0xbe6   : > { %16830 = vmatprep.mubr.f32.mxu0 %v23056_v6  ;;  %16876 = vmatprep.mubr.f32.mxu1 %v11058_v21 }
 0xbe7   : > { %16890 = vmatpush3.msra.mxu0 %v25033_v46  ;;  %16934 = vmatpush3.msra.mxu1 %v25022_v17 }
 0xbe8   : > { %16891 = vmatprep.subr.mxu0 %v25034_v3  ;;  %16935 = vmatprep.subr.mxu1 %v25023_v13 }
 0xbe9   : > { %16831 = vmatmul.mubr.f32.gmra.mxu0 %v23063_v29  ;;  %16877 = vmatmul.mubr.f32.gmra.mxu1 %v25035_v14 }
 0xbea   : > { %16833 = vmatprep.mubr.f32.mxu0 %v23075_v48  ;;  %16879 = vmatprep.mubr.f32.mxu1 %v11078_v27 }
 0xbeb   : > { %16892 = vmatpush3.msra.mxu0 %v25034_v3  ;;  %16936 = vmatpush3.msra.mxu1 %v25023_v13 }
 0xbec   : > { %16893 = vmatprep.subr.mxu0 %v25036_v57  ;;  %16937 = vmatprep.subr.mxu1 %v25026_v52 }
 0xbed   : > { %16834 = vmatmul.mubr.f32.gmra.mxu0 %v23078_v9  ;;  %16880 = vmatmul.mubr.f32.gmra.mxu1 %v11088_v38 }
 0xbee   : > { %16836 = vmatprep.mubr.f32.mxu0 %v23089_v11  ;;  %16882 = vmatprep.mubr.f32.mxu1 %v11098_v59 }
 0xbef   : > { %16894 = vmatpush3.msra.mxu0 %v25036_v57  ;;  %16938 = vmatpush3.msra.mxu1 %v25026_v52 }
 0xbf0   : > { %16895 = vmatprep.subr.mxu0 %v25037_v4  ;;  %16939 = vmatprep.subr.mxu1 %v25028_v33 }
 0xbf1   : > { %16837 = vmatmul.mubr.f32.gmra.mxu0 %v23096_v18  ;;  %16883 = vmatmul.mubr.f32.gmra.mxu1 %v11108_v44 }
 0xbf2   : > { %16839 = vmatprep.mubr.f32.mxu0 %v23122_v10  ;;  %16896 = vmatpush3.msra.mxu0 %v25037_v4 }
 0xbf3   : > { %16941 = vmatprep.mubr.f32.mxu1 %v22933_v8  ;;  %16940 = vmatpush3.msra.mxu1 %v25028_v33 }
 0xbf4   : > { %16897 = vmatprep.subr.mxu0 %v25038_v58 }
 0xbf5   : > { %16840 = vmatmul.mubr.f32.gmra.mxu0 %v23125_v62  ;;  %16942 = vmatmul.mubr.f32.vlgmr.msra.gmra.mxu1 %v22922_v26 }
 0xbf6   : > { %16842 = vmatprep.mubr.f32.mxu0 %v23142_v32  ;;  %16898 = vmatpush3.msra.mxu0 %v25038_v58 }
 0xbf7   : > { %16944 = vmatprep.mubr.f32.mxu1 %v22941_v49  ;;  %16899 = vmatprep.subr.mxu0 %v25039_v35 }
 0xbf8   : > { %16900 = vmatpush3.msra.mxu0 %v25039_v35 }
 0xbf9   : > { %16843 = vmatmul.mubr.f32.gmra.mxu0 %v23138_v22  ;;  %16945 = vmatmul.mubr.f32.gmra.mxu1 %v22963_v60 }
 0xbfa   : > { %16901 = vmatprep.mubr.f32.mxu0 %v22933_v8  ;;  %16947 = vmatprep.mubr.f32.mxu1 %v22978_v23 }
 0xbfd   : > { %16902 = vmatmul.mubr.f32.vlgmr.msra.gmra.mxu0 %v22922_v26  ;;  %16948 = vmatmul.mubr.f32.gmra.mxu1 %v22981_v55  ;;  %v24278_v26 = vmov 0.0  }
 0xbfe   : > { %16904 = vmatprep.mubr.f32.mxu0 %v22941_v49  ;;  %16950 = vmatprep.mubr.f32.mxu1 %v23044_v51 }
 0xbff   : > { %16965 = vmatprep.subr.mxu0 %v24278_v26  ;;  %17000 = vmatprep.subr.mxu1 %v24278_v26 }
 0xc01   : > { %16905 = vmatmul.mubr.f32.gmra.mxu0 %v22963_v60  ;;  %16951 = vmatmul.mubr.f32.gmra.mxu1 %v23052_v1 }
 0xc02   : > { %16907 = vmatprep.mubr.f32.mxu0 %v22978_v23  ;;  %16953 = vmatprep.mubr.f32.mxu1 %v23059_v54 }
 0xc05   : > { %16908 = vmatmul.mubr.f32.gmra.mxu0 %v22981_v55  ;;  %16954 = vmatmul.mubr.f32.gmra.mxu1 %v23066_v2 }
 0xc06   : > { %16910 = vmatprep.mubr.f32.mxu0 %v23044_v51  ;;  %16956 = vmatprep.mubr.f32.mxu1 %v23071_v53 }
 0xc09   : > { %16911 = vmatmul.mubr.f32.gmra.mxu0 %v23052_v1  ;;  %16957 = vmatmul.mubr.f32.gmra.mxu1 %v23084_v47 }
 0xc0a   : > { %16913 = vmatprep.mubr.f32.mxu0 %v23059_v54  ;;  %16959 = vmatprep.mubr.f32.mxu1 %v23098_v5 }
 0xc0d   : > { %16914 = vmatmul.mubr.f32.gmra.mxu0 %v23066_v2  ;;  %16960 = vmatmul.mubr.f32.gmra.mxu1 %v23115_v56 }
 0xc0e   : > { %16916 = vmatprep.mubr.f32.mxu0 %v23071_v53  ;;  %16962 = vmatprep.mubr.f32.mxu1 %v23129_v16 }
 0xc11   : > { %16917 = vmatmul.mubr.f32.gmra.mxu0 %v23084_v47  ;;  %16963 = vmatmul.mubr.f32.gmra.mxu1 %v23131_v34 }
 0xc12   : > { %16919 = vmatprep.mubr.f32.mxu0 %v23098_v5  ;;  %17032 = vmatprep.mubr.msk.f32.mxu1 %vm17420_vm2, %v24278_v26 }
 0xc15   : > { %16920 = vmatmul.mubr.f32.gmra.mxu0 %v23115_v56 }
 0xc16   : > { %16922 = vmatprep.mubr.f32.mxu0 %v23129_v16 }
 0xc19   : > { %16923 = vmatmul.mubr.f32.gmra.mxu0 %v23131_v34 }
 0xc1a   : > { %16997 = vmatprep.mubr.msk.f32.mxu0 %vm17420_vm2, %v24278_v26 }
 0xc66   : > { %v16783_v8 = vpop.f32.mrf.mxu1 }
 0xc68   : > { %v11223_v49 = vpop.f32.mrf.mxu1 }
 0xc6b   : > { %v16786_v60 = vpop.f32.mrf.mxu1 }
 0xc6d   : > { %v11235_v55 = vpop.f32.mrf.mxu1 }
 0xc6e   : > { %v16743_v45 = vpop.f32.mrf.mxu0 }
 0xc6f   : > { %v11230_v42 = vadd.f32 %v16783_v8, %v16743_v45  ;;  %v16789_v43 = vpop.f32.mrf.mxu1 }
 0xc70   : > { %v10962_v23 = vpop.f32.mrf.mxu0 }
 0xc71   : > { %v11224_v7 = vadd.f32 %v11223_v49, %v10962_v23  ;;  %v11247_v52 = vpop.f32.mrf.mxu1 }
 0xc73   : > { %v16746_v15 = vpop.f32.mrf.mxu0 }
 0xc74   : > { %v11242_v63 = vadd.f32 %v16786_v60, %v16746_v15 }
 0xc75   : > { %v10982_v19 = vpop.f32.mrf.mxu0 }
 0xc76   : > { %v11236_v37 = vadd.f32 %v11235_v55, %v10982_v19 }
 0xc77   : > { %v16749_v17 = vpop.f32.mrf.mxu0 }
 0xc78   : > { %v11254_v13 = vadd.f32 %v16789_v43, %v16749_v17 }
 0xc79   : > { %v11002_v33 = vpop.f32.mrf.mxu0 }
 0xc7a   : > { %v11248_v51 = vadd.f32 %v11247_v52, %v11002_v33 }
 0xc81   : > { %v16792_v1 = vpop.f32.mrf.mxu1 }
 0xc83   : > { %v11259_v6 = vpop.f32.mrf.mxu1 }
 0xc85   : > { %v16795_v12 = vpop.f32.mrf.mxu1 }
 0xc87   : > { %v11271_v54 = vpop.f32.mrf.mxu1 }
 0xc89   : > { %v16752_v29 = vpop.f32.mrf.mxu0  ;;  %v16798_v2 = vpop.f32.mrf.mxu1 }
 0xc8a   : > { %v23262_v24 = vadd.f32 %v16792_v1, %v16752_v29 }
 0xc8b   : > { %v11022_v53 = vpop.f32.mrf.mxu0  ;;  %v11283_v48 = vpop.f32.mrf.mxu1 }
 0xc8c   : > { %v23264_v9 = vadd.f32 %v11259_v6, %v11022_v53 }
 0xc8d   : > { %v16755_v30 = vpop.f32.mrf.mxu0  ;;  %v16801_v47 = vpop.f32.mrf.mxu1 }
 0xc8e   : > { %v23266_v61 = vadd.f32 %v16795_v12, %v16755_v30 }
 0xc8f   : > { %v11042_v11 = vpop.f32.mrf.mxu0  ;;  %v11295_v18 = vpop.f32.mrf.mxu1 }
 0xc90   : > { %v23268_v5 = vadd.f32 %v11271_v54, %v11042_v11 }
 0xc91   : > { %v16758_v28 = vpop.f32.mrf.mxu0  ;;  %v23270_v21 = vpop.f32.mrf.mxu1 }
 0xc92   : > { %v23272_v31 = vadd.f32 %v16798_v2, %v16758_v28 }
 0xc93   : > { %v11062_v56 = vpop.f32.mrf.mxu0  ;;  %v23274_v10 = vpop.f32.mrf.mxu1 }
 0xc94   : > { %v23276_v62 = vadd.f32 %v11283_v48, %v11062_v56 }
 0xc95   : > { %v16761_v16 = vpop.f32.mrf.mxu0  ;;  %v16863_v34 = vpop.f32.mrf.mxu1 }
 0xc96   : > { %v23278_v27 = vadd.f32 %v16801_v47, %v16761_v16 }
 0xc97   : > { %v11082_v38 = vpop.f32.mrf.mxu0  ;;  %v11587_v22 = vpop.f32.mrf.mxu1 }
 0xc98   : > { %v23280_v32 = vadd.f32 %v11295_v18, %v11082_v38 }
 0xc99   : > { %v23282_v40 = vpop.f32.mrf.mxu0  ;;  %v16866_v0 = vpop.f32.mrf.mxu1 }
 0xc9b   : > { %v23284_v39 = vpop.f32.mrf.mxu0  ;;  %v11603_v59 = vpop.f32.mrf.mxu1 }
 0xc9d   : > { %v16823_v44 = vpop.f32.mrf.mxu0  ;;  %v16869_v50 = vpop.f32.mrf.mxu1 }
 0xc9e   : > { %v11409_v20 = vadd.f32 %v16823_v44, %v11230_v42 }
 0xc9f   : > { %v11401_v41 = vpop.f32.mrf.mxu0  ;;  %v11619_v25 = vpop.f32.mrf.mxu1 }
 0xca0   : > { %v11402_v36 = vadd.f32 %v11401_v41, %v11224_v7  ;;  %v23286_v46 = vadd.f32 %v16863_v34, %v11409_v20 }
 0xca1   : > { %v16826_v3 = vpop.f32.mrf.mxu0  ;;  %v23288_v14 = vpop.f32.mrf.mxu1 }
 0xca2   : > { %v11423_v57 = vadd.f32 %v16826_v3, %v11242_v63  ;;  %v23290_v4 = vadd.f32 %v11587_v22, %v11402_v36 }
 0xca3   : > { %v11415_v58 = vpop.f32.mrf.mxu0  ;;  %v23292_v35 = vpop.f32.mrf.mxu1 }
 0xca4   : > { %v11416_v8 = vadd.f32 %v11415_v58, %v11236_v37  ;;  %v23294_v49 = vadd.f32 %v16866_v0, %v11423_v57 }
 0xca5   : > { %v16829_v60 = vpop.f32.mrf.mxu0  ;;  %v16875_v45 = vpop.f32.mrf.mxu1 }
 0xca6   : > { %v11437_v42 = vadd.f32 %v16829_v60, %v11254_v13  ;;  %v23296_v23 = vadd.f32 %v11603_v59, %v11416_v8 }
 0xca7   : > { %v11429_v55 = vpop.f32.mrf.mxu0  ;;  %v23298_v7 = vpop.f32.mrf.mxu1 }
 0xca8   : > { %25040 = vst [vmem:[#allocation29_spill] sm:$0xff] %v23296_v23  ;;  %v11430_v15 = vadd.f32 %v11429_v55, %v11248_v51  ;;  %v23300_v43 = vadd.f32 %v16869_v50, %v11437_v42 }
 0xca9   : > { %v16832_v63 = vpop.f32.mrf.mxu0  ;;  %v16878_v19 = vpop.f32.mrf.mxu1 }
 0xcaa   : > { %v23302_v17 = vadd.f32 %v11619_v25, %v11430_v15 }
 0xcab   : > { %v11443_v52 = vpop.f32.mrf.mxu0  ;;  %v11667_v33 = vpop.f32.mrf.mxu1 }
 0xcad   : > { %v16835_v37 = vpop.f32.mrf.mxu0  ;;  %v16881_v1 = vpop.f32.mrf.mxu1 }
 0xcae   : > { %v11465_v55 = vadd.f32 %v16835_v37, %v23266_v61  ;;  %v11308_v61 = vadd.f32 %v23274_v10, %v23284_v39 }
 0xcaf   : > { %v11457_v6 = vpop.f32.mrf.mxu0  ;;  %v11683_v12 = vpop.f32.mrf.mxu1 }
 0xcb1   : > { %v16838_v54 = vpop.f32.mrf.mxu0  ;;  %v23304_v13 = vpop.f32.mrf.mxu1 }
 0xcb2   : > { %v11479_v58 = vadd.f32 %v16838_v54, %v23272_v31 }
 0xcb3   : > { %v11471_v29 = vpop.f32.mrf.mxu0  ;;  %v23306_v2 = vpop.f32.mrf.mxu1 }
 0xcb4   : > { %v11472_v42 = vadd.f32 %v11471_v29, %v23276_v62  ;;  %v11660_v62 = vadd.f32 %v16875_v45, %v11465_v55 }
 0xcb5   : > { %v16841_v53 = vpop.f32.mrf.mxu0  ;;  %v23308_v51 = vpop.f32.mrf.mxu1 }
 0xcb6   : > { %v11493_v26 = vadd.f32 %v16841_v53, %v23278_v27  ;;  %v11668_v54 = vadd.f32 %v11667_v33, %v11472_v42 }
 0xcb7   : > { %v11485_v48 = vpop.f32.mrf.mxu0  ;;  %v23310_v30 = vpop.f32.mrf.mxu1 }
 0xcb8   : > { %25041 = vst [vmem:[#allocation13_spill] sm:$0xff] %v23310_v30  ;;  %v11676_v30 = vadd.f32 %v16878_v19, %v11479_v58  ;;  %v11486_v23 = vadd.f32 %v11485_v48, %v23280_v32  ;;  %v11692_v37 = vadd.f32 %v16881_v1, %v11493_v26 }
 0xcb9   : > { %v16844_v47 = vpop.f32.mrf.mxu0  ;;  %v23312_v11 = vpop.f32.mrf.mxu1 }
 0xcba   : > { %25042 = vst [vmem:[#allocation90_spill] sm:$0xff] %v23312_v11 }
 0xcbb   : > { %v11499_v18 = vpop.f32.mrf.mxu0  ;;  %v23314_v28 = vpop.f32.mrf.mxu1 }
 0xcbc   : > { %25043 = vst [vmem:[#allocation88_spill] sm:$0xff] %v23314_v28  ;;  %v11458_v28 = vadd.f32 %v11457_v6, %v23268_v5  ;;  %v11444_v5 = vadd.f32 %v11443_v52, %v23264_v9  ;;  %v11500_v48 = vadd.f32 %v11499_v18, %v11308_v61 }
 0xcbd   : > { %v16903_v56 = vpop.f32.mrf.mxu0  ;;  %v23316_v16 = vpop.f32.mrf.mxu1 }
 0xcbe   : > { %25044 = vst [vmem:[#allocation48_spill] sm:$0xff] %v23316_v16  ;;  %v11451_v16 = vadd.f32 %v16832_v63, %v23262_v24  ;;  %v11652_v53 = vadd.f32 %v23298_v7, %v11458_v28  ;;  %v11809_v24 = vadd.f32 %v16903_v56, %v23286_v46  ;;  %v11636_v7 = vadd.f32 %v23292_v35, %v11444_v5  ;;  %v25047_v28 = vld [vmem:[#allocation38_spill] sm:$0xff] }
 0xcbf   : > { %v23318_v34 = vpop.f32.mrf.mxu0  ;;  %v23320_v38 = vpop.f32.mrf.mxu1 }
 0xcc0   : > { %25045 = vst [vmem:[#allocation41_spill] sm:$0xff] %v23320_v38  ;;  %v11644_v45 = vadd.f32 %v23288_v14, %v11451_v16  ;;  %v11700_v14 = vadd.f32 %v23306_v2, %v11500_v48 }
 0xcc1   : > { %v23322_v22 = vpop.f32.mrf.mxu0  ;;  %v23324_v0 = vpop.f32.mrf.mxu1 }
 0xcc3   : > { %v23326_v59 = vpop.f32.mrf.mxu0  ;;  %v23328_v44 = vpop.f32.mrf.mxu1 }
 0xcc4   : > { %25046 = vst [vmem:[#allocation27_spill] sm:$0xff] %v23326_v59  ;;  %v11314_v59 = vadd.f32 %v23270_v21, %v23282_v40 }
 0xcc5   : > { %v23330_v50 = vpop.f32.mrf.mxu0  ;;  %v16955_v20 = vpop.f32.mrf.mxu1  ;;  %v25055_v48 = vld [vmem:[#allocation48_spill] sm:$0xff] }
 0xcc6   : > { %v11507_v27 = vadd.f32 %v16844_v47, %v11314_v59  ;;  %v11833_v2 = vadd.f32 %v23330_v50, %v23300_v43  ;;  %v25053_v50 = vld [vmem:[#allocation54_spill] sm:$0xff] }
 0xcc7   : > { %v23332_v41 = vpop.f32.mrf.mxu0  ;;  %v12019_v25 = vpop.f32.mrf.mxu1 }
 0xcc8   : > { %v11708_v9 = vadd.f32 %v23304_v13, %v11507_v27  ;;  %v23360_v13 = vadd.f32 %v23308_v51, %v11809_v24  ;;  %v11827_v43 = vadd.f32 %v23332_v41, %v23302_v17 }
 0xcc9   : > { %v16912_v36 = vpop.f32.mrf.mxu0  ;;  %v16958_v3 = vpop.f32.mrf.mxu1 }
 0xcca   : > { %v11845_v52 = vadd.f32 %v16912_v36, %v11644_v45  ;;  %v25057_v45 = vld [vmem:[#allocation29_spill] sm:$0xff] }
 0xccb   : > { %v11838_v57 = vpop.f32.mrf.mxu0  ;;  %v12031_v8 = vpop.f32.mrf.mxu1 }
 0xccc   : > { %v11839_v35 = vadd.f32 %v11838_v57, %v11636_v7 }
 0xccd   : > { %v16915_v60 = vpop.f32.mrf.mxu0  ;;  %v16961_v11 = vpop.f32.mrf.mxu1 }
 0xcce   : > { %v11857_v6 = vadd.f32 %v16915_v60, %v11660_v62  ;;  %v25052_v62 = vld [vmem:[#allocation49_spill] sm:$0xff] }
 0xccf   : > { %v11850_v15 = vpop.f32.mrf.mxu0  ;;  %v12043_v21 = vpop.f32.mrf.mxu1 }
 0xcd0   : > { %v11851_v63 = vadd.f32 %v11850_v15, %v11652_v53  ;;  %v12026_v1 = vadd.f32 %v16955_v20, %v11857_v6  ;;  %v25049_v20 = vld [vmem:[#allocation84_spill] sm:$0xff]  ;;  %v12014_v15 = vadd.f32 %v23324_v0, %v11845_v52  ;;  %v12008_v0 = vadd.f32 %v23328_v44, %v11839_v35  ;;  %v25054_v53 = vld [vmem:[#allocation55_spill] sm:$0xff] }
 0xcd1   : > { %v16918_v38 = vpop.f32.mrf.mxu0  ;;  %v16964_v18 = vpop.f32.mrf.mxu1 }
 0xcd2   : > { %v11869_v31 = vadd.f32 %v16918_v38, %v11676_v30  ;;  %v11684_v30 = vadd.f32 %v11683_v12, %v11486_v23  ;;  %v25048_v23 = vld [vmem:[#allocation82_spill] sm:$0xff]  ;;  %v12020_v16 = vadd.f32 %v12019_v25, %v11851_v63  ;;  %v25058_v63 = vld [vmem:[#allocation27_spill] sm:$0xff] }
 0xcd3   : > { %v11862_v29 = vpop.f32.mrf.mxu0  ;;  %v12055_v57 = vpop.f32.mrf.mxu1 }
 0xcd4   : > { %v11863_v19 = vadd.f32 %v11862_v29, %v11668_v54  ;;  %v12038_v40 = vadd.f32 %v16958_v3, %v11869_v31  ;;  %v25051_v31 = vld [vmem:[#allocation60_spill] sm:$0xff] }
 0xcd5   : > { %v16921_v32 = vpop.f32.mrf.mxu0  ;;  %v12074_v54 = vadd.f32 %v12026_v1, %v25051_v31  ;;  %v25066_v31 = vld [vmem:[#allocation25_spill] sm:$0xff] }
 0xcd6   : > { %v11881_v33 = vadd.f32 %v16921_v32, %v11692_v37  ;;  %v12032_v10 = vadd.f32 %v12031_v8, %v11863_v19  ;;  %v12076_v38 = vadd.f32 %v12038_v40, %v25047_v28  ;;  %v25050_v8 = vld [vmem:[#allocation7_spill] sm:$0xff]  ;;  %v11803_v19 = vadd.f32 %v23318_v34, %v23290_v4  ;;  %v25061_v28 = vld [vmem:[#allocation90_spill] sm:$0xff] }
 0xcd7   : > { %v11874_v39 = vpop.f32.mrf.mxu0  ;;  %v12073_v37 = vadd.f32 %v12020_v16, %v25053_v50  ;;  %v11821_v32 = vadd.f32 %v23322_v22, %v23294_v49  ;;  %v12002_v4 = vadd.f32 %v25055_v48, %v11833_v2  ;;  %v25056_v34 = vld [vmem:[#allocation83_spill] sm:$0xff]  ;;  %v25060_v22 = vld [vmem:[#allocation68_spill] sm:$0xff] }
 0xcd8   : > { %v12050_v47 = vadd.f32 %v16961_v11, %v11881_v33  ;;  %v11875_v26 = vadd.f32 %v11874_v39, %v11684_v30  ;;  %v23357_v11 = vld [vmem:[%s23891_s1 + $0x2b0] ss:$0 sm:$0xff]  ;;  %v12075_v36 = vadd.f32 %v12032_v10, %v25049_v20  ;;  %v12072_v33 = vadd.f32 %v12014_v15, %v25056_v34  ;;  %v25059_v39 = vld [vmem:[#allocation41_spill] sm:$0xff] }
 0xcd9   : > { %v16924_v59 = vpop.f32.mrf.mxu0  ;;  %v12096_v51 = vadd.f32 %v23357_v11, %v12076_v38  ;;  %v12094_v17 = vadd.f32 %v23357_v11, %v12074_v54  ;;  %v11815_v10 = vadd.f32 %v25058_v63, %v25057_v45  ;;  %v11996_v49 = vadd.f32 %v25059_v39, %v11827_v43  ;;  %v25064_v20 = vld [vmem:[#allocation88_spill] sm:$0xff]  ;;  %v25070_v39 = vld [vmem:[#allocation79_spill] sm:$0xff] }
 0xcda   : > { %v12078_v12 = vadd.f32 %v12050_v47, %v25048_v23  ;;  %v12044_v46 = vadd.f32 %v12043_v21, %v11875_v26  ;;  %v11893_v56 = vadd.f32 %v16924_v59, %v11708_v9  ;;  %v12095_v5 = vadd.f32 %v23357_v11, %v12075_v36  ;;  %v25069_v34 = vld [vmem:[#allocation32_spill] sm:$0xff] }
 0xcdb   : > { %v11886_v3 = vpop.f32.mrf.mxu0  ;;  %v23393_v30 = vand.u32 4294901760, %v12096_v51  ;;  %v12071_v47 = vadd.f32 %v12008_v0, %v25060_v22  ;;  %v12093_v26 = vadd.f32 %v23357_v11, %v12073_v37  ;;  %v11990_v38 = vadd.f32 %v25061_v28, %v11821_v32  ;;  %v25067_v0 = vld [vmem:[#allocation13_spill] sm:$0xff]  ;;  %v25068_v37 = vld [vmem:[#allocation67_spill] sm:$0xff] }
 0xcdc   : > { %v12098_v58 = vadd.f32 %v23357_v11, %v12078_v12  ;;  %v12077_v60 = vadd.f32 %v12044_v46, %v25050_v8  ;;  %v12062_v42 = vadd.f32 %v16964_v18, %v11893_v56  ;;  %v11887_v55 = vadd.f32 %v11886_v3, %v11700_v14  ;;  %v25062_v18 = vld [vmem:[#allocation50_spill] sm:$0xff] }
 0xcdd   : > { %v23409_v7 = vand.u32 4294901760, %v12095_v5  ;;  %v12070_v59 = vadd.f32 %v12002_v4, %v25062_v18  ;;  %v12092_v23 = vadd.f32 %v23357_v11, %v12072_v33  ;;  %v25063_v12 = vmov 0.0   ;;  %v25065_v3 = vld [vmem:[#allocation26_spill] sm:$0xff] }
 0xcde   : > { %v12097_v25 = vadd.f32 %v23357_v11, %v12077_v60  ;;  %v12080_v29 = vadd.f32 %v12062_v42, %v25052_v62  ;;  %v12056_v61 = vadd.f32 %v12055_v57, %v11887_v55  ;;  %v23372_v27 = vand.u32 4294901760, %v12098_v58  ;;  %v240_v4 = vld [vmem:[%s23891_s1 + $0x280] sm:$0xff] }
 0xcdf   : > { %v23418_v46 = vand.u32 4294901760, %v12094_v17  ;;  %v23427_v16 = vsub.f32 %v12096_v51, %v23393_v30  ;;  %v11984_v36 = vadd.f32 %v25064_v20, %v11815_v10  ;;  %v12091_v8 = vadd.f32 %v23357_v11, %v12071_v47 }
 0xce0   : > { %v12100_v6 = vadd.f32 %v23357_v11, %v12080_v29  ;;  %v12079_v21 = vadd.f32 %v12056_v61, %v25054_v53  ;;  %v23383_v40 = vand.u32 4294901760, %v12097_v25  ;;  %v23396_v24 = vsub.f32 %v12098_v58, %v23372_v27 }
 0xce1   : > { %v12069_v58 = vadd.f32 %v11996_v49, %v25065_v3  ;;  %v23433_v60 = vand.u32 4294901760, %v12093_v26  ;;  %v23442_v15 = vsub.f32 %v12095_v5, %v23409_v7  ;;  %v12068_v54 = vadd.f32 %v11990_v38, %v25066_v31 }
 0xce2   : > { %v12099_v44 = vadd.f32 %v23357_v11, %v12079_v21  ;;  %v23391_v41 = vand.u32 4294901760, %v12100_v6  ;;  %v23412_v1 = vsub.f32 %v12097_v25, %v23383_v40  ;;  %v12209_v35 = vand.u32 4294901760, %v23396_v24 }
 0xce3   : > { %v12090_v51 = vadd.f32 %v23357_v11, %v12070_v59  ;;  %v23447_v57 = vand.u32 4294901760, %v12092_v23  ;;  %v23450_v25 = vsub.f32 %v12094_v17, %v23418_v46  ;;  %v12223_v43 = vand.u32 4294901760, %v23427_v16 }
 0xce4   : > { %16966 = vmatpush3.msra.mxu0 %v23391_v41  ;;  %v23404_v9 = vand.u32 4294901760, %v12099_v44  ;;  %v23407_v52 = vsub.f32 %v12100_v6, %v23391_v41  ;;  %v12216_v2 = vand.u32 4294901760, %v23412_v1  ;;  %v12210_v61 = vsub.f32 %v23396_v24, %v12209_v35 }
 0xce5   : > { %16967 = vmatprep.subr.mxu0 %v25063_v12  ;;  %v11972_v50 = vadd.f32 %v25067_v0, %v11803_v19  ;;  %v12067_v5 = vadd.f32 %v11984_v36, %v25068_v37  ;;  %v12089_v6 = vadd.f32 %v23357_v11, %v12069_v58  ;;  %v23464_v53 = vand.u32 4294901760, %v12091_v8 }
 0xce6   : > { %16968 = vmatpush3.msra.mxu0 %v23404_v9  ;;  %v12195_v56 = vand.u32 4294901760, %v23407_v52  ;;  %v23423_v14 = vsub.f32 %v12099_v44, %v23404_v9  ;;  %v12217_v32 = vsub.f32 %v23412_v1, %v12216_v2  ;;  %v12230_v48 = vand.u32 4294901760, %v23442_v15 }
 0xce7   : > { %16969 = vmatprep.subr.mxu0 %v25063_v12  ;;  %v23472_v19 = vsub.f32 %v12093_v26, %v23433_v60  ;;  %v12066_v33 = vadd.f32 %v23360_v13, %v25069_v34  ;;  %v12088_v17 = vadd.f32 %v23357_v11, %v12068_v54  ;;  %v23482_v44 = vand.u32 4294901760, %v12090_v51 }
 0xce8   : > { %16970 = vmatpush3.msra.mxu0 %v23372_v27  ;;  %v12196_v42 = vsub.f32 %v23407_v52, %v12195_v56  ;;  %v12202_v55 = vand.u32 4294901760, %v23423_v14  ;;  %v12211_v45 = vand.u32 4294901760, %v12210_v61  ;;  %v12224_v63 = vsub.f32 %v23427_v16, %v12223_v43 }
 0xce9   : > { %16971 = vmatprep.subr.mxu0 %v25063_v12  ;;  %v12237_v10 = vand.u32 4294901760, %v23450_v25  ;;  %v23490_v13 = vsub.f32 %v12092_v23, %v23447_v57  ;;  %v12065_v49 = vadd.f32 %v11972_v50, %v25070_v39  ;;  %v12087_v22 = vadd.f32 %v23357_v11, %v12067_v5 }
 0xcea   : > { %16972 = vmatpush3.msra.mxu0 %v23383_v40  ;;  %v12197_v62 = vand.u32 4294901760, %v12196_v42  ;;  %v12203_v29 = vsub.f32 %v23423_v14, %v12202_v55  ;;  %v23496_v47 = vand.u32 4294901760, %v12089_v6  ;;  %v23498_v26 = vand.u32 4294901760, %v240_v4 }
 0xceb   : > { %16973 = vmatprep.subr.mxu0 %v25063_v12  ;;  %v12218_v28 = vand.u32 4294901760, %v12217_v32  ;;  %v12231_v38 = vsub.f32 %v23442_v15, %v12230_v48  ;;  %v12244_v18 = vand.u32 4294901760, %v23472_v19  ;;  %v23506_v59 = vsub.f32 %v12091_v8, %v23464_v53 }
 0xcec   : > { %16974 = vmatpush3.msra.mxu0 %v23393_v30  ;;  %17001 = vmatpush3.msra.mxu1 %v12197_v62  ;;  %v12204_v21 = vand.u32 4294901760, %v12203_v29  ;;  %v12086_v23 = vadd.f32 %v23357_v11, %v12066_v33  ;;  %v23511_v20 = vand.u32 4294901760, %v12088_v17  ;;  %v12225_v36 = vand.u32 4294901760, %v12224_v63 }
 0xced   : > { %16975 = vmatprep.subr.mxu0 %v25063_v12  ;;  %17002 = vmatprep.subr.mxu1 %v25063_v12  ;;  %v12238_v3 = vsub.f32 %v23450_v25, %v12237_v10  ;;  %v12251_v58 = vand.u32 4294901760, %v23490_v13  ;;  %v23519_v8 = vsub.f32 %v12090_v51, %v23482_v44  ;;  %v12085_v42 = vadd.f32 %v23357_v11, %v12065_v49 }
 0xcee   : > { %16976 = vmatpush3.msra.mxu0 %v23409_v7  ;;  %17003 = vmatpush3.msra.mxu1 %v12204_v21  ;;  %v23524_v31 = vand.u32 4294901760, %v12087_v22  ;;  %v23527_v54 = vsub.f32 %v240_v4, %v23498_v26  ;;  %v12232_v62 = vand.u32 4294901760, %v12231_v38  ;;  %v12245_v51 = vsub.f32 %v23472_v19, %v12244_v18 }
 0xcef   : > { %16977 = vmatprep.subr.mxu0 %v25063_v12  ;;  %17004 = vmatprep.subr.mxu1 %v25063_v12  ;;  %v12258_v29 = vand.u32 4294901760, %v23506_v59  ;;  %v23535_v11 = vsub.f32 %v12089_v6, %v23496_v47  ;;  %v23539_v61 = vand.u32 4294901760, %v12086_v23  ;;  %v12239_v0 = vand.u32 4294901760, %v12238_v3 }
 0xcf0   : > { %16978 = vmatpush3.msra.mxu0 %v23418_v46  ;;  %17005 = vmatpush3.msra.mxu1 %v12211_v45  ;;  %v12252_v50 = vsub.f32 %v23490_v13, %v12251_v58  ;;  %v12265_v37 = vand.u32 4294901760, %v23519_v8  ;;  %v23547_v5 = vsub.f32 %v12088_v17, %v23511_v20  ;;  %v23551_v6 = vand.u32 4294901760, %v12085_v42 }
 0xcf1   : > { %16979 = vmatprep.subr.mxu0 %v25063_v12  ;;  %17006 = vmatprep.subr.mxu1 %v25063_v12  ;;  %v12184_v21 = vand.u32 4294901760, %v23527_v54  ;;  %v12246_v32 = vand.u32 4294901760, %v12245_v51  ;;  %v12259_v4 = vsub.f32 %v23506_v59, %v12258_v29  ;;  %v12272_v34 = vand.u32 4294901760, %v23535_v11 }
 0xcf2   : > { %16980 = vmatpush3.msra.mxu0 %v23433_v60  ;;  %17007 = vmatpush3.msra.mxu1 %v12218_v28  ;;  %v23560_v33 = vsub.f32 %v12087_v22, %v23524_v31  ;;  %v12253_v17 = vand.u32 4294901760, %v12252_v50  ;;  %v12266_v45 = vsub.f32 %v23519_v8, %v12265_v37  ;;  %v12279_v63 = vand.u32 4294901760, %v23547_v5 }
 0xcf3   : > { %16981 = vmatprep.subr.mxu0 %v25063_v12  ;;  %17008 = vmatprep.subr.mxu1 %v25063_v12  ;;  %v23570_v39 = vsub.f32 %v12086_v23, %v23539_v61  ;;  %v12185_v49 = vsub.f32 %v23527_v54, %v12184_v21  ;;  %v12260_v22 = vand.u32 4294901760, %v12259_v4  ;;  %v12273_v28 = vsub.f32 %v23535_v11, %v12272_v34 }
 0xcf4   : > { %16982 = vmatpush3.msra.mxu0 %v23447_v57  ;;  %17009 = vmatpush3.msra.mxu1 %v12225_v36  ;;  %v12286_v38 = vand.u32 4294901760, %v23560_v33  ;;  %v23583_v23 = vsub.f32 %v12085_v42, %v23551_v6  ;;  %v12267_v36 = vand.u32 4294901760, %v12266_v45  ;;  %v12280_v3 = vsub.f32 %v23547_v5, %v12279_v63 }
 0xcf5   : > { %16983 = vmatprep.subr.mxu0 %v25063_v12  ;;  %17010 = vmatprep.subr.mxu1 %v25063_v12  ;;  %v12274_v42 = vand.u32 4294901760, %v12273_v28  ;;  %v12186_v51 = vand.u32 4294901760, %v12185_v49 }
 0xcf6   : > { %16984 = vmatpush3.msra.mxu0 %v23464_v53  ;;  %17011 = vmatpush3.msra.mxu1 %v12232_v62  ;;  %v12293_v62 = vand.u32 4294901760, %v23570_v39  ;;  %v12300_v50 = vand.u32 4294901760, %v23583_v23 }
 0xcf7   : > { %16985 = vmatprep.subr.mxu0 %v25063_v12  ;;  %17012 = vmatprep.subr.mxu1 %v25063_v12 }
 0xcf8   : > { %16986 = vmatpush3.msra.mxu0 %v23482_v44  ;;  %17013 = vmatpush3.msra.mxu1 %v12239_v0  ;;  %v12287_v0 = vsub.f32 %v23560_v33, %v12286_v38  ;;  %v12294_v4 = vsub.f32 %v23570_v39, %v12293_v62  ;;  %v12301_v45 = vsub.f32 %v23583_v23, %v12300_v50 }
 0xcf9   : > { %16987 = vmatprep.subr.mxu0 %v25063_v12  ;;  %17014 = vmatprep.subr.mxu1 %v25063_v12 }
 0xcfa   : > { %16988 = vmatpush3.msra.mxu0 %v23496_v47  ;;  %17015 = vmatpush3.msra.mxu1 %v12246_v32  ;;  %v12281_v32 = vand.u32 4294901760, %v12280_v3  ;;  %v12295_v49 = vand.u32 4294901760, %v12294_v4 }
 0xcfb   : > { %16989 = vmatprep.subr.mxu0 %v25063_v12  ;;  %17016 = vmatprep.subr.mxu1 %v25063_v12 }
 0xcfc   : > { %16990 = vmatpush3.msra.mxu0 %v23511_v20  ;;  %17017 = vmatpush3.msra.mxu1 %v12253_v17  ;;  %v12288_v17 = vand.u32 4294901760, %v12287_v0 }
 0xcfd   : > { %16991 = vmatprep.subr.mxu0 %v25063_v12  ;;  %17018 = vmatprep.subr.mxu1 %v25063_v12 }
 0xcfe   : > { %16992 = vmatpush3.msra.mxu0 %v23524_v31  ;;  %17019 = vmatpush3.msra.mxu1 %v12260_v22  ;;  %v12302_v22 = vand.u32 4294901760, %v12301_v45 }
 0xcff   : > { %16993 = vmatprep.subr.mxu0 %v25063_v12  ;;  %17020 = vmatprep.subr.mxu1 %v25063_v12 }
 0xd00   : > { %16994 = vmatpush3.msra.mxu0 %v23539_v61  ;;  %17021 = vmatpush3.msra.mxu1 %v12267_v36 }
 0xd01   : > { %16995 = vmatprep.subr.mxu0 %v25063_v12  ;;  %17022 = vmatprep.subr.mxu1 %v25063_v12 }
 0xd02   : > { %16996 = vmatpush3.msra.mxu0 %v23551_v6  ;;  %17023 = vmatpush3.msra.mxu1 %v12274_v42  ;;  %v13302_v42 = vld [vmem:[%s23891_s1 + $0x2b8] ss:$0 sm:$0xff] }
 0xd03   : > { %17024 = vmatprep.subr.mxu1 %v25063_v12  ;;  %17035 = vmatprep.subr.mxu0 %v25063_v12 }
 0xd04   : > { %16998 = vmatmul.mubr.f32.vlgmr.msra.gmra.mxu0 %v12186_v51  ;;  %17025 = vmatpush3.msra.mxu1 %v12281_v32 }
 0xd05   : > { %17036 = vmatpush3.msra.mxu0 %v23407_v52  ;;  %17026 = vmatprep.subr.mxu1 %v25063_v12  ;;  %v206_v52 = vld [vmem:[%s23891_s1 + $0x170] sm:$0xff] }
 0xd06   : > { %17037 = vmatprep.subr.mxu0 %v25063_v12  ;;  %17027 = vmatpush3.msra.mxu1 %v12288_v17 }
 0xd07   : > { %17038 = vmatpush3.msra.mxu0 %v23423_v14  ;;  %17028 = vmatprep.subr.mxu1 %v25063_v12  ;;  %v204_v14 = vld [vmem:[%s23891_s1 + $0x160] sm:$0xff] }
 0xd08   : > { %17039 = vmatprep.subr.mxu0 %v25063_v12  ;;  %17029 = vmatpush3.msra.mxu1 %v12295_v49 }
 0xd09   : > { %17040 = vmatpush3.msra.mxu0 %v23396_v24  ;;  %17030 = vmatprep.subr.mxu1 %v25063_v12 }
 0xd0a   : > { %17041 = vmatprep.subr.mxu0 %v25063_v12  ;;  %17031 = vmatpush3.msra.mxu1 %v12302_v22 }
 0xd0b   : > { %17042 = vmatpush3.msra.mxu0 %v23412_v1  ;;  %17033 = vmatmul.mubr.f32.vlgmr.msra.gmra.mxu1 %v23498_v26  ;;  %v205_v1 = vld [vmem:[%s23891_s1 + $0x168] sm:$0xff] }
 0xd0c   : > { %17043 = vmatprep.subr.mxu0 %v25063_v12  ;;  %17070 = vmatprep.subr.mxu1 %v25063_v12 }
 0xd0d   : > { %17044 = vmatpush3.msra.mxu0 %v23427_v16  ;;  %17071 = vmatpush3.msra.mxu1 %v23391_v41 }
 0xd0e   : > { %17045 = vmatprep.subr.mxu0 %v25063_v12  ;;  %17072 = vmatprep.subr.mxu1 %v25063_v12 }
 0xd0f   : > { %17046 = vmatpush3.msra.mxu0 %v23442_v15  ;;  %17073 = vmatpush3.msra.mxu1 %v23404_v9 }
 0xd10   : > { %17047 = vmatprep.subr.mxu0 %v25063_v12  ;;  %17074 = vmatprep.subr.mxu1 %v25063_v12 }
 0xd11   : > { %17048 = vmatpush3.msra.mxu0 %v23450_v25  ;;  %17075 = vmatpush3.msra.mxu1 %v23372_v27 }
 0xd12   : > { %17049 = vmatprep.subr.mxu0 %v25063_v12  ;;  %17076 = vmatprep.subr.mxu1 %v25063_v12 }
 0xd13   : > { %17050 = vmatpush3.msra.mxu0 %v23472_v19  ;;  %17077 = vmatpush3.msra.mxu1 %v23383_v40 }
 0xd14   : > { %17051 = vmatprep.subr.mxu0 %v25063_v12  ;;  %17078 = vmatprep.subr.mxu1 %v25063_v12 }
 0xd15   : > { %17052 = vmatpush3.msra.mxu0 %v23490_v13  ;;  %17079 = vmatpush3.msra.mxu1 %v23393_v30 }
 0xd16   : > { %17053 = vmatprep.subr.mxu0 %v25063_v12  ;;  %17080 = vmatprep.subr.mxu1 %v25063_v12 }
 0xd17   : > { %17054 = vmatpush3.msra.mxu0 %v23506_v59  ;;  %17081 = vmatpush3.msra.mxu1 %v23409_v7 }
 0xd18   : > { %17055 = vmatprep.subr.mxu0 %v25063_v12  ;;  %17082 = vmatprep.subr.mxu1 %v25063_v12 }
 0xd19   : > { %17056 = vmatpush3.msra.mxu0 %v23519_v8  ;;  %17083 = vmatpush3.msra.mxu1 %v23418_v46 }
 0xd1a   : > { %17057 = vmatprep.subr.mxu0 %v25063_v12  ;;  %17084 = vmatprep.subr.mxu1 %v25063_v12 }
 0xd1b   : > { %17058 = vmatpush3.msra.mxu0 %v23535_v11  ;;  %17085 = vmatpush3.msra.mxu1 %v23433_v60 }
 0xd1c   : > { %17059 = vmatprep.subr.mxu0 %v25063_v12  ;;  %17086 = vmatprep.subr.mxu1 %v25063_v12 }
 0xd1d   : > { %17060 = vmatpush3.msra.mxu0 %v23547_v5  ;;  %17087 = vmatpush3.msra.mxu1 %v23447_v57 }
 0xd1e   : > { %17061 = vmatprep.subr.mxu0 %v25063_v12  ;;  %17088 = vmatprep.subr.mxu1 %v25063_v12 }
 0xd1f   : > { %17062 = vmatpush3.msra.mxu0 %v23560_v33  ;;  %17089 = vmatpush3.msra.mxu1 %v23464_v53 }
 0xd20   : > { %17063 = vmatprep.subr.mxu0 %v25063_v12  ;;  %17090 = vmatprep.subr.mxu1 %v25063_v12 }
 0xd21   : > { %17064 = vmatpush3.msra.mxu0 %v23570_v39  ;;  %17091 = vmatpush3.msra.mxu1 %v23482_v44 }
 0xd22   : > { %17065 = vmatprep.subr.mxu0 %v25063_v12  ;;  %17092 = vmatprep.subr.mxu1 %v25063_v12 }
 0xd23   : > { %17066 = vmatpush3.msra.mxu0 %v23583_v23  ;;  %17067 = vmatprep.mubr.msk.f32.mxu0 %vm17420_vm2, %v25063_v12 }
 0xd24   : > { %17093 = vmatpush3.msra.mxu1 %v23496_v47  ;;  %17068 = vmatmul.mubr.f32.vlgmr.msra.gmra.mxu0 %v23527_v54 }
 0xd25   : > { %17094 = vmatprep.subr.mxu1 %v25063_v12  ;;  %17105 = vmatprep.subr.mxu0 %v25063_v12 }
 0xd26   : > { %17095 = vmatpush3.msra.mxu1 %v23511_v20  ;;  %17106 = vmatpush3.msra.mxu0 %v12195_v56  ;;  %v23802_v56 = vand.u32 4294901760, %v205_v1 }
 0xd27   : > { %17096 = vmatprep.subr.mxu1 %v25063_v12  ;;  %17107 = vmatprep.subr.mxu0 %v25063_v12 }
 0xd28   : > { %17097 = vmatpush3.msra.mxu1 %v23524_v31  ;;  %17108 = vmatpush3.msra.mxu0 %v12202_v55  ;;  %v23811_v16 = vsub.f32 %v205_v1, %v23802_v56 }
 0xd29   : > { %17098 = vmatprep.subr.mxu1 %v25063_v12  ;;  %17109 = vmatprep.subr.mxu0 %v25063_v12 }
 0xd2a   : > { %17099 = vmatpush3.msra.mxu1 %v23539_v61  ;;  %17110 = vmatpush3.msra.mxu0 %v12209_v35 }
 0xd2b   : > { %17100 = vmatprep.subr.mxu1 %v25063_v12  ;;  %17111 = vmatprep.subr.mxu0 %v25063_v12 }
 0xd2c   : > { %17101 = vmatpush3.msra.mxu1 %v23551_v6  ;;  %17102 = vmatprep.mubr.msk.f32.mxu1 %vm17420_vm2, %v25063_v12 }
 0xd2d   : > { %17112 = vmatpush3.msra.mxu0 %v12216_v2  ;;  %17103 = vmatmul.mubr.f32.vlgmr.msra.gmra.mxu1 %v12184_v21  ;;  %v12869_v2 = vand.u32 4294901760, %v23811_v16 }
 0xd2e   : > { %17113 = vmatprep.subr.mxu0 %v25063_v12  ;;  %17140 = vmatprep.subr.mxu1 %v25063_v12 }
 0xd2f   : > { %17114 = vmatpush3.msra.mxu0 %v12223_v43  ;;  %17141 = vmatpush3.msra.mxu1 %v23391_v41  ;;  %v12870_v25 = vsub.f32 %v23811_v16, %v12869_v2 }
 0xd30   : > { %17115 = vmatprep.subr.mxu0 %v25063_v12  ;;  %17142 = vmatprep.subr.mxu1 %v25063_v12 }
 0xd31   : > { %17116 = vmatpush3.msra.mxu0 %v12230_v48  ;;  %17143 = vmatpush3.msra.mxu1 %v23404_v9 }
 0xd32   : > { %17117 = vmatprep.subr.mxu0 %v25063_v12  ;;  %17144 = vmatprep.subr.mxu1 %v25063_v12 }
 0xd33   : > { %17118 = vmatpush3.msra.mxu0 %v12237_v10  ;;  %17145 = vmatpush3.msra.mxu1 %v23372_v27  ;;  %v207_v27 = vld [vmem:[%s23891_s1 + $0x178] sm:$0xff] }
 0xd34   : > { %17119 = vmatprep.subr.mxu0 %v25063_v12  ;;  %17146 = vmatprep.subr.mxu1 %v25063_v12 }
 0xd35   : > { %17120 = vmatpush3.msra.mxu0 %v12244_v18  ;;  %17147 = vmatpush3.msra.mxu1 %v23383_v40  ;;  %v23779_v40 = vand.u32 4294901760, %v207_v27 }
 0xd36   : > { %17121 = vmatprep.subr.mxu0 %v25063_v12  ;;  %17148 = vmatprep.subr.mxu1 %v25063_v12 }
 0xd37   : > { %17122 = vmatpush3.msra.mxu0 %v12251_v58  ;;  %17149 = vmatpush3.msra.mxu1 %v23393_v30  ;;  %v23782_v41 = vsub.f32 %v207_v27, %v23779_v40 }
 0xd38   : > { %17123 = vmatprep.subr.mxu0 %v25063_v12  ;;  %17150 = vmatprep.subr.mxu1 %v25063_v12 }
 0xd39   : > { %17124 = vmatpush3.msra.mxu0 %v12258_v29  ;;  %17151 = vmatpush3.msra.mxu1 %v23409_v7  ;;  %v12855_v30 = vand.u32 4294901760, %v23782_v41  ;;  %v23794_v7 = vand.u32 4294901760, %v206_v52 }
 0xd3a   : > { %17125 = vmatprep.subr.mxu0 %v25063_v12  ;;  %17152 = vmatprep.subr.mxu1 %v25063_v12 }
 0xd3b   : > { %17126 = vmatpush3.msra.mxu0 %v12265_v37  ;;  %17153 = vmatpush3.msra.mxu1 %v23418_v46  ;;  %v12856_v24 = vsub.f32 %v23782_v41, %v12855_v30  ;;  %v23800_v46 = vsub.f32 %v206_v52, %v23794_v7 }
 0xd3c   : > { %17127 = vmatprep.subr.mxu0 %v25063_v12  ;;  %17154 = vmatprep.subr.mxu1 %v25063_v12 }
 0xd3d   : > { %17128 = vmatpush3.msra.mxu0 %v12272_v34  ;;  %17155 = vmatpush3.msra.mxu1 %v23433_v60  ;;  %v12857_v9 = vand.u32 4294901760, %v12856_v24  ;;  %v12862_v35 = vand.u32 4294901760, %v23800_v46  ;;  %v23813_v60 = vand.u32 4294901760, %v204_v14 }
 0xd3e   : > { %17129 = vmatprep.subr.mxu0 %v25063_v12  ;;  %17156 = vmatprep.subr.mxu1 %v25063_v12 }
 0xd3f   : > { %17130 = vmatpush3.msra.mxu0 %v12279_v63  ;;  %17157 = vmatpush3.msra.mxu1 %v23447_v57  ;;  %v12863_v55 = vsub.f32 %v23800_v46, %v12862_v35  ;;  %v23822_v15 = vsub.f32 %v204_v14, %v23813_v60 }
 0xd40   : > { %17131 = vmatprep.subr.mxu0 %v25063_v12  ;;  %17158 = vmatprep.subr.mxu1 %v25063_v12 }
 0xd41   : > { %17132 = vmatpush3.msra.mxu0 %v12286_v38  ;;  %17159 = vmatpush3.msra.mxu1 %v23464_v53  ;;  %v12864_v57 = vand.u32 4294901760, %v12863_v55  ;;  %v12876_v43 = vand.u32 4294901760, %v23822_v15  ;;  %v12871_v53 = vand.u32 4294901760, %v12870_v25 }
 0xd42   : > { %17133 = vmatprep.subr.mxu0 %v25063_v12  ;;  %17160 = vmatprep.subr.mxu1 %v25063_v12 }
 0xd43   : > { %17134 = vmatpush3.msra.mxu0 %v12293_v62  ;;  %17161 = vmatpush3.msra.mxu1 %v23482_v44  ;;  %v12877_v48 = vsub.f32 %v23822_v15, %v12876_v43 }
 0xd44   : > { %17135 = vmatprep.subr.mxu0 %v25063_v12  ;;  %17162 = vmatprep.subr.mxu1 %v25063_v12 }
 0xd45   : > { %17136 = vmatpush3.msra.mxu0 %v12300_v50  ;;  %17137 = vmatprep.mubr.msk.f32.mxu0 %vm17420_vm2, %v25063_v12  ;;  %v12878_v19 = vand.u32 4294901760, %v12877_v48 }
 0xd46   : > { %17163 = vmatpush3.msra.mxu1 %v23496_v47  ;;  %17138 = vmatmul.mubr.f32.vlgmr.msra.gmra.mxu0 %v23498_v26 }
 0xd47   : > { %17164 = vmatprep.subr.mxu1 %v25063_v12  ;;  %17172 = vmatprep.mubr.msk.f32.mxu1 %vm17420_vm2, %v25063_v12 }
 0xd48   : > { %17165 = vmatpush3.msra.mxu1 %v23511_v20  ;;  %17175 = vmatprep.subr.mxu0 %v25063_v12 }
 0xd49   : > { %17166 = vmatprep.subr.mxu1 %v25063_v12  ;;  %17183 = vmatprep.mubr.msk.f32.mxu0 %vm17420_vm2, %v25063_v12 }
 0xd4a   : > { %17167 = vmatpush3.msra.mxu1 %v23524_v31  ;;  %17176 = vmatpush3.msra.mxu0 %v23779_v40 }
 0xd4b   : > { %17168 = vmatprep.subr.mxu1 %v25063_v12  ;;  %17177 = vmatprep.subr.mxu0 %v25063_v12 }
 0xd4c   : > { %17169 = vmatpush3.msra.mxu1 %v23539_v61  ;;  %17178 = vmatpush3.msra.mxu0 %v23794_v7 }
 0xd4d   : > { %17170 = vmatprep.subr.mxu1 %v25063_v12  ;;  %17179 = vmatprep.subr.mxu0 %v25063_v12 }
 0xd4e   : > { %17171 = vmatpush3.msra.mxu1 %v23551_v6  ;;  %17180 = vmatpush3.msra.mxu0 %v23802_v56 }
 0xd4f   : > { %17173 = vmatmul.mubr.f32.vlgmr.msra.gmra.mxu1 %v23498_v26  ;;  %17186 = vmatprep.subr.mxu1 %v25063_v12 }
 0xd50   : > { %17194 = vmatprep.mubr.msk.f32.mxu1 %vm17420_vm2, %v25063_v12  ;;  %17187 = vmatpush3.msra.mxu1 %v12857_v9 }
 0xd51   : > { %17188 = vmatprep.subr.mxu1 %v25063_v12  ;;  %17181 = vmatprep.subr.mxu0 %v25063_v12 }
 0xd52   : > { %17182 = vmatpush3.msra.mxu0 %v23813_v60  ;;  %17189 = vmatpush3.msra.mxu1 %v12864_v57 }
 0xd53   : > { %17197 = vmatprep.subr.mxu0 %v25063_v12  ;;  %17190 = vmatprep.subr.mxu1 %v25063_v12 }
 0xd54   : > { %17191 = vmatpush3.msra.mxu1 %v12871_v53 }
 0xd55   : > { %17192 = vmatprep.subr.mxu1 %v25063_v12 }
 0xd56   : > { %17193 = vmatpush3.msra.mxu1 %v12878_v19 }
 0xd57   : > { %17208 = vmatprep.subr.mxu1 %v25063_v12 }
 0xdc4   : > { %v12188_v44 = vpop.f32.mrf.mxu0 }
 0xdc6   : > { %v16999_v10 = vpop.f32.mrf.mxu0 }
 0xdcb   : > { %v12339_v13 = vpop.f32.mrf.mxu1 }
 0xdcc   : > { %v12340_v8 = vadd.f32 %v12339_v13, %v12188_v44 }
 0xdcd   : > { %v17034_v47 = vpop.f32.mrf.mxu1 }
 0xde4   : > { %v12443_v26 = vpop.f32.mrf.mxu0 }
 0xde5   : > { %v12444_v54 = vadd.f32 %v12443_v26, %v12340_v8 }
 0xde6   : > { %v17069_v18 = vpop.f32.mrf.mxu0 }
 0xded   : > { %v12532_v59 = vpop.f32.mrf.mxu1 }
 0xdee   : > { %v12533_v29 = vadd.f32 %v12532_v59, %v12444_v54 }
 0xdef   : > { %v17104_v20 = vpop.f32.mrf.mxu1 }
 0xe06   : > { %v12651_v58 = vpop.f32.mrf.mxu0 }
 0xe07   : > { %v12652_v11 = vadd.f32 %v12651_v58, %v12533_v29 }
 0xe08   : > { %v17139_v31 = vpop.f32.mrf.mxu0 }
 0xe0f   : > { %v12738_v61 = vpop.f32.mrf.mxu1 }
 0xe10   : > { %v12739_v37 = vadd.f32 %v12738_v61, %v12652_v11 }
 0xe11   : > { %v17174_v5 = vpop.f32.mrf.mxu1 }
 0xe12   : > { %v12747_v6 = vsel %vm1534_vm0, %v12739_v37, 0 }
 0xe13   : > { %v12818_v21 = vand.u32 4294901760, %v12747_v6 }
 0xe15   : > { %v12819_v34 = vsub.f32 %v12747_v6, %v12818_v21  ;;  %17195 = vmatmul.mubr.f32.vlgmr.msra.gmra.mxu1 %v12818_v21 }
 0xe16   : > { %17209 = vmatpush3.msra.mxu1 %v23779_v40  ;;  %17216 = vmatprep.mubr.msk.f32.mxu1 %vm17420_vm2, %v25063_v12 }
 0xe17   : > { %v12820_v33 = vand.u32 4294901760, %v12819_v34  ;;  %17210 = vmatprep.subr.mxu1 %v25063_v12 }
 0xe18   : > { %17211 = vmatpush3.msra.mxu1 %v23794_v7 }
 0xe19   : > { %v12821_v63 = vsub.f32 %v12819_v34, %v12820_v33  ;;  %17212 = vmatprep.subr.mxu1 %v25063_v12 }
 0xe1a   : > { %17213 = vmatpush3.msra.mxu1 %v23802_v56 }
 0xe1b   : > { %v12822_v39 = vand.u32 4294901760, %v12821_v63  ;;  %17214 = vmatprep.subr.mxu1 %v25063_v12 }
 0xe1c   : > { %17215 = vmatpush3.msra.mxu1 %v23813_v60 }
 0xe1d   : > { %17217 = vmatmul.mubr.f32.vlgmr.msra.gmra.mxu1 %v12820_v33  ;;  %17230 = vmatprep.subr.mxu1 %v25063_v12 }
 0xe1e   : > { %17184 = vmatmul.mubr.f32.vlgmr.msra.gmra.mxu0 %v12822_v39  ;;  %17231 = vmatpush3.msra.mxu1 %v23779_v40 }
 0xe1f   : > { %17198 = vmatpush3.msra.mxu0 %v23782_v41  ;;  %17232 = vmatprep.subr.mxu1 %v25063_v12 }
 0xe20   : > { %17199 = vmatprep.subr.mxu0 %v25063_v12  ;;  %17233 = vmatpush3.msra.mxu1 %v23794_v7 }
 0xe21   : > { %17200 = vmatpush3.msra.mxu0 %v23800_v46  ;;  %17234 = vmatprep.subr.mxu1 %v25063_v12 }
 0xe22   : > { %17201 = vmatprep.subr.mxu0 %v25063_v12  ;;  %17235 = vmatpush3.msra.mxu1 %v23802_v56 }
 0xe23   : > { %17202 = vmatpush3.msra.mxu0 %v23811_v16  ;;  %17236 = vmatprep.subr.mxu1 %v25063_v12 }
 0xe24   : > { %17203 = vmatprep.subr.mxu0 %v25063_v12  ;;  %17205 = vmatprep.mubr.msk.f32.mxu0 %vm17420_vm2, %v25063_v12 }
 0xe25   : > { %17204 = vmatpush3.msra.mxu0 %v23822_v15  ;;  %17237 = vmatpush3.msra.mxu1 %v23813_v60 }
 0xe26   : > { %17238 = vmatprep.mubr.msk.f32.mxu1 %vm17420_vm2, %v25063_v12  ;;  %17206 = vmatmul.mubr.f32.vlgmr.msra.gmra.mxu0 %v12819_v34 }
 0xe27   : > { %17219 = vmatprep.subr.mxu0 %v25063_v12  ;;  %17239 = vmatmul.mubr.f32.vlgmr.msra.gmra.mxu1 %v12818_v21 }
 0xe28   : > { %17220 = vmatpush3.msra.mxu0 %v12855_v30  ;;  %17227 = vmatprep.mubr.msk.f32.mxu0 %vm17420_vm2, %v25063_v12 }
 0xe29   : > { %17221 = vmatprep.subr.mxu0 %v25063_v12 }
 0xe2a   : > { %17222 = vmatpush3.msra.mxu0 %v12862_v35 }
 0xe2b   : > { %17223 = vmatprep.subr.mxu0 %v25063_v12 }
 0xe2c   : > { %17224 = vmatpush3.msra.mxu0 %v12869_v2 }
 0xe2d   : > { %17225 = vmatprep.subr.mxu0 %v25063_v12 }
 0xe2e   : > { %17226 = vmatpush3.msra.mxu0 %v12876_v43 }
 0xe2f   : > { %17228 = vmatmul.mubr.f32.vlgmr.msra.gmra.mxu0 %v12818_v21 }
 0xed5   : > { %v12915_v28 = vpop.f32.mrf.mxu1 }
 0xed7   : > { %v17196_v38 = vpop.f32.mrf.mxu1 }
 0xedd   : > { %v13072_v23 = vpop.f32.mrf.mxu1 }
 0xede   : > { %v12824_v36 = vpop.f32.mrf.mxu0 }
 0xedf   : > { %v17218_v3 = vpop.f32.mrf.mxu1  ;;  %v12825_v51 = vadd.f32 %v13302_v42, %v12824_v36 }
 0xee0   : > { %v17185_v62 = vpop.f32.mrf.mxu0 }
 0xee1   : > { %v12916_v12 = vadd.f32 %v12915_v28, %v12825_v51 }
 0xee6   : > { %v12995_v0 = vpop.f32.mrf.mxu0 }
 0xee7   : > { %v13230_v50 = vpop.f32.mrf.mxu1  ;;  %v12996_v17 = vadd.f32 %v12995_v0, %v12916_v12 }
 0xee8   : > { %v17207_v32 = vpop.f32.mrf.mxu0 }
 0xee9   : > { %v17240_v4 = vpop.f32.mrf.mxu1  ;;  %v13073_v45 = vadd.f32 %v13072_v23, %v12996_v17 }
 0xeef   : > { %v13155_v49 = vpop.f32.mrf.mxu0 }
 0xef0   : > { %v13156_v22 = vadd.f32 %v13155_v49, %v13073_v45 }
 0xef1   : > { %v17229_v27 = vpop.f32.mrf.mxu0 }
 0xef2   : > { %v13231_v40 = vadd.f32 %v13230_v50, %v13156_v22 }
 0xef4   : > { %13234 = vst [vmem:[%s143_s13] sm:$0xff] %v13231_v40 }
 0xef5 PF: > { %s12_s9 = sadd.s32 1, %s17417_s9  }
 0xef6   : > { %p9_p5 = scmp.ge.s32.totalorder %s12_s9, 4  }
 0xef8   :  { %11 = sbr.rel (!%p9_p5) target bundleno = 1 (0x1), region = 58 }

</bundles_post_ra>
